<compile_context>
chip_gen: v6e
topology: v6e:2x2x1
jax: 0.10.0
libtpu: 0.0.40
codegen_flags: <defaults>
</compile_context>

<pallas_src>
from functools import partial

import jax
import jax.numpy as jnp
from jax import lax
from jax.experimental import pallas as pl
from jax.experimental.pallas import tpu as pltpu


def _round_up(x, m):
    return ((x + m - 1) // m) * m


# ----------------------------- Pallas kernels -------------------------------

def _backbone_kernel(x_ref, w_ref, scale_ref, shift_ref, o_ref, *,
                     batch, H, W, Wp, Rimg, n_acc, n_rows, b_pad):
    """3x3 conv (9 shifted matmuls) + folded eval BN2d + ReLU + global avg pool.

    x_ref:     (B*Rimg, Cp)   flat padded-NHWC image rows (f32, zero padded)
    w_ref:     (9, Cp, Cbb_p) per-tap conv weights (bf16, zero padded)
    scale_ref: (1, Cbb_p)     gamma / sqrt(running_var + eps)   (zero padded)
    shift_ref: (1, Cbb_p)     beta - running_mean * scale       (zero padded)
    o_ref:     (b_pad, Cbb_p) pooled features (rows >= batch are zero)
    """
    xf = x_ref[...]                                   # (B*Rimg, Cp) f32
    cbb_p = w_ref.shape[-1]

    # 9 taps: accumulate shifted-row matmuls on the MXU in bf16 with f32 acc.
    acc = jnp.zeros((n_rows, cbb_p), jnp.float32)
    for ki in range(3):
        for kj in range(3):
            off = ki * Wp + kj                        # static tap offset (rows)
            xs = xf[off:off + n_rows, :]              # static slice, f32
            acc = acc + jnp.dot(xs.astype(jnp.bfloat16), w_ref[ki * 3 + kj],
                                preferred_element_type=jnp.float32)

    # BatchNorm2d (eval, folded) + ReLU on the VPU in f32.
    y = jnp.maximum(acc * scale_ref[...] + shift_ref[...], 0.0)

    # Global average pool as an MXU contraction with a masked pooling matrix:
    # pool[b, g] = 1/(H*W) iff row g is a valid conv-output row of image b.
    col = lax.broadcasted_iota(jnp.int32, (b_pad, n_rows), 1)
    row = lax.broadcasted_iota(jnp.int32, (b_pad, n_rows), 0)
    r = col - row * Rimg                              # row index local to image
    valid = (r >= 0) & (r < n_acc) & ((r % Wp) < W) & (row < batch)
    pool = jnp.where(valid, 1.0 / (H * W), 0.0).astype(jnp.float32)
    o_ref[...] = jnp.dot(pool, y, preferred_element_type=jnp.float32)


def _neck_kernel(f_ref, w1_ref, g_ref, b_ref, w2_ref, o_ref, *, batch, eps):
    """BYOL neck: fc(no bias) -> BatchNorm1d(batch stats) -> ReLU -> fc(no bias).

    f_ref:  (b_pad, in_p) f32 (rows >= batch are zero padding)
    w1_ref: (in_p, hid_p) bf16     g_ref/b_ref: (1, hid_p) f32
    w2_ref: (hid_p, out_p) bf16    o_ref: (b_pad, out_p) f32
    """
    h = jnp.dot(f_ref[...].astype(jnp.bfloat16), w1_ref[...],
                preferred_element_type=jnp.float32)           # (b_pad, hid_p)

    # BatchNorm1d training-mode statistics over the real `batch` rows only
    # (padded rows are masked out of mean / biased variance).
    row = lax.broadcasted_iota(jnp.int32, h.shape, 0)
    m = (row < batch).astype(jnp.float32)
    mean = jnp.sum(h * m, axis=0, keepdims=True) / batch
    diff = (h - mean) * m
    var = jnp.sum(diff * diff, axis=0, keepdims=True) / batch
    hn = (h - mean) * lax.rsqrt(var + eps) * g_ref[...] + b_ref[...]
    hn = jnp.maximum(hn, 0.0)                                 # ReLU (f32)

    o_ref[...] = jnp.dot(hn.astype(jnp.bfloat16), w2_ref[...],
                         preferred_element_type=jnp.float32)


# ------------------------------ wrappers -------------------------------------

def backbone_forward(x, w_conv, bn_scale, bn_shift):
    """x: (B, C_in, H, W) NCHW; w_conv: (C_bb, C_in, 3, 3).

    Returns padded pooled features (b_pad, Cbb_p); rows >= B and cols >= C_bb
    are exactly zero.
    """
    B, C, H, W = x.shape
    Cbb = w_conv.shape[0]
    Hp, Wp = H + 2, W + 2
    Cp = _round_up(C, 128)
    Cbb_p = _round_up(Cbb, 128)
    Rimg = _round_up(Hp * Wp + 2, 8)       # per-image row stride (>= Hp*Wp + 2)
    n_acc = H * Wp                          # rows carrying this image's outputs
    n_rows = (B - 1) * Rimg + n_acc         # rows accumulated per tap (batch)
    b_pad = max(8, _round_up(B, 8))

    # NCHW -> flat padded-NHWC rows (single transpose of the raw image; no 9x
    # im2col materialization).
    xn = jnp.transpose(x, (0, 2, 3, 1))                         # (B, H, W, C)
    xn = jnp.pad(xn, ((0, 0), (1, 1), (1, 1), (0, 0)))          # (B, Hp, Wp, C)
    xn = xn.reshape(B, Hp * Wp, C)
    xn = jnp.pad(xn, ((0, 0), (0, Rimg - Hp * Wp), (0, Cp - C)))
    xflat = xn.reshape(B * Rimg, Cp).astype(jnp.float32)

    # (Cbb, C, 3, 3) -> (9, Cp, Cbb_p): tap (ki,kj) gives a (C, Cbb) matrix.
    wt = jnp.transpose(w_conv, (2, 3, 1, 0)).reshape(9, C, Cbb)
    wt = jnp.pad(wt, ((0, 0), (0, Cp - C), (0, Cbb_p - Cbb))).astype(jnp.bfloat16)

    scale = jnp.pad(bn_scale.reshape(1, Cbb),
                    ((0, 0), (0, Cbb_p - Cbb))).astype(jnp.float32)
    shift = jnp.pad(bn_shift.reshape(1, Cbb),
                    ((0, 0), (0, Cbb_p - Cbb))).astype(jnp.float32)

    kernel = partial(_backbone_kernel, batch=B, H=H, W=W, Wp=Wp, Rimg=Rimg,
                     n_acc=n_acc, n_rows=n_rows, b_pad=b_pad)
    return pl.pallas_call(
        kernel,
        out_shape=jax.ShapeDtypeStruct((b_pad, Cbb_p), jnp.float32),
        grid_spec=pltpu.PrefetchScalarGridSpec(
            num_scalar_prefetch=0,
            grid=(1,),
            in_specs=[
                pl.BlockSpec((B * Rimg, Cp), lambda i: (0, 0)),
                pl.BlockSpec((9, Cp, Cbb_p), lambda i: (0, 0, 0)),
                pl.BlockSpec((1, Cbb_p), lambda i: (0, 0)),
                pl.BlockSpec((1, Cbb_p), lambda i: (0, 0)),
            ],
            out_specs=pl.BlockSpec((b_pad, Cbb_p), lambda i: (0, 0)),
        ),
        compiler_params=pltpu.CompilerParams(
            dimension_semantics=("arbitrary",)),
    )(xflat, wt, scale, shift)


def neck_forward(feat_padded, w1, gamma, beta, w2, *, batch, eps=1e-5):
    """feat_padded: (b_pad, in_p) padded features -> (batch, out_dim)."""
    b_pad, in_p = feat_padded.shape
    in_dim, hid = w1.shape
    out_dim = w2.shape[1]
    hid_p = _round_up(hid, 128)
    out_p = _round_up(out_dim, 128)

    w1p = jnp.pad(w1, ((0, in_p - in_dim), (0, hid_p - hid))).astype(jnp.bfloat16)
    w2p = jnp.pad(w2, ((0, hid_p - hid), (0, out_p - out_dim))).astype(jnp.bfloat16)
    gp = jnp.pad(gamma.reshape(1, hid), ((0, 0), (0, hid_p - hid))).astype(jnp.float32)
    bp = jnp.pad(beta.reshape(1, hid), ((0, 0), (0, hid_p - hid))).astype(jnp.float32)

    kernel = partial(_neck_kernel, batch=batch, eps=eps)
    out = pl.pallas_call(
        kernel,
        out_shape=jax.ShapeDtypeStruct((b_pad, out_p), jnp.float32),
        grid_spec=pltpu.PrefetchScalarGridSpec(
            num_scalar_prefetch=0,
            grid=(1,),
            in_specs=[
                pl.BlockSpec((b_pad, in_p), lambda i: (0, 0)),
                pl.BlockSpec((in_p, hid_p), lambda i: (0, 0)),
                pl.BlockSpec((1, hid_p), lambda i: (0, 0)),
                pl.BlockSpec((1, hid_p), lambda i: (0, 0)),
                pl.BlockSpec((hid_p, out_p), lambda i: (0, 0)),
            ],
            out_specs=pl.BlockSpec((b_pad, out_p), lambda i: (0, 0)),
        ),
        compiler_params=pltpu.CompilerParams(
            dimension_semantics=("arbitrary",)),
    )(feat_padded, w1p, gp, bp, w2p)
    return out[:batch, :out_dim]


def encoder_forward(im, params):
    feat = backbone_forward(im, params["w_conv"], params["bn_scale"],
                            params["bn_shift"])
    out = neck_forward(feat, params["w1"], params["g1"], params["b1"],
                       params["w2"], batch=im.shape[0])
    return out


# ------------------------------- main ----------------------------------------

if __name__ == "__main__":
    B, C_in, H, W = 2, 4, 16, 16          # small synthetic input (NCHW)
    C_bb, hid_dim, out_dim = 32, 64, 32   # backbone.out_channels, hid_dim, out_dim
    eps = 1e-5

    key = jax.random.PRNGKey(0)
    ks = jax.random.split(key, 8)

    x = jax.random.normal(ks[0], (B, C_in, H, W), jnp.float32)

    # Backbone params (conv 3x3 no bias + BatchNorm2d eval-mode running stats).
    w_conv = jax.random.normal(ks[1], (C_bb, C_in, 3, 3), jnp.float32) * (
        2.0 / (C_in * 9)) ** 0.5
    gamma2d = 1.0 + 0.01 * jax.random.normal(ks[2], (C_bb,), jnp.float32)
    beta2d = 0.01 * jax.random.normal(ks[3], (C_bb,), jnp.float32)
    run_mean = jnp.zeros((C_bb,), jnp.float32)
    run_var = jnp.ones((C_bb,), jnp.float32)
    bn_scale = gamma2d / jnp.sqrt(run_var + eps)
    bn_shift = beta2d - run_mean * bn_scale

    # Neck params: Linear(C_bb, hid, bias=False), BN1d(hid), Linear(hid, out, bias=False)
    w1 = jax.random.normal(ks[4], (C_bb, hid_dim), jnp.float32) * (2.0 / C_bb) ** 0.5
    g1 = jnp.ones((1, hid_dim), jnp.float32)
    b1 = jnp.zeros((1, hid_dim), jnp.float32)
    w2 = jax.random.normal(ks[5], (hid_dim, out_dim), jnp.float32) * (1.0 / hid_dim) ** 0.5

    params = dict(w_conv=w_conv, bn_scale=bn_scale, bn_shift=bn_shift,
                  w1=w1, g1=g1, b1=b1, w2=w2)

    out = jax.jit(encoder_forward)(x, params)
    jax.block_until_ready(out)
    assert out.shape == (B, out_dim) and out.dtype == jnp.float32
    print("KERNEL_OK")
</pallas_src>

<mosaic_0001>
module attributes {stable_mosaic.version = 11 : i64} {
  func.func @_backbone_kernel(%arg0: i32, %arg1: memref<656x128xf32, #tpu.memory_space<vmem>>, %arg2: memref<9x128x128xbf16, #tpu.memory_space<vmem>>, %arg3: memref<1x128xf32, #tpu.memory_space<vmem>>, %arg4: memref<1x128xf32, #tpu.memory_space<vmem>>, %arg5: memref<8x128xf32, #tpu.memory_space<vmem>>) attributes {dimension_semantics = [#tpu.dimension_semantics<arbitrary>], iteration_bounds = array<i64: 1>, scalar_prefetch = 0 : i64, scratch_operands = 0 : i64, tpu.core_type = #tpu.core_type<tc>, window_params = [{pipeline_mode = #tpu.pipeline_mode<synchronous>, transform_indices = @transform_0, window_bounds = array<i64: 656, 128>}, {pipeline_mode = #tpu.pipeline_mode<synchronous>, transform_indices = @transform_1, window_bounds = array<i64: 9, 128, 128>}, {pipeline_mode = #tpu.pipeline_mode<synchronous>, transform_indices = @transform_2, window_bounds = array<i64: 1, 128>}, {pipeline_mode = #tpu.pipeline_mode<synchronous>, transform_indices = @transform_3, window_bounds = array<i64: 1, 128>}, {pipeline_mode = #tpu.pipeline_mode<synchronous>, transform_indices = @transform_4, window_bounds = array<i64: 8, 128>}]} {
    %c0 = arith.constant 0 : index
    %c0_0 = arith.constant 0 : index
    %0 = vector.load %arg1[%c0, %c0_0] : memref<656x128xf32, #tpu.memory_space<vmem>>, vector<656x128xf32>
    %cst = arith.constant 0.000000e+00 : f32
    %1 = vector.broadcast %cst : f32 to vector<616x128xf32>
    %2 = vector.extract_strided_slice %0 {offsets = [0, 0], sizes = [616, 128], strides = [1, 1]} : vector<656x128xf32> to vector<616x128xf32>
    %3 = arith.truncf %2 : vector<616x128xf32> to vector<616x128xbf16>
    %c0_1 = arith.constant 0 : index
    %c0_2 = arith.constant 0 : index
    %c0_3 = arith.constant 0 : index
    %4 = vector.load %arg2[%c0_1, %c0_2, %c0_3] : memref<9x128x128xbf16, #tpu.memory_space<vmem>>, vector<1x128x128xbf16>
    %5 = vector.shape_cast %4 : vector<1x128x128xbf16> to vector<128x128xbf16>
    %cst_4 = arith.constant dense<0.000000e+00> : vector<616x128xf32>
    %6 = tpu.matmul %3, %5, %cst_4 {dimension_numbers = #tpu.dot_dimension_numbers<[1], [0], [0], [1], [0, 0, 1, 1], [], []>} : vector<616x128xbf16>, vector<128x128xbf16>, vector<616x128xf32> -> vector<616x128xf32>
    %7 = arith.addf %1, %6 : vector<616x128xf32>
    %8 = vector.extract_strided_slice %0 {offsets = [1, 0], sizes = [616, 128], strides = [1, 1]} : vector<656x128xf32> to vector<616x128xf32>
    %9 = arith.truncf %8 : vector<616x128xf32> to vector<616x128xbf16>
    %c1 = arith.constant 1 : index
    %c0_5 = arith.constant 0 : index
    %c0_6 = arith.constant 0 : index
    %10 = vector.load %arg2[%c1, %c0_5, %c0_6] : memref<9x128x128xbf16, #tpu.memory_space<vmem>>, vector<1x128x128xbf16>
    %11 = vector.shape_cast %10 : vector<1x128x128xbf16> to vector<128x128xbf16>
    %cst_7 = arith.constant dense<0.000000e+00> : vector<616x128xf32>
    %12 = tpu.matmul %9, %11, %cst_7 {dimension_numbers = #tpu.dot_dimension_numbers<[1], [0], [0], [1], [0, 0, 1, 1], [], []>} : vector<616x128xbf16>, vector<128x128xbf16>, vector<616x128xf32> -> vector<616x128xf32>
    %13 = arith.addf %7, %12 : vector<616x128xf32>
    %14 = vector.extract_strided_slice %0 {offsets = [2, 0], sizes = [616, 128], strides = [1, 1]} : vector<656x128xf32> to vector<616x128xf32>
    %15 = arith.truncf %14 : vector<616x128xf32> to vector<616x128xbf16>
    %c2 = arith.constant 2 : index
    %c0_8 = arith.constant 0 : index
    %c0_9 = arith.constant 0 : index
    %16 = vector.load %arg2[%c2, %c0_8, %c0_9] : memref<9x128x128xbf16, #tpu.memory_space<vmem>>, vector<1x128x128xbf16>
    %17 = vector.shape_cast %16 : vector<1x128x128xbf16> to vector<128x128xbf16>
    %cst_10 = arith.constant dense<0.000000e+00> : vector<616x128xf32>
    %18 = tpu.matmul %15, %17, %cst_10 {dimension_numbers = #tpu.dot_dimension_numbers<[1], [0], [0], [1], [0, 0, 1, 1], [], []>} : vector<616x128xbf16>, vector<128x128xbf16>, vector<616x128xf32> -> vector<616x128xf32>
    %19 = arith.addf %13, %18 : vector<616x128xf32>
    %20 = vector.extract_strided_slice %0 {offsets = [18, 0], sizes = [616, 128], strides = [1, 1]} : vector<656x128xf32> to vector<616x128xf32>
    %21 = arith.truncf %20 : vector<616x128xf32> to vector<616x128xbf16>
    %c3 = arith.constant 3 : index
    %c0_11 = arith.constant 0 : index
    %c0_12 = arith.constant 0 : index
    %22 = vector.load %arg2[%c3, %c0_11, %c0_12] : memref<9x128x128xbf16, #tpu.memory_space<vmem>>, vector<1x128x128xbf16>
    %23 = vector.shape_cast %22 : vector<1x128x128xbf16> to vector<128x128xbf16>
    %cst_13 = arith.constant dense<0.000000e+00> : vector<616x128xf32>
    %24 = tpu.matmul %21, %23, %cst_13 {dimension_numbers = #tpu.dot_dimension_numbers<[1], [0], [0], [1], [0, 0, 1, 1], [], []>} : vector<616x128xbf16>, vector<128x128xbf16>, vector<616x128xf32> -> vector<616x128xf32>
    %25 = arith.addf %19, %24 : vector<616x128xf32>
    %26 = vector.extract_strided_slice %0 {offsets = [19, 0], sizes = [616, 128], strides = [1, 1]} : vector<656x128xf32> to vector<616x128xf32>
    %27 = arith.truncf %26 : vector<616x128xf32> to vector<616x128xbf16>
    %c4 = arith.constant 4 : index
    %c0_14 = arith.constant 0 : index
    %c0_15 = arith.constant 0 : index
    %28 = vector.load %arg2[%c4, %c0_14, %c0_15] : memref<9x128x128xbf16, #tpu.memory_space<vmem>>, vector<1x128x128xbf16>
    %29 = vector.shape_cast %28 : vector<1x128x128xbf16> to vector<128x128xbf16>
    %cst_16 = arith.constant dense<0.000000e+00> : vector<616x128xf32>
    %30 = tpu.matmul %27, %29, %cst_16 {dimension_numbers = #tpu.dot_dimension_numbers<[1], [0], [0], [1], [0, 0, 1, 1], [], []>} : vector<616x128xbf16>, vector<128x128xbf16>, vector<616x128xf32> -> vector<616x128xf32>
    %31 = arith.addf %25, %30 : vector<616x128xf32>
    %32 = vector.extract_strided_slice %0 {offsets = [20, 0], sizes = [616, 128], strides = [1, 1]} : vector<656x128xf32> to vector<616x128xf32>
    %33 = arith.truncf %32 : vector<616x128xf32> to vector<616x128xbf16>
    %c5 = arith.constant 5 : index
    %c0_17 = arith.constant 0 : index
    %c0_18 = arith.constant 0 : index
    %34 = vector.load %arg2[%c5, %c0_17, %c0_18] : memref<9x128x128xbf16, #tpu.memory_space<vmem>>, vector<1x128x128xbf16>
    %35 = vector.shape_cast %34 : vector<1x128x128xbf16> to vector<128x128xbf16>
    %cst_19 = arith.constant dense<0.000000e+00> : vector<616x128xf32>
    %36 = tpu.matmul %33, %35, %cst_19 {dimension_numbers = #tpu.dot_dimension_numbers<[1], [0], [0], [1], [0, 0, 1, 1], [], []>} : vector<616x128xbf16>, vector<128x128xbf16>, vector<616x128xf32> -> vector<616x128xf32>
    %37 = arith.addf %31, %36 : vector<616x128xf32>
    %38 = vector.extract_strided_slice %0 {offsets = [36, 0], sizes = [616, 128], strides = [1, 1]} : vector<656x128xf32> to vector<616x128xf32>
    %39 = arith.truncf %38 : vector<616x128xf32> to vector<616x128xbf16>
    %c6 = arith.constant 6 : index
    %c0_20 = arith.constant 0 : index
    %c0_21 = arith.constant 0 : index
    %40 = vector.load %arg2[%c6, %c0_20, %c0_21] : memref<9x128x128xbf16, #tpu.memory_space<vmem>>, vector<1x128x128xbf16>
    %41 = vector.shape_cast %40 : vector<1x128x128xbf16> to vector<128x128xbf16>
    %cst_22 = arith.constant dense<0.000000e+00> : vector<616x128xf32>
    %42 = tpu.matmul %39, %41, %cst_22 {dimension_numbers = #tpu.dot_dimension_numbers<[1], [0], [0], [1], [0, 0, 1, 1], [], []>} : vector<616x128xbf16>, vector<128x128xbf16>, vector<616x128xf32> -> vector<616x128xf32>
    %43 = arith.addf %37, %42 : vector<616x128xf32>
    %44 = vector.extract_strided_slice %0 {offsets = [37, 0], sizes = [616, 128], strides = [1, 1]} : vector<656x128xf32> to vector<616x128xf32>
    %45 = arith.truncf %44 : vector<616x128xf32> to vector<616x128xbf16>
    %c7 = arith.constant 7 : index
    %c0_23 = arith.constant 0 : index
    %c0_24 = arith.constant 0 : index
    %46 = vector.load %arg2[%c7, %c0_23, %c0_24] : memref<9x128x128xbf16, #tpu.memory_space<vmem>>, vector<1x128x128xbf16>
    %47 = vector.shape_cast %46 : vector<1x128x128xbf16> to vector<128x128xbf16>
    %cst_25 = arith.constant dense<0.000000e+00> : vector<616x128xf32>
    %48 = tpu.matmul %45, %47, %cst_25 {dimension_numbers = #tpu.dot_dimension_numbers<[1], [0], [0], [1], [0, 0, 1, 1], [], []>} : vector<616x128xbf16>, vector<128x128xbf16>, vector<616x128xf32> -> vector<616x128xf32>
    %49 = arith.addf %43, %48 : vector<616x128xf32>
    %50 = vector.extract_strided_slice %0 {offsets = [38, 0], sizes = [616, 128], strides = [1, 1]} : vector<656x128xf32> to vector<616x128xf32>
    %51 = arith.truncf %50 : vector<616x128xf32> to vector<616x128xbf16>
    %c8 = arith.constant 8 : index
    %c0_26 = arith.constant 0 : index
    %c0_27 = arith.constant 0 : index
    %52 = vector.load %arg2[%c8, %c0_26, %c0_27] : memref<9x128x128xbf16, #tpu.memory_space<vmem>>, vector<1x128x128xbf16>
    %53 = vector.shape_cast %52 : vector<1x128x128xbf16> to vector<128x128xbf16>
    %cst_28 = arith.constant dense<0.000000e+00> : vector<616x128xf32>
    %54 = tpu.matmul %51, %53, %cst_28 {dimension_numbers = #tpu.dot_dimension_numbers<[1], [0], [0], [1], [0, 0, 1, 1], [], []>} : vector<616x128xbf16>, vector<128x128xbf16>, vector<616x128xf32> -> vector<616x128xf32>
    %55 = arith.addf %49, %54 : vector<616x128xf32>
    %c0_29 = arith.constant 0 : index
    %c0_30 = arith.constant 0 : index
    %56 = vector.load %arg3[%c0_29, %c0_30] : memref<1x128xf32, #tpu.memory_space<vmem>>, vector<1x128xf32>
    %57 = vector.broadcast %56 : vector<1x128xf32> to vector<616x128xf32>
    %58 = arith.mulf %55, %57 : vector<616x128xf32>
    %c0_31 = arith.constant 0 : index
    %c0_32 = arith.constant 0 : index
    %59 = vector.load %arg4[%c0_31, %c0_32] : memref<1x128xf32, #tpu.memory_space<vmem>>, vector<1x128xf32>
    %60 = vector.broadcast %59 : vector<1x128xf32> to vector<616x128xf32>
    %61 = arith.addf %58, %60 : vector<616x128xf32>
    %cst_33 = arith.constant 0.000000e+00 : f32
    %62 = vector.broadcast %cst_33 : f32 to vector<616x128xf32>
    %63 = arith.maximumf %61, %62 : vector<616x128xf32>
    %64 = tpu.iota {dimensions = array<i32: 1>} : vector<8x616xi32>
    %65 = tpu.iota {dimensions = array<i32: 0>} : vector<8x616xi32>
    %c328_i32 = arith.constant 328 : i32
    %66 = vector.broadcast %c328_i32 : i32 to vector<8x616xi32>
    %67 = arith.muli %65, %66 : vector<8x616xi32>
    %68 = arith.subi %64, %67 : vector<8x616xi32>
    %c0_i32 = arith.constant 0 : i32
    %69 = vector.broadcast %c0_i32 : i32 to vector<8x616xi32>
    %70 = arith.cmpi sge, %68, %69 : vector<8x616xi32>
    %c288_i32 = arith.constant 288 : i32
    %71 = vector.broadcast %c288_i32 : i32 to vector<8x616xi32>
    %72 = arith.cmpi slt, %68, %71 : vector<8x616xi32>
    %73 = arith.andi %70, %72 : vector<8x616xi1>
    %c18_i32 = arith.constant 18 : i32
    %c0_i32_34 = arith.constant 0 : i32
    %74 = arith.cmpi eq, %c18_i32, %c0_i32_34 : i32
    %c1_i32 = arith.constant 1 : i32
    %75 = arith.select %74, %c1_i32, %c18_i32 : i32
    %76 = vector.broadcast %75 : i32 to vector<8x616xi32>
    %77 = arith.remsi %68, %76 : vector<8x616xi32>
    %c0_i32_35 = arith.constant 0 : i32
    %78 = vector.broadcast %c0_i32_35 : i32 to vector<8x616xi32>
    %79 = arith.cmpi ne, %77, %78 : vector<8x616xi32>
    %c0_i32_36 = arith.constant 0 : i32
    %80 = vector.broadcast %c0_i32_36 : i32 to vector<8x616xi32>
    %81 = arith.cmpi slt, %77, %80 : vector<8x616xi32>
    %c0_i32_37 = arith.constant 0 : i32
    %82 = arith.cmpi slt, %75, %c0_i32_37 : i32
    %83 = vector.broadcast %82 : i1 to vector<8x616xi1>
    %84 = vector.broadcast %83 : vector<8x616xi1> to vector<8x616xi1>
    %85 = arith.xori %81, %84 : vector<8x616xi1>
    %86 = arith.andi %85, %79 : vector<8x616xi1>
    %87 = vector.broadcast %75 : i32 to vector<8x616xi32>
    %88 = arith.addi %77, %87 : vector<8x616xi32>
    %89 = arith.select %86, %88, %77 : vector<8x616xi1>, vector<8x616xi32>
    %c16_i32 = arith.constant 16 : i32
    %90 = vector.broadcast %c16_i32 : i32 to vector<8x616xi32>
    %91 = arith.cmpi slt, %89, %90 : vector<8x616xi32>
    %92 = arith.andi %73, %91 : vector<8x616xi1>
    %c2_i32 = arith.constant 2 : i32
    %93 = vector.broadcast %c2_i32 : i32 to vector<8x616xi32>
    %94 = arith.cmpi slt, %65, %93 : vector<8x616xi32>
    %95 = arith.andi %92, %94 : vector<8x616xi1>
    %cst_38 = arith.constant 3.906250e-03 : f32
    %cst_39 = arith.constant 0.000000e+00 : f32
    %96 = vector.broadcast %cst_38 : f32 to vector<8x616xf32>
    %97 = vector.broadcast %cst_39 : f32 to vector<8x616xf32>
    %98 = arith.select %95, %96, %97 : vector<8x616xi1>, vector<8x616xf32>
    %cst_40 = arith.constant dense<0.000000e+00> : vector<8x128xf32>
    %99 = tpu.matmul %98, %63, %cst_40 {dimension_numbers = #tpu.dot_dimension_numbers<[1], [0], [0], [1], [0, 0, 1, 1], [], []>} : vector<8x616xf32>, vector<616x128xf32>, vector<8x128xf32> -> vector<8x128xf32>
    %c0_41 = arith.constant 0 : index
    %c0_42 = arith.constant 0 : index
    %100 = vector.load %arg5[%c0_41, %c0_42] : memref<8x128xf32, #tpu.memory_space<vmem>>, vector<8x128xf32>
    tpu.vector_store %arg5[%c0_41, %c0_42], %99 {strides = array<i32>} : memref<8x128xf32, #tpu.memory_space<vmem>>, vector<8x128xf32>,
    return
  }
  func.func @transform_0(%arg0: i32) -> (i32, i32) {
    %c0_i32 = arith.constant 0 : i32
    %c0_i32_0 = arith.constant 0 : i32
    %c0_i32_1 = arith.constant 0 : i32
    return %c0_i32, %c0_i32_0 : i32, i32
  }
  func.func @transform_1(%arg0: i32) -> (i32, i32, i32) {
    %c0_i32 = arith.constant 0 : i32
    %c0_i32_0 = arith.constant 0 : i32
    %c0_i32_1 = arith.constant 0 : i32
    %c0_i32_2 = arith.constant 0 : i32
    return %c0_i32, %c0_i32_0, %c0_i32_1 : i32, i32, i32
  }
  func.func @transform_2(%arg0: i32) -> (i32, i32) {
    %c0_i32 = arith.constant 0 : i32
    %c0_i32_0 = arith.constant 0 : i32
    %c0_i32_1 = arith.constant 0 : i32
    return %c0_i32, %c0_i32_0 : i32, i32
  }
  func.func @transform_3(%arg0: i32) -> (i32, i32) {
    %c0_i32 = arith.constant 0 : i32
    %c0_i32_0 = arith.constant 0 : i32
    %c0_i32_1 = arith.constant 0 : i32
    return %c0_i32, %c0_i32_0 : i32, i32
  }
  func.func @transform_4(%arg0: i32) -> (i32, i32) {
    %c0_i32 = arith.constant 0 : i32
    %c0_i32_0 = arith.constant 0 : i32
    %c0_i32_1 = arith.constant 0 : i32
    return %c0_i32, %c0_i32_0 : i32, i32
  }
}

module attributes {stable_mosaic.version = 11 : i64} {
  func.func @_neck_kernel(%arg0: i32, %arg1: memref<8x128xf32, #tpu.memory_space<vmem>>, %arg2: memref<128x128xbf16, #tpu.memory_space<vmem>>, %arg3: memref<1x128xf32, #tpu.memory_space<vmem>>, %arg4: memref<1x128xf32, #tpu.memory_space<vmem>>, %arg5: memref<128x128xbf16, #tpu.memory_space<vmem>>, %arg6: memref<8x128xf32, #tpu.memory_space<vmem>>) attributes {dimension_semantics = [#tpu.dimension_semantics<arbitrary>], iteration_bounds = array<i64: 1>, scalar_prefetch = 0 : i64, scratch_operands = 0 : i64, tpu.core_type = #tpu.core_type<tc>, window_params = [{pipeline_mode = #tpu.pipeline_mode<synchronous>, transform_indices = @transform_0, window_bounds = array<i64: 8, 128>}, {pipeline_mode = #tpu.pipeline_mode<synchronous>, transform_indices = @transform_1, window_bounds = array<i64: 128, 128>}, {pipeline_mode = #tpu.pipeline_mode<synchronous>, transform_indices = @transform_2, window_bounds = array<i64: 1, 128>}, {pipeline_mode = #tpu.pipeline_mode<synchronous>, transform_indices = @transform_3, window_bounds = array<i64: 1, 128>}, {pipeline_mode = #tpu.pipeline_mode<synchronous>, transform_indices = @transform_4, window_bounds = array<i64: 128, 128>}, {pipeline_mode = #tpu.pipeline_mode<synchronous>, transform_indices = @transform_5, window_bounds = array<i64: 8, 128>}]} {
    %c0 = arith.constant 0 : index
    %c0_0 = arith.constant 0 : index
    %0 = vector.load %arg1[%c0, %c0_0] : memref<8x128xf32, #tpu.memory_space<vmem>>, vector<8x128xf32>
    %1 = arith.truncf %0 : vector<8x128xf32> to vector<8x128xbf16>
    %c0_1 = arith.constant 0 : index
    %c0_2 = arith.constant 0 : index
    %2 = vector.load %arg2[%c0_1, %c0_2] : memref<128x128xbf16, #tpu.memory_space<vmem>>, vector<128x128xbf16>
    %cst = arith.constant dense<0.000000e+00> : vector<8x128xf32>
    %3 = tpu.matmul %1, %2, %cst {dimension_numbers = #tpu.dot_dimension_numbers<[1], [0], [0], [1], [0, 0, 1, 1], [], []>} : vector<8x128xbf16>, vector<128x128xbf16>, vector<8x128xf32> -> vector<8x128xf32>
    %4 = tpu.iota {dimensions = array<i32: 0>} : vector<8x128xi32>
    %c2_i32 = arith.constant 2 : i32
    %5 = vector.broadcast %c2_i32 : i32 to vector<8x128xi32>
    %6 = arith.cmpi slt, %4, %5 : vector<8x128xi32>
    %7 = arith.extui %6 : vector<8x128xi1> to vector<8x128xi32>
    %8 = arith.sitofp %7 : vector<8x128xi32> to vector<8x128xf32>
    %9 = arith.mulf %3, %8 : vector<8x128xf32>
    %cst_3 = arith.constant dense<0.000000e+00> : vector<128xf32>
    %10 = vector.multi_reduction <add>, %9, %cst_3 [0] : vector<8x128xf32> to vector<128xf32>
    %11 = vector.shape_cast %10 : vector<128xf32> to vector<1x128xf32>
    %cst_4 = arith.constant 2.000000e+00 : f32
    %12 = vector.broadcast %cst_4 : f32 to vector<1x128xf32>
    %13 = arith.divf %11, %12 : vector<1x128xf32>
    %14 = vector.broadcast %13 : vector<1x128xf32> to vector<8x128xf32>
    %15 = arith.subf %3, %14 : vector<8x128xf32>
    %16 = arith.mulf %15, %8 : vector<8x128xf32>
    %17 = arith.mulf %16, %16 : vector<8x128xf32>
    %cst_5 = arith.constant dense<0.000000e+00> : vector<128xf32>
    %18 = vector.multi_reduction <add>, %17, %cst_5 [0] : vector<8x128xf32> to vector<128xf32>
    %19 = vector.shape_cast %18 : vector<128xf32> to vector<1x128xf32>
    %cst_6 = arith.constant 2.000000e+00 : f32
    %20 = vector.broadcast %cst_6 : f32 to vector<1x128xf32>
    %21 = arith.divf %19, %20 : vector<1x128xf32>
    %22 = vector.broadcast %13 : vector<1x128xf32> to vector<8x128xf32>
    %23 = arith.subf %3, %22 : vector<8x128xf32>
    %cst_7 = arith.constant 9.99999974E-6 : f32
    %24 = vector.broadcast %cst_7 : f32 to vector<1x128xf32>
    %25 = arith.addf %21, %24 : vector<1x128xf32>
    %26 = math.rsqrt %25 : vector<1x128xf32>
    %27 = vector.broadcast %26 : vector<1x128xf32> to vector<8x128xf32>
    %28 = arith.mulf %23, %27 : vector<8x128xf32>
    %c0_8 = arith.constant 0 : index
    %c0_9 = arith.constant 0 : index
    %29 = vector.load %arg3[%c0_8, %c0_9] : memref<1x128xf32, #tpu.memory_space<vmem>>, vector<1x128xf32>
    %30 = vector.broadcast %29 : vector<1x128xf32> to vector<8x128xf32>
    %31 = arith.mulf %28, %30 : vector<8x128xf32>
    %c0_10 = arith.constant 0 : index
    %c0_11 = arith.constant 0 : index
    %32 = vector.load %arg4[%c0_10, %c0_11] : memref<1x128xf32, #tpu.memory_space<vmem>>, vector<1x128xf32>
    %33 = vector.broadcast %32 : vector<1x128xf32> to vector<8x128xf32>
    %34 = arith.addf %31, %33 : vector<8x128xf32>
    %cst_12 = arith.constant 0.000000e+00 : f32
    %35 = vector.broadcast %cst_12 : f32 to vector<8x128xf32>
    %36 = arith.maximumf %34, %35 : vector<8x128xf32>
    %37 = arith.truncf %36 : vector<8x128xf32> to vector<8x128xbf16>
    %c0_13 = arith.constant 0 : index
    %c0_14 = arith.constant 0 : index
    %38 = vector.load %arg5[%c0_13, %c0_14] : memref<128x128xbf16, #tpu.memory_space<vmem>>, vector<128x128xbf16>
    %cst_15 = arith.constant dense<0.000000e+00> : vector<8x128xf32>
    %39 = tpu.matmul %37, %38, %cst_15 {dimension_numbers = #tpu.dot_dimension_numbers<[1], [0], [0], [1], [0, 0, 1, 1], [], []>} : vector<8x128xbf16>, vector<128x128xbf16>, vector<8x128xf32> -> vector<8x128xf32>
    %c0_16 = arith.constant 0 : index
    %c0_17 = arith.constant 0 : index
    %40 = vector.load %arg6[%c0_16, %c0_17] : memref<8x128xf32, #tpu.memory_space<vmem>>, vector<8x128xf32>
    tpu.vector_store %arg6[%c0_16, %c0_17], %39 {strides = array<i32>} : memref<8x128xf32, #tpu.memory_space<vmem>>, vector<8x128xf32>,
    return
  }
  func.func @transform_0(%arg0: i32) -> (i32, i32) {
    %c0_i32 = arith.constant 0 : i32
    %c0_i32_0 = arith.constant 0 : i32
    %c0_i32_1 = arith.constant 0 : i32
    return %c0_i32, %c0_i32_0 : i32, i32
  }
  func.func @transform_1(%arg0: i32) -> (i32, i32) {
    %c0_i32 = arith.constant 0 : i32
    %c0_i32_0 = arith.constant 0 : i32
    %c0_i32_1 = arith.constant 0 : i32
    return %c0_i32, %c0_i32_0 : i32, i32
  }
  func.func @transform_2(%arg0: i32) -> (i32, i32) {
    %c0_i32 = arith.constant 0 : i32
    %c0_i32_0 = arith.constant 0 : i32
    %c0_i32_1 = arith.constant 0 : i32
    return %c0_i32, %c0_i32_0 : i32, i32
  }
  func.func @transform_3(%arg0: i32) -> (i32, i32) {
    %c0_i32 = arith.constant 0 : i32
    %c0_i32_0 = arith.constant 0 : i32
    %c0_i32_1 = arith.constant 0 : i32
    return %c0_i32, %c0_i32_0 : i32, i32
  }
  func.func @transform_4(%arg0: i32) -> (i32, i32) {
    %c0_i32 = arith.constant 0 : i32
    %c0_i32_0 = arith.constant 0 : i32
    %c0_i32_1 = arith.constant 0 : i32
    return %c0_i32, %c0_i32_0 : i32, i32
  }
  func.func @transform_5(%arg0: i32) -> (i32, i32) {
    %c0_i32 = arith.constant 0 : i32
    %c0_i32_0 = arith.constant 0 : i32
    %c0_i32_1 = arith.constant 0 : i32
    return %c0_i32, %c0_i32_0 : i32, i32
  }
}

</mosaic_0001>

<bundles_post_ra>
// kernel: encoder_forward.3
= control target key start
LH: loop header
LB: loop body
LE: loop exit
PB: predicated region body
PF: predicated region fallthrough
CT: control target
= control target key end

     0   :  { %v378_v0 = vmov 0.0   ;;  %vm379_vm0 = vmmov 0   ;;  %v127_v19 = vlaneseq  ;;  %s470_s1 = inlined_call_operand.vmem [shape: bf16[128,128], index: 1, kind: input, shape index: {}]   ;;  %s471_s0 = inlined_call_operand.vmem [shape: f32[8,128], index: 0, kind: input, shape index: {}]   ;;  %s472_s4 = inlined_call_operand.vmem [shape: bf16[128,128], index: 4, kind: input, shape index: {}]   ;;  %s473_s2 = inlined_call_operand.vmem [shape: f32[1,128], index: 2, kind: input, shape index: {}]   ;;  %s474_s3 = inlined_call_operand.vmem [shape: f32[1,128], index: 3, kind: input, shape index: {}]   ;;  %s475_s5 = inlined_call_operand.vmem [shape: f32[8,128], index: 5, kind: output, shape index: {}]  }
   0x1   :  { %318 = vmatprep.subr.bf16.mxu0 %v378_v0  ;;  %v360_v1 = vld [vmem:[%s470_s1 + $0x38] sm:$0xff]   ;;  %334 = vmatprep.mubr.msk.bf16.mxu0 %vm379_vm0, %v378_v0  ;;  %v361_v2 = vld [vmem:[%s470_s1 + $0x30] sm:$0xff]   ;;  %v362_v3 = vld [vmem:[%s470_s1 + $0x28] sm:$0xff]  }
   0x2   :  { %338 = vmatprep.subr.bf16.mxu1 %v378_v0  ;;  %354 = vmatprep.mubr.msk.bf16.mxu1 %vm379_vm0, %v378_v0  ;;  %v363_v4 = vld [vmem:[%s470_s1 + $0x20] sm:$0xff]   ;;  %v364_v5 = vld [vmem:[%s470_s1 + $0x18] sm:$0xff]   ;;  %v365_v6 = vld [vmem:[%s470_s1 + $0x10] sm:$0xff]   ;;  %v128_v20 = vshrl.u32 %v127_v19, 7 }
   0x3   :  { %319 = vmatpush3.bf16.msra.mxu0 %v360_v1  ;;  %v366_v7 = vld [vmem:[%s470_s1 + $0x8] sm:$0xff]   ;;  %v367_v8 = vld [vmem:[%s470_s1] sm:$0xff]   ;;  %v368_v11 = vld [vmem:[%s472_s4 + $0x38] sm:$0xff]  }
   0x4   :  { %320 = vmatprep.subr.bf16.mxu0 %v378_v0  ;;  %v21_v9 = vld [vmem:[%s471_s0] sm:$0xff]  ;;  %339 = vmatpush3.bf16.msra.mxu1 %v368_v11  ;;  %v369_v12 = vld [vmem:[%s472_s4 + $0x30] sm:$0xff]   ;;  %v370_v13 = vld [vmem:[%s472_s4 + $0x28] sm:$0xff]   ;;  %vm129_vm1 = vcmp.lt.s32.totalorder %v128_v20, 2 }
   0x5   :  { %v22_v10 = vpack.c.bf16 %v21_v9, %v21_v9  ;;  %340 = vmatprep.subr.bf16.mxu1 %v378_v0  ;;  %v371_v14 = vld [vmem:[%s472_s4 + $0x20] sm:$0xff]   ;;  %v372_v15 = vld [vmem:[%s472_s4 + $0x18] sm:$0xff]   ;;  %v373_v16 = vld [vmem:[%s472_s4 + $0x10] sm:$0xff]   ;;  %v289_v21 = vsel %vm129_vm1, 1.0, %v378_v0 }
   0x6   :  { %v374_v17 = vld [vmem:[%s472_s4 + $0x8] sm:$0xff]   ;;  %v375_v18 = vld [vmem:[%s472_s4] sm:$0xff]  }
   0x7   :  { %321 = vmatpush3.bf16.msra.mxu0 %v361_v2  ;;  %v290_v46 = vld [vmem:[%s473_s2] ss:$0 sm:$0xff] }
   0x8   :  { %322 = vmatprep.subr.bf16.mxu0 %v378_v0  ;;  %341 = vmatpush3.bf16.msra.mxu1 %v369_v12  ;;  %v291_v48 = vld [vmem:[%s474_s3] ss:$0 sm:$0xff] }
   0x9   :  { %342 = vmatprep.subr.bf16.mxu1 %v378_v0 }
   0xb   :  { %323 = vmatpush3.bf16.msra.mxu0 %v362_v3 }
   0xc   :  { %324 = vmatprep.subr.bf16.mxu0 %v378_v0  ;;  %343 = vmatpush3.bf16.msra.mxu1 %v370_v13 }
   0xd   :  { %344 = vmatprep.subr.bf16.mxu1 %v378_v0 }
   0xf   :  { %325 = vmatpush3.bf16.msra.mxu0 %v363_v4 }
  0x10   :  { %326 = vmatprep.subr.bf16.mxu0 %v378_v0  ;;  %345 = vmatpush3.bf16.msra.mxu1 %v371_v14 }
  0x11   :  { %346 = vmatprep.subr.bf16.mxu1 %v378_v0 }
  0x13   :  { %327 = vmatpush3.bf16.msra.mxu0 %v364_v5 }
  0x14   :  { %328 = vmatprep.subr.bf16.mxu0 %v378_v0  ;;  %347 = vmatpush3.bf16.msra.mxu1 %v372_v15 }
  0x15   :  { %348 = vmatprep.subr.bf16.mxu1 %v378_v0 }
  0x17   :  { %329 = vmatpush3.bf16.msra.mxu0 %v365_v6 }
  0x18   :  { %330 = vmatprep.subr.bf16.mxu0 %v378_v0  ;;  %349 = vmatpush3.bf16.msra.mxu1 %v373_v16 }
  0x19   :  { %350 = vmatprep.subr.bf16.mxu1 %v378_v0 }
  0x1b   :  { %331 = vmatpush3.bf16.msra.mxu0 %v366_v7 }
  0x1c   :  { %332 = vmatprep.subr.bf16.mxu0 %v378_v0  ;;  %351 = vmatpush3.bf16.msra.mxu1 %v374_v17 }
  0x1d   :  { %352 = vmatprep.subr.bf16.mxu1 %v378_v0 }
  0x1f   :  { %333 = vmatpush3.bf16.msra.mxu0 %v367_v8 }
  0x20   :  { %353 = vmatpush3.bf16.msra.mxu1 %v375_v18 }
  0x22   :  { %335 = vmatmul.mubr.bf16.vlgmr.msra.gmra.mxu0 %v22_v10 }
  0xe2   :  { %v121_v22 = vpop.f32.mrf.mxu0 }
  0xe3   :  { %v132_v23 = vmul.f32 %v289_v21, %v121_v22 }
  0xe4   :  { %v336_v24 = vpop.f32.mrf.mxu0 }
  0xe5   :  { %v133_v25 = vrot.slane %v132_v23, 4 }
  0xe6   :  { %v124_v26 = vpop.f32.mrf.mxu0 }
  0xe7   :  { %v134_v27 = vadd.f32 %v133_v25, %v132_v23 }
  0xe8   :  { %v337_v28 = vpop.f32.mrf.mxu0 }
  0xe9   :  { %v135_v29 = vrot.slane %v134_v27, 2 }
  0xeb   :  { %v136_v30 = vadd.f32 %v135_v29, %v134_v27 }
  0xed   :  { %v137_v31 = vrot.slane %v136_v30, 1 }
  0xef   :  { %v138_v32 = vadd.f32 %v137_v31, %v136_v30 }
  0xf1   :  { %v140_v33 = vmul.f32 0.5, %v138_v32 }
  0xf3   :  { %v141_v34 = vsub.f32 %v121_v22, %v140_v33 }
  0xf5   :  { %v142_v35 = vmul.f32 %v289_v21, %v141_v34 }
  0xf7   :  { %v143_v36 = vmul.f32 %v142_v35, %v142_v35 }
  0xf9   :  { %v144_v37 = vrot.slane %v143_v36, 4 }
  0xfb   :  { %v145_v38 = vadd.f32 %v144_v37, %v143_v36 }
  0xfd   :  { %v146_v39 = vrot.slane %v145_v38, 2 }
  0xff   :  { %v147_v40 = vadd.f32 %v146_v39, %v145_v38 }
 0x101   :  { %v148_v41 = vrot.slane %v147_v40, 1 }
 0x103   :  { %v149_v42 = vadd.f32 %v148_v41, %v147_v40 }
 0x105   :  { %v150_v43 = vmul.f32 0.5, %v149_v42 }
 0x107   :  { %v151_v44 = vadd.f32 1e-05, %v150_v43 }
 0x109   :  { %376 = vrsqrt.f32 %v151_v44 }
 0x116   :  { %v377_v45 = vpop.eup %376 }
 0x117   :  { %v153_v47 = vmul.f32 %v377_v45, %v141_v34 }
 0x119   :  { %v161_v49 = vmul.f32 %v290_v46, %v153_v47 }
 0x11b   :  { %v169_v50 = vadd.f32 %v291_v48, %v161_v49 }
 0x11d   :  { %v170_v51 = vmax.f32 %v169_v50, 0.0 }
 0x11f   :  { %v171_v52 = vpack.c.bf16 %v170_v51, %v170_v51 }
 0x121   :  { %355 = vmatmul.mubr.bf16.vlgmr.msra.gmra.mxu1 %v171_v52 }
 0x1e1   :  { %v270_v53 = vpop.f32.mrf.mxu1 }
 0x1e2   :  { %276 = vst [vmem:[%s475_s5] sm:$0xff] %v270_v53 }
 0x1e3   :  { %v356_v54 = vpop.f32.mrf.mxu1 }
 0x1e5   :  { %v273_v55 = vpop.f32.mrf.mxu1 }
 0x1e7   :  { %v357_v56 = vpop.f32.mrf.mxu1 }

// kernel: encoder_forward.2
= control target key start
LH: loop header
LB: loop body
LE: loop exit
PB: predicated region body
PF: predicated region fallthrough
CT: control target
= control target key end

     0   :  { %v13504_v0 = vmov 0.0   ;;  %vm8507_vm0 = vmmov 0   ;;  %vm173_vm1 = vsmask.f32 7424  ;;  %vm1364_vm2 = vcmask 1046528   ;;  %s13492_s1 = inlined_call_operand.vmem [shape: bf16[9,128,128], index: 1, kind: input, shape index: {}]   ;;  %s13493_s0 = inlined_call_operand.vmem [shape: f32[656,128], index: 0, kind: input, shape index: {}]   ;;  %s13494_s2 = inlined_call_operand.vmem [shape: f32[1,128], index: 2, kind: input, shape index: {}]   ;;  %s13495_s3 = inlined_call_operand.vmem [shape: f32[1,128], index: 3, kind: input, shape index: {}]   ;;  %s13496_s4 = inlined_call_operand.vmem [shape: f32[8,128], index: 4, kind: output, shape index: {}]  }
   0x1   :  { %6825 = vmatprep.subr.bf16.mxu0 %v13504_v0  ;;  %8402 = vmatprep.subr.bf16.mxu1 %v13504_v0  ;;  %v8431_v1 = vld [vmem:[%s13492_s1 + $0x78] sm:$0xff]   ;;  %v8432_v2 = vld [vmem:[%s13492_s1 + $0x70] sm:$0xff]   ;;  %v8433_v3 = vld [vmem:[%s13492_s1 + $0x68] sm:$0xff]   ;;  %vm2459_vm3 = vsmask.f32 6400  ;;  %vm3145_vm4 = vcmask 1045504  }
   0x2   :  { %6841 = vmatprep.mubr.msk.bf16.mxu0 %vm8507_vm0, %v13504_v0  ;;  %6937 = vmatprep.mubr.msk.bf16.mxu1 %vm8507_vm0, %v13504_v0  ;;  %v20_v4 = vld [vmem:[%s13493_s0 + $0x10] sm:$0xff]  ;;  %v21_v5 = vld [vmem:[%s13493_s0 + $0x18] sm:$0xff]  ;;  %v8434_v6 = vld [vmem:[%s13492_s1 + $0x60] sm:$0xff]   ;;  %vm4240_vm5 = vsmask.f32 5376  ;;  %vm4926_vm6 = vcmask 1044480  }
   0x3   :  { %6826 = vmatpush3.bf16.msra.mxu0 %v8431_v1  ;;  %8410 = vmatpush3.bf16.msra.mxu1 %v8431_v1  ;;  %v18_v7 = vld [vmem:[%s13493_s0] sm:$0xff]  ;;  %v8565_v8 = vpack.c.bf16 %v21_v5, %v20_v4  ;;  %v19_v9 = vld [vmem:[%s13493_s0 + $0x8] sm:$0xff]  ;;  %v8435_v14 = vld [vmem:[%s13492_s1 + $0x58] sm:$0xff]  }
   0x4   :  { %6827 = vmatprep.subr.bf16.mxu0 %v13504_v0  ;;  %8403 = vmatprep.subr.bf16.mxu1 %v13504_v0  ;;  %v66_v10 = vld [vmem:[%s13493_s0 + $0x180] sm:$0xff]  ;;  %v67_v11 = vld [vmem:[%s13493_s0 + $0x188] sm:$0xff]  ;;  %v8583_v15 = vpack.c.bf16 %v19_v9, %v18_v7  ;;  %v68_v18 = vld [vmem:[%s13493_s0 + $0x190] sm:$0xff] }
   0x5   :  { %13757 = vst [vmem:[#allocation2_spill] sm:$0xff] %v8565_v8  ;;  %v182_v12 = vshll.u32 %v8565_v8, 16  ;;  %v186_v13 = vshrl.u32 %v8565_v8, 16  ;;  %v8587_v17 = vpack.c.bf16 %v67_v11, %v66_v10  ;;  %v69_v19 = vld [vmem:[%s13493_s0 + $0x198] sm:$0xff]  ;;  %v8436_v22 = vld [vmem:[%s13492_s1 + $0x50] sm:$0xff]   ;;  %v8437_v26 = vld [vmem:[%s13492_s1 + $0x48] sm:$0xff]  }
   0x6   :  { %v177_v23 = vshll.u32 %v8583_v15, 16  ;;  %v8607_v24 = vpack.c.bf16 %v69_v19, %v68_v18  ;;  %v175_v27 = vshrl.u32 %v8583_v15, 16  ;;  %v22_v28 = vld [vmem:[%s13493_s0 + $0x20] sm:$0xff]  ;;  %v23_v29 = vld [vmem:[%s13493_s0 + $0x28] sm:$0xff]  ;;  %v24_v44 = vld [vmem:[%s13493_s0 + $0x30] sm:$0xff] }
   0x7   :  { %6828 = vmatpush3.bf16.msra.mxu0 %v8432_v2  ;;  %8411 = vmatpush3.bf16.msra.mxu1 %v8432_v2  ;;  %v8585_v16 = vrot.slane %v182_v12, 2  ;;  %13759 = vst [vmem:[#allocation4_spill] sm:$0xff] %v8587_v17  ;;  %v8599_v20 = vrot.slane %v186_v13, 1  ;;  %v8610_v25 = vshll.u32 %v8587_v17, 16  ;;  %v8626_v32 = vshrl.u32 %v8587_v17, 16  ;;  %v70_v34 = vld [vmem:[%s13493_s0 + $0x1a0] sm:$0xff] }
   0x8   :  { %6829 = vmatprep.subr.bf16.mxu0 %v13504_v0  ;;  %8404 = vmatprep.subr.bf16.mxu1 %v13504_v0  ;;  %13761 = vst [vmem:[#allocation6_spill] sm:$0xff] %v8607_v24  ;;  %v179_v30 = vrot.slane %v177_v23, 1  ;;  %v8629_v33 = vshll.u32 %v8607_v24, 16  ;;  %v71_v35 = vld [vmem:[%s13493_s0 + $0x1a8] sm:$0xff]  ;;  %v8639_v36 = vpack.c.bf16 %v23_v29, %v22_v28  ;;  %v8438_v38 = vld [vmem:[%s13492_s1 + $0x40] sm:$0xff]   ;;  %v184_v40 = vrot.slane %v182_v12, 1 }
   0x9   :  { %13758 = vst [vmem:[#allocation3_spill] sm:$0xff] %v8585_v16  ;;  %13760 = vst [vmem:[#allocation5_spill] sm:$0xff] %v8599_v20  ;;  %v13497_v31 = vrot.slane %v8610_v25, 1  ;;  %v8641_v37 = vpack.c.bf16 %v71_v35, %v70_v34  ;;  %v25_v45 = vld [vmem:[%s13493_s0 + $0x38] sm:$0xff]  ;;  %v72_v46 = vld [vmem:[%s13493_s0 + $0x1b0] sm:$0xff]  ;;  %v8667_v49 = vshrl.u32 %v8607_v24, 16 }
   0xa   :  { %13762 = vst [vmem:[#allocation7_spill] sm:$0xff] %v8610_v25  ;;  %13763 = vst [vmem:[#allocation8_spill] sm:$0xff] %v8626_v32  ;;  %v180_v39 = vor.u32 %v179_v30, %v175_v27  ;;  %v376_v42 = vrot.slane %v8629_v33, 1  ;;  %v8653_v43 = vshll.u32 %v8639_v36, 16  ;;  %v73_v51 = vld [vmem:[%s13493_s0 + $0x1b8] sm:$0xff]  ;;  %v188_v53 = vor.u32 %v186_v13, %v184_v40  ;;  %v8440_v59 = vld [vmem:[%s13492_s1 + $0x30] sm:$0xff]  }
   0xb   :  { %6830 = vmatpush3.bf16.msra.mxu0 %v8433_v3  ;;  %8412 = vmatpush3.bf16.msra.mxu1 %v8433_v3  ;;  %13764 = vst [vmem:[#allocation9_spill] sm:$0xff] %v8629_v33  ;;  %13765 = vst [vmem:[#allocation10_spill] sm:$0xff] %v8639_v36  ;;  %v372_v41 = vor.u32 %v8626_v32, %v13497_v31  ;;  %v8670_v50 = vshll.u32 %v8641_v37, 16  ;;  %v8439_v52 = vld [vmem:[%s13492_s1 + $0x38] sm:$0xff]   ;;  %v8689_v57 = vpack.c.bf16 %v25_v45, %v24_v44  ;;  %v26_v3 = vld [vmem:[%s13493_s0 + $0x40] sm:$0xff] }
   0xc   :  { %6831 = vmatprep.subr.bf16.mxu0 %v13504_v0  ;;  %8405 = vmatprep.subr.bf16.mxu1 %v13504_v0  ;;  %13766 = vst [vmem:[#allocation11_spill] sm:$0xff] %v8641_v37  ;;  %13767 = vst [vmem:[#allocation12_spill] sm:$0xff] %v8653_v43  ;;  %v185_v47 = vsel %vm173_vm1, %v180_v39, %v184_v40  ;;  %v192_v54 = vrot.slane %v8653_v43, 1  ;;  %v380_v55 = vor.u32 %v8667_v49, %v376_v42  ;;  %v27_v4 = vld [vmem:[%s13493_s0 + $0x48] sm:$0xff]  ;;  %v74_v5 = vld [vmem:[%s13493_s0 + $0x1c0] sm:$0xff] }
   0xd   :  { %v377_v48 = vsel %vm173_vm1, %v372_v41, %v376_v42  ;;  %13768 = vst [vmem:[#allocation13_spill] sm:$0xff] %v8667_v49  ;;  %13769 = vst [vmem:[#allocation14_spill] sm:$0xff] %v8670_v50  ;;  %v384_v56 = vrot.slane %v8670_v50, 1  ;;  %v8691_v58 = vpack.c.bf16 %v73_v51, %v72_v46  ;;  %v8699_v61 = vshrl.u32 %v8639_v36, 16  ;;  %v8441_v7 = vld [vmem:[%s13492_s1 + $0x28] sm:$0xff]   ;;  %v8442_v18 = vld [vmem:[%s13492_s1 + $0x20] sm:$0xff]  }
   0xe   :  { %13770 = vst [vmem:[#allocation15_spill] sm:$0xff] %v8689_v57  ;;  %v193_v60 = vsel %vm173_vm1, %v188_v53, %v192_v54  ;;  %v8703_v63 = vshll.u32 %v8689_v57, 16  ;;  %v8706_v1 = vshrl.u32 %v8641_v37, 16  ;;  %v8728_v10 = vpack.c.bf16 %v27_v4, %v26_v3  ;;  %v28_v19 = vld [vmem:[%s13493_s0 + $0x50] sm:$0xff]  ;;  %v77_v35 = vld [vmem:[%s13493_s0 + $0x1d8] sm:$0xff]  ;;  %v78_v53 = vld [vmem:[%s13493_s0 + $0x1e0] sm:$0xff] }
   0xf   :  { %6832 = vmatpush3.bf16.msra.mxu0 %v8434_v6  ;;  %8413 = vmatpush3.bf16.msra.mxu1 %v8434_v6  ;;  %13771 = vst [vmem:[#allocation16_spill] sm:$0xff] %v8691_v58  ;;  %13772 = vst [vmem:[#allocation17_spill] sm:$0xff] %v8699_v61  ;;  %v385_v62 = vsel %vm173_vm1, %v380_v55, %v384_v56  ;;  %v8709_v2 = vshll.u32 %v8691_v58, 16  ;;  %v75_v6 = vld [vmem:[%s13493_s0 + $0x1c8] sm:$0xff]  ;;  %v196_v9 = vor.u32 %v8699_v61, %v192_v54  ;;  %v76_v27 = vld [vmem:[%s13493_s0 + $0x1d0] sm:$0xff] }
  0x10   :  { %6833 = vmatprep.subr.bf16.mxu0 %v13504_v0  ;;  %8406 = vmatprep.subr.bf16.mxu1 %v13504_v0  ;;  %13773 = vst [vmem:[#allocation18_spill] sm:$0xff] %v8703_v63  ;;  %13774 = vst [vmem:[#allocation19_spill] sm:$0xff] %v8706_v1  ;;  %v200_v11 = vrot.slane %v8703_v63, 1  ;;  %v388_v12 = vor.u32 %v8706_v1, %v384_v56  ;;  %v8750_v23 = vshrl.u32 %v8689_v57, 16  ;;  %v8761_v30 = vshrl.u32 %v8691_v58, 16  ;;  %v8444_v46 = vld [vmem:[%s13492_s1 + $0x10] sm:$0xff]  }
  0x11   :  { %13775 = vst [vmem:[#allocation20_spill] sm:$0xff] %v8709_v2  ;;  %13776 = vst [vmem:[#allocation21_spill] sm:$0xff] %v8728_v10  ;;  %v392_v13 = vrot.slane %v8709_v2, 1  ;;  %v8783_v45 = vpack.c.bf16 %v77_v35, %v76_v27  ;;  %v8796_v51 = vshrl.u32 %v8728_v10, 16  ;;  %v79_v54 = vld [vmem:[%s13493_s0 + $0x1e8] sm:$0xff]  ;;  %v81_v27 = vld [vmem:[%s13493_s0 + $0x1f8] sm:$0xff] }
  0x12   :  { %13778 = vst [vmem:[#allocation23_spill] sm:$0xff] %v8750_v23  ;;  %v201_v28 = vsel %vm173_vm1, %v196_v9, %v200_v11  ;;  %13780 = vst [vmem:[#allocation25_spill] sm:$0xff] %v8761_v30  ;;  %v204_v39 = vor.u32 %v8750_v23, %v200_v11  ;;  %v8829_v9 = vpack.c.bf16 %v79_v54, %v78_v53  ;;  %v32_v11 = vld [vmem:[%s13493_s0 + $0x70] sm:$0xff]  ;;  %v8450_v31 = vld [vmem:[%s13492_s1 + $0xa0] sm:$0xff]  }
  0x13   :  { %6834 = vmatpush3.bf16.msra.mxu0 %v8435_v14  ;;  %8414 = vmatpush3.bf16.msra.mxu1 %v8435_v14  ;;  %v8737_v14 = vpack.c.bf16 %v75_v6, %v74_v5  ;;  %v393_v29 = vsel %vm173_vm1, %v388_v12, %v392_v13  ;;  %v396_v42 = vor.u32 %v8761_v30, %v392_v13  ;;  %v8446_v12 = vld [vmem:[%s13492_s1] sm:$0xff]   ;;  %v33_v13 = vld [vmem:[%s13493_s0 + $0x78] sm:$0xff] }
  0x14   :  { %6835 = vmatprep.subr.bf16.mxu0 %v13504_v0  ;;  %8407 = vmatprep.subr.bf16.mxu1 %v13504_v0  ;;  %13783 = vst [vmem:[#allocation28_spill] sm:$0xff] %v8783_v45  ;;  %13784 = vst [vmem:[#allocation29_spill] sm:$0xff] %v8796_v51 }
  0x15   :  { %13777 = vst [vmem:[#allocation22_spill] sm:$0xff] %v8737_v14  ;;  %v8764_v34 = vshll.u32 %v8737_v14, 16  ;;  %13789 = vst [vmem:[#allocation34_spill] sm:$0xff] %v8829_v9 }
  0x17   :  { %6836 = vmatpush3.bf16.msra.mxu0 %v8436_v22  ;;  %8415 = vmatpush3.bf16.msra.mxu1 %v8436_v22  ;;  %v29_v22 = vld [vmem:[%s13493_s0 + $0x58] sm:$0xff]  ;;  %13781 = vst [vmem:[#allocation26_spill] sm:$0xff] %v8764_v34  ;;  %v400_v44 = vrot.slane %v8764_v34, 1  ;;  %v86_v34 = vld [vmem:[%s13493_s0 + $0x220] sm:$0xff] }
  0x18   :  { %6837 = vmatprep.subr.bf16.mxu0 %v13504_v0  ;;  %8408 = vmatprep.subr.bf16.mxu1 %v13504_v0  ;;  %v8774_v40 = vpack.c.bf16 %v29_v22, %v28_v19 }
  0x19   :  { %v401_v56 = vsel %vm173_vm1, %v396_v42, %v400_v44  ;;  %v8867_v42 = vpack.c.bf16 %v33_v13, %v32_v11  ;;  %v36_v11 = vld [vmem:[%s13493_s0 + $0x90] sm:$0xff] }
  0x1a   :  { %13782 = vst [vmem:[#allocation27_spill] sm:$0xff] %v8774_v40  ;;  %v8845_v19 = vshrl.u32 %v8774_v40, 16 }
  0x1b   :  { %6838 = vmatpush3.bf16.msra.mxu0 %v8437_v26  ;;  %8416 = vmatpush3.bf16.msra.mxu1 %v8437_v26  ;;  %v8753_v26 = vshll.u32 %v8728_v10, 16  ;;  %13794 = vst [vmem:[#allocation39_spill] sm:$0xff] %v8867_v42 }
  0x1c   :  { %6839 = vmatprep.subr.bf16.mxu0 %v13504_v0  ;;  %8409 = vmatprep.subr.bf16.mxu1 %v13504_v0  ;;  %13790 = vst [vmem:[#allocation35_spill] sm:$0xff] %v8845_v19 }
  0x1d   :  { %13779 = vst [vmem:[#allocation24_spill] sm:$0xff] %v8753_v26  ;;  %v208_v41 = vrot.slane %v8753_v26, 1 }
  0x1f   :  { %6840 = vmatpush3.bf16.msra.mxu0 %v8438_v38  ;;  %8417 = vmatpush3.bf16.msra.mxu1 %v8438_v38  ;;  %v8443_v38 = vld [vmem:[%s13492_s1 + $0x18] sm:$0xff]   ;;  %v209_v55 = vsel %vm173_vm1, %v204_v39, %v208_v41  ;;  %v212_v3 = vor.u32 %v8796_v51, %v208_v41  ;;  %v8862_v39 = vshll.u32 %v8829_v9, 16  ;;  %v35_v41 = vld [vmem:[%s13493_s0 + $0x88] sm:$0xff] }
  0x20   :  { %6997 = vmatprep.subr.bf16.mxu1 %v13504_v0  ;;  %7169 = vmatprep.subr.bf16.mxu0 %v13504_v0 }
  0x21   :  { %13793 = vst [vmem:[#allocation38_spill] sm:$0xff] %v8862_v39 }
  0x22   :  { %6842 = vmatmul.mubr.bf16.vlgmr.msra.gmra.mxu0 %v185_v47  ;;  %6938 = vmatmul.mubr.bf16.vlgmr.msra.gmra.mxu1 %v377_v48  ;;  %v30_v47 = vld [vmem:[%s13493_s0 + $0x60] sm:$0xff]  ;;  %v31_v48 = vld [vmem:[%s13493_s0 + $0x68] sm:$0xff] }
  0x23   :  { %6845 = vmatprep.mubr.msk.bf16.mxu0 %vm8507_vm0, %v13504_v0  ;;  %6941 = vmatprep.mubr.msk.bf16.mxu1 %vm8507_vm0, %v13504_v0  ;;  %v8820_v4 = vpack.c.bf16 %v31_v48, %v30_v47 }
  0x24   :  { %6998 = vmatpush3.bf16.msra.mxu1 %v8439_v52  ;;  %v8799_v52 = vshll.u32 %v8774_v40, 16 }
  0x25   :  { %6999 = vmatprep.subr.bf16.mxu1 %v13504_v0  ;;  %13788 = vst [vmem:[#allocation33_spill] sm:$0xff] %v8820_v4  ;;  %v8848_v22 = vshll.u32 %v8820_v4, 16  ;;  %v8877_v48 = vshrl.u32 %v8820_v4, 16 }
  0x26   :  { %13785 = vst [vmem:[#allocation30_spill] sm:$0xff] %v8799_v52  ;;  %v216_v5 = vrot.slane %v8799_v52, 1 }
  0x27   :  { %13791 = vst [vmem:[#allocation36_spill] sm:$0xff] %v8848_v22  ;;  %v224_v47 = vrot.slane %v8848_v22, 1  ;;  %13796 = vst [vmem:[#allocation41_spill] sm:$0xff] %v8877_v48 }
  0x28   :  { %7000 = vmatpush3.bf16.msra.mxu1 %v8440_v59  ;;  %v8810_v59 = vshrl.u32 %v8737_v14, 16  ;;  %v220_v53 = vor.u32 %v8845_v19, %v216_v5 }
  0x29   :  { %7001 = vmatprep.subr.bf16.mxu1 %v13504_v0 }
  0x2a   :  { %6846 = vmatmul.mubr.bf16.gmra.mxu0 %v193_v60  ;;  %6942 = vmatmul.mubr.bf16.gmra.mxu1 %v385_v62  ;;  %13786 = vst [vmem:[#allocation31_spill] sm:$0xff] %v8810_v59  ;;  %v8813_v60 = vshll.u32 %v8783_v45, 16  ;;  %v8445_v62 = vld [vmem:[%s13492_s1 + $0x8] sm:$0xff]   ;;  %v404_v6 = vor.u32 %v8810_v59, %v400_v44  ;;  %v225_v13 = vsel %vm173_vm1, %v220_v53, %v224_v47  ;;  %v8927_v53 = vshrl.u32 %v8867_v42, 16 }
  0x2b   :  { %6849 = vmatprep.mubr.msk.bf16.mxu0 %vm8507_vm0, %v13504_v0  ;;  %6945 = vmatprep.mubr.msk.bf16.mxu1 %vm8507_vm0, %v13504_v0 }
  0x2c   :  { %7002 = vmatpush3.bf16.msra.mxu1 %v8441_v7  ;;  %13787 = vst [vmem:[#allocation32_spill] sm:$0xff] %v8813_v60  ;;  %v408_v7 = vrot.slane %v8813_v60, 1  ;;  %13803 = vst [vmem:[#allocation48_spill] sm:$0xff] %v8927_v53 }
  0x2d   :  { %7003 = vmatprep.subr.bf16.mxu1 %v13504_v0 }
  0x2e   :  { %v409_v35 = vsel %vm173_vm1, %v404_v6, %v408_v7  ;;  %v83_v6 = vld [vmem:[%s13493_s0 + $0x208] sm:$0xff] }
  0x30   :  { %7004 = vmatpush3.bf16.msra.mxu1 %v8442_v18  ;;  %v80_v18 = vld [vmem:[%s13493_s0 + $0x1f0] sm:$0xff] }
  0x31   :  { %7005 = vmatprep.subr.bf16.mxu1 %v13504_v0  ;;  %v8869_v44 = vpack.c.bf16 %v81_v27, %v80_v18  ;;  %v8913_v27 = vshrl.u32 %v8829_v9, 16 }
  0x32   :  { %6850 = vmatmul.mubr.bf16.gmra.mxu0 %v201_v28  ;;  %6946 = vmatmul.mubr.bf16.gmra.mxu1 %v393_v29  ;;  %v34_v28 = vld [vmem:[%s13493_s0 + $0x80] sm:$0xff]  ;;  %v217_v29 = vsel %vm173_vm1, %v212_v3, %v216_v5  ;;  %v8898_v5 = vshll.u32 %v8867_v42, 16 }
  0x33   :  { %6853 = vmatprep.mubr.msk.bf16.mxu0 %vm8507_vm0, %v13504_v0  ;;  %6949 = vmatprep.mubr.msk.bf16.mxu1 %vm8507_vm0, %v13504_v0  ;;  %13795 = vst [vmem:[#allocation40_spill] sm:$0xff] %v8869_v44  ;;  %v82_v3 = vld [vmem:[%s13493_s0 + $0x200] sm:$0xff]  ;;  %13800 = vst [vmem:[#allocation45_spill] sm:$0xff] %v8913_v27 }
  0x34   :  { %7006 = vmatpush3.bf16.msra.mxu1 %v8443_v38  ;;  %v8859_v38 = vshrl.u32 %v8783_v45, 16  ;;  %13798 = vst [vmem:[#allocation43_spill] sm:$0xff] %v8898_v5 }
  0x35   :  { %7007 = vmatprep.subr.bf16.mxu1 %v13504_v0 }
  0x36   :  { %13792 = vst [vmem:[#allocation37_spill] sm:$0xff] %v8859_v38  ;;  %v412_v54 = vor.u32 %v8859_v38, %v408_v7  ;;  %v8901_v7 = vshll.u32 %v8869_v44, 16 }
  0x38   :  { %7008 = vmatpush3.bf16.msra.mxu1 %v8444_v46  ;;  %v8447_v46 = vld [vmem:[%s13492_s1 + $0xb8] sm:$0xff]   ;;  %13799 = vst [vmem:[#allocation44_spill] sm:$0xff] %v8901_v7 }
  0x39   :  { %7009 = vmatprep.subr.bf16.mxu1 %v13504_v0  ;;  %7170 = vmatpush3.bf16.msra.mxu0 %v8447_v46  ;;  %v424_v46 = vrot.slane %v8901_v7, 1 }
  0x3a   :  { %6854 = vmatmul.mubr.bf16.gmra.mxu0 %v209_v55  ;;  %6950 = vmatmul.mubr.bf16.gmra.mxu1 %v401_v56  ;;  %v416_v55 = vrot.slane %v8862_v39, 1  ;;  %v8886_v56 = vpack.c.bf16 %v35_v41, %v34_v28  ;;  %v232_v41 = vrot.slane %v8898_v5, 1  ;;  %v64_v5 = vld [vmem:[%s13493_s0 + $0x170] sm:$0xff] }
  0x3b   :  { %6857 = vmatprep.mubr.msk.bf16.mxu0 %vm8507_vm0, %v13504_v0  ;;  %6953 = vmatprep.mubr.msk.bf16.mxu1 %vm8507_vm0, %v13504_v0 }
  0x3c   :  { %7010 = vmatpush3.bf16.msra.mxu1 %v8445_v62  ;;  %13797 = vst [vmem:[#allocation42_spill] sm:$0xff] %v8886_v56  ;;  %v8448_v62 = vld [vmem:[%s13492_s1 + $0xb0] sm:$0xff]   ;;  %7171 = vmatprep.subr.bf16.mxu0 %v13504_v0  ;;  %v417_v18 = vsel %vm173_vm1, %v412_v54, %v416_v55  ;;  %v8916_v28 = vshll.u32 %v8886_v56, 16  ;;  %v8930_v54 = vshrl.u32 %v8869_v44, 16  ;;  %v8954_v39 = vshrl.u32 %v8886_v56, 16 }
  0x3d   :  { %7011 = vmatprep.subr.bf16.mxu1 %v13504_v0  ;;  %7172 = vmatpush3.bf16.msra.mxu0 %v8448_v62  ;;  %v84_v62 = vld [vmem:[%s13493_s0 + $0x210] sm:$0xff] }
  0x3e   :  { %13801 = vst [vmem:[#allocation46_spill] sm:$0xff] %v8916_v28  ;;  %7173 = vmatprep.subr.bf16.mxu0 %v13504_v0  ;;  %13804 = vst [vmem:[#allocation49_spill] sm:$0xff] %v8930_v54 }
  0x3f   :  { %13807 = vst [vmem:[#allocation52_spill] sm:$0xff] %v8954_v39 }
  0x40   :  { %7012 = vmatpush3.bf16.msra.mxu1 %v8446_v12  ;;  %v37_v12 = vld [vmem:[%s13493_s0 + $0x98] sm:$0xff] }
  0x41   :  { %7341 = vmatprep.subr.bf16.mxu1 %v13504_v0  ;;  %v8945_v21 = vpack.c.bf16 %v37_v12, %v36_v11 }
  0x42   :  { %6858 = vmatmul.mubr.bf16.gmra.mxu0 %v217_v29  ;;  %6954 = vmatmul.mubr.bf16.gmra.mxu1 %v409_v35  ;;  %v8918_v29 = vpack.c.bf16 %v83_v6, %v82_v3  ;;  %v8449_v35 = vld [vmem:[%s13492_s1 + $0xa8] sm:$0xff]   ;;  %v85_v3 = vld [vmem:[%s13493_s0 + $0x218] sm:$0xff]  ;;  %v228_v6 = vor.u32 %v8877_v48, %v224_v47 }
  0x43   :  { %6861 = vmatprep.mubr.msk.bf16.mxu0 %vm8507_vm0, %v13504_v0  ;;  %6957 = vmatprep.mubr.msk.bf16.mxu1 %vm8507_vm0, %v13504_v0  ;;  %13805 = vst [vmem:[#allocation50_spill] sm:$0xff] %v8945_v21  ;;  %v8957_v47 = vpack.c.bf16 %v85_v3, %v84_v62  ;;  %v8962_v12 = vshll.u32 %v8945_v21, 16  ;;  %v13811_v3 = vmov 0.0   ;;  %v8982_v60 = vshrl.u32 %v8945_v21, 16 }
  0x44   :  { %13802 = vst [vmem:[#allocation47_spill] sm:$0xff] %v8918_v29  ;;  %7174 = vmatpush3.bf16.msra.mxu0 %v8449_v35  ;;  %v8951_v7 = vshll.u32 %v8918_v29, 16  ;;  %v38_v35 = vld [vmem:[%s13493_s0 + $0xa0] sm:$0xff] }
  0x45   :  { %7175 = vmatprep.subr.bf16.mxu0 %v13504_v0  ;;  %13808 = vst [vmem:[#allocation53_spill] sm:$0xff] %v8957_v47  ;;  %13809 = vst [vmem:[#allocation54_spill] sm:$0xff] %v8962_v12  ;;  %v248_v38 = vrot.slane %v8962_v12, 1 }
  0x46   :  { %13806 = vst [vmem:[#allocation51_spill] sm:$0xff] %v8951_v7  ;;  %v432_v62 = vrot.slane %v8951_v7, 1  ;;  %13813 = vst [vmem:[#allocation57_spill] sm:$0xff] %v8982_v60  ;;  %v428_v7 = vor.u32 %v8930_v54, %v424_v46 }
  0x48   :  { %7176 = vmatpush3.bf16.msra.mxu0 %v8450_v31  ;;  %v236_v31 = vor.u32 %v8927_v53, %v232_v41  ;;  %v433_v54 = vsel %vm173_vm1, %v428_v7, %v432_v62 }
  0x49   :  { %7177 = vmatprep.subr.bf16.mxu0 %v13811_v3 }
  0x4a   :  { %6862 = vmatmul.mubr.bf16.gmra.mxu0 %v225_v13  ;;  %6958 = vmatmul.mubr.bf16.gmra.mxu1 %v417_v18  ;;  %v420_v13 = vor.u32 %v8913_v27, %v416_v55  ;;  %v240_v18 = vrot.slane %v8916_v28, 1  ;;  %v233_v55 = vsel %vm173_vm1, %v228_v6, %v232_v41  ;;  %v8965_v27 = vshrl.u32 %v8918_v29, 16  ;;  %v8451_v6 = vld [vmem:[%s13492_s1 + $0x98] sm:$0xff]   ;;  %v87_v41 = vld [vmem:[%s13493_s0 + $0x228] sm:$0xff]  ;;  %v60_v28 = vld [vmem:[%s13493_s0 + $0x150] sm:$0xff] }
  0x4b   :  { %6865 = vmatprep.mubr.msk.bf16.mxu0 %vm8507_vm0, %v13504_v0  ;;  %6961 = vmatprep.mubr.msk.bf16.mxu1 %vm8507_vm0, %v13504_v0  ;;  %v39_v0 = vld [vmem:[%s13493_s0 + $0xa8] sm:$0xff] }
  0x4c   :  { %v425_v11 = vsel %vm173_vm1, %v420_v13, %v424_v46  ;;  %13810 = vst [vmem:[#allocation55_spill] sm:$0xff] %v8965_v27  ;;  %v8979_v13 = vshll.u32 %v8957_v47, 16  ;;  %7178 = vmatpush3.bf16.msra.mxu0 %v8451_v6  ;;  %v241_v46 = vsel %vm173_vm1, %v236_v31, %v240_v18  ;;  %v8454_v6 = vld [vmem:[%s13492_s1 + $0x80] sm:$0xff]   ;;  %v244_v7 = vor.u32 %v8954_v39, %v240_v18 }
  0x4d   :  { %7179 = vmatprep.subr.bf16.mxu0 %v13811_v3  ;;  %v436_v31 = vor.u32 %v8965_v27, %v432_v62  ;;  %v9034_v18 = vshrl.u32 %v8957_v47, 16  ;;  %v88_v62 = vld [vmem:[%s13493_s0 + $0x230] sm:$0xff]  ;;  %v62_v39 = vld [vmem:[%s13493_s0 + $0x160] sm:$0xff] }
  0x4e   :  { %13812 = vst [vmem:[#allocation56_spill] sm:$0xff] %v8979_v13 }
  0x4f   :  { %13817 = vst [vmem:[#allocation61_spill] sm:$0xff] %v9034_v18 }
  0x52   :  { %6866 = vmatmul.mubr.bf16.gmra.mxu0 %v233_v55  ;;  %6962 = vmatmul.mubr.bf16.gmra.mxu1 %v425_v11  ;;  %v8452_v55 = vld [vmem:[%s13492_s1 + $0x90] sm:$0xff]   ;;  %v8994_v11 = vpack.c.bf16 %v39_v0, %v38_v35  ;;  %v8453_v0 = vld [vmem:[%s13492_s1 + $0x88] sm:$0xff]   ;;  %v440_v35 = vrot.slane %v8979_v13, 1  ;;  %v249_v13 = vsel %vm173_vm1, %v244_v7, %v248_v38 }
  0x53   :  { %6869 = vmatprep.mubr.msk.bf16.mxu0 %vm8507_vm0, %v13811_v3  ;;  %6965 = vmatprep.mubr.msk.bf16.mxu1 %vm8507_vm0, %v13811_v3 }
  0x54   :  { %13814 = vst [vmem:[#allocation58_spill] sm:$0xff] %v8994_v11  ;;  %7180 = vmatpush3.bf16.msra.mxu0 %v8452_v55  ;;  %v9006_v59 = vshll.u32 %v8994_v11, 16  ;;  %v9022_v55 = vpack.c.bf16 %v87_v41, %v86_v34  ;;  %v441_v2 = vsel %vm173_vm1, %v436_v31, %v440_v35  ;;  %v89_v41 = vld [vmem:[%s13493_s0 + $0x238] sm:$0xff]  ;;  %v444_v27 = vor.u32 %v9034_v18, %v440_v35  ;;  %v42_v35 = vld [vmem:[%s13493_s0 + $0xc0] sm:$0xff] }
  0x55   :  { %7181 = vmatprep.subr.bf16.mxu0 %v13811_v3  ;;  %v9056_v30 = vpack.c.bf16 %v89_v41, %v88_v62  ;;  %v43_v62 = vld [vmem:[%s13493_s0 + $0xc8] sm:$0xff]  ;;  %v90_v41 = vld [vmem:[%s13493_s0 + $0x240] sm:$0xff] }
  0x56   :  { %13815 = vst [vmem:[#allocation59_spill] sm:$0xff] %v9006_v59  ;;  %13816 = vst [vmem:[#allocation60_spill] sm:$0xff] %v9022_v55  ;;  %v9037_v34 = vshll.u32 %v9022_v55, 16  ;;  %v256_v31 = vrot.slane %v9006_v59, 1  ;;  %v9092_v33 = vpack.c.bf16 %v43_v62, %v42_v35  ;;  %v44_v35 = vld [vmem:[%s13493_s0 + $0xd0] sm:$0xff]  ;;  %v45_v62 = vld [vmem:[%s13493_s0 + $0xd8] sm:$0xff] }
  0x57   :  { %13820 = vst [vmem:[#allocation64_spill] sm:$0xff] %v9056_v30  ;;  %v9070_v50 = vshll.u32 %v9056_v30, 16 }
  0x58   :  { %7182 = vmatpush3.bf16.msra.mxu0 %v8453_v0  ;;  %13818 = vst [vmem:[#allocation62_spill] sm:$0xff] %v9037_v34  ;;  %v252_v0 = vor.u32 %v8982_v60, %v248_v38  ;;  %13825 = vst [vmem:[#allocation69_spill] sm:$0xff] %v9092_v33 }
  0x59   :  { %7183 = vmatprep.subr.bf16.mxu0 %v13811_v3  ;;  %13824 = vst [vmem:[#allocation68_spill] sm:$0xff] %v9070_v50  ;;  %v456_v1 = vrot.slane %v9070_v50, 1 }
  0x5a   :  { %6870 = vmatmul.mubr.bf16.gmra.mxu0 %v241_v46  ;;  %6966 = vmatmul.mubr.bf16.gmra.mxu1 %v433_v54  ;;  %v40_v54 = vld [vmem:[%s13493_s0 + $0xb0] sm:$0xff]  ;;  %v41_v46 = vld [vmem:[%s13493_s0 + $0xb8] sm:$0xff] }
  0x5b   :  { %6873 = vmatprep.mubr.msk.bf16.mxu0 %vm8507_vm0, %v13811_v3  ;;  %6969 = vmatprep.mubr.msk.bf16.mxu1 %vm8507_vm0, %v13811_v3  ;;  %v9047_v7 = vpack.c.bf16 %v41_v46, %v40_v54  ;;  %v9067_v46 = vshrl.u32 %v9022_v55, 16 }
  0x5c   :  { %7184 = vmatpush3.bf16.msra.mxu0 %v8454_v6  ;;  %v448_v6 = vrot.slane %v9037_v34, 1 }
  0x5d   :  { %7513 = vmatprep.subr.bf16.mxu0 %v13811_v3  ;;  %13819 = vst [vmem:[#allocation63_spill] sm:$0xff] %v9047_v7  ;;  %v9062_v38 = vshll.u32 %v9047_v7, 16  ;;  %13823 = vst [vmem:[#allocation67_spill] sm:$0xff] %v9067_v46 }
  0x5e   :  { %v449_v54 = vsel %vm173_vm1, %v444_v27, %v448_v6  ;;  %v91_v27 = vld [vmem:[%s13493_s0 + $0x248] sm:$0xff]  ;;  %v452_v18 = vor.u32 %v9067_v46, %v448_v6 }
  0x5f   :  { %13822 = vst [vmem:[#allocation66_spill] sm:$0xff] %v9062_v38  ;;  %v264_v34 = vrot.slane %v9062_v38, 1  ;;  %v9094_v49 = vpack.c.bf16 %v91_v27, %v90_v41  ;;  %v9105_v38 = vshll.u32 %v9092_v33, 16  ;;  %v92_v41 = vld [vmem:[%s13493_s0 + $0x250] sm:$0xff] }
  0x60   :  { %v457_v32 = vsel %vm173_vm1, %v452_v18, %v456_v1  ;;  %v93_v18 = vld [vmem:[%s13493_s0 + $0x258] sm:$0xff] }
  0x61   :  { %13826 = vst [vmem:[#allocation70_spill] sm:$0xff] %v9094_v49  ;;  %13829 = vst [vmem:[#allocation73_spill] sm:$0xff] %v9105_v38  ;;  %v9108_v6 = vshll.u32 %v9094_v49, 16  ;;  %v272_v50 = vrot.slane %v9105_v38, 1 }
  0x62   :  { %6874 = vmatmul.mubr.bf16.gmra.mxu0 %v249_v13  ;;  %6970 = vmatmul.mubr.bf16.gmra.mxu1 %v441_v2  ;;  %v9059_v2 = vshrl.u32 %v8994_v11, 16  ;;  %v257_v13 = vsel %vm173_vm1, %v252_v0, %v256_v31 }
  0x63   :  { %6877 = vmatprep.mubr.msk.bf16.mxu0 %vm8507_vm0, %v13811_v3  ;;  %6973 = vmatprep.mubr.msk.bf16.mxu1 %vm8507_vm0, %v13811_v3  ;;  %13830 = vst [vmem:[#allocation74_spill] sm:$0xff] %v9108_v6  ;;  %v464_v59 = vrot.slane %v9108_v6, 1 }
  0x64   :  { %13821 = vst [vmem:[#allocation65_spill] sm:$0xff] %v9059_v2  ;;  %v260_v0 = vor.u32 %v9059_v2, %v256_v31  ;;  %v9100_v31 = vshrl.u32 %v9056_v30, 16  ;;  %v9132_v2 = vpack.c.bf16 %v93_v18, %v92_v41  ;;  %v47_v41 = vld [vmem:[%s13493_s0 + $0xe8] sm:$0xff]  ;;  %v94_v18 = vld [vmem:[%s13493_s0 + $0x260] sm:$0xff] }
  0x66   :  { %13828 = vst [vmem:[#allocation72_spill] sm:$0xff] %v9100_v31  ;;  %v460_v46 = vor.u32 %v9100_v31, %v456_v1  ;;  %13832 = vst [vmem:[#allocation76_spill] sm:$0xff] %v9132_v2  ;;  %v9146_v38 = vshll.u32 %v9132_v2, 16  ;;  %v46_v1 = vld [vmem:[%s13493_s0 + $0xe0] sm:$0xff] }
  0x67   :  { %v9161_v6 = vpack.c.bf16 %v47_v41, %v46_v1  ;;  %v9181_v41 = vshrl.u32 %v9132_v2, 16 }
  0x68   :  { %13836 = vst [vmem:[#allocation80_spill] sm:$0xff] %v9146_v38  ;;  %v472_v12 = vrot.slane %v9146_v38, 1 }
  0x69   :  { %13837 = vst [vmem:[#allocation81_spill] sm:$0xff] %v9161_v6  ;;  %13841 = vst [vmem:[#allocation85_spill] sm:$0xff] %v9181_v41 }
  0x6a   :  { %6878 = vmatmul.mubr.bf16.gmra.mxu0 %v257_v13  ;;  %6974 = vmatmul.mubr.bf16.gmra.mxu1 %v449_v54  ;;  %v9097_v13 = vshrl.u32 %v9047_v7, 16  ;;  %v265_v54 = vsel %vm173_vm1, %v260_v0, %v264_v34  ;;  %v9123_v0 = vpack.c.bf16 %v45_v62, %v44_v35  ;;  %v465_v35 = vsel %vm173_vm1, %v460_v46, %v464_v59  ;;  %v95_v46 = vld [vmem:[%s13493_s0 + $0x268] sm:$0xff] }
  0x6b   :  { %6881 = vmatprep.mubr.msk.bf16.mxu0 %vm8507_vm0, %v13811_v3  ;;  %6977 = vmatprep.mubr.msk.bf16.mxu1 %vm8507_vm0, %v13811_v3  ;;  %v9143_v62 = vshrl.u32 %v9094_v49, 16  ;;  %v9170_v60 = vpack.c.bf16 %v95_v46, %v94_v18  ;;  %v49_v18 = vld [vmem:[%s13493_s0 + $0xf8] sm:$0xff] }
  0x6c   :  { %13827 = vst [vmem:[#allocation71_spill] sm:$0xff] %v9097_v13  ;;  %v268_v27 = vor.u32 %v9097_v13, %v264_v34  ;;  %13831 = vst [vmem:[#allocation75_spill] sm:$0xff] %v9123_v0  ;;  %v9138_v34 = vshll.u32 %v9123_v0, 16 }
  0x6d   :  { %13835 = vst [vmem:[#allocation79_spill] sm:$0xff] %v9143_v62  ;;  %v468_v13 = vor.u32 %v9143_v62, %v464_v59  ;;  %13838 = vst [vmem:[#allocation82_spill] sm:$0xff] %v9170_v60  ;;  %v48_v59 = vld [vmem:[%s13493_s0 + $0xf0] sm:$0xff] }
  0x6e   :  { %13834 = vst [vmem:[#allocation78_spill] sm:$0xff] %v9138_v34  ;;  %v280_v31 = vrot.slane %v9138_v34, 1  ;;  %v9184_v34 = vshll.u32 %v9170_v60, 16  ;;  %v9200_v62 = vpack.c.bf16 %v49_v18, %v48_v59  ;;  %v9217_v59 = vshrl.u32 %v9170_v60, 16 }
  0x6f   :  { %v473_v1 = vsel %vm173_vm1, %v468_v13, %v472_v12 }
  0x70   :  { %13842 = vst [vmem:[#allocation86_spill] sm:$0xff] %v9184_v34  ;;  %v480_v38 = vrot.slane %v9184_v34, 1  ;;  %13843 = vst [vmem:[#allocation87_spill] sm:$0xff] %v9200_v62 }
  0x71   :  { %13846 = vst [vmem:[#allocation90_spill] sm:$0xff] %v9217_v59 }
  0x72   :  { %6882 = vmatmul.mubr.bf16.gmra.mxu0 %v265_v54  ;;  %6978 = vmatmul.mubr.bf16.gmra.mxu1 %v457_v32  ;;  %v9135_v32 = vshrl.u32 %v9092_v33, 16  ;;  %v273_v54 = vsel %vm173_vm1, %v268_v27, %v272_v50  ;;  %v484_v34 = vor.u32 %v9217_v59, %v480_v38 }
  0x73   :  { %6885 = vmatprep.mubr.msk.bf16.mxu0 %vm8507_vm0, %v13811_v3  ;;  %6981 = vmatprep.mubr.msk.bf16.mxu1 %vm8507_vm0, %v13811_v3 }
  0x74   :  { %13833 = vst [vmem:[#allocation77_spill] sm:$0xff] %v9135_v32  ;;  %v276_v27 = vor.u32 %v9135_v32, %v272_v50  ;;  %v9176_v50 = vshll.u32 %v9161_v6, 16 }
  0x76   :  { %13840 = vst [vmem:[#allocation84_spill] sm:$0xff] %v9176_v50  ;;  %v288_v13 = vrot.slane %v9176_v50, 1  ;;  %v50_v50 = vld [vmem:[%s13493_s0 + $0x100] sm:$0xff] }
  0x7a   :  { %6886 = vmatmul.mubr.bf16.gmra.mxu0 %v273_v54  ;;  %6982 = vmatmul.mubr.bf16.gmra.mxu1 %v465_v35  ;;  %v9173_v54 = vshrl.u32 %v9123_v0, 16  ;;  %v281_v35 = vsel %vm173_vm1, %v276_v27, %v280_v31  ;;  %v476_v27 = vor.u32 %v9181_v41, %v472_v12  ;;  %v51_v12 = vld [vmem:[%s13493_s0 + $0x108] sm:$0xff] }
  0x7b   :  { %6889 = vmatprep.mubr.msk.bf16.mxu0 %vm8507_vm0, %v13811_v3  ;;  %6985 = vmatprep.mubr.msk.bf16.mxu1 %vm8507_vm0, %v13811_v3 }
  0x7c   :  { %13839 = vst [vmem:[#allocation83_spill] sm:$0xff] %v9173_v54  ;;  %v284_v46 = vor.u32 %v9173_v54, %v280_v31  ;;  %v9205_v31 = vshrl.u32 %v9161_v6, 16  ;;  %v52_v54 = vld [vmem:[%s13493_s0 + $0x110] sm:$0xff] }
  0x7e   :  { %v289_v32 = vsel %vm173_vm1, %v284_v46, %v288_v13  ;;  %13844 = vst [vmem:[#allocation88_spill] sm:$0xff] %v9205_v31  ;;  %v292_v18 = vor.u32 %v9205_v31, %v288_v13  ;;  %v53_v13 = vld [vmem:[%s13493_s0 + $0x118] sm:$0xff]  ;;  %v58_v31 = vld [vmem:[%s13493_s0 + $0x140] sm:$0xff] }
  0x82   :  { %6890 = vmatmul.mubr.bf16.gmra.mxu0 %v281_v35  ;;  %6986 = vmatmul.mubr.bf16.gmra.mxu1 %v473_v1  ;;  %v481_v35 = vsel %vm173_vm1, %v476_v27, %v480_v38  ;;  %v9208_v1 = vshll.u32 %v9200_v62, 16  ;;  %v9225_v27 = vpack.c.bf16 %v51_v12, %v50_v50  ;;  %v9247_v12 = vpack.c.bf16 %v53_v13, %v52_v54 }
  0x83   :  { %6893 = vmatprep.mubr.msk.bf16.mxu0 %vm8507_vm0, %v13811_v3  ;;  %6989 = vmatprep.mubr.msk.bf16.mxu1 %vm8507_vm0, %v13811_v3 }
  0x84   :  { %13845 = vst [vmem:[#allocation89_spill] sm:$0xff] %v9208_v1  ;;  %v296_v46 = vrot.slane %v9208_v1, 1  ;;  %13847 = vst [vmem:[#allocation91_spill] sm:$0xff] %v9225_v27  ;;  %v9233_v41 = vshll.u32 %v9225_v27, 16  ;;  %v9251_v59 = vshrl.u32 %v9225_v27, 16  ;;  %v9273_v1 = vshrl.u32 %v9247_v12, 16 }
  0x85   :  { %13850 = vst [vmem:[#allocation94_spill] sm:$0xff] %v9247_v12 }
  0x86   :  { %13849 = vst [vmem:[#allocation93_spill] sm:$0xff] %v9233_v41  ;;  %v304_v50 = vrot.slane %v9233_v41, 1  ;;  %13851 = vst [vmem:[#allocation95_spill] sm:$0xff] %v9251_v59 }
  0x87   :  { %13854 = vst [vmem:[#allocation98_spill] sm:$0xff] %v9273_v1 }
  0x88   :  { %v308_v54 = vor.u32 %v9251_v59, %v304_v50 }
  0x8a   :  { %6894 = vmatmul.mubr.bf16.gmra.mxu0 %v289_v32  ;;  %6990 = vmatmul.mubr.bf16.gmra.mxu1 %v481_v35  ;;  %v297_v32 = vsel %vm173_vm1, %v292_v18, %v296_v46  ;;  %v9230_v35 = vshrl.u32 %v9200_v62, 16 }
  0x8b   :  { %6897 = vmatprep.mubr.msk.bf16.mxu0 %vm8507_vm0, %v13811_v3  ;;  %6993 = vmatprep.mubr.msk.bf16.mxu1 %vm8507_vm0, %v13811_v3 }
  0x8c   :  { %13848 = vst [vmem:[#allocation92_spill] sm:$0xff] %v9230_v35  ;;  %v300_v38 = vor.u32 %v9230_v35, %v296_v46  ;;  %v55_v46 = vld [vmem:[%s13493_s0 + $0x128] sm:$0xff]  ;;  %v56_v35 = vld [vmem:[%s13493_s0 + $0x130] sm:$0xff] }
  0x8e   :  { %v305_v18 = vsel %vm173_vm1, %v300_v38, %v304_v50  ;;  %v57_v50 = vld [vmem:[%s13493_s0 + $0x138] sm:$0xff] }
  0x92   :  { %6898 = vmatmul.mubr.bf16.gmra.mxu0 %v297_v32  ;;  %6994 = vmatmul.mubr.bf16.gmra.mxu1 %v484_v34  ;;  %v9254_v32 = vshll.u32 %v9247_v12, 16  ;;  %v54_v34 = vld [vmem:[%s13493_s0 + $0x120] sm:$0xff] }
  0x93   :  { %6901 = vmatprep.mubr.msk.bf16.mxu0 %vm8507_vm0, %v13811_v3  ;;  %7013 = vmatprep.mubr.msk.bf16.mxu1 %vm8507_vm0, %v13811_v3  ;;  %v9269_v38 = vpack.c.bf16 %v55_v46, %v54_v34 }
  0x94   :  { %13852 = vst [vmem:[#allocation96_spill] sm:$0xff] %v9254_v32  ;;  %v312_v13 = vrot.slane %v9254_v32, 1 }
  0x95   :  { %13853 = vst [vmem:[#allocation97_spill] sm:$0xff] %v9269_v38  ;;  %v9295_v59 = vshrl.u32 %v9269_v38, 16 }
  0x96   :  { %v313_v41 = vsel %vm173_vm1, %v308_v54, %v312_v13  ;;  %v316_v34 = vor.u32 %v9273_v1, %v312_v13  ;;  %v9291_v54 = vpack.c.bf16 %v57_v50, %v56_v35  ;;  %v59_v13 = vld [vmem:[%s13493_s0 + $0x148] sm:$0xff] }
  0x97   :  { %13857 = vst [vmem:[#allocation101_spill] sm:$0xff] %v9295_v59 }
  0x98   :  { %13856 = vst [vmem:[#allocation100_spill] sm:$0xff] %v9291_v54  ;;  %v9317_v1 = vshrl.u32 %v9291_v54, 16 }
  0x9a   :  { %6902 = vmatmul.mubr.bf16.gmra.mxu0 %v305_v18  ;;  %7014 = vmatmul.mubr.bf16.vlgmr.msra.gmra.mxu1 %v8583_v15  ;;  %v9276_v18 = vshll.u32 %v9269_v38, 16  ;;  %13860 = vst [vmem:[#allocation104_spill] sm:$0xff] %v9317_v1 }
  0x9b   :  { %6905 = vmatprep.mubr.msk.bf16.mxu0 %vm8507_vm0, %v13811_v3  ;;  %7017 = vmatprep.mubr.msk.bf16.mxu1 %vm8507_vm0, %v13811_v3 }
  0x9c   :  { %13855 = vst [vmem:[#allocation99_spill] sm:$0xff] %v9276_v18  ;;  %v320_v46 = vrot.slane %v9276_v18, 1 }
  0x9e   :  { %v321_v32 = vsel %vm173_vm1, %v316_v34, %v320_v46  ;;  %v324_v35 = vor.u32 %v9295_v59, %v320_v46  ;;  %v9313_v34 = vpack.c.bf16 %v59_v13, %v58_v31  ;;  %v61_v46 = vld [vmem:[%s13493_s0 + $0x158] sm:$0xff] }
  0xa0   :  { %13859 = vst [vmem:[#allocation103_spill] sm:$0xff] %v9313_v34  ;;  %v9339_v59 = vshrl.u32 %v9313_v34, 16 }
  0xa2   :  { %6906 = vmatmul.mubr.bf16.gmra.mxu0 %v313_v41  ;;  %7018 = vmatmul.mubr.bf16.gmra.mxu1 %v8565_v8  ;;  %v9298_v41 = vshll.u32 %v9291_v54, 16  ;;  %13863 = vst [vmem:[#allocation107_spill] sm:$0xff] %v9339_v59 }
  0xa3   :  { %6909 = vmatprep.mubr.msk.bf16.mxu0 %vm8507_vm0, %v13811_v3  ;;  %7021 = vmatprep.mubr.msk.bf16.mxu1 %vm8507_vm0, %v13811_v3 }
  0xa4   :  { %13858 = vst [vmem:[#allocation102_spill] sm:$0xff] %v9298_v41  ;;  %v328_v50 = vrot.slane %v9298_v41, 1 }
  0xa6   :  { %v329_v18 = vsel %vm173_vm1, %v324_v35, %v328_v50  ;;  %v332_v31 = vor.u32 %v9317_v1, %v328_v50  ;;  %v9335_v35 = vpack.c.bf16 %v61_v46, %v60_v28  ;;  %v63_v50 = vld [vmem:[%s13493_s0 + $0x168] sm:$0xff] }
  0xa8   :  { %13862 = vst [vmem:[#allocation106_spill] sm:$0xff] %v9335_v35  ;;  %v9361_v1 = vshrl.u32 %v9335_v35, 16 }
  0xaa   :  { %6910 = vmatmul.mubr.bf16.gmra.mxu0 %v321_v32  ;;  %7022 = vmatmul.mubr.bf16.gmra.mxu1 %v8639_v36  ;;  %v9320_v32 = vshll.u32 %v9313_v34, 16  ;;  %13866 = vst [vmem:[#allocation110_spill] sm:$0xff] %v9361_v1 }
  0xab   :  { %6913 = vmatprep.mubr.msk.bf16.mxu0 %vm8507_vm0, %v13811_v3  ;;  %7025 = vmatprep.mubr.msk.bf16.mxu1 %vm8507_vm0, %v13811_v3 }
  0xac   :  { %13861 = vst [vmem:[#allocation105_spill] sm:$0xff] %v9320_v32  ;;  %v336_v13 = vrot.slane %v9320_v32, 1 }
  0xae   :  { %v337_v41 = vsel %vm173_vm1, %v332_v31, %v336_v13  ;;  %v340_v28 = vor.u32 %v9339_v59, %v336_v13  ;;  %v9357_v31 = vpack.c.bf16 %v63_v50, %v62_v39  ;;  %v65_v13 = vld [vmem:[%s13493_s0 + $0x178] sm:$0xff] }
  0xb0   :  { %13865 = vst [vmem:[#allocation109_spill] sm:$0xff] %v9357_v31  ;;  %v9383_v59 = vshrl.u32 %v9357_v31, 16 }
  0xb2   :  { %6914 = vmatmul.mubr.bf16.gmra.mxu0 %v329_v18  ;;  %7026 = vmatmul.mubr.bf16.gmra.mxu1 %v8689_v57  ;;  %v9342_v18 = vshll.u32 %v9335_v35, 16  ;;  %13869 = vst [vmem:[#allocation113_spill] sm:$0xff] %v9383_v59 }
  0xb3   :  { %6917 = vmatprep.mubr.msk.bf16.mxu0 %vm8507_vm0, %v13811_v3  ;;  %7029 = vmatprep.mubr.msk.bf16.mxu1 %vm8507_vm0, %v13811_v3 }
  0xb4   :  { %13864 = vst [vmem:[#allocation108_spill] sm:$0xff] %v9342_v18  ;;  %v344_v46 = vrot.slane %v9342_v18, 1 }
  0xb6   :  { %v345_v32 = vsel %vm173_vm1, %v340_v28, %v344_v46  ;;  %v348_v39 = vor.u32 %v9361_v1, %v344_v46  ;;  %v9379_v28 = vpack.c.bf16 %v65_v13, %v64_v5 }
  0xb8   :  { %13868 = vst [vmem:[#allocation112_spill] sm:$0xff] %v9379_v28 }
  0xba   :  { %6918 = vmatmul.mubr.bf16.gmra.mxu0 %v337_v41  ;;  %7030 = vmatmul.mubr.bf16.gmra.mxu1 %v8728_v10  ;;  %v9364_v41 = vshll.u32 %v9357_v31, 16 }
  0xbb   :  { %6921 = vmatprep.mubr.msk.bf16.mxu0 %vm8507_vm0, %v13811_v3  ;;  %7033 = vmatprep.mubr.msk.bf16.mxu1 %vm8507_vm0, %v13811_v3 }
  0xbc   :  { %13867 = vst [vmem:[#allocation111_spill] sm:$0xff] %v9364_v41  ;;  %v352_v50 = vrot.slane %v9364_v41, 1 }
  0xbe   :  { %v353_v18 = vsel %vm173_vm1, %v348_v39, %v352_v50  ;;  %v356_v5 = vor.u32 %v9383_v59, %v352_v50  ;;  %v9397_v39 = vshrl.u32 %v9379_v28, 16  ;;  %v13872_v50 = vrot.slane %v8610_v25, 1 }
  0xc0   :  { %13871 = vst [vmem:[#allocation115_spill] sm:$0xff] %v9397_v39 }
  0xc2   :  { %6922 = vmatmul.mubr.bf16.gmra.mxu0 %v345_v32  ;;  %7034 = vmatmul.mubr.bf16.gmra.mxu1 %v8774_v40  ;;  %v9386_v32 = vshll.u32 %v9379_v28, 16 }
  0xc3   :  { %6925 = vmatprep.mubr.msk.bf16.mxu0 %vm8507_vm0, %v13811_v3  ;;  %7037 = vmatprep.mubr.msk.bf16.mxu1 %vm8507_vm0, %v13811_v3 }
  0xc4   :  { %13870 = vst [vmem:[#allocation114_spill] sm:$0xff] %v9386_v32  ;;  %v360_v46 = vrot.slane %v9386_v32, 1 }
  0xc6   :  { %v361_v13 = vsel %vm173_vm1, %v356_v5, %v360_v46  ;;  %v1365_v5 = vrot.slane %v8583_v15, 1  ;;  %v1368_v15 = vrot.slane %v8639_v36, 1 }
  0xca   :  { %6926 = vmatmul.mubr.bf16.gmra.mxu0 %v353_v18  ;;  %7038 = vmatmul.mubr.bf16.gmra.mxu1 %v8820_v4  ;;  %v364_v18 = vor.u32 %v9397_v39, %v360_v46 }
  0xcb   :  { %6929 = vmatprep.mubr.msk.bf16.mxu0 %vm8507_vm0, %v13811_v3  ;;  %7041 = vmatprep.mubr.msk.bf16.mxu1 %vm8507_vm0, %v13811_v3 }
  0xcc   :  { %v369_v32 = vsel %vm173_vm1, %v364_v18, %v13872_v50 }
  0xd2   :  { %6930 = vmatmul.mubr.bf16.gmra.mxu0 %v361_v13  ;;  %7042 = vmatmul.mubr.bf16.gmra.mxu1 %v8867_v42  ;;  %v1366_v13 = vrot.slane %v8565_v8, 1 }
  0xd3   :  { %6933 = vmatprep.mubr.msk.bf16.mxu0 %vm8507_vm0, %v13811_v3  ;;  %7045 = vmatprep.mubr.msk.bf16.mxu1 %vm8507_vm0, %v13811_v3 }
  0xd4   :  { %v1367_v46 = vsel %vm1364_vm2, %v1365_v5, %v1366_v13  ;;  %v9431_v8 = vsel %vm1364_vm2, %v1366_v13, %v1368_v15 }
  0xda   :  { %6934 = vmatmul.mubr.bf16.gmra.mxu0 %v369_v32  ;;  %7046 = vmatmul.mubr.bf16.gmra.mxu1 %v8886_v56 }
  0xdb   :  { %7049 = vmatprep.mubr.msk.bf16.mxu1 %vm8507_vm0, %v13811_v3  ;;  %7185 = vmatprep.mubr.msk.bf16.mxu0 %vm8507_vm0, %v13811_v3 }
  0xe2   :  { %v9416_v39 = vpop.f32.mrf.mxu0  ;;  %v9418_v25 = vpop.f32.mrf.mxu1  ;;  %7050 = vmatmul.mubr.bf16.gmra.mxu1 %v8945_v21  ;;  %7186 = vmatmul.mubr.bf16.vlgmr.msra.gmra.mxu0 %v1367_v46 }
  0xe3   :  { %13873 = vst [vmem:[#allocation116_spill] sm:$0xff] %v9418_v25  ;;  %7053 = vmatprep.mubr.msk.bf16.mxu1 %vm8507_vm0, %v13811_v3  ;;  %7189 = vmatprep.mubr.msk.bf16.mxu0 %vm8507_vm0, %v13811_v3 }
  0xe4   :  { %v6843_v32 = vpop.f32.mrf.mxu0  ;;  %v6939_v18 = vpop.f32.mrf.mxu1 }
  0xe5   :  { %v1370_v32 = vrot.slane %v8689_v57, 1 }
  0xe6   :  { %v9426_v50 = vpop.f32.mrf.mxu0  ;;  %v9428_v5 = vpop.f32.mrf.mxu1 }
  0xe7   :  { %13874 = vst [vmem:[#allocation117_spill] sm:$0xff] %v9428_v5  ;;  %v9449_v36 = vsel %vm1364_vm2, %v1368_v15, %v1370_v32 }
  0xe8   :  { %v6844_v41 = vpop.f32.mrf.mxu0  ;;  %v6940_v59 = vpop.f32.mrf.mxu1 }
  0xea   :  { %v9433_v46 = vpop.f32.mrf.mxu0  ;;  %v9435_v1 = vpop.f32.mrf.mxu1  ;;  %7054 = vmatmul.mubr.bf16.gmra.mxu1 %v8994_v11  ;;  %7190 = vmatmul.mubr.bf16.gmra.mxu0 %v9431_v8 }
  0xeb   :  { %13875 = vst [vmem:[#allocation118_spill] sm:$0xff] %v9435_v1  ;;  %7057 = vmatprep.mubr.msk.bf16.mxu1 %vm8507_vm0, %v13811_v3  ;;  %7193 = vmatprep.mubr.msk.bf16.mxu0 %vm8507_vm0, %v13811_v3 }
  0xec   :  { %v6847_v13 = vpop.f32.mrf.mxu0  ;;  %v6943_v18 = vpop.f32.mrf.mxu1 }
  0xed   :  { %v1372_v13 = vrot.slane %v8728_v10, 1 }
  0xee   :  { %v9444_v41 = vpop.f32.mrf.mxu0  ;;  %v9446_v59 = vpop.f32.mrf.mxu1 }
  0xef   :  { %13876 = vst [vmem:[#allocation119_spill] sm:$0xff] %v9446_v59  ;;  %v9467_v57 = vsel %vm1364_vm2, %v1370_v32, %v1372_v13 }
  0xf0   :  { %v6848_v1 = vpop.f32.mrf.mxu0  ;;  %v6944_v5 = vpop.f32.mrf.mxu1 }
  0xf2   :  { %v9451_v25 = vpop.f32.mrf.mxu0  ;;  %v9453_v53 = vpop.f32.mrf.mxu1  ;;  %7058 = vmatmul.mubr.bf16.gmra.mxu1 %v9047_v7  ;;  %7194 = vmatmul.mubr.bf16.gmra.mxu0 %v9449_v36 }
  0xf3   :  { %13877 = vst [vmem:[#allocation120_spill] sm:$0xff] %v9453_v53  ;;  %7061 = vmatprep.mubr.msk.bf16.mxu1 %vm8507_vm0, %v13811_v3  ;;  %7197 = vmatprep.mubr.msk.bf16.mxu0 %vm8507_vm0, %v13811_v3 }
  0xf4   :  { %v6851_v15 = vpop.f32.mrf.mxu0  ;;  %v6947_v18 = vpop.f32.mrf.mxu1 }
  0xf5   :  { %v1374_v15 = vrot.slane %v8774_v40, 1 }
  0xf6   :  { %v9462_v1 = vpop.f32.mrf.mxu0  ;;  %v9464_v5 = vpop.f32.mrf.mxu1 }
  0xf7   :  { %13878 = vst [vmem:[#allocation121_spill] sm:$0xff] %v9464_v5  ;;  %v9485_v10 = vsel %vm1364_vm2, %v1372_v13, %v1374_v15 }
  0xf8   :  { %v6852_v53 = vpop.f32.mrf.mxu0  ;;  %v6948_v59 = vpop.f32.mrf.mxu1  ;;  %13881 = vst [vmem:[#allocation124_spill] sm:$0xff] %v9485_v10 }
  0xfa   :  { %v9469_v22 = vpop.f32.mrf.mxu0  ;;  %v9471_v48 = vpop.f32.mrf.mxu1  ;;  %7062 = vmatmul.mubr.bf16.gmra.mxu1 %v9092_v33  ;;  %7198 = vmatmul.mubr.bf16.gmra.mxu0 %v9467_v57 }
  0xfb   :  { %13879 = vst [vmem:[#allocation122_spill] sm:$0xff] %v9471_v48  ;;  %7065 = vmatprep.mubr.msk.bf16.mxu1 %vm8507_vm0, %v13811_v3  ;;  %7201 = vmatprep.mubr.msk.bf16.mxu0 %vm8507_vm0, %v13811_v3 }
  0xfc   :  { %v6855_v32 = vpop.f32.mrf.mxu0  ;;  %v6951_v18 = vpop.f32.mrf.mxu1 }
  0xfd   :  { %v1376_v32 = vrot.slane %v8820_v4, 1 }
  0xfe   :  { %v9480_v53 = vpop.f32.mrf.mxu0  ;;  %v9482_v59 = vpop.f32.mrf.mxu1 }
  0xff   :  { %13880 = vst [vmem:[#allocation123_spill] sm:$0xff] %v9482_v59  ;;  %v8456_v59 = vld [vmem:[%s13492_s1 + $0x138] sm:$0xff]  }
 0x100   :  { %v6856_v48 = vpop.f32.mrf.mxu0  ;;  %v6952_v5 = vpop.f32.mrf.mxu1  ;;  %7514 = vmatpush3.bf16.msra.mxu0 %v8456_v59 }
 0x101   :  { %v8455_v48 = vld [vmem:[%s13492_s1 + $0xf8] sm:$0xff]   ;;  %7515 = vmatprep.subr.bf16.mxu0 %v13811_v3 }
 0x102   :  { %v9487_v52 = vpop.f32.mrf.mxu0  ;;  %v9489_v19 = vpop.f32.mrf.mxu1  ;;  %7066 = vmatmul.mubr.bf16.gmra.mxu1 %v9123_v0  ;;  %7202 = vmatmul.mubr.bf16.gmra.mxu0 %v9485_v10 }
 0x103   :  { %13882 = vst [vmem:[#allocation125_spill] sm:$0xff] %v9489_v19  ;;  %7069 = vmatprep.mubr.msk.bf16.mxu1 %vm8507_vm0, %v13811_v3  ;;  %7205 = vmatprep.mubr.msk.bf16.mxu0 %vm8507_vm0, %v13811_v3  ;;  %v9506_v19 = vsel %vm1364_vm2, %v1374_v15, %v1376_v32  ;;  %v1378_v15 = vrot.slane %v8867_v42, 1 }
 0x104   :  { %v6859_v13 = vpop.f32.mrf.mxu0  ;;  %v6955_v18 = vpop.f32.mrf.mxu1  ;;  %7342 = vmatpush3.bf16.msra.mxu1 %v8455_v48  ;;  %13884 = vst [vmem:[#allocation127_spill] sm:$0xff] %v9506_v19 }
 0x105   :  { %7343 = vmatprep.subr.bf16.mxu1 %v13811_v3 }
 0x106   :  { %v9501_v5 = vpop.f32.mrf.mxu0  ;;  %v9503_v40 = vpop.f32.mrf.mxu1 }
 0x107   :  { %13883 = vst [vmem:[#allocation126_spill] sm:$0xff] %v9503_v40 }
 0x108   :  { %v6860_v13 = vpop.f32.mrf.mxu0  ;;  %v6956_v18 = vpop.f32.mrf.mxu1 }
 0x10a   :  { %v9512_v4 = vpop.f32.mrf.mxu0  ;;  %v9514_v26 = vpop.f32.mrf.mxu1  ;;  %7070 = vmatmul.mubr.bf16.gmra.mxu1 %v9161_v6  ;;  %7206 = vmatmul.mubr.bf16.gmra.mxu0 %v9506_v19 }
 0x10b   :  { %13885 = vst [vmem:[#allocation128_spill] sm:$0xff] %v9514_v26  ;;  %7073 = vmatprep.mubr.msk.bf16.mxu1 %vm8507_vm0, %v13811_v3  ;;  %7209 = vmatprep.mubr.msk.bf16.mxu0 %vm8507_vm0, %v13811_v3  ;;  %v9529_v26 = vsel %vm1364_vm2, %v1376_v32, %v1378_v15 }
 0x10c   :  { %v6863_v48 = vpop.f32.mrf.mxu0  ;;  %v6959_v13 = vpop.f32.mrf.mxu1  ;;  %13887 = vst [vmem:[#allocation130_spill] sm:$0xff] %v9529_v26 }
 0x10d   :  { %v1380_v48 = vrot.slane %v8886_v56, 1 }
 0x10e   :  { %v9524_v59 = vpop.f32.mrf.mxu0  ;;  %v9526_v18 = vpop.f32.mrf.mxu1 }
 0x10f   :  { %13886 = vst [vmem:[#allocation129_spill] sm:$0xff] %v9526_v18  ;;  %v9547_v42 = vsel %vm1364_vm2, %v1378_v15, %v1380_v48 }
 0x110   :  { %v6864_v40 = vpop.f32.mrf.mxu0  ;;  %v6960_v51 = vpop.f32.mrf.mxu1  ;;  %13890 = vst [vmem:[#allocation133_spill] sm:$0xff] %v9547_v42 }
 0x112   :  { %v9531_v63 = vpop.f32.mrf.mxu0  ;;  %v9533_v23 = vpop.f32.mrf.mxu1  ;;  %7074 = vmatmul.mubr.bf16.gmra.mxu1 %v9200_v62  ;;  %7210 = vmatmul.mubr.bf16.gmra.mxu0 %v9529_v26 }
 0x113   :  { %13888 = vst [vmem:[#allocation131_spill] sm:$0xff] %v9533_v23  ;;  %7077 = vmatprep.mubr.msk.bf16.mxu1 %vm8507_vm0, %v13811_v3  ;;  %7213 = vmatprep.mubr.msk.bf16.mxu0 %vm8507_vm0, %v13811_v3 }
 0x114   :  { %v6867_v32 = vpop.f32.mrf.mxu0  ;;  %v6963_v13 = vpop.f32.mrf.mxu1 }
 0x115   :  { %v1382_v32 = vrot.slane %v8945_v21, 1 }
 0x116   :  { %v9542_v40 = vpop.f32.mrf.mxu0  ;;  %v9544_v51 = vpop.f32.mrf.mxu1 }
 0x117   :  { %13889 = vst [vmem:[#allocation132_spill] sm:$0xff] %v9544_v51  ;;  %v9565_v56 = vsel %vm1364_vm2, %v1380_v48, %v1382_v32 }
 0x118   :  { %v6868_v23 = vpop.f32.mrf.mxu0  ;;  %v6964_v18 = vpop.f32.mrf.mxu1  ;;  %13893 = vst [vmem:[#allocation136_spill] sm:$0xff] %v9565_v56 }
 0x11a   :  { %v9549_v20 = vpop.f32.mrf.mxu0  ;;  %v9551_v16 = vpop.f32.mrf.mxu1  ;;  %7078 = vmatmul.mubr.bf16.gmra.mxu1 %v9225_v27  ;;  %7214 = vmatmul.mubr.bf16.gmra.mxu0 %v9547_v42  ;;  %v8459_v42 = vld [vmem:[%s13492_s1 + $0xe8] sm:$0xff]  }
 0x11b   :  { %13891 = vst [vmem:[#allocation134_spill] sm:$0xff] %v9551_v16  ;;  %7081 = vmatprep.mubr.msk.bf16.mxu1 %vm8507_vm0, %v13811_v3  ;;  %7217 = vmatprep.mubr.msk.bf16.mxu0 %vm8507_vm0, %v13811_v3 }
 0x11c   :  { %v6871_v15 = vpop.f32.mrf.mxu0  ;;  %v6967_v13 = vpop.f32.mrf.mxu1 }
 0x11d   :  { %v1384_v15 = vrot.slane %v8994_v11, 1 }
 0x11e   :  { %v9560_v23 = vpop.f32.mrf.mxu0  ;;  %v9562_v18 = vpop.f32.mrf.mxu1 }
 0x11f   :  { %13892 = vst [vmem:[#allocation135_spill] sm:$0xff] %v9562_v18  ;;  %v9583_v21 = vsel %vm1364_vm2, %v1382_v32, %v1384_v15 }
 0x120   :  { %v6872_v16 = vpop.f32.mrf.mxu0  ;;  %v6968_v51 = vpop.f32.mrf.mxu1  ;;  %13896 = vst [vmem:[#allocation139_spill] sm:$0xff] %v9583_v21 }
 0x122   :  { %v9567_v43 = vpop.f32.mrf.mxu0  ;;  %v9569_v61 = vpop.f32.mrf.mxu1  ;;  %7082 = vmatmul.mubr.bf16.gmra.mxu1 %v9247_v12  ;;  %7218 = vmatmul.mubr.bf16.gmra.mxu0 %v9565_v56 }
 0x123   :  { %13894 = vst [vmem:[#allocation137_spill] sm:$0xff] %v9569_v61  ;;  %7085 = vmatprep.mubr.msk.bf16.mxu1 %vm8507_vm0, %v13811_v3  ;;  %7221 = vmatprep.mubr.msk.bf16.mxu0 %vm8507_vm0, %v13811_v3 }
 0x124   :  { %v6875_v48 = vpop.f32.mrf.mxu0  ;;  %v6971_v13 = vpop.f32.mrf.mxu1 }
 0x125   :  { %v1386_v48 = vrot.slane %v9047_v7, 1 }
 0x126   :  { %v9578_v16 = vpop.f32.mrf.mxu0  ;;  %v9580_v51 = vpop.f32.mrf.mxu1 }
 0x127   :  { %13895 = vst [vmem:[#allocation138_spill] sm:$0xff] %v9580_v51  ;;  %v8458_v51 = vld [vmem:[%s13492_s1 + $0x130] sm:$0xff]  }
 0x128   :  { %v6876_v61 = vpop.f32.mrf.mxu0  ;;  %v6972_v18 = vpop.f32.mrf.mxu1  ;;  %7516 = vmatpush3.bf16.msra.mxu0 %v8458_v51 }
 0x129   :  { %v8457_v61 = vld [vmem:[%s13492_s1 + $0xf0] sm:$0xff]   ;;  %7517 = vmatprep.subr.bf16.mxu0 %v13811_v3 }
 0x12a   :  { %v9585_v56 = vpop.f32.mrf.mxu0  ;;  %v9587_v60 = vpop.f32.mrf.mxu1  ;;  %7086 = vmatmul.mubr.bf16.gmra.mxu1 %v9269_v38  ;;  %7222 = vmatmul.mubr.bf16.gmra.mxu0 %v9583_v21 }
 0x12b   :  { %13897 = vst [vmem:[#allocation140_spill] sm:$0xff] %v9585_v56  ;;  %13898 = vst [vmem:[#allocation141_spill] sm:$0xff] %v9587_v60  ;;  %7089 = vmatprep.mubr.msk.bf16.mxu1 %vm8507_vm0, %v13811_v3  ;;  %7225 = vmatprep.mubr.msk.bf16.mxu0 %vm8507_vm0, %v13811_v3  ;;  %v9604_v60 = vsel %vm1364_vm2, %v1384_v15, %v1386_v48  ;;  %v1388_v15 = vrot.slane %v9092_v33, 1 }
 0x12c   :  { %v6879_v32 = vpop.f32.mrf.mxu0  ;;  %v6975_v13 = vpop.f32.mrf.mxu1  ;;  %7344 = vmatpush3.bf16.msra.mxu1 %v8457_v61  ;;  %13901 = vst [vmem:[#allocation144_spill] sm:$0xff] %v9604_v60 }
 0x12d   :  { %7345 = vmatprep.subr.bf16.mxu1 %v13811_v3 }
 0x12e   :  { %v9599_v18 = vpop.f32.mrf.mxu0  ;;  %v9601_v11 = vpop.f32.mrf.mxu1 }
 0x12f   :  { %13899 = vst [vmem:[#allocation142_spill] sm:$0xff] %v9599_v18  ;;  %13900 = vst [vmem:[#allocation143_spill] sm:$0xff] %v9601_v11 }
 0x130   :  { %v6880_v32 = vpop.f32.mrf.mxu0  ;;  %v6976_v13 = vpop.f32.mrf.mxu1  ;;  %7346 = vmatpush3.bf16.msra.mxu1 %v8459_v42  ;;  %v8461_v42 = vld [vmem:[%s13492_s1 + $0xd8] sm:$0xff]  }
 0x131   :  { %7347 = vmatprep.subr.bf16.mxu1 %v13811_v3 }
 0x132   :  { %v9610_v7 = vpop.f32.mrf.mxu0  ;;  %v9612_v21 = vpop.f32.mrf.mxu1  ;;  %7090 = vmatmul.mubr.bf16.gmra.mxu1 %v9291_v54  ;;  %7226 = vmatmul.mubr.bf16.gmra.mxu0 %v9604_v60 }
 0x133   :  { %13902 = vst [vmem:[#allocation145_spill] sm:$0xff] %v9610_v7  ;;  %13903 = vst [vmem:[#allocation146_spill] sm:$0xff] %v9612_v21  ;;  %7093 = vmatprep.mubr.msk.bf16.mxu1 %vm8507_vm0, %v13811_v3  ;;  %7229 = vmatprep.mubr.msk.bf16.mxu0 %vm8507_vm0, %v13811_v3  ;;  %v9627_v21 = vsel %vm1364_vm2, %v1386_v48, %v1388_v15 }
 0x134   :  { %v6883_v61 = vpop.f32.mrf.mxu0  ;;  %v6979_v32 = vpop.f32.mrf.mxu1  ;;  %13906 = vst [vmem:[#allocation149_spill] sm:$0xff] %v9627_v21 }
 0x135   :  { %v8460_v61 = vld [vmem:[%s13492_s1 + $0xe0] sm:$0xff]  }
 0x136   :  { %v9622_v51 = vpop.f32.mrf.mxu0  ;;  %v9624_v13 = vpop.f32.mrf.mxu1  ;;  %7348 = vmatpush3.bf16.msra.mxu1 %v8460_v61  ;;  %v8462_v61 = vld [vmem:[%s13492_s1 + $0xd0] sm:$0xff]  }
 0x137   :  { %13904 = vst [vmem:[#allocation147_spill] sm:$0xff] %v9622_v51  ;;  %13905 = vst [vmem:[#allocation148_spill] sm:$0xff] %v9624_v13  ;;  %7349 = vmatprep.subr.bf16.mxu1 %v13811_v3 }
 0x138   :  { %v6884_v11 = vpop.f32.mrf.mxu0  ;;  %v6980_v60 = vpop.f32.mrf.mxu1 }
 0x139   :  { %v1390_v60 = vrot.slane %v9123_v0, 1 }
 0x13a   :  { %v9632_v26 = vpop.f32.mrf.mxu0  ;;  %v9634_v33 = vpop.f32.mrf.mxu1  ;;  %7094 = vmatmul.mubr.bf16.gmra.mxu1 %v9313_v34  ;;  %7230 = vmatmul.mubr.bf16.gmra.mxu0 %v9627_v21 }
 0x13b   :  { %13907 = vst [vmem:[#allocation150_spill] sm:$0xff] %v9632_v26  ;;  %13908 = vst [vmem:[#allocation151_spill] sm:$0xff] %v9634_v33  ;;  %7097 = vmatprep.mubr.msk.bf16.mxu1 %vm8507_vm0, %v13811_v3  ;;  %7233 = vmatprep.mubr.msk.bf16.mxu0 %vm8507_vm0, %v13811_v3  ;;  %v9652_v13 = vsel %vm1364_vm2, %v1388_v15, %v1390_v60 }
 0x13c   :  { %v6887_v11 = vpop.f32.mrf.mxu0  ;;  %v6983_v48 = vpop.f32.mrf.mxu1  ;;  %13911 = vst [vmem:[#allocation154_spill] sm:$0xff] %v9652_v13  ;;  %7350 = vmatpush3.bf16.msra.mxu1 %v8461_v42  ;;  %v8463_v42 = vld [vmem:[%s13492_s1 + $0xc8] sm:$0xff]  }
 0x13d   :  { %7351 = vmatprep.subr.bf16.mxu1 %v13811_v3 }
 0x13e   :  { %v9647_v32 = vpop.f32.mrf.mxu0  ;;  %v9649_v33 = vpop.f32.mrf.mxu1 }
 0x13f   :  { %13909 = vst [vmem:[#allocation152_spill] sm:$0xff] %v9647_v32  ;;  %13910 = vst [vmem:[#allocation153_spill] sm:$0xff] %v9649_v33 }
 0x140   :  { %v6888_v21 = vpop.f32.mrf.mxu0  ;;  %v6984_v26 = vpop.f32.mrf.mxu1  ;;  %7352 = vmatpush3.bf16.msra.mxu1 %v8462_v61  ;;  %v8464_v61 = vld [vmem:[%s13492_s1 + $0xc0] sm:$0xff]  }
 0x141   :  { %v1392_v21 = vrot.slane %v9161_v6, 1  ;;  %7353 = vmatprep.subr.bf16.mxu1 %v13811_v3 }
 0x142   :  { %v9658_v11 = vpop.f32.mrf.mxu0  ;;  %v9660_v48 = vpop.f32.mrf.mxu1  ;;  %7098 = vmatmul.mubr.bf16.gmra.mxu1 %v9335_v35  ;;  %7234 = vmatmul.mubr.bf16.gmra.mxu0 %v9652_v13 }
 0x143   :  { %13912 = vst [vmem:[#allocation155_spill] sm:$0xff] %v9658_v11  ;;  %13913 = vst [vmem:[#allocation156_spill] sm:$0xff] %v9660_v48  ;;  %7101 = vmatprep.mubr.msk.bf16.mxu1 %vm8507_vm0, %v13811_v3  ;;  %7237 = vmatprep.mubr.msk.bf16.mxu0 %vm8507_vm0, %v13811_v3  ;;  %v9678_v33 = vsel %vm1364_vm2, %v1390_v60, %v1392_v21 }
 0x144   :  { %v6891_v26 = vpop.f32.mrf.mxu0  ;;  %v6987_v15 = vpop.f32.mrf.mxu1  ;;  %13916 = vst [vmem:[#allocation159_spill] sm:$0xff] %v9678_v33  ;;  %7354 = vmatpush3.bf16.msra.mxu1 %v8463_v42 }
 0x145   :  { %7355 = vmatprep.subr.bf16.mxu1 %v13811_v3 }
 0x146   :  { %v9673_v0 = vpop.f32.mrf.mxu0  ;;  %v9675_v48 = vpop.f32.mrf.mxu1 }
 0x147   :  { %13914 = vst [vmem:[#allocation157_spill] sm:$0xff] %v9673_v0  ;;  %13915 = vst [vmem:[#allocation158_spill] sm:$0xff] %v9675_v48 }
 0x148   :  { %v6892_v13 = vpop.f32.mrf.mxu0  ;;  %v6988_v11 = vpop.f32.mrf.mxu1  ;;  %7356 = vmatpush3.bf16.msra.mxu1 %v8464_v61 }
 0x149   :  { %v1394_v13 = vrot.slane %v9200_v62, 1  ;;  %7685 = vmatprep.subr.bf16.mxu1 %v13811_v3 }
 0x14a   :  { %v9684_v26 = vpop.f32.mrf.mxu0  ;;  %v9686_v15 = vpop.f32.mrf.mxu1  ;;  %7102 = vmatmul.mubr.bf16.gmra.mxu1 %v9357_v31  ;;  %7238 = vmatmul.mubr.bf16.gmra.mxu0 %v9678_v33 }
 0x14b   :  { %13917 = vst [vmem:[#allocation160_spill] sm:$0xff] %v9684_v26  ;;  %13918 = vst [vmem:[#allocation161_spill] sm:$0xff] %v9686_v15  ;;  %7105 = vmatprep.mubr.msk.bf16.mxu1 %vm8507_vm0, %v13811_v3  ;;  %7241 = vmatprep.mubr.msk.bf16.mxu0 %vm8507_vm0, %v13811_v3  ;;  %v9704_v48 = vsel %vm1364_vm2, %v1392_v21, %v1394_v13 }
 0x14c   :  { %v6895_v60 = vpop.f32.mrf.mxu0  ;;  %v6991_v11 = vpop.f32.mrf.mxu1  ;;  %13921 = vst [vmem:[#allocation164_spill] sm:$0xff] %v9704_v48 }
 0x14d   :  { %v8465_v11 = vld [vmem:[%s13492_s1 + $0x128] sm:$0xff]  }
 0x14e   :  { %v9699_v6 = vpop.f32.mrf.mxu0  ;;  %v9701_v15 = vpop.f32.mrf.mxu1  ;;  %7518 = vmatpush3.bf16.msra.mxu0 %v8465_v11 }
 0x14f   :  { %13919 = vst [vmem:[#allocation162_spill] sm:$0xff] %v9699_v6  ;;  %13920 = vst [vmem:[#allocation163_spill] sm:$0xff] %v9701_v15  ;;  %7519 = vmatprep.subr.bf16.mxu0 %v13811_v3 }
 0x150   :  { %v6896_v33 = vpop.f32.mrf.mxu0  ;;  %v6992_v26 = vpop.f32.mrf.mxu1 }
 0x151   :  { %v1396_v33 = vrot.slane %v9225_v27, 1 }
 0x152   :  { %v9707_v60 = vpop.f32.mrf.mxu0  ;;  %v9709_v42 = vpop.f32.mrf.mxu1  ;;  %7106 = vmatmul.mubr.bf16.gmra.mxu1 %v9379_v28  ;;  %7242 = vmatmul.mubr.bf16.gmra.mxu0 %v9704_v48 }
 0x153   :  { %13922 = vst [vmem:[#allocation165_spill] sm:$0xff] %v9707_v60  ;;  %13923 = vst [vmem:[#allocation166_spill] sm:$0xff] %v9709_v42  ;;  %7109 = vmatprep.mubr.msk.bf16.mxu1 %vm8507_vm0, %v13811_v3  ;;  %7245 = vmatprep.mubr.msk.bf16.mxu0 %vm8507_vm0, %v13811_v3  ;;  %v9724_v42 = vsel %vm1364_vm2, %v1394_v13, %v1396_v33 }
 0x154   :  { %v6899_v21 = vpop.f32.mrf.mxu0  ;;  %v6995_v26 = vpop.f32.mrf.mxu1  ;;  %13925 = vst [vmem:[#allocation168_spill] sm:$0xff] %v9724_v42 }
 0x156   :  { %v9721_v61 = vpop.f32.mrf.mxu0  ;;  %v913_v62 = vpop.f32.mrf.mxu1 }
 0x157   :  { %13924 = vst [vmem:[#allocation167_spill] sm:$0xff] %v9721_v61  ;;  %v1398_v62 = vrot.slane %v9247_v12, 1 }
 0x158   :  { %v6900_v15 = vpop.f32.mrf.mxu0  ;;  %v6996_v48 = vpop.f32.mrf.mxu1 }
 0x159   :  { %v9743_v26 = vsel %vm1364_vm2, %v1396_v33, %v1398_v62 }
 0x15a   :  { %v9727_v60 = vpop.f32.mrf.mxu0  ;;  %v9729_v27 = vpop.f32.mrf.mxu1  ;;  %7110 = vmatmul.mubr.bf16.gmra.mxu1 %v8587_v17  ;;  %7246 = vmatmul.mubr.bf16.gmra.mxu0 %v9724_v42  ;;  %13928 = vst [vmem:[#allocation171_spill] sm:$0xff] %v9743_v26 }
 0x15b   :  { %13926 = vst [vmem:[#allocation169_spill] sm:$0xff] %v9727_v60  ;;  %7113 = vmatprep.mubr.msk.bf16.mxu1 %vm8507_vm0, %v13811_v3  ;;  %7249 = vmatprep.mubr.msk.bf16.mxu0 %vm8507_vm0, %v13811_v3 }
 0x15c   :  { %v6903_v13 = vpop.f32.mrf.mxu0  ;;  %v7015_v21 = vpop.f32.mrf.mxu1 }
 0x15d   :  { %v1400_v13 = vrot.slane %v9269_v38, 1 }
 0x15e   :  { %v9738_v15 = vpop.f32.mrf.mxu0  ;;  %v9740_v48 = vpop.f32.mrf.mxu1 }
 0x15f   :  { %13927 = vst [vmem:[#allocation170_spill] sm:$0xff] %v9738_v15  ;;  %v9761_v12 = vsel %vm1364_vm2, %v1398_v62, %v1400_v13 }
 0x160   :  { %v6904_v11 = vpop.f32.mrf.mxu0  ;;  %v7016_v60 = vpop.f32.mrf.mxu1  ;;  %13931 = vst [vmem:[#allocation174_spill] sm:$0xff] %v9761_v12 }
 0x162   :  { %v9745_v42 = vpop.f32.mrf.mxu0  ;;  %v9747_v61 = vpop.f32.mrf.mxu1  ;;  %7114 = vmatmul.mubr.bf16.gmra.mxu1 %v8607_v24  ;;  %7250 = vmatmul.mubr.bf16.gmra.mxu0 %v9743_v26 }
 0x163   :  { %13929 = vst [vmem:[#allocation172_spill] sm:$0xff] %v9745_v42  ;;  %7117 = vmatprep.mubr.msk.bf16.mxu1 %vm8507_vm0, %v13811_v3  ;;  %7253 = vmatprep.mubr.msk.bf16.mxu0 %vm8507_vm0, %v13811_v3 }
 0x164   :  { %v6907_v33 = vpop.f32.mrf.mxu0  ;;  %v7019_v21 = vpop.f32.mrf.mxu1 }
 0x165   :  { %v1402_v33 = vrot.slane %v9291_v54, 1 }
 0x166   :  { %v9756_v11 = vpop.f32.mrf.mxu0  ;;  %v9758_v60 = vpop.f32.mrf.mxu1 }
 0x167   :  { %13930 = vst [vmem:[#allocation173_spill] sm:$0xff] %v9756_v11  ;;  %v9779_v38 = vsel %vm1364_vm2, %v1400_v13, %v1402_v33 }
 0x168   :  { %v6908_v42 = vpop.f32.mrf.mxu0  ;;  %v7020_v15 = vpop.f32.mrf.mxu1  ;;  %13934 = vst [vmem:[#allocation177_spill] sm:$0xff] %v9779_v38 }
 0x16a   :  { %v9763_v26 = vpop.f32.mrf.mxu0  ;;  %v9765_v6 = vpop.f32.mrf.mxu1  ;;  %7118 = vmatmul.mubr.bf16.gmra.mxu1 %v8641_v37  ;;  %7254 = vmatmul.mubr.bf16.gmra.mxu0 %v9761_v12 }
 0x16b   :  { %13932 = vst [vmem:[#allocation175_spill] sm:$0xff] %v9763_v26  ;;  %7121 = vmatprep.mubr.msk.bf16.mxu1 %vm8507_vm0, %v13811_v3  ;;  %7257 = vmatprep.mubr.msk.bf16.mxu0 %vm8507_vm0, %v13811_v3 }
 0x16c   :  { %v6911_v62 = vpop.f32.mrf.mxu0  ;;  %v7023_v21 = vpop.f32.mrf.mxu1 }
 0x16d   :  { %v1404_v62 = vrot.slane %v9313_v34, 1 }
 0x16e   :  { %v9774_v42 = vpop.f32.mrf.mxu0  ;;  %v9776_v15 = vpop.f32.mrf.mxu1 }
 0x16f   :  { %13933 = vst [vmem:[#allocation176_spill] sm:$0xff] %v9774_v42  ;;  %v9797_v54 = vsel %vm1364_vm2, %v1402_v33, %v1404_v62 }
 0x170   :  { %v6912_v26 = vpop.f32.mrf.mxu0  ;;  %v7024_v11 = vpop.f32.mrf.mxu1  ;;  %13937 = vst [vmem:[#allocation180_spill] sm:$0xff] %v9797_v54 }
 0x172   :  { %v9781_v12 = vpop.f32.mrf.mxu0  ;;  %v9783_v0 = vpop.f32.mrf.mxu1  ;;  %7122 = vmatmul.mubr.bf16.gmra.mxu1 %v8691_v58  ;;  %7258 = vmatmul.mubr.bf16.gmra.mxu0 %v9779_v38 }
 0x173   :  { %13935 = vst [vmem:[#allocation178_spill] sm:$0xff] %v9781_v12  ;;  %7125 = vmatprep.mubr.msk.bf16.mxu1 %vm8507_vm0, %v13811_v3  ;;  %7261 = vmatprep.mubr.msk.bf16.mxu0 %vm8507_vm0, %v13811_v3 }
 0x174   :  { %v6915_v13 = vpop.f32.mrf.mxu0  ;;  %v7027_v21 = vpop.f32.mrf.mxu1 }
 0x175   :  { %v1406_v13 = vrot.slane %v9335_v35, 1 }
 0x176   :  { %v9792_v26 = vpop.f32.mrf.mxu0  ;;  %v9794_v11 = vpop.f32.mrf.mxu1 }
 0x177   :  { %13936 = vst [vmem:[#allocation179_spill] sm:$0xff] %v9792_v26 }
 0x178   :  { %v6916_v12 = vpop.f32.mrf.mxu0  ;;  %v7028_v42 = vpop.f32.mrf.mxu1 }
 0x179   :  { %v8466_v12 = vld [vmem:[%s13492_s1 + $0x120] sm:$0xff]  }
 0x17a   :  { %v9799_v38 = vpop.f32.mrf.mxu0  ;;  %v9801_v32 = vpop.f32.mrf.mxu1  ;;  %7126 = vmatmul.mubr.bf16.gmra.mxu1 %v8737_v14  ;;  %7262 = vmatmul.mubr.bf16.gmra.mxu0 %v9797_v54  ;;  %v9818_v54 = vsel %vm1364_vm2, %v1404_v62, %v1406_v13  ;;  %v1408_v62 = vrot.slane %v9357_v31, 1 }
 0x17b   :  { %13938 = vst [vmem:[#allocation181_spill] sm:$0xff] %v9799_v38  ;;  %7129 = vmatprep.mubr.msk.bf16.mxu1 %vm8507_vm0, %v13811_v3  ;;  %7265 = vmatprep.mubr.msk.bf16.mxu0 %vm8507_vm0, %v13811_v3  ;;  %13940 = vst [vmem:[#allocation183_spill] sm:$0xff] %v9818_v54 }
 0x17c   :  { %v6919_v33 = vpop.f32.mrf.mxu0  ;;  %v7031_v21 = vpop.f32.mrf.mxu1  ;;  %7520 = vmatpush3.bf16.msra.mxu0 %v8466_v12  ;;  %v9837_v35 = vsel %vm1364_vm2, %v1406_v13, %v1408_v62 }
 0x17d   :  { %7521 = vmatprep.subr.bf16.mxu0 %v13811_v3  ;;  %13943 = vst [vmem:[#allocation186_spill] sm:$0xff] %v9837_v35 }
 0x17e   :  { %v9813_v42 = vpop.f32.mrf.mxu0  ;;  %v9815_v34 = vpop.f32.mrf.mxu1 }
 0x17f   :  { %13939 = vst [vmem:[#allocation182_spill] sm:$0xff] %v9813_v42 }
 0x180   :  { %v6920_v38 = vpop.f32.mrf.mxu0  ;;  %v7032_v26 = vpop.f32.mrf.mxu1 }
 0x182   :  { %v9821_v51 = vpop.f32.mrf.mxu0  ;;  %v9823_v33 = vpop.f32.mrf.mxu1  ;;  %7130 = vmatmul.mubr.bf16.gmra.mxu1 %v8783_v45  ;;  %7266 = vmatmul.mubr.bf16.gmra.mxu0 %v9818_v54  ;;  %v8467_v54 = vld [vmem:[%s13492_s1 + $0x118] sm:$0xff]  }
 0x183   :  { %13941 = vst [vmem:[#allocation184_spill] sm:$0xff] %v9821_v51  ;;  %7133 = vmatprep.mubr.msk.bf16.mxu1 %vm8507_vm0, %v13811_v3  ;;  %7269 = vmatprep.mubr.msk.bf16.mxu0 %vm8507_vm0, %v13811_v3 }
 0x184   :  { %v6923_v21 = vpop.f32.mrf.mxu0  ;;  %v7035_v12 = vpop.f32.mrf.mxu1  ;;  %7522 = vmatpush3.bf16.msra.mxu0 %v8467_v54  ;;  %v8469_v54 = vld [vmem:[%s13492_s1 + $0x108] sm:$0xff]  }
 0x185   :  { %7523 = vmatprep.subr.bf16.mxu0 %v13811_v3  ;;  %v8468_v21 = vld [vmem:[%s13492_s1 + $0x110] sm:$0xff]  }
 0x186   :  { %v9832_v38 = vpop.f32.mrf.mxu0  ;;  %v9834_v26 = vpop.f32.mrf.mxu1 }
 0x187   :  { %13942 = vst [vmem:[#allocation185_spill] sm:$0xff] %v9832_v38 }
 0x188   :  { %v6924_v51 = vpop.f32.mrf.mxu0  ;;  %v7036_v42 = vpop.f32.mrf.mxu1  ;;  %7524 = vmatpush3.bf16.msra.mxu0 %v8468_v21  ;;  %v8470_v21 = vld [vmem:[%s13492_s1 + $0x100] sm:$0xff]  }
 0x189   :  { %v1410_v51 = vrot.slane %v9379_v28, 1  ;;  %7525 = vmatprep.subr.bf16.mxu0 %v13811_v3 }
 0x18a   :  { %v9842_v19 = vpop.f32.mrf.mxu0  ;;  %v9844_v7 = vpop.f32.mrf.mxu1  ;;  %7134 = vmatmul.mubr.bf16.gmra.mxu1 %v8829_v9  ;;  %7270 = vmatmul.mubr.bf16.gmra.mxu0 %v9837_v35 }
 0x18b   :  { %13944 = vst [vmem:[#allocation187_spill] sm:$0xff] %v9842_v19  ;;  %7137 = vmatprep.mubr.msk.bf16.mxu1 %vm8507_vm0, %v13811_v3  ;;  %7273 = vmatprep.mubr.msk.bf16.mxu0 %vm8507_vm0, %v13811_v3  ;;  %v9862_v35 = vsel %vm1364_vm2, %v1408_v62, %v1410_v51 }
 0x18c   :  { %v6927_v13 = vpop.f32.mrf.mxu0  ;;  %v7039_v42 = vpop.f32.mrf.mxu1  ;;  %13946 = vst [vmem:[#allocation189_spill] sm:$0xff] %v9862_v35  ;;  %7526 = vmatpush3.bf16.msra.mxu0 %v8469_v54 }
 0x18d   :  { %7527 = vmatprep.subr.bf16.mxu0 %v13811_v3 }
 0x18e   :  { %v9857_v12 = vpop.f32.mrf.mxu0  ;;  %v9859_v31 = vpop.f32.mrf.mxu1 }
 0x18f   :  { %13945 = vst [vmem:[#allocation188_spill] sm:$0xff] %v9857_v12 }
 0x190   :  { %v6928_v19 = vpop.f32.mrf.mxu0  ;;  %v7040_v38 = vpop.f32.mrf.mxu1  ;;  %7528 = vmatpush3.bf16.msra.mxu0 %v8470_v21 }
 0x191   :  { %v1412_v19 = vrot.slane %v8587_v17, 1  ;;  %7857 = vmatprep.subr.bf16.mxu0 %v13811_v3 }
 0x192   :  { %v9868_v13 = vpop.f32.mrf.mxu0  ;;  %v9870_v42 = vpop.f32.mrf.mxu1  ;;  %7138 = vmatmul.mubr.bf16.gmra.mxu1 %v8869_v44  ;;  %7274 = vmatmul.mubr.bf16.gmra.mxu0 %v9862_v35 }
 0x193   :  { %13947 = vst [vmem:[#allocation190_spill] sm:$0xff] %v9868_v13  ;;  %7141 = vmatprep.mubr.msk.bf16.mxu1 %vm8507_vm0, %v13811_v3  ;;  %7277 = vmatprep.mubr.msk.bf16.mxu0 %vm8507_vm0, %v13811_v3  ;;  %v9888_v13 = vsel %vm1364_vm2, %v1410_v51, %v1412_v19  ;;  %v1414_v51 = vrot.slane %v8607_v24, 1 }
 0x194   :  { %v6931_v62 = vpop.f32.mrf.mxu0  ;;  %v7043_v38 = vpop.f32.mrf.mxu1  ;;  %13949 = vst [vmem:[#allocation192_spill] sm:$0xff] %v9888_v13 }
 0x195   :  { %v9907_v17 = vsel %vm1364_vm2, %v1412_v19, %v1414_v51 }
 0x196   :  { %v9883_v28 = vpop.f32.mrf.mxu0  ;;  %v9885_v35 = vpop.f32.mrf.mxu1  ;;  %13952 = vst [vmem:[#allocation195_spill] sm:$0xff] %v9907_v17 }
 0x197   :  { %13948 = vst [vmem:[#allocation191_spill] sm:$0xff] %v9883_v28 }
 0x198   :  { %v6932_v12 = vpop.f32.mrf.mxu0  ;;  %v7044_v18 = vpop.f32.mrf.mxu1 }
 0x19a   :  { %v9891_v62 = vpop.f32.mrf.mxu0  ;;  %v9893_v54 = vpop.f32.mrf.mxu1  ;;  %7142 = vmatmul.mubr.bf16.gmra.mxu1 %v8918_v29  ;;  %7278 = vmatmul.mubr.bf16.gmra.mxu0 %v9888_v13  ;;  %v999_v13 = vadd.f32 %v9729_v27, %v9416_v39  ;;  %v1002_v27 = vadd.f32 %v9740_v48, %v9426_v50  ;;  %v1418_v48 = vrot.slane %v8691_v58, 1 }
 0x19b   :  { %13950 = vst [vmem:[#allocation193_spill] sm:$0xff] %v9891_v62  ;;  %7145 = vmatprep.mubr.msk.bf16.mxu1 %vm8507_vm0, %v13811_v3  ;;  %7281 = vmatprep.mubr.msk.bf16.mxu0 %vm8507_vm0, %v13811_v3 }
 0x19c   :  { %v6935_v18 = vpop.f32.mrf.mxu0  ;;  %v7047_v12 = vpop.f32.mrf.mxu1 }
 0x19e   :  { %v9902_v38 = vpop.f32.mrf.mxu0  ;;  %v9904_v21 = vpop.f32.mrf.mxu1 }
 0x19f   :  { %13951 = vst [vmem:[#allocation194_spill] sm:$0xff] %v9902_v38 }
 0x1a0   :  { %v6936_v62 = vpop.f32.mrf.mxu0  ;;  %v7048_v28 = vpop.f32.mrf.mxu1 }
 0x1a1   :  { %v1416_v28 = vrot.slane %v8641_v37, 1 }
 0x1a2   :  { %v9911_v10 = vpop.f32.mrf.mxu1  ;;  %7146 = vmatmul.mubr.bf16.gmra.mxu1 %v8957_v47  ;;  %v1563_v56 = vpop.f32.mrf.mxu0  ;;  %7282 = vmatmul.mubr.bf16.gmra.mxu0 %v9907_v17  ;;  %v1007_v17 = vadd.f32 %v9747_v61, %v9433_v46  ;;  %v1010_v46 = vadd.f32 %v9758_v60, %v9444_v41  ;;  %v1420_v60 = vrot.slane %v8737_v14, 1 }
 0x1a3   :  { %v9915_v18 = vadd.f32 %v1563_v56, %v999_v13  ;;  %7149 = vmatprep.mubr.msk.bf16.mxu1 %vm8507_vm0, %v13811_v3  ;;  %7285 = vmatprep.mubr.msk.bf16.mxu0 %vm8507_vm0, %v13811_v3  ;;  %v9929_v56 = vsel %vm1364_vm2, %v1414_v51, %v1416_v28 }
 0x1a4   :  { %v7051_v19 = vpop.f32.mrf.mxu1  ;;  %v7187_v62 = vpop.f32.mrf.mxu0 }
 0x1a5   :  { %13953 = vst [vmem:[#allocation196_spill] sm:$0xff] %v9915_v18 }
 0x1a6   :  { %v9924_v39 = vpop.f32.mrf.mxu1  ;;  %v1566_v12 = vpop.f32.mrf.mxu0 }
 0x1a7   :  { %v9926_v24 = vadd.f32 %v1566_v12, %v1002_v27 }
 0x1a8   :  { %v7052_v13 = vpop.f32.mrf.mxu1  ;;  %v7188_v18 = vpop.f32.mrf.mxu0 }
 0x1aa   :  { %v9933_v38 = vpop.f32.mrf.mxu1  ;;  %7150 = vmatmul.mubr.bf16.gmra.mxu1 %v9022_v55  ;;  %v1571_v19 = vpop.f32.mrf.mxu0  ;;  %7286 = vmatmul.mubr.bf16.gmra.mxu0 %v9929_v56 }
 0x1ab   :  { %v9937_v50 = vadd.f32 %v1571_v19, %v1007_v17  ;;  %7153 = vmatprep.mubr.msk.bf16.mxu1 %vm8507_vm0, %v13811_v3  ;;  %7289 = vmatprep.mubr.msk.bf16.mxu0 %vm8507_vm0, %v13811_v3  ;;  %v9951_v17 = vsel %vm1364_vm2, %v1416_v28, %v1418_v48  ;;  %v1015_v19 = vadd.f32 %v9765_v6, %v9451_v25 }
 0x1ac   :  { %v7055_v51 = vpop.f32.mrf.mxu1  ;;  %v7191_v18 = vpop.f32.mrf.mxu0  ;;  %v1018_v25 = vadd.f32 %v9776_v15, %v9462_v1  ;;  %v1422_v15 = vrot.slane %v8783_v45, 1 }
 0x1ae   :  { %v9946_v61 = vpop.f32.mrf.mxu1  ;;  %v1574_v62 = vpop.f32.mrf.mxu0 }
 0x1af   :  { %v9948_v27 = vadd.f32 %v1574_v62, %v1010_v46 }
 0x1b0   :  { %v7056_v12 = vpop.f32.mrf.mxu1  ;;  %v7192_v13 = vpop.f32.mrf.mxu0 }
 0x1b1   :  { %v9973_v12 = vsel %vm1364_vm2, %v1418_v48, %v1420_v60 }
 0x1b2   :  { %v9955_v37 = vpop.f32.mrf.mxu1  ;;  %7154 = vmatmul.mubr.bf16.gmra.mxu1 %v9056_v30  ;;  %v1579_v51 = vpop.f32.mrf.mxu0  ;;  %7290 = vmatmul.mubr.bf16.gmra.mxu0 %v9951_v17 }
 0x1b3   :  { %v9959_v41 = vadd.f32 %v1579_v51, %v1015_v19  ;;  %7157 = vmatprep.mubr.msk.bf16.mxu1 %vm8507_vm0, %v13811_v3  ;;  %7293 = vmatprep.mubr.msk.bf16.mxu0 %vm8507_vm0, %v13811_v3  ;;  %v1023_v51 = vadd.f32 %v9783_v0, %v9469_v22  ;;  %v1026_v22 = vadd.f32 %v9794_v11, %v9480_v53  ;;  %v1424_v11 = vrot.slane %v8829_v9, 1 }
 0x1b4   :  { %v7059_v28 = vpop.f32.mrf.mxu1  ;;  %v7195_v18 = vpop.f32.mrf.mxu0 }
 0x1b6   :  { %v9968_v6 = vpop.f32.mrf.mxu1  ;;  %v1582_v46 = vpop.f32.mrf.mxu0 }
 0x1b7   :  { %v9970_v62 = vadd.f32 %v1582_v46, %v1018_v25 }
 0x1b8   :  { %v7060_v13 = vpop.f32.mrf.mxu1  ;;  %v7196_v19 = vpop.f32.mrf.mxu0 }
 0x1b9   :  { %v9995_v13 = vsel %vm1364_vm2, %v1420_v60, %v1422_v15 }
 0x1ba   :  { %v9977_v58 = vpop.f32.mrf.mxu1  ;;  %7158 = vmatmul.mubr.bf16.gmra.mxu1 %v9094_v49  ;;  %v1587_v28 = vpop.f32.mrf.mxu0  ;;  %7294 = vmatmul.mubr.bf16.gmra.mxu0 %v9973_v12 }
 0x1bb   :  { %v9981_v1 = vadd.f32 %v1587_v28, %v1023_v51  ;;  %7161 = vmatprep.mubr.msk.bf16.mxu1 %vm8507_vm0, %v13811_v3  ;;  %7297 = vmatprep.mubr.msk.bf16.mxu0 %vm8507_vm0, %v13811_v3  ;;  %v1031_v28 = vadd.f32 %v9801_v32, %v9487_v52  ;;  %v1034_v52 = vadd.f32 %v9815_v34, %v9501_v5 }
 0x1bc   :  { %v7063_v48 = vpop.f32.mrf.mxu1  ;;  %v7199_v18 = vpop.f32.mrf.mxu0 }
 0x1be   :  { %v9990_v0 = vpop.f32.mrf.mxu1  ;;  %v1590_v25 = vpop.f32.mrf.mxu0 }
 0x1bf   :  { %v9992_v46 = vadd.f32 %v1590_v25, %v1026_v22  ;;  %v8503_v25 = vld [vmem:[%s13493_s0 + $0x260] sm:$0xff] }
 0x1c0   :  { %v7064_v19 = vpop.f32.mrf.mxu1  ;;  %v7200_v51 = vpop.f32.mrf.mxu0 }
 0x1c1   :  { %v138_v19 = vpack.c.bf16 %v8503_v25, %v8503_v25 }
 0x1c2   :  { %v9999_v14 = vpop.f32.mrf.mxu1  ;;  %7162 = vmatmul.mubr.bf16.gmra.mxu1 %v9132_v2  ;;  %v1595_v48 = vpop.f32.mrf.mxu0  ;;  %7298 = vmatmul.mubr.bf16.gmra.mxu0 %v9995_v13 }
 0x1c3   :  { %v10003_v53 = vadd.f32 %v1595_v48, %v1031_v28  ;;  %7165 = vmatprep.mubr.msk.bf16.mxu1 %vm8507_vm0, %v13811_v3  ;;  %7301 = vmatprep.mubr.msk.bf16.mxu0 %vm8507_vm0, %v13811_v3  ;;  %v10020_v28 = vsel %vm1364_vm2, %v1422_v15, %v1424_v11  ;;  %v1426_v15 = vrot.slane %v8869_v44, 1 }
 0x1c4   :  { %v7067_v60 = vpop.f32.mrf.mxu1  ;;  %v7203_v18 = vpop.f32.mrf.mxu0 }
 0x1c5   :  { %v1039_v60 = vadd.f32 %v9823_v33, %v9512_v4  ;;  %v1042_v4 = vadd.f32 %v9834_v26, %v9524_v59  ;;  %v1428_v26 = vrot.slane %v8918_v29, 1 }
 0x1c6   :  { %v10012_v32 = vpop.f32.mrf.mxu1  ;;  %v1598_v22 = vpop.f32.mrf.mxu0 }
 0x1c7   :  { %v10017_v51 = vadd.f32 %v1598_v22, %v1034_v52 }
 0x1c8   :  { %v7068_v48 = vpop.f32.mrf.mxu1  ;;  %v7204_v9 = vpop.f32.mrf.mxu0 }
 0x1ca   :  { %v10024_v18 = vpop.f32.mrf.mxu1  ;;  %7166 = vmatmul.mubr.bf16.gmra.mxu1 %v138_v19  ;;  %v1603_v34 = vpop.f32.mrf.mxu0  ;;  %7302 = vmatmul.mubr.bf16.gmra.mxu0 %v10020_v28  ;;  %v10041_v19 = vsel %vm1364_vm2, %v1424_v11, %v1426_v15 }
 0x1cb   :  { %v10027_v5 = vadd.f32 %v1603_v34, %v1039_v60  ;;  %7305 = vmatprep.mubr.msk.bf16.mxu0 %vm8507_vm0, %v13811_v3  ;;  %7357 = vmatprep.mubr.msk.bf16.mxu1 %vm8507_vm0, %v13811_v3  ;;  %v1047_v34 = vadd.f32 %v9844_v7, %v9531_v63  ;;  %v1050_v63 = vadd.f32 %v9859_v31, %v9542_v40  ;;  %v1430_v40 = vrot.slane %v8957_v47, 1 }
 0x1cc   :  { %v7071_v9 = vpop.f32.mrf.mxu1  ;;  %v7207_v52 = vpop.f32.mrf.mxu0 }
 0x1ce   :  { %v10036_v33 = vpop.f32.mrf.mxu1  ;;  %v1606_v22 = vpop.f32.mrf.mxu0 }
 0x1cf   :  { %v10038_v25 = vadd.f32 %v1606_v22, %v1042_v4 }
 0x1d0   :  { %v7072_v48 = vpop.f32.mrf.mxu1  ;;  %v7208_v60 = vpop.f32.mrf.mxu0 }
 0x1d2   :  { %v10045_v45 = vpop.f32.mrf.mxu1  ;;  %v1611_v9 = vpop.f32.mrf.mxu0  ;;  %7306 = vmatmul.mubr.bf16.gmra.mxu0 %v10041_v19  ;;  %7358 = vmatmul.mubr.bf16.vlgmr.msra.gmra.mxu1 %v9431_v8  ;;  %v10063_v8 = vsel %vm1364_vm2, %v1426_v15, %v1428_v26 }
 0x1d3   :  { %v10049_v59 = vadd.f32 %v1611_v9, %v1047_v34  ;;  %7309 = vmatprep.mubr.msk.bf16.mxu0 %vm8507_vm0, %v13811_v3  ;;  %7361 = vmatprep.mubr.msk.bf16.mxu1 %vm8507_vm0, %v13811_v3  ;;  %v1055_v34 = vadd.f32 %v9870_v42, %v9549_v20  ;;  %v1058_v20 = vadd.f32 %v9885_v35, %v9560_v23  ;;  %v1432_v23 = vrot.slane %v9022_v55, 1  ;;  %v13960_v55 = vld [vmem:[#allocation145_spill] sm:$0xff] }
 0x1d4   :  { %v7075_v11 = vpop.f32.mrf.mxu1  ;;  %v7211_v52 = vpop.f32.mrf.mxu0  ;;  %v1079_v29 = vadd.f32 %v9933_v38, %v13960_v55  ;;  %v13963_v55 = vld [vmem:[#allocation147_spill] sm:$0xff] }
 0x1d5   :  { %v1082_v38 = vadd.f32 %v9946_v61, %v13963_v55 }
 0x1d6   :  { %v10058_v7 = vpop.f32.mrf.mxu1  ;;  %v1614_v4 = vpop.f32.mrf.mxu0 }
 0x1d7   :  { %v10060_v22 = vadd.f32 %v1614_v4, %v1050_v63 }
 0x1d8   :  { %v7076_v48 = vpop.f32.mrf.mxu1  ;;  %v7212_v60 = vpop.f32.mrf.mxu0 }
 0x1da   :  { %v10067_v9 = vpop.f32.mrf.mxu1  ;;  %v1619_v11 = vpop.f32.mrf.mxu0  ;;  %7310 = vmatmul.mubr.bf16.gmra.mxu0 %v10063_v8  ;;  %7362 = vmatmul.mubr.bf16.gmra.mxu1 %v9449_v36  ;;  %v10085_v36 = vsel %vm1364_vm2, %v1428_v26, %v1430_v40 }
 0x1db   :  { %v10071_v31 = vadd.f32 %v1619_v11, %v1055_v34  ;;  %7313 = vmatprep.mubr.msk.bf16.mxu0 %vm8507_vm0, %v13811_v3  ;;  %7365 = vmatprep.mubr.msk.bf16.mxu1 %vm8507_vm0, %v13811_v3  ;;  %v1063_v34 = vadd.f32 %v9893_v54, %v9567_v43  ;;  %v1066_v43 = vadd.f32 %v9904_v21, %v9578_v16  ;;  %v1434_v21 = vrot.slane %v9056_v30, 1  ;;  %v13966_v30 = vld [vmem:[#allocation150_spill] sm:$0xff] }
 0x1dc   :  { %v7079_v15 = vpop.f32.mrf.mxu1  ;;  %v7215_v52 = vpop.f32.mrf.mxu0 }
 0x1de   :  { %v10080_v42 = vpop.f32.mrf.mxu1  ;;  %v1622_v63 = vpop.f32.mrf.mxu0 }
 0x1df   :  { %v10082_v4 = vadd.f32 %v1622_v63, %v1058_v20 }
 0x1e0   :  { %v7080_v48 = vpop.f32.mrf.mxu1  ;;  %v7216_v60 = vpop.f32.mrf.mxu0 }
 0x1e2   :  { %v10089_v11 = vpop.f32.mrf.mxu1  ;;  %v1627_v15 = vpop.f32.mrf.mxu0  ;;  %7314 = vmatmul.mubr.bf16.gmra.mxu0 %v10085_v36  ;;  %7366 = vmatmul.mubr.bf16.gmra.mxu1 %v9467_v57  ;;  %v10107_v57 = vsel %vm1364_vm2, %v1430_v40, %v1432_v23 }
 0x1e3   :  { %v10093_v35 = vadd.f32 %v1627_v15, %v1063_v34  ;;  %7317 = vmatprep.mubr.msk.bf16.mxu0 %vm8507_vm0, %v13811_v3  ;;  %7369 = vmatprep.mubr.msk.bf16.mxu1 %vm8507_vm0, %v13811_v3  ;;  %v13954_v34 = vld [vmem:[#allocation140_spill] sm:$0xff] }
 0x1e4   :  { %v7083_v26 = vpop.f32.mrf.mxu1  ;;  %v7219_v52 = vpop.f32.mrf.mxu0  ;;  %v1071_v15 = vadd.f32 %v9911_v10, %v13954_v34  ;;  %v13957_v10 = vld [vmem:[#allocation142_spill] sm:$0xff] }
 0x1e5   :  { %v13955_v52 = vld [vmem:[#allocation124_spill] sm:$0xff] }
 0x1e6   :  { %v10102_v54 = vpop.f32.mrf.mxu1  ;;  %v1630_v20 = vpop.f32.mrf.mxu0 }
 0x1e7   :  { %v10104_v63 = vadd.f32 %v1630_v20, %v1066_v43  ;;  %v1074_v20 = vadd.f32 %v9924_v39, %v13957_v10 }
 0x1e8   :  { %v7084_v48 = vpop.f32.mrf.mxu1  ;;  %v7220_v60 = vpop.f32.mrf.mxu0 }
 0x1ea   :  { %v10111_v47 = vpop.f32.mrf.mxu1  ;;  %v1635_v26 = vpop.f32.mrf.mxu0  ;;  %7318 = vmatmul.mubr.bf16.gmra.mxu0 %v10107_v57  ;;  %7370 = vmatmul.mubr.bf16.gmra.mxu1 %v13955_v52 }
 0x1eb   :  { %v10115_v16 = vadd.f32 %v1635_v26, %v1071_v15  ;;  %7321 = vmatprep.mubr.msk.bf16.mxu0 %vm8507_vm0, %v13811_v3  ;;  %7373 = vmatprep.mubr.msk.bf16.mxu1 %vm8507_vm0, %v13811_v3  ;;  %v10129_v15 = vsel %vm1364_vm2, %v1432_v23, %v1434_v21  ;;  %v1436_v23 = vrot.slane %v9094_v49, 1  ;;  %v13972_v49 = vld [vmem:[#allocation155_spill] sm:$0xff] }
 0x1ec   :  { %v7087_v40 = vpop.f32.mrf.mxu1  ;;  %v7223_v43 = vpop.f32.mrf.mxu0  ;;  %13959 = vst [vmem:[#allocation142_spill] sm:$0xff] %v10129_v15 }
 0x1ed   :  { %13956 = vst [vmem:[#allocation140_spill] sm:$0xff] %v10115_v16  ;;  %v13961_v43 = vld [vmem:[#allocation127_spill] sm:$0xff] }
 0x1ee   :  { %v10124_v48 = vpop.f32.mrf.mxu1  ;;  %v1638_v60 = vpop.f32.mrf.mxu0 }
 0x1ef   :  { %v10126_v34 = vadd.f32 %v1638_v60, %v1074_v20 }
 0x1f0   :  { %v7088_v26 = vpop.f32.mrf.mxu1  ;;  %v7224_v52 = vpop.f32.mrf.mxu0 }
 0x1f1   :  { %13958 = vst [vmem:[#allocation124_spill] sm:$0xff] %v10126_v34 }
 0x1f2   :  { %v10133_v44 = vpop.f32.mrf.mxu1  ;;  %v1643_v40 = vpop.f32.mrf.mxu0  ;;  %7322 = vmatmul.mubr.bf16.gmra.mxu0 %v10129_v15  ;;  %7374 = vmatmul.mubr.bf16.gmra.mxu1 %v13961_v43  ;;  %v13998_v15 = vld [vmem:[#allocation144_spill] sm:$0xff] }
 0x1f3   :  { %v10137_v39 = vadd.f32 %v1643_v40, %v1079_v29  ;;  %7325 = vmatprep.mubr.msk.bf16.mxu0 %vm8507_vm0, %v13811_v3  ;;  %7377 = vmatprep.mubr.msk.bf16.mxu1 %vm8507_vm0, %v13811_v3  ;;  %v10151_v29 = vsel %vm1364_vm2, %v1434_v21, %v1436_v23  ;;  %v1438_v21 = vrot.slane %v9132_v2, 1 }
 0x1f4   :  { %v7091_v10 = vpop.f32.mrf.mxu1  ;;  %v7227_v20 = vpop.f32.mrf.mxu0  ;;  %13965 = vst [vmem:[#allocation147_spill] sm:$0xff] %v10151_v29 }
 0x1f5   :  { %13962 = vst [vmem:[#allocation145_spill] sm:$0xff] %v10137_v39  ;;  %v1087_v39 = vadd.f32 %v9955_v37, %v13966_v30  ;;  %v13967_v20 = vld [vmem:[#allocation130_spill] sm:$0xff]  ;;  %v13969_v37 = vld [vmem:[#allocation152_spill] sm:$0xff] }
 0x1f6   :  { %v10146_v60 = vpop.f32.mrf.mxu1  ;;  %v1646_v26 = vpop.f32.mrf.mxu0  ;;  %v1090_v30 = vadd.f32 %v9968_v6, %v13969_v37 }
 0x1f7   :  { %v10148_v52 = vadd.f32 %v1646_v26, %v1082_v38 }
 0x1f8   :  { %v7092_v40 = vpop.f32.mrf.mxu1  ;;  %v7228_v43 = vpop.f32.mrf.mxu0 }
 0x1f9   :  { %13964 = vst [vmem:[#allocation127_spill] sm:$0xff] %v10148_v52 }
 0x1fa   :  { %v10155_v34 = vpop.f32.mrf.mxu1  ;;  %v1651_v10 = vpop.f32.mrf.mxu0  ;;  %7326 = vmatmul.mubr.bf16.gmra.mxu0 %v10151_v29  ;;  %7378 = vmatmul.mubr.bf16.gmra.mxu1 %v13967_v20 }
 0x1fb   :  { %v10159_v61 = vadd.f32 %v1651_v10, %v1087_v39  ;;  %7329 = vmatprep.mubr.msk.bf16.mxu0 %vm8507_vm0, %v13811_v3  ;;  %7381 = vmatprep.mubr.msk.bf16.mxu1 %vm8507_vm0, %v13811_v3  ;;  %v10173_v39 = vsel %vm1364_vm2, %v1436_v23, %v1438_v21  ;;  %v13975_v23 = vld [vmem:[#allocation82_spill] sm:$0xff] }
 0x1fc   :  { %v7095_v55 = vpop.f32.mrf.mxu1  ;;  %v7231_v38 = vpop.f32.mrf.mxu0  ;;  %13971 = vst [vmem:[#allocation152_spill] sm:$0xff] %v10173_v39  ;;  %v10188_v37 = vrot.slane %v13975_v23, 1 }
 0x1fd   :  { %13968 = vst [vmem:[#allocation150_spill] sm:$0xff] %v10159_v61  ;;  %v1095_v61 = vadd.f32 %v9977_v58, %v13972_v49  ;;  %v13973_v38 = vld [vmem:[#allocation133_spill] sm:$0xff] }
 0x1fe   :  { %v10168_v26 = vpop.f32.mrf.mxu1  ;;  %v1654_v40 = vpop.f32.mrf.mxu0  ;;  %13976 = vst [vmem:[#allocation133_spill] sm:$0xff] %v10188_v37  ;;  %v13977_v58 = vld [vmem:[#allocation157_spill] sm:$0xff] }
 0x1ff   :  { %v10170_v43 = vadd.f32 %v1654_v40, %v1090_v30  ;;  %v1098_v40 = vadd.f32 %v9990_v0, %v13977_v58  ;;  %v13981_v0 = vld [vmem:[#allocation136_spill] sm:$0xff]  ;;  %v13983_v58 = vld [vmem:[#allocation162_spill] sm:$0xff] }
 0x200   :  { %v7096_v10 = vpop.f32.mrf.mxu1  ;;  %v7232_v20 = vpop.f32.mrf.mxu0 }
 0x201   :  { %13970 = vst [vmem:[#allocation130_spill] sm:$0xff] %v10170_v43 }
 0x202   :  { %v10177_v52 = vpop.f32.mrf.mxu1  ;;  %v1659_v55 = vpop.f32.mrf.mxu0  ;;  %7330 = vmatmul.mubr.bf16.gmra.mxu0 %v10173_v39  ;;  %7382 = vmatmul.mubr.bf16.gmra.mxu1 %v13973_v38 }
 0x203   :  { %v10181_v6 = vadd.f32 %v1659_v55, %v1095_v61  ;;  %7333 = vmatprep.mubr.msk.bf16.mxu0 %vm8507_vm0, %v13811_v3  ;;  %7385 = vmatprep.mubr.msk.bf16.mxu1 %vm8507_vm0, %v13811_v3  ;;  %v10198_v61 = vsel %vm1364_vm2, %v1438_v21, %v10188_v37 }
 0x204   :  { %v7099_v30 = vpop.f32.mrf.mxu1  ;;  %v7235_v49 = vpop.f32.mrf.mxu0  ;;  %13979 = vst [vmem:[#allocation197_spill] sm:$0xff] %v10198_v61 }
 0x205   :  { %13974 = vst [vmem:[#allocation155_spill] sm:$0xff] %v10181_v6  ;;  %v13980_v6 = vld [vmem:[#allocation160_spill] sm:$0xff] }
 0x206   :  { %v10192_v10 = vpop.f32.mrf.mxu1  ;;  %v1662_v20 = vpop.f32.mrf.mxu0  ;;  %v1103_v23 = vadd.f32 %v9999_v14, %v13980_v6  ;;  %v1106_v14 = vadd.f32 %v10012_v32, %v13983_v58  ;;  %v13988_v32 = vld [vmem:[#allocation139_spill] sm:$0xff] }
 0x207   :  { %v10194_v38 = vadd.f32 %v1662_v20, %v1098_v40 }
 0x208   :  { %v7100_v55 = vpop.f32.mrf.mxu1  ;;  %v7236_v2 = vpop.f32.mrf.mxu0 }
 0x209   :  { %13978 = vst [vmem:[#allocation157_spill] sm:$0xff] %v10194_v38  ;;  %v13985_v55 = vld [vmem:[#allocation17_spill] sm:$0xff] }
 0x20a   :  { %v10202_v43 = vpop.f32.mrf.mxu1  ;;  %v1667_v30 = vpop.f32.mrf.mxu0  ;;  %7334 = vmatmul.mubr.bf16.gmra.mxu0 %v10198_v61  ;;  %7386 = vmatmul.mubr.bf16.gmra.mxu1 %v13981_v0  ;;  %v2463_v0 = vrot.slane %v13985_v55, 1  ;;  %v13987_v61 = vld [vmem:[#allocation165_spill] sm:$0xff] }
 0x20b   :  { %v10206_v49 = vadd.f32 %v1667_v30, %v1103_v23  ;;  %7337 = vmatprep.mubr.msk.bf16.mxu0 %vm8507_vm0, %v13811_v3  ;;  %7389 = vmatprep.mubr.msk.bf16.mxu1 %vm8507_vm0, %v13811_v3  ;;  %v13986_v23 = vld [vmem:[#allocation12_spill] sm:$0xff]  ;;  %v1111_v39 = vadd.f32 %v10024_v18, %v13987_v61  ;;  %v13990_v18 = vld [vmem:[#allocation167_spill] sm:$0xff] }
 0x20c   :  { %v7103_v21 = vpop.f32.mrf.mxu1  ;;  %v7239_v2 = vpop.f32.mrf.mxu0  ;;  %v2464_v30 = vrot.slane %v13986_v23, 2  ;;  %v1114_v61 = vadd.f32 %v10036_v33, %v13990_v18 }
 0x20d   :  { %13982 = vst [vmem:[#allocation160_spill] sm:$0xff] %v10206_v49 }
 0x20e   :  { %v10214_v6 = vpop.f32.mrf.mxu1  ;;  %v1670_v40 = vpop.f32.mrf.mxu0 }
 0x20f   :  { %v10216_v20 = vadd.f32 %v1670_v40, %v1106_v14 }
 0x210   :  { %v7104_v49 = vpop.f32.mrf.mxu1  ;;  %v7240_v38 = vpop.f32.mrf.mxu0 }
 0x211   :  { %13984 = vst [vmem:[#allocation136_spill] sm:$0xff] %v10216_v20  ;;  %v2465_v49 = vor.u32 %v2464_v30, %v2463_v0 }
 0x212   :  { %v10222_v29 = vpop.f32.mrf.mxu1  ;;  %v1675_v21 = vpop.f32.mrf.mxu0  ;;  %7338 = vmatmul.mubr.bf16.gmra.mxu0 %v10188_v37  ;;  %7390 = vmatmul.mubr.bf16.gmra.mxu1 %v13988_v32  ;;  %v13996_v37 = vld [vmem:[#allocation18_spill] sm:$0xff] }
 0x213   :  { %v10226_v2 = vadd.f32 %v1675_v21, %v1111_v39  ;;  %7393 = vmatprep.mubr.msk.bf16.mxu1 %vm8507_vm0, %v13811_v3  ;;  %7529 = vmatprep.mubr.msk.bf16.mxu0 %vm8507_vm0, %v13811_v3  ;;  %v13992_v39 = vld [vmem:[#allocation3_spill] sm:$0xff]  ;;  %v13993_v21 = vld [vmem:[#allocation5_spill] sm:$0xff]  ;;  %v2468_v0 = vrot.slane %v13996_v37, 2 }
 0x214   :  { %v7107_v38 = vpop.f32.mrf.mxu1  ;;  %v7243_v58 = vpop.f32.mrf.mxu0  ;;  %v13994_v32 = vor.u32 %v13992_v39, %v13993_v21 }
 0x215   :  { %13989 = vst [vmem:[#allocation162_spill] sm:$0xff] %v10226_v2  ;;  %v13995_v2 = vld [vmem:[#allocation23_spill] sm:$0xff]  ;;  %v13997_v58 = vld [vmem:[#allocation169_spill] sm:$0xff] }
 0x216   :  { %v10234_v14 = vpop.f32.mrf.mxu1  ;;  %v1678_v40 = vpop.f32.mrf.mxu0  ;;  %v2466_v55 = vsel %vm2459_vm3, %v13994_v32, %v2465_v49  ;;  %v2467_v20 = vrot.slane %v13995_v2, 1  ;;  %v1119_v16 = vadd.f32 %v10045_v45, %v13997_v58  ;;  %v14000_v32 = vld [vmem:[#allocation170_spill] sm:$0xff] }
 0x217   :  { %v10236_v23 = vadd.f32 %v1678_v40, %v1114_v61  ;;  %v1122_v45 = vadd.f32 %v10058_v7, %v14000_v32  ;;  %v14005_v7 = vld [vmem:[#allocation149_spill] sm:$0xff] }
 0x218   :  { %v7108_v30 = vpop.f32.mrf.mxu1  ;;  %v7244_v38 = vpop.f32.mrf.mxu0  ;;  %v2469_v40 = vor.u32 %v2468_v0, %v2467_v20  ;;  %v14007_v32 = vld [vmem:[#allocation173_spill] sm:$0xff] }
 0x219   :  { %13991 = vst [vmem:[#allocation165_spill] sm:$0xff] %v10236_v23  ;;  %v14004_v23 = vld [vmem:[#allocation172_spill] sm:$0xff] }
 0x21a   :  { %v10246_v33 = vpop.f32.mrf.mxu1  ;;  %v1683_v18 = vpop.f32.mrf.mxu0  ;;  %7394 = vmatmul.mubr.bf16.gmra.mxu1 %v13998_v15  ;;  %7530 = vmatmul.mubr.bf16.vlgmr.msra.gmra.mxu0 %v2466_v55  ;;  %v14002_v15 = vld [vmem:[#allocation29_spill] sm:$0xff]  ;;  %v1127_v20 = vadd.f32 %v10067_v9, %v14004_v23  ;;  %v1130_v9 = vadd.f32 %v10080_v42, %v14007_v32  ;;  %v14012_v42 = vld [vmem:[#allocation154_spill] sm:$0xff]  ;;  %v14014_v32 = vld [vmem:[#allocation176_spill] sm:$0xff] }
 0x21b   :  { %v10249_v61 = vadd.f32 %v1683_v18, %v1119_v16  ;;  %7397 = vmatprep.mubr.msk.bf16.mxu1 %vm8507_vm0, %v13811_v3  ;;  %7533 = vmatprep.mubr.msk.bf16.mxu0 %vm8507_vm0, %v13811_v3  ;;  %v2470_v16 = vsel %vm2459_vm3, %v2465_v49, %v2469_v40  ;;  %v2471_v55 = vrot.slane %v14002_v15, 1  ;;  %v14003_v18 = vld [vmem:[#allocation24_spill] sm:$0xff] }
 0x21c   :  { %v7111_v39 = vpop.f32.mrf.mxu1  ;;  %v7247_v21 = vpop.f32.mrf.mxu0  ;;  %v2472_v37 = vrot.slane %v14003_v18, 2 }
 0x21d   :  { %13999 = vst [vmem:[#allocation139_spill] sm:$0xff] %v10249_v61 }
 0x21e   :  { %v10257_v30 = vpop.f32.mrf.mxu1  ;;  %v1686_v38 = vpop.f32.mrf.mxu0  ;;  %v2473_v49 = vor.u32 %v2472_v37, %v2471_v55 }
 0x21f   :  { %v10259_v58 = vadd.f32 %v1686_v38, %v1122_v45 }
 0x220   :  { %v7112_v2 = vpop.f32.mrf.mxu1  ;;  %v7248_v61 = vpop.f32.mrf.mxu0 }
 0x221   :  { %14001 = vst [vmem:[#allocation167_spill] sm:$0xff] %v10259_v58  ;;  %v14011_v58 = vld [vmem:[#allocation175_spill] sm:$0xff] }
 0x222   :  { %v10266_v0 = vpop.f32.mrf.mxu1  ;;  %v1691_v39 = vpop.f32.mrf.mxu0  ;;  %7398 = vmatmul.mubr.bf16.gmra.mxu1 %v14005_v7  ;;  %7534 = vmatmul.mubr.bf16.gmra.mxu0 %v2470_v16  ;;  %v2474_v16 = vsel %vm2459_vm3, %v2469_v40, %v2473_v49  ;;  %v14010_v7 = vld [vmem:[#allocation30_spill] sm:$0xff]  ;;  %v1135_v37 = vadd.f32 %v10089_v11, %v14011_v58  ;;  %v1138_v11 = vadd.f32 %v10102_v54, %v14014_v32  ;;  %v14019_v54 = vld [vmem:[#allocation159_spill] sm:$0xff] }
 0x223   :  { %v10269_v21 = vadd.f32 %v1691_v39, %v1127_v20  ;;  %7401 = vmatprep.mubr.msk.bf16.mxu1 %vm8507_vm0, %v13811_v3  ;;  %7537 = vmatprep.mubr.msk.bf16.mxu0 %vm8507_vm0, %v13811_v3  ;;  %v14009_v20 = vld [vmem:[#allocation35_spill] sm:$0xff]  ;;  %v2476_v18 = vrot.slane %v14010_v7, 2 }
 0x224   :  { %v7115_v2 = vpop.f32.mrf.mxu1  ;;  %v7251_v61 = vpop.f32.mrf.mxu0  ;;  %v2475_v39 = vrot.slane %v14009_v20, 1  ;;  %v14021_v32 = vld [vmem:[#allocation179_spill] sm:$0xff] }
 0x225   :  { %14006 = vst [vmem:[#allocation3_spill] sm:$0xff] %v10269_v21 }
 0x226   :  { %v10277_v23 = vpop.f32.mrf.mxu1  ;;  %v1694_v45 = vpop.f32.mrf.mxu0  ;;  %v2477_v40 = vor.u32 %v2476_v18, %v2475_v39 }
 0x227   :  { %v10279_v38 = vadd.f32 %v1694_v45, %v1130_v9 }
 0x228   :  { %v7116_v15 = vpop.f32.mrf.mxu1  ;;  %v7252_v21 = vpop.f32.mrf.mxu0 }
 0x229   :  { %14008 = vst [vmem:[#allocation5_spill] sm:$0xff] %v10279_v38  ;;  %v14018_v38 = vld [vmem:[#allocation178_spill] sm:$0xff] }
 0x22a   :  { %v10286_v55 = vpop.f32.mrf.mxu1  ;;  %v1699_v2 = vpop.f32.mrf.mxu0  ;;  %7402 = vmatmul.mubr.bf16.gmra.mxu1 %v14012_v42  ;;  %7538 = vmatmul.mubr.bf16.gmra.mxu0 %v2474_v16  ;;  %v2478_v16 = vsel %vm2459_vm3, %v2473_v49, %v2477_v40  ;;  %v14017_v42 = vld [vmem:[#allocation36_spill] sm:$0xff]  ;;  %v1143_v18 = vadd.f32 %v10111_v47, %v14018_v38  ;;  %v1146_v47 = vadd.f32 %v10124_v48, %v14021_v32 }
 0x22b   :  { %v10289_v61 = vadd.f32 %v1699_v2, %v1135_v37  ;;  %7405 = vmatprep.mubr.msk.bf16.mxu1 %vm8507_vm0, %v13811_v3  ;;  %7541 = vmatprep.mubr.msk.bf16.mxu0 %vm8507_vm0, %v13811_v3  ;;  %v14016_v37 = vld [vmem:[#allocation41_spill] sm:$0xff]  ;;  %v2480_v7 = vrot.slane %v14017_v42, 2  ;;  %v14026_v48 = vld [vmem:[#allocation164_spill] sm:$0xff] }
 0x22c   :  { %v7119_v15 = vpop.f32.mrf.mxu1  ;;  %v7255_v21 = vpop.f32.mrf.mxu0  ;;  %v2479_v2 = vrot.slane %v14016_v37, 1 }
 0x22d   :  { %14013 = vst [vmem:[#allocation169_spill] sm:$0xff] %v10289_v61 }
 0x22e   :  { %v10297_v58 = vpop.f32.mrf.mxu1  ;;  %v1702_v9 = vpop.f32.mrf.mxu0  ;;  %v2481_v49 = vor.u32 %v2480_v7, %v2479_v2 }
 0x22f   :  { %v10299_v45 = vadd.f32 %v1702_v9, %v1138_v11 }
 0x230   :  { %v7120_v20 = vpop.f32.mrf.mxu1  ;;  %v7256_v61 = vpop.f32.mrf.mxu0 }
 0x231   :  { %14015 = vst [vmem:[#allocation144_spill] sm:$0xff] %v10299_v45  ;;  %v14025_v45 = vld [vmem:[#allocation181_spill] sm:$0xff] }
 0x232   :  { %v10306_v39 = vpop.f32.mrf.mxu1  ;;  %v1707_v15 = vpop.f32.mrf.mxu0  ;;  %7406 = vmatmul.mubr.bf16.gmra.mxu1 %v14019_v54  ;;  %7542 = vmatmul.mubr.bf16.gmra.mxu0 %v2478_v16  ;;  %v2482_v16 = vsel %vm2459_vm3, %v2477_v40, %v2481_v49  ;;  %v14024_v54 = vld [vmem:[#allocation43_spill] sm:$0xff]  ;;  %v1151_v7 = vadd.f32 %v10133_v44, %v14025_v45  ;;  %v8471_v44 = vld [vmem:[%s13492_s1 + $0x178] sm:$0xff]   ;;  %v14028_v45 = vld [vmem:[#allocation182_spill] sm:$0xff] }
 0x233   :  { %v10309_v21 = vadd.f32 %v1707_v15, %v1143_v18  ;;  %7409 = vmatprep.mubr.msk.bf16.mxu1 %vm8507_vm0, %v13811_v3  ;;  %7545 = vmatprep.mubr.msk.bf16.mxu0 %vm8507_vm0, %v13811_v3  ;;  %v14023_v18 = vld [vmem:[#allocation48_spill] sm:$0xff]  ;;  %v2484_v42 = vrot.slane %v14024_v54, 2  ;;  %v1154_v32 = vadd.f32 %v10146_v60, %v14028_v45 }
 0x234   :  { %v7123_v20 = vpop.f32.mrf.mxu1  ;;  %v7259_v61 = vpop.f32.mrf.mxu0  ;;  %v2483_v15 = vrot.slane %v14023_v18, 1  ;;  %7686 = vmatpush3.bf16.msra.mxu1 %v8471_v44  ;;  %v14032_v45 = vld [vmem:[#allocation184_spill] sm:$0xff]  ;;  %v14038_v18 = vld [vmem:[#allocation54_spill] sm:$0xff] }
 0x235   :  { %14020 = vst [vmem:[#allocation170_spill] sm:$0xff] %v10309_v21  ;;  %7687 = vmatprep.subr.bf16.mxu1 %v13811_v3  ;;  %v1159_v54 = vadd.f32 %v10155_v34, %v14032_v45  ;;  %v14035_v34 = vld [vmem:[#allocation185_spill] sm:$0xff] }
 0x236   :  { %v10317_v38 = vpop.f32.mrf.mxu1  ;;  %v1710_v11 = vpop.f32.mrf.mxu0  ;;  %v2485_v40 = vor.u32 %v2484_v42, %v2483_v15  ;;  %v14031_v42 = vld [vmem:[#allocation46_spill] sm:$0xff] }
 0x237   :  { %v10319_v9 = vadd.f32 %v1710_v11, %v1146_v47  ;;  %v2488_v15 = vrot.slane %v14031_v42, 2 }
 0x238   :  { %v7124_v37 = vpop.f32.mrf.mxu1  ;;  %v7260_v21 = vpop.f32.mrf.mxu0 }
 0x239   :  { %14022 = vst [vmem:[#allocation172_spill] sm:$0xff] %v10319_v9  ;;  %v14046_v9 = vld [vmem:[#allocation190_spill] sm:$0xff] }
 0x23a   :  { %v10326_v2 = vpop.f32.mrf.mxu1  ;;  %v1715_v20 = vpop.f32.mrf.mxu0  ;;  %7410 = vmatmul.mubr.bf16.gmra.mxu1 %v14026_v48  ;;  %7546 = vmatmul.mubr.bf16.gmra.mxu0 %v2482_v16 }
 0x23b   :  { %v10329_v61 = vadd.f32 %v1715_v20, %v1151_v7  ;;  %7413 = vmatprep.mubr.msk.bf16.mxu1 %vm8507_vm0, %v13811_v3  ;;  %7549 = vmatprep.mubr.msk.bf16.mxu0 %vm8507_vm0, %v13811_v3  ;;  %v2486_v7 = vsel %vm2459_vm3, %v2481_v49, %v2485_v40  ;;  %v14030_v20 = vld [vmem:[#allocation52_spill] sm:$0xff] }
 0x23c   :  { %v7127_v37 = vpop.f32.mrf.mxu1  ;;  %v7263_v21 = vpop.f32.mrf.mxu0  ;;  %v2487_v48 = vrot.slane %v14030_v20, 1  ;;  %v14033_v49 = vld [vmem:[#allocation168_spill] sm:$0xff] }
 0x23d   :  { %14027 = vst [vmem:[#allocation149_spill] sm:$0xff] %v10329_v61  ;;  %v8472_v37 = vld [vmem:[%s13492_s1 + $0x1b8] sm:$0xff]  }
 0x23e   :  { %v10340_v47 = vpop.f32.mrf.mxu1  ;;  %v1718_v11 = vpop.f32.mrf.mxu0  ;;  %7858 = vmatpush3.bf16.msra.mxu0 %v8472_v37  ;;  %v1162_v37 = vadd.f32 %v10168_v26, %v14035_v34  ;;  %v14040_v26 = vld [vmem:[#allocation171_spill] sm:$0xff] }
 0x23f   :  { %v10342_v16 = vadd.f32 %v1718_v11, %v1154_v32  ;;  %7859 = vmatprep.subr.bf16.mxu0 %v13811_v3 }
 0x240   :  { %v7128_v21 = vpop.f32.mrf.mxu1  ;;  %v7264_v60 = vpop.f32.mrf.mxu0 }
 0x241   :  { %14029 = vst [vmem:[#allocation173_spill] sm:$0xff] %v10342_v16  ;;  %v2489_v21 = vor.u32 %v2488_v15, %v2487_v48  ;;  %v14039_v15 = vld [vmem:[#allocation187_spill] sm:$0xff] }
 0x242   :  { %v10353_v44 = vpop.f32.mrf.mxu1  ;;  %v1723_v32 = vpop.f32.mrf.mxu0  ;;  %7414 = vmatmul.mubr.bf16.gmra.mxu1 %v14033_v49  ;;  %7550 = vmatmul.mubr.bf16.gmra.mxu0 %v2486_v7 }
 0x243   :  { %v10356_v11 = vadd.f32 %v1723_v32, %v1159_v54  ;;  %7417 = vmatprep.mubr.msk.bf16.mxu1 %vm8507_vm0, %v13811_v3  ;;  %7553 = vmatprep.mubr.msk.bf16.mxu0 %vm8507_vm0, %v13811_v3  ;;  %v2490_v54 = vsel %vm2459_vm3, %v2485_v40, %v2489_v21  ;;  %v14037_v32 = vld [vmem:[#allocation57_spill] sm:$0xff] }
 0x244   :  { %v7131_v60 = vpop.f32.mrf.mxu1  ;;  %v7267_v42 = vpop.f32.mrf.mxu0  ;;  %v2491_v20 = vrot.slane %v14037_v32, 1 }
 0x245   :  { %14034 = vst [vmem:[#allocation175_spill] sm:$0xff] %v10356_v11  ;;  %v2492_v11 = vrot.slane %v14038_v18, 2  ;;  %v1167_v42 = vadd.f32 %v10177_v52, %v14039_v15 }
 0x246   :  { %v10365_v45 = vpop.f32.mrf.mxu1  ;;  %v1726_v49 = vpop.f32.mrf.mxu0 }
 0x247   :  { %v10367_v7 = vadd.f32 %v1726_v49, %v1162_v37  ;;  %v2493_v40 = vor.u32 %v2492_v11, %v2491_v20  ;;  %v14042_v49 = vld [vmem:[#allocation188_spill] sm:$0xff]  ;;  %v1175_v20 = vadd.f32 %v10202_v43, %v14046_v9 }
 0x248   :  { %v7132_v16 = vpop.f32.mrf.mxu1  ;;  %v7268_v48 = vpop.f32.mrf.mxu0  ;;  %v1170_v52 = vadd.f32 %v10192_v10, %v14042_v49  ;;  %v14047_v10 = vld [vmem:[#allocation174_spill] sm:$0xff]  ;;  %v14049_v49 = vld [vmem:[#allocation191_spill] sm:$0xff] }
 0x249   :  { %14036 = vst [vmem:[#allocation154_spill] sm:$0xff] %v10367_v7  ;;  %v1178_v43 = vadd.f32 %v10214_v6, %v14049_v49  ;;  %v14054_v6 = vld [vmem:[#allocation177_spill] sm:$0xff]  ;;  %v14056_v49 = vld [vmem:[#allocation194_spill] sm:$0xff] }
 0x24a   :  { %v10374_v60 = vpop.f32.mrf.mxu1  ;;  %v1731_v61 = vpop.f32.mrf.mxu0  ;;  %7418 = vmatmul.mubr.bf16.gmra.mxu1 %v14040_v26  ;;  %7554 = vmatmul.mubr.bf16.gmra.mxu0 %v2490_v54  ;;  %v14044_v54 = vld [vmem:[#allocation65_spill] sm:$0xff]  ;;  %v14045_v26 = vld [vmem:[#allocation59_spill] sm:$0xff] }
 0x24b   :  { %v10377_v34 = vadd.f32 %v1731_v61, %v1167_v42  ;;  %7421 = vmatprep.mubr.msk.bf16.mxu1 %vm8507_vm0, %v13811_v3  ;;  %7557 = vmatprep.mubr.msk.bf16.mxu0 %vm8507_vm0, %v13811_v3  ;;  %v2494_v61 = vsel %vm2459_vm3, %v2489_v21, %v2493_v40  ;;  %v2495_v42 = vrot.slane %v14044_v54, 1  ;;  %v2496_v32 = vrot.slane %v14045_v26, 2 }
 0x24c   :  { %v7135_v16 = vpop.f32.mrf.mxu1  ;;  %v7271_v37 = vpop.f32.mrf.mxu0 }
 0x24d   :  { %14041 = vst [vmem:[#allocation176_spill] sm:$0xff] %v10377_v34  ;;  %v2497_v21 = vor.u32 %v2496_v32, %v2495_v42 }
 0x24e   :  { %v10385_v48 = vpop.f32.mrf.mxu1  ;;  %v1734_v15 = vpop.f32.mrf.mxu0 }
 0x24f   :  { %v10387_v18 = vadd.f32 %v1734_v15, %v1170_v52 }
 0x250   :  { %v7136_v34 = vpop.f32.mrf.mxu1  ;;  %v7272_v7 = vpop.f32.mrf.mxu0 }
 0x251   :  { %14043 = vst [vmem:[#allocation178_spill] sm:$0xff] %v10387_v18  ;;  %v14053_v18 = vld [vmem:[#allocation193_spill] sm:$0xff] }
 0x252   :  { %v10394_v11 = vpop.f32.mrf.mxu1  ;;  %v1739_v16 = vpop.f32.mrf.mxu0  ;;  %7422 = vmatmul.mubr.bf16.gmra.mxu1 %v14047_v10  ;;  %7558 = vmatmul.mubr.bf16.gmra.mxu0 %v2494_v61  ;;  %v2498_v61 = vsel %vm2459_vm3, %v2493_v40, %v2497_v21  ;;  %v14052_v10 = vld [vmem:[#allocation66_spill] sm:$0xff]  ;;  %v1183_v32 = vadd.f32 %v10222_v29, %v14053_v18  ;;  %v1186_v29 = vadd.f32 %v10234_v14, %v14056_v49  ;;  %v14060_v14 = vld [vmem:[#allocation180_spill] sm:$0xff] }
 0x253   :  { %v10397_v37 = vadd.f32 %v1739_v16, %v1175_v20  ;;  %7425 = vmatprep.mubr.msk.bf16.mxu1 %vm8507_vm0, %v13811_v3  ;;  %7561 = vmatprep.mubr.msk.bf16.mxu0 %vm8507_vm0, %v13811_v3  ;;  %v14051_v20 = vld [vmem:[#allocation71_spill] sm:$0xff]  ;;  %v2500_v26 = vrot.slane %v14052_v10, 2 }
 0x254   :  { %v7139_v34 = vpop.f32.mrf.mxu1  ;;  %v7275_v7 = vpop.f32.mrf.mxu0  ;;  %v2499_v16 = vrot.slane %v14051_v20, 1 }
 0x255   :  { %14048 = vst [vmem:[#allocation159_spill] sm:$0xff] %v10397_v37 }
 0x256   :  { %v10405_v9 = vpop.f32.mrf.mxu1  ;;  %v1742_v52 = vpop.f32.mrf.mxu0  ;;  %v2501_v40 = vor.u32 %v2500_v26, %v2499_v16 }
 0x257   :  { %v10407_v15 = vadd.f32 %v1742_v52, %v1178_v43 }
 0x258   :  { %v7140_v54 = vpop.f32.mrf.mxu1  ;;  %v7276_v37 = vpop.f32.mrf.mxu0 }
 0x259   :  { %14050 = vst [vmem:[#allocation179_spill] sm:$0xff] %v10407_v15  ;;  %v14059_v15 = vld [vmem:[#allocation116_spill] sm:$0xff] }
 0x25a   :  { %v10414_v42 = vpop.f32.mrf.mxu1  ;;  %v1747_v34 = vpop.f32.mrf.mxu0  ;;  %7426 = vmatmul.mubr.bf16.gmra.mxu1 %v14054_v6  ;;  %7562 = vmatmul.mubr.bf16.gmra.mxu0 %v2498_v61  ;;  %v2502_v61 = vsel %vm2459_vm3, %v2497_v21, %v2501_v40  ;;  %v14058_v6 = vld [vmem:[#allocation73_spill] sm:$0xff]  ;;  %v1191_v26 = vadd.f32 %v10246_v33, %v14059_v15  ;;  %v8473_v33 = vld [vmem:[%s13492_s1 + $0x170] sm:$0xff]  }
 0x25b   :  { %v10417_v7 = vadd.f32 %v1747_v34, %v1183_v32  ;;  %7429 = vmatprep.mubr.msk.bf16.mxu1 %vm8507_vm0, %v13811_v3  ;;  %7565 = vmatprep.mubr.msk.bf16.mxu0 %vm8507_vm0, %v13811_v3  ;;  %v14057_v32 = vld [vmem:[#allocation77_spill] sm:$0xff]  ;;  %v2504_v10 = vrot.slane %v14058_v6, 2 }
 0x25c   :  { %v7143_v54 = vpop.f32.mrf.mxu1  ;;  %v7279_v37 = vpop.f32.mrf.mxu0  ;;  %v2503_v34 = vrot.slane %v14057_v32, 1  ;;  %v14062_v15 = vld [vmem:[#allocation117_spill] sm:$0xff]  ;;  %7688 = vmatpush3.bf16.msra.mxu1 %v8473_v33  ;;  %v14072_v32 = vld [vmem:[#allocation84_spill] sm:$0xff] }
 0x25d   :  { %14055 = vst [vmem:[#allocation181_spill] sm:$0xff] %v10417_v7  ;;  %v1194_v49 = vadd.f32 %v10257_v30, %v14062_v15  ;;  %7689 = vmatprep.subr.bf16.mxu1 %v13811_v3  ;;  %v14066_v15 = vld [vmem:[#allocation118_spill] sm:$0xff] }
 0x25e   :  { %v10425_v18 = vpop.f32.mrf.mxu1  ;;  %v1750_v43 = vpop.f32.mrf.mxu0  ;;  %v2505_v21 = vor.u32 %v2504_v10, %v2503_v34  ;;  %v14065_v10 = vld [vmem:[#allocation78_spill] sm:$0xff]  ;;  %v1199_v6 = vadd.f32 %v10266_v0, %v14066_v15  ;;  %v14069_v0 = vld [vmem:[#allocation119_spill] sm:$0xff] }
 0x25f   :  { %v10427_v52 = vadd.f32 %v1750_v43, %v1186_v29  ;;  %v2508_v34 = vrot.slane %v14065_v10, 2 }
 0x260   :  { %v7144_v20 = vpop.f32.mrf.mxu1  ;;  %v7280_v7 = vpop.f32.mrf.mxu0 }
 0x262   :  { %v10434_v16 = vpop.f32.mrf.mxu1  ;;  %v1755_v54 = vpop.f32.mrf.mxu0  ;;  %7430 = vmatmul.mubr.bf16.gmra.mxu1 %v14060_v14  ;;  %7566 = vmatmul.mubr.bf16.gmra.mxu0 %v2502_v61 }
 0x263   :  { %v10437_v37 = vadd.f32 %v1755_v54, %v1191_v26  ;;  %7433 = vmatprep.mubr.msk.bf16.mxu1 %vm8507_vm0, %v13811_v3  ;;  %7569 = vmatprep.mubr.msk.bf16.mxu0 %vm8507_vm0, %v13811_v3  ;;  %v2506_v26 = vsel %vm2459_vm3, %v2501_v40, %v2505_v21  ;;  %v14064_v54 = vld [vmem:[#allocation83_spill] sm:$0xff] }
 0x264   :  { %v7147_v20 = vpop.f32.mrf.mxu1  ;;  %v7283_v7 = vpop.f32.mrf.mxu0  ;;  %v2507_v14 = vrot.slane %v14064_v54, 1  ;;  %v14067_v40 = vld [vmem:[#allocation183_spill] sm:$0xff] }
 0x265   :  { %14061 = vst [vmem:[#allocation164_spill] sm:$0xff] %v10437_v37  ;;  %v8474_v20 = vld [vmem:[%s13492_s1 + $0x1b0] sm:$0xff]   ;;  %v14095_v37 = vld [vmem:[#allocation195_spill] sm:$0xff] }
 0x266   :  { %v10448_v29 = vpop.f32.mrf.mxu1  ;;  %v1758_v43 = vpop.f32.mrf.mxu0  ;;  %7860 = vmatpush3.bf16.msra.mxu0 %v8474_v20  ;;  %v1202_v20 = vadd.f32 %v10277_v23, %v14069_v0  ;;  %v8475_v23 = vld [vmem:[%s13492_s1 + $0x168] sm:$0xff]  }
 0x267   :  { %v10450_v61 = vadd.f32 %v1758_v43, %v1194_v49  ;;  %7861 = vmatprep.subr.bf16.mxu0 %v13811_v3  ;;  %7690 = vmatpush3.bf16.msra.mxu1 %v8475_v23 }
 0x268   :  { %v7148_v7 = vpop.f32.mrf.mxu1  ;;  %v7284_v30 = vpop.f32.mrf.mxu0  ;;  %7691 = vmatprep.subr.bf16.mxu1 %v13811_v3 }
 0x269   :  { %14063 = vst [vmem:[#allocation182_spill] sm:$0xff] %v10450_v61  ;;  %v2509_v7 = vor.u32 %v2508_v34, %v2507_v14  ;;  %v14073_v34 = vld [vmem:[#allocation120_spill] sm:$0xff] }
 0x26a   :  { %v10461_v33 = vpop.f32.mrf.mxu1  ;;  %v1763_v49 = vpop.f32.mrf.mxu0  ;;  %7434 = vmatmul.mubr.bf16.gmra.mxu1 %v14067_v40  ;;  %7570 = vmatmul.mubr.bf16.gmra.mxu0 %v2506_v26 }
 0x26b   :  { %v10464_v43 = vadd.f32 %v1763_v49, %v1199_v6  ;;  %7437 = vmatprep.mubr.msk.bf16.mxu1 %vm8507_vm0, %v13811_v3  ;;  %7573 = vmatprep.mubr.msk.bf16.mxu0 %vm8507_vm0, %v13811_v3  ;;  %v2510_v6 = vsel %vm2459_vm3, %v2505_v21, %v2509_v7  ;;  %v14071_v49 = vld [vmem:[#allocation88_spill] sm:$0xff] }
 0x26c   :  { %v7151_v30 = vpop.f32.mrf.mxu1  ;;  %v7287_v10 = vpop.f32.mrf.mxu0  ;;  %v2511_v54 = vrot.slane %v14071_v49, 1 }
 0x26d   :  { %14068 = vst [vmem:[#allocation184_spill] sm:$0xff] %v10464_v43  ;;  %v2512_v43 = vrot.slane %v14072_v32, 2  ;;  %v1207_v10 = vadd.f32 %v10286_v55, %v14073_v34 }
 0x26e   :  { %v10473_v15 = vpop.f32.mrf.mxu1  ;;  %v1766_v40 = vpop.f32.mrf.mxu0 }
 0x26f   :  { %v10475_v26 = vadd.f32 %v1766_v40, %v1202_v20  ;;  %v14074_v20 = vld [vmem:[#allocation186_spill] sm:$0xff] }
 0x270   :  { %v7152_v61 = vpop.f32.mrf.mxu1  ;;  %v7288_v14 = vpop.f32.mrf.mxu0 }
 0x271   :  { %14070 = vst [vmem:[#allocation168_spill] sm:$0xff] %v10475_v26  ;;  %v2513_v61 = vor.u32 %v2512_v43, %v2511_v54  ;;  %v14076_v14 = vld [vmem:[#allocation121_spill] sm:$0xff]  ;;  %v14078_v54 = vld [vmem:[#allocation92_spill] sm:$0xff] }
 0x272   :  { %v10485_v30 = vpop.f32.mrf.mxu1  ;;  %v1771_v0 = vpop.f32.mrf.mxu0  ;;  %7438 = vmatmul.mubr.bf16.gmra.mxu1 %v14074_v20  ;;  %7574 = vmatmul.mubr.bf16.gmra.mxu0 %v2510_v6  ;;  %v1210_v34 = vadd.f32 %v10297_v58, %v14076_v14  ;;  %v8476_v6 = vld [vmem:[%s13492_s1 + $0x160] sm:$0xff]   ;;  %v2515_v43 = vrot.slane %v14078_v54, 1 }
 0x273   :  { %v10488_v21 = vadd.f32 %v1771_v0, %v1207_v10  ;;  %7441 = vmatprep.mubr.msk.bf16.mxu1 %vm8507_vm0, %v13811_v3  ;;  %7577 = vmatprep.mubr.msk.bf16.mxu0 %vm8507_vm0, %v13811_v3  ;;  %v2514_v32 = vsel %vm2459_vm3, %v2509_v7, %v2513_v61  ;;  %v14080_v58 = vld [vmem:[#allocation122_spill] sm:$0xff]  ;;  %v14081_v7 = vld [vmem:[#allocation189_spill] sm:$0xff] }
 0x274   :  { %v7155_v55 = vpop.f32.mrf.mxu1  ;;  %v7291_v40 = vpop.f32.mrf.mxu0  ;;  %7692 = vmatpush3.bf16.msra.mxu1 %v8476_v6  ;;  %v1215_v14 = vadd.f32 %v10306_v39, %v14080_v58 }
 0x275   :  { %14075 = vst [vmem:[#allocation185_spill] sm:$0xff] %v10488_v21  ;;  %v14079_v55 = vld [vmem:[#allocation89_spill] sm:$0xff]  ;;  %7693 = vmatprep.subr.bf16.mxu1 %v13811_v3 }
 0x276   :  { %v10500_v10 = vpop.f32.mrf.mxu1  ;;  %v1774_v0 = vpop.f32.mrf.mxu0  ;;  %v2516_v23 = vrot.slane %v14079_v55, 2  ;;  %v8477_v21 = vld [vmem:[%s13492_s1 + $0x158] sm:$0xff]  }
 0x277   :  { %v10502_v20 = vadd.f32 %v1774_v0, %v1210_v34 }
 0x278   :  { %v7156_v40 = vpop.f32.mrf.mxu1  ;;  %v7292_v49 = vpop.f32.mrf.mxu0  ;;  %v2517_v39 = vor.u32 %v2516_v23, %v2515_v43  ;;  %7694 = vmatpush3.bf16.msra.mxu1 %v8477_v21  ;;  %v14085_v43 = vld [vmem:[#allocation95_spill] sm:$0xff] }
 0x279   :  { %14077 = vst [vmem:[#allocation187_spill] sm:$0xff] %v10502_v20  ;;  %v14083_v40 = vld [vmem:[#allocation123_spill] sm:$0xff]  ;;  %7695 = vmatprep.subr.bf16.mxu1 %v13811_v3  ;;  %v2519_v23 = vrot.slane %v14085_v43, 1 }
 0x27a   :  { %v10513_v34 = vpop.f32.mrf.mxu1  ;;  %v1779_v0 = vpop.f32.mrf.mxu0  ;;  %7442 = vmatmul.mubr.bf16.gmra.mxu1 %v14081_v7  ;;  %7578 = vmatmul.mubr.bf16.gmra.mxu0 %v2514_v32  ;;  %v1218_v58 = vadd.f32 %v10317_v38, %v14083_v40  ;;  %v8478_v32 = vld [vmem:[%s13492_s1 + $0x150] sm:$0xff]   ;;  %v2518_v55 = vsel %vm2459_vm3, %v2513_v61, %v2517_v39  ;;  %v14087_v38 = vld [vmem:[#allocation125_spill] sm:$0xff]  ;;  %v8479_v20 = vld [vmem:[%s13492_s1 + $0x148] sm:$0xff]  }
 0x27b   :  { %v10516_v54 = vadd.f32 %v1779_v0, %v1215_v14  ;;  %7445 = vmatprep.mubr.msk.bf16.mxu1 %vm8507_vm0, %v13811_v3  ;;  %7581 = vmatprep.mubr.msk.bf16.mxu0 %vm8507_vm0, %v13811_v3  ;;  %v1223_v40 = vadd.f32 %v10326_v2, %v14087_v38  ;;  %v14088_v61 = vld [vmem:[#allocation192_spill] sm:$0xff] }
 0x27c   :  { %v7159_v49 = vpop.f32.mrf.mxu1  ;;  %v7295_v6 = vpop.f32.mrf.mxu0  ;;  %7696 = vmatpush3.bf16.msra.mxu1 %v8478_v32 }
 0x27d   :  { %14082 = vst [vmem:[#allocation171_spill] sm:$0xff] %v10516_v54  ;;  %v14086_v49 = vld [vmem:[#allocation93_spill] sm:$0xff]  ;;  %7697 = vmatprep.subr.bf16.mxu1 %v13811_v3 }
 0x27e   :  { %v10528_v14 = vpop.f32.mrf.mxu1  ;;  %v1782_v0 = vpop.f32.mrf.mxu0  ;;  %v2520_v21 = vrot.slane %v14086_v49, 2 }
 0x27f   :  { %v10530_v7 = vadd.f32 %v1782_v0, %v1218_v58 }
 0x280   :  { %v7160_v6 = vpop.f32.mrf.mxu1  ;;  %v7296_v54 = vpop.f32.mrf.mxu0  ;;  %v2521_v2 = vor.u32 %v2520_v21, %v2519_v23  ;;  %7698 = vmatpush3.bf16.msra.mxu1 %v8479_v20  ;;  %v14092_v23 = vld [vmem:[#allocation98_spill] sm:$0xff] }
 0x281   :  { %14084 = vst [vmem:[#allocation188_spill] sm:$0xff] %v10530_v7  ;;  %v14090_v6 = vld [vmem:[#allocation126_spill] sm:$0xff]  ;;  %7699 = vmatprep.subr.bf16.mxu1 %v13811_v3  ;;  %v2523_v21 = vrot.slane %v14092_v23, 1  ;;  %v14099_v23 = vld [vmem:[#allocation99_spill] sm:$0xff] }
 0x282   :  { %v10541_v58 = vpop.f32.mrf.mxu1  ;;  %v1787_v0 = vpop.f32.mrf.mxu0  ;;  %7446 = vmatmul.mubr.bf16.gmra.mxu1 %v14088_v61  ;;  %7582 = vmatmul.mubr.bf16.gmra.mxu0 %v2518_v55  ;;  %v1226_v38 = vadd.f32 %v10340_v47, %v14090_v6  ;;  %v8480_v55 = vld [vmem:[%s13492_s1 + $0x140] sm:$0xff]   ;;  %v2522_v49 = vsel %vm2459_vm3, %v2517_v39, %v2521_v2  ;;  %v14094_v47 = vld [vmem:[#allocation128_spill] sm:$0xff] }
 0x283   :  { %v10544_v43 = vadd.f32 %v1787_v0, %v1223_v40  ;;  %7449 = vmatprep.mubr.msk.bf16.mxu1 %vm8507_vm0, %v13811_v3  ;;  %7585 = vmatprep.mubr.msk.bf16.mxu0 %vm8507_vm0, %v13811_v3  ;;  %v1231_v6 = vadd.f32 %v10353_v44, %v14094_v47  ;;  %v8481_v44 = vld [vmem:[%s13492_s1 + $0x1a8] sm:$0xff]  }
 0x284   :  { %v7163_v54 = vpop.f32.mrf.mxu1  ;;  %v7299_v32 = vpop.f32.mrf.mxu0  ;;  %7700 = vmatpush3.bf16.msra.mxu1 %v8480_v55  ;;  %7862 = vmatpush3.bf16.msra.mxu0 %v8481_v44 }
 0x285   :  { %14089 = vst [vmem:[#allocation190_spill] sm:$0xff] %v10544_v43  ;;  %v14093_v54 = vld [vmem:[#allocation96_spill] sm:$0xff]  ;;  %8029 = vmatprep.subr.bf16.mxu1 %v13811_v3  ;;  %7863 = vmatprep.subr.bf16.mxu0 %v13811_v3 }
 0x286   :  { %v10556_v40 = vpop.f32.mrf.mxu1  ;;  %v1790_v0 = vpop.f32.mrf.mxu0  ;;  %v2524_v20 = vrot.slane %v14093_v54, 2 }
 0x287   :  { %v10558_v61 = vadd.f32 %v1790_v0, %v1226_v38  ;;  %v14097_v0 = vld [vmem:[#allocation129_spill] sm:$0xff] }
 0x288   :  { %v7164_v32 = vpop.f32.mrf.mxu1  ;;  %v7300_v43 = vpop.f32.mrf.mxu0  ;;  %v2525_v39 = vor.u32 %v2524_v20, %v2523_v21  ;;  %v2528_v21 = vrot.slane %v14099_v23, 2 }
 0x289   :  { %14091 = vst [vmem:[#allocation174_spill] sm:$0xff] %v10558_v61  ;;  %v1234_v32 = vadd.f32 %v10365_v45, %v14097_v0  ;;  %v14101_v0 = vld [vmem:[#allocation196_spill] sm:$0xff] }
 0x28a   :  { %v10566_v7 = vpop.f32.mrf.mxu1  ;;  %v1795_v26 = vpop.f32.mrf.mxu0  ;;  %7450 = vmatmul.mubr.bf16.gmra.mxu1 %v14095_v37  ;;  %7586 = vmatmul.mubr.bf16.gmra.mxu0 %v2522_v49  ;;  %v2526_v47 = vsel %vm2459_vm3, %v2521_v2, %v2525_v39 }
 0x28b   :  { %v10569_v38 = vadd.f32 %v1795_v26, %v1231_v6  ;;  %7453 = vmatprep.mubr.msk.bf16.mxu1 %vm8507_vm0, %v13811_v3  ;;  %7589 = vmatprep.mubr.msk.bf16.mxu0 %vm8507_vm0, %v13811_v3  ;;  %v14098_v6 = vld [vmem:[#allocation101_spill] sm:$0xff] }
 0x28c   :  { %v7167_v43 = vpop.f32.mrf.mxu1  ;;  %v7303_v55 = vpop.f32.mrf.mxu0  ;;  %v2527_v54 = vrot.slane %v14098_v6, 1 }
 0x28d   :  { %14096 = vst [vmem:[#allocation191_spill] sm:$0xff] %v10569_v38  ;;  %v14100_v55 = vld [vmem:[#allocation131_spill] sm:$0xff] }
 0x28e   :  { %v1305_v37 = vpop.f32.mrf.mxu1  ;;  %v1798_v49 = vpop.f32.mrf.mxu0  ;;  %v1239_v38 = vadd.f32 %v10374_v60, %v14100_v55  ;;  %v14102_v60 = vld [vmem:[#allocation132_spill] sm:$0xff] }
 0x28f   :  { %v10580_v26 = vadd.f32 %v1798_v49, %v1234_v32  ;;  %v2529_v32 = vor.u32 %v2528_v21, %v2527_v54  ;;  %v14105_v21 = vld [vmem:[#allocation134_spill] sm:$0xff] }
 0x290   :  { %v7168_v20 = vpop.f32.mrf.mxu1  ;;  %v7304_v43 = vpop.f32.mrf.mxu0 }
 0x291   :  { %v1242_v20 = vadd.f32 %v10385_v48, %v14102_v60  ;;  %v2530_v23 = vsel %vm2459_vm3, %v2525_v39, %v2529_v32 }
 0x292   :  { %v1803_v61 = vpop.f32.mrf.mxu0  ;;  %v2055_v45 = vpop.f32.mrf.mxu1  ;;  %7454 = vmatmul.mubr.bf16.gmra.mxu1 %v9929_v56  ;;  %7590 = vmatmul.mubr.bf16.gmra.mxu0 %v2526_v47  ;;  %v14103_v47 = vld [vmem:[#allocation104_spill] sm:$0xff] }
 0x293   :  { %v10589_v44 = vadd.f32 %v1803_v61, %v1239_v38  ;;  %v10592_v2 = vadd.f32 %v2055_v45, %v14101_v0  ;;  %7457 = vmatprep.mubr.msk.bf16.mxu1 %vm8507_vm0, %v13811_v3  ;;  %7593 = vmatprep.mubr.msk.bf16.mxu0 %vm8507_vm0, %v13811_v3  ;;  %v2531_v61 = vrot.slane %v14103_v47, 1  ;;  %v14104_v38 = vld [vmem:[#allocation102_spill] sm:$0xff] }
 0x294   :  { %v7307_v37 = vpop.f32.mrf.mxu0  ;;  %v7359_v49 = vpop.f32.mrf.mxu1  ;;  %v2532_v55 = vrot.slane %v14104_v38, 2 }
 0x295   :  { %v1247_v37 = vadd.f32 %v10394_v11, %v14105_v21  ;;  %v14106_v11 = vld [vmem:[#allocation135_spill] sm:$0xff] }
 0x296   :  { %v1806_v43 = vpop.f32.mrf.mxu0  ;;  %v2058_v56 = vpop.f32.mrf.mxu1  ;;  %v2533_v60 = vor.u32 %v2532_v55, %v2531_v61  ;;  %v14107_v61 = vld [vmem:[#allocation107_spill] sm:$0xff] }
 0x297   :  { %v10602_v45 = vadd.f32 %v1806_v43, %v1242_v20  ;;  %v10605_v0 = vadd.f32 %v2058_v56, %v9926_v24  ;;  %v2535_v55 = vrot.slane %v14107_v61, 1 }
 0x298   :  { %v7308_v6 = vpop.f32.mrf.mxu0  ;;  %v7360_v54 = vpop.f32.mrf.mxu1 }
 0x299   :  { %v1250_v6 = vadd.f32 %v10405_v9, %v14106_v11  ;;  %v14108_v54 = vld [vmem:[#allocation105_spill] sm:$0xff] }
 0x29a   :  { %v1811_v49 = vpop.f32.mrf.mxu0  ;;  %v2063_v48 = vpop.f32.mrf.mxu1  ;;  %7458 = vmatmul.mubr.bf16.gmra.mxu1 %v9951_v17  ;;  %7594 = vmatmul.mubr.bf16.gmra.mxu0 %v2530_v23  ;;  %v2534_v23 = vsel %vm2459_vm3, %v2529_v32, %v2533_v60  ;;  %v2536_v21 = vrot.slane %v14108_v54, 2 }
 0x29b   :  { %v10611_v47 = vadd.f32 %v1811_v49, %v1247_v37  ;;  %v10614_v20 = vadd.f32 %v2063_v48, %v9937_v50  ;;  %7461 = vmatprep.mubr.msk.bf16.mxu1 %vm8507_vm0, %v13811_v3  ;;  %7597 = vmatprep.mubr.msk.bf16.mxu0 %vm8507_vm0, %v13811_v3  ;;  %v14109_v48 = vld [vmem:[#allocation137_spill] sm:$0xff] }
 0x29c   :  { %v7311_v24 = vpop.f32.mrf.mxu0  ;;  %v7363_v39 = vpop.f32.mrf.mxu1 }
 0x29d   :  { %v1255_v24 = vadd.f32 %v10414_v42, %v14109_v48  ;;  %v14110_v42 = vld [vmem:[#allocation138_spill] sm:$0xff]  ;;  %v14112_v48 = vld [vmem:[#allocation108_spill] sm:$0xff] }
 0x29e   :  { %v1814_v43 = vpop.f32.mrf.mxu0  ;;  %v2066_v17 = vpop.f32.mrf.mxu1 }
 0x29f   :  { %v10623_v56 = vadd.f32 %v1814_v43, %v1250_v6  ;;  %v10626_v50 = vadd.f32 %v2066_v17, %v9948_v27  ;;  %v2537_v27 = vor.u32 %v2536_v21, %v2535_v55  ;;  %v1258_v17 = vadd.f32 %v10425_v18, %v14110_v42  ;;  %v14113_v21 = vld [vmem:[#allocation141_spill] sm:$0xff] }
 0x2a0   :  { %v7312_v37 = vpop.f32.mrf.mxu0  ;;  %v7364_v49 = vpop.f32.mrf.mxu1 }
 0x2a2   :  { %v1819_v39 = vpop.f32.mrf.mxu0  ;;  %v2071_v9 = vpop.f32.mrf.mxu1  ;;  %7462 = vmatmul.mubr.bf16.gmra.mxu1 %v9973_v12  ;;  %7598 = vmatmul.mubr.bf16.gmra.mxu0 %v2534_v23  ;;  %v14111_v23 = vld [vmem:[#allocation110_spill] sm:$0xff] }
 0x2a3   :  { %v10633_v32 = vadd.f32 %v1819_v39, %v1255_v24  ;;  %v10636_v11 = vadd.f32 %v2071_v9, %v9959_v41  ;;  %7465 = vmatprep.mubr.msk.bf16.mxu1 %vm8507_vm0, %v13811_v3  ;;  %7601 = vmatprep.mubr.msk.bf16.mxu0 %vm8507_vm0, %v13811_v3  ;;  %v2539_v49 = vrot.slane %v14111_v23, 1  ;;  %v2540_v24 = vrot.slane %v14112_v48, 2 }
 0x2a4   :  { %v7315_v6 = vpop.f32.mrf.mxu0  ;;  %v7367_v43 = vpop.f32.mrf.mxu1  ;;  %v2538_v9 = vsel %vm2459_vm3, %v2533_v60, %v2537_v27 }
 0x2a5   :  { %v1263_v6 = vadd.f32 %v10434_v16, %v14113_v21  ;;  %v2541_v42 = vor.u32 %v2540_v24, %v2539_v49  ;;  %v14114_v16 = vld [vmem:[#allocation143_spill] sm:$0xff]  ;;  %v14115_v24 = vld [vmem:[#allocation113_spill] sm:$0xff] }
 0x2a6   :  { %v1822_v37 = vpop.f32.mrf.mxu0  ;;  %v2074_v12 = vpop.f32.mrf.mxu1 }
 0x2a7   :  { %v10646_v41 = vadd.f32 %v1822_v37, %v1258_v17  ;;  %v10649_v39 = vadd.f32 %v2074_v12, %v9970_v62  ;;  %v2542_v12 = vsel %vm2459_vm3, %v2537_v27, %v2541_v42 }
 0x2a8   :  { %v7316_v54 = vpop.f32.mrf.mxu0  ;;  %v7368_v55 = vpop.f32.mrf.mxu1 }
 0x2a9   :  { %v1266_v54 = vadd.f32 %v10448_v29, %v14114_v16  ;;  %v14116_v55 = vld [vmem:[#allocation111_spill] sm:$0xff] }
 0x2aa   :  { %v1827_v43 = vpop.f32.mrf.mxu0  ;;  %v2079_v18 = vpop.f32.mrf.mxu1  ;;  %7466 = vmatmul.mubr.bf16.gmra.mxu1 %v9995_v13  ;;  %7602 = vmatmul.mubr.bf16.gmra.mxu0 %v2538_v9  ;;  %v2543_v9 = vrot.slane %v14115_v24, 1  ;;  %v2544_v21 = vrot.slane %v14116_v55, 2 }
 0x2ab   :  { %v10655_v23 = vadd.f32 %v1827_v43, %v1263_v6  ;;  %v10658_v17 = vadd.f32 %v2079_v18, %v9981_v1  ;;  %7469 = vmatprep.mubr.msk.bf16.mxu1 %vm8507_vm0, %v13811_v3  ;;  %7605 = vmatprep.mubr.msk.bf16.mxu0 %vm8507_vm0, %v13811_v3  ;;  %v14117_v18 = vld [vmem:[#allocation146_spill] sm:$0xff] }
 0x2ac   :  { %v7319_v62 = vpop.f32.mrf.mxu0  ;;  %v7371_v60 = vpop.f32.mrf.mxu1 }
 0x2ad   :  { %v1271_v62 = vadd.f32 %v10461_v33, %v14117_v18  ;;  %v8482_v33 = vld [vmem:[%s13492_s1 + $0x1a0] sm:$0xff]  }
 0x2ae   :  { %v1830_v37 = vpop.f32.mrf.mxu0  ;;  %v2082_v13 = vpop.f32.mrf.mxu1  ;;  %v14120_v18 = vld [vmem:[#allocation114_spill] sm:$0xff]  ;;  %7864 = vmatpush3.bf16.msra.mxu0 %v8482_v33 }
 0x2af   :  { %v10667_v49 = vadd.f32 %v1830_v37, %v1266_v54  ;;  %v10670_v1 = vadd.f32 %v2082_v13, %v9992_v46  ;;  %v2545_v46 = vor.u32 %v2544_v21, %v2543_v9  ;;  %7865 = vmatprep.subr.bf16.mxu0 %v13811_v3 }
 0x2b0   :  { %v7320_v6 = vpop.f32.mrf.mxu0  ;;  %v7372_v43 = vpop.f32.mrf.mxu1 }
 0x2b1   :  { %v2546_v21 = vsel %vm2459_vm3, %v2541_v42, %v2545_v46 }
 0x2b2   :  { %v1835_v60 = vpop.f32.mrf.mxu0  ;;  %v2087_v29 = vpop.f32.mrf.mxu1  ;;  %7470 = vmatmul.mubr.bf16.gmra.mxu1 %v10020_v28  ;;  %7606 = vmatmul.mubr.bf16.gmra.mxu0 %v2542_v12  ;;  %v14118_v28 = vld [vmem:[#allocation148_spill] sm:$0xff] }
 0x2b3   :  { %v10677_v27 = vadd.f32 %v1835_v60, %v1271_v62  ;;  %v10680_v16 = vadd.f32 %v2087_v29, %v10003_v53  ;;  %7473 = vmatprep.mubr.msk.bf16.mxu1 %vm8507_vm0, %v13811_v3  ;;  %7609 = vmatprep.mubr.msk.bf16.mxu0 %vm8507_vm0, %v13811_v3  ;;  %v1274_v13 = vadd.f32 %v10473_v15, %v14118_v28  ;;  %v14119_v53 = vld [vmem:[#allocation115_spill] sm:$0xff]  ;;  %v2548_v62 = vrot.slane %v14120_v18, 2  ;;  %v14149_v18 = vld [vmem:[#allocation152_spill] sm:$0xff] }
 0x2b4   :  { %v7323_v54 = vpop.f32.mrf.mxu0  ;;  %v7375_v37 = vpop.f32.mrf.mxu1  ;;  %v2547_v43 = vrot.slane %v14119_v53, 1 }
 0x2b5   :  { %v14121_v37 = vld [vmem:[#allocation151_spill] sm:$0xff] }
 0x2b6   :  { %v1838_v12 = vpop.f32.mrf.mxu0  ;;  %v2090_v6 = vpop.f32.mrf.mxu1  ;;  %v1279_v15 = vadd.f32 %v10485_v30, %v14121_v37  ;;  %v2549_v33 = vor.u32 %v2548_v62, %v2547_v43  ;;  %v14122_v30 = vld [vmem:[#allocation153_spill] sm:$0xff] }
 0x2b7   :  { %v10693_v60 = vadd.f32 %v1838_v12, %v1274_v13  ;;  %v10696_v9 = vadd.f32 %v2090_v6, %v10017_v51  ;;  %v1282_v6 = vadd.f32 %v10500_v10, %v14122_v30  ;;  %v8483_v10 = vld [vmem:[%s13492_s1 + $0x198] sm:$0xff]  }
 0x2b8   :  { %v7324_v29 = vpop.f32.mrf.mxu0  ;;  %v7376_v54 = vpop.f32.mrf.mxu1  ;;  %v2550_v43 = vsel %vm2459_vm3, %v2545_v46, %v2549_v33  ;;  %7866 = vmatpush3.bf16.msra.mxu0 %v8483_v10 }
 0x2b9   :  { %v14124_v54 = vld [vmem:[#allocation7_spill] sm:$0xff]  ;;  %7867 = vmatprep.subr.bf16.mxu0 %v13811_v3 }
 0x2ba   :  { %v1843_v28 = vpop.f32.mrf.mxu0  ;;  %v2095_v55 = vpop.f32.mrf.mxu1  ;;  %7474 = vmatmul.mubr.bf16.gmra.mxu1 %v10041_v19  ;;  %7610 = vmatmul.mubr.bf16.gmra.mxu0 %v2546_v21  ;;  %v2552_v37 = vrot.slane %v14124_v54, 2 }
 0x2bb   :  { %v10703_v13 = vadd.f32 %v1843_v28, %v1279_v15  ;;  %v10706_v51 = vadd.f32 %v2095_v55, %v10027_v5  ;;  %7477 = vmatprep.mubr.msk.bf16.mxu1 %vm8507_vm0, %v13811_v3  ;;  %7613 = vmatprep.mubr.msk.bf16.mxu0 %vm8507_vm0, %v13811_v3  ;;  %v14123_v55 = vld [vmem:[#allocation8_spill] sm:$0xff] }
 0x2bc   :  { %v7327_v42 = vpop.f32.mrf.mxu0  ;;  %v7379_v12 = vpop.f32.mrf.mxu1  ;;  %v2551_v21 = vrot.slane %v14123_v55, 1 }
 0x2bd   :  { %v14125_v42 = vld [vmem:[#allocation156_spill] sm:$0xff] }
 0x2be   :  { %v1846_v29 = vpop.f32.mrf.mxu0  ;;  %v2098_v19 = vpop.f32.mrf.mxu1  ;;  %v1287_v12 = vadd.f32 %v10513_v34, %v14125_v42  ;;  %v2553_v34 = vor.u32 %v2552_v37, %v2551_v21  ;;  %v14127_v42 = vld [vmem:[#allocation13_spill] sm:$0xff] }
 0x2bf   :  { %v10715_v62 = vadd.f32 %v1846_v29, %v1282_v6  ;;  %v10718_v5 = vadd.f32 %v2098_v19, %v10038_v25 }
 0x2c0   :  { %v7328_v15 = vpop.f32.mrf.mxu0  ;;  %v7380_v28 = vpop.f32.mrf.mxu1  ;;  %v2554_v37 = vsel %vm2459_vm3, %v2549_v33, %v2553_v34 }
 0x2c1   :  { %v14126_v15 = vld [vmem:[#allocation158_spill] sm:$0xff] }
 0x2c2   :  { %v1851_v30 = vpop.f32.mrf.mxu0  ;;  %v2103_v46 = vpop.f32.mrf.mxu1  ;;  %7478 = vmatmul.mubr.bf16.gmra.mxu1 %v10063_v8  ;;  %7614 = vmatmul.mubr.bf16.gmra.mxu0 %v2550_v43  ;;  %v1290_v28 = vadd.f32 %v10528_v14, %v14126_v15  ;;  %v8485_v15 = vld [vmem:[%s13492_s1 + $0x188] sm:$0xff]  }
 0x2c3   :  { %v10728_v25 = vadd.f32 %v1851_v30, %v1287_v12  ;;  %v10731_v6 = vadd.f32 %v2103_v46, %v10049_v59  ;;  %7481 = vmatprep.mubr.msk.bf16.mxu1 %vm8507_vm0, %v13811_v3  ;;  %7617 = vmatprep.mubr.msk.bf16.mxu0 %vm8507_vm0, %v13811_v3  ;;  %v8484_v59 = vld [vmem:[%s13492_s1 + $0x190] sm:$0xff]   ;;  %v2555_v12 = vrot.slane %v14127_v42, 1  ;;  %v14128_v30 = vld [vmem:[#allocation9_spill] sm:$0xff] }
 0x2c4   :  { %v7331_v29 = vpop.f32.mrf.mxu0  ;;  %v7383_v19 = vpop.f32.mrf.mxu1  ;;  %v2556_v46 = vrot.slane %v14128_v30, 2  ;;  %7868 = vmatpush3.bf16.msra.mxu0 %v8484_v59 }
 0x2c5   :  { %v14129_v29 = vld [vmem:[#allocation161_spill] sm:$0xff]  ;;  %7869 = vmatprep.subr.bf16.mxu0 %v13811_v3 }
 0x2c6   :  { %v1854_v8 = vpop.f32.mrf.mxu0  ;;  %v2106_v43 = vpop.f32.mrf.mxu1  ;;  %v1295_v19 = vadd.f32 %v10541_v58, %v14129_v29 }
 0x2c7   :  { %v10745_v54 = vadd.f32 %v1854_v8, %v1290_v28  ;;  %v10748_v21 = vadd.f32 %v2106_v43, %v10060_v22  ;;  %v2557_v22 = vor.u32 %v2556_v46, %v2555_v12  ;;  %v14130_v43 = vld [vmem:[#allocation163_spill] sm:$0xff] }
 0x2c8   :  { %v7332_v14 = vpop.f32.mrf.mxu0  ;;  %v7384_v10 = vpop.f32.mrf.mxu1  ;;  %7870 = vmatpush3.bf16.msra.mxu0 %v8485_v15 }
 0x2c9   :  { %v1298_v14 = vadd.f32 %v10556_v40, %v14130_v43  ;;  %7871 = vmatprep.subr.bf16.mxu0 %v13811_v3  ;;  %v14131_v10 = vld [vmem:[#allocation19_spill] sm:$0xff] }
 0x2ca   :  { %v1859_v30 = vpop.f32.mrf.mxu0  ;;  %v2111_v28 = vpop.f32.mrf.mxu1  ;;  %7482 = vmatmul.mubr.bf16.gmra.mxu1 %v10085_v36  ;;  %7618 = vmatmul.mubr.bf16.gmra.mxu0 %v2554_v37  ;;  %v8486_v36 = vld [vmem:[%s13492_s1 + $0x180] sm:$0xff]   ;;  %v2559_v29 = vrot.slane %v14131_v10, 1 }
 0x2cb   :  { %v10758_v8 = vadd.f32 %v1859_v30, %v1295_v19  ;;  %v10761_v33 = vadd.f32 %v2111_v28, %v10071_v31  ;;  %7485 = vmatprep.mubr.msk.bf16.mxu1 %vm8507_vm0, %v13811_v3  ;;  %7621 = vmatprep.mubr.msk.bf16.mxu0 %vm8507_vm0, %v13811_v3  ;;  %v2558_v30 = vsel %vm2459_vm3, %v2553_v34, %v2557_v22  ;;  %v14132_v19 = vld [vmem:[#allocation14_spill] sm:$0xff] }
 0x2cc   :  { %v7335_v58 = vpop.f32.mrf.mxu0  ;;  %v7387_v59 = vpop.f32.mrf.mxu1  ;;  %v2560_v15 = vrot.slane %v14132_v19, 2  ;;  %7872 = vmatpush3.bf16.msra.mxu0 %v8486_v36  ;;  %v14136_v19 = vld [vmem:[#allocation142_spill] sm:$0xff] }
 0x2cd   :  { %v14133_v58 = vld [vmem:[#allocation166_spill] sm:$0xff]  ;;  %8201 = vmatprep.subr.bf16.mxu0 %v13811_v3 }
 0x2ce   :  { %v1862_v31 = vpop.f32.mrf.mxu0  ;;  %v2114_v12 = vpop.f32.mrf.mxu1  ;;  %v1303_v59 = vadd.f32 %v10566_v7, %v14133_v58 }
 0x2cf   :  { %v10774_v46 = vadd.f32 %v1862_v31, %v1298_v14  ;;  %v10777_v37 = vadd.f32 %v2114_v12, %v10082_v4  ;;  %v2561_v14 = vor.u32 %v2560_v15, %v2559_v29  ;;  %v14137_v29 = vld [vmem:[#allocation140_spill] sm:$0xff] }
 0x2d0   :  { %v7336_v40 = vpop.f32.mrf.mxu0  ;;  %v7388_v28 = vpop.f32.mrf.mxu1 }
 0x2d2   :  { %v1867_v43 = vpop.f32.mrf.mxu0  ;;  %v2119_v42 = vpop.f32.mrf.mxu1  ;;  %7486 = vmatmul.mubr.bf16.gmra.mxu1 %v10107_v57  ;;  %7622 = vmatmul.mubr.bf16.gmra.mxu0 %v2558_v30  ;;  %v2562_v57 = vsel %vm2459_vm3, %v2557_v22, %v2561_v14  ;;  %v14134_v30 = vld [vmem:[#allocation25_spill] sm:$0xff] }
 0x2d3   :  { %v10785_v34 = vadd.f32 %v1867_v43, %v1303_v59  ;;  %v10788_v4 = vadd.f32 %v2119_v42, %v10093_v35  ;;  %7489 = vmatprep.mubr.msk.bf16.mxu1 %vm8507_vm0, %v13811_v3  ;;  %7625 = vmatprep.mubr.msk.bf16.mxu0 %vm8507_vm0, %v13811_v3  ;;  %v2563_v28 = vrot.slane %v14134_v30, 1  ;;  %v14135_v35 = vld [vmem:[#allocation20_spill] sm:$0xff] }
 0x2d4   :  { %v7339_v7 = vpop.f32.mrf.mxu0  ;;  %v7391_v36 = vpop.f32.mrf.mxu1  ;;  %v2564_v42 = vrot.slane %v14135_v35, 2 }
 0x2d6   :  { %v1870_v31 = vpop.f32.mrf.mxu0  ;;  %v2122_v12 = vpop.f32.mrf.mxu1 }
 0x2d7   :  { %v10795_v40 = vadd.f32 %v2122_v12, %v10104_v63  ;;  %v2565_v63 = vor.u32 %v2564_v42, %v2563_v28  ;;  %v14142_v28 = vld [vmem:[#allocation147_spill] sm:$0xff] }
 0x2d8   :  { %v7340_v58 = vpop.f32.mrf.mxu0  ;;  %v7392_v59 = vpop.f32.mrf.mxu1 }
 0x2da   :  { %v2127_v43 = vpop.f32.mrf.mxu1  ;;  %7490 = vmatmul.mubr.bf16.gmra.mxu1 %v14136_v19  ;;  %v2741_v10 = vpop.f32.mrf.mxu0  ;;  %7626 = vmatmul.mubr.bf16.gmra.mxu0 %v2562_v57  ;;  %v14138_v19 = vld [vmem:[#allocation31_spill] sm:$0xff]  ;;  %v14139_v57 = vld [vmem:[#allocation26_spill] sm:$0xff] }
 0x2db   :  { %v10802_v15 = vadd.f32 %v2127_v43, %v14137_v29  ;;  %v10805_v7 = vadd.f32 %v2741_v10, %v10592_v2  ;;  %7493 = vmatprep.mubr.msk.bf16.mxu1 %vm8507_vm0, %v13811_v3  ;;  %7629 = vmatprep.mubr.msk.bf16.mxu0 %vm8507_vm0, %v13811_v3  ;;  %v2567_v58 = vrot.slane %v14138_v19, 1  ;;  %v2568_v59 = vrot.slane %v14139_v57, 2  ;;  %v14140_v43 = vld [vmem:[#allocation124_spill] sm:$0xff] }
 0x2dc   :  { %v7395_v22 = vpop.f32.mrf.mxu1  ;;  %v7531_v36 = vpop.f32.mrf.mxu0  ;;  %v2566_v10 = vsel %vm2459_vm3, %v2561_v14, %v2565_v63 }
 0x2dd   :  { %v2569_v22 = vor.u32 %v2568_v59, %v2567_v58  ;;  %v14143_v36 = vld [vmem:[#allocation145_spill] sm:$0xff] }
 0x2de   :  { %v2130_v31 = vpop.f32.mrf.mxu1  ;;  %v2744_v12 = vpop.f32.mrf.mxu0 }
 0x2df   :  { %v10814_v29 = vadd.f32 %v2130_v31, %v14140_v43  ;;  %v10817_v2 = vadd.f32 %v2744_v12, %v10605_v0  ;;  %v2570_v31 = vsel %vm2459_vm3, %v2565_v63, %v2569_v22  ;;  %v14145_v12 = vld [vmem:[#allocation127_spill] sm:$0xff]  ;;  %v14148_v43 = vld [vmem:[#allocation32_spill] sm:$0xff] }
 0x2e0   :  { %v7396_v35 = vpop.f32.mrf.mxu1  ;;  %v7532_v30 = vpop.f32.mrf.mxu0 }
 0x2e1   :  { %14141 = vst [vmem:[#allocation193_spill] sm:$0xff] %v10817_v2 }
 0x2e2   :  { %v2135_v55 = vpop.f32.mrf.mxu1  ;;  %7494 = vmatmul.mubr.bf16.gmra.mxu1 %v14142_v28  ;;  %v2749_v42 = vpop.f32.mrf.mxu0  ;;  %7630 = vmatmul.mubr.bf16.gmra.mxu0 %v2566_v10  ;;  %v2572_v10 = vrot.slane %v14148_v43, 2  ;;  %v14155_v43 = vld [vmem:[#allocation130_spill] sm:$0xff] }
 0x2e3   :  { %v10822_v19 = vadd.f32 %v2135_v55, %v14143_v36  ;;  %v10825_v57 = vadd.f32 %v2749_v42, %v10614_v20  ;;  %7497 = vmatprep.mubr.msk.bf16.mxu1 %vm8507_vm0, %v13811_v3  ;;  %7633 = vmatprep.mubr.msk.bf16.mxu0 %vm8507_vm0, %v13811_v3  ;;  %v14147_v20 = vld [vmem:[#allocation37_spill] sm:$0xff] }
 0x2e4   :  { %v7399_v0 = vpop.f32.mrf.mxu1  ;;  %v7535_v14 = vpop.f32.mrf.mxu0  ;;  %v2571_v59 = vrot.slane %v14147_v20, 1 }
 0x2e5   :  { %14144 = vst [vmem:[#allocation177_spill] sm:$0xff] %v10825_v57  ;;  %v14150_v14 = vld [vmem:[#allocation150_spill] sm:$0xff]  ;;  %v14212_v57 = vld [vmem:[#allocation173_spill] sm:$0xff] }
 0x2e6   :  { %v2138_v30 = vpop.f32.mrf.mxu1  ;;  %v2752_v35 = vpop.f32.mrf.mxu0 }
 0x2e7   :  { %v10833_v58 = vadd.f32 %v2138_v30, %v14145_v12  ;;  %v10836_v55 = vadd.f32 %v2752_v35, %v10626_v50  ;;  %v2573_v50 = vor.u32 %v2572_v10, %v2571_v59  ;;  %v96_v30 = vld [vmem:[%s13493_s0 + $0x270] sm:$0xff] }
 0x2e8   :  { %v7400_v28 = vpop.f32.mrf.mxu1  ;;  %v7536_v42 = vpop.f32.mrf.mxu0 }
 0x2e9   :  { %14146 = vst [vmem:[#allocation194_spill] sm:$0xff] %v10836_v55  ;;  %v14153_v42 = vld [vmem:[#allocation45_spill] sm:$0xff]  ;;  %v2574_v20 = vsel %vm2459_vm3, %v2569_v22, %v2573_v50 }
 0x2ea   :  { %v2143_v36 = vpop.f32.mrf.mxu1  ;;  %7498 = vmatmul.mubr.bf16.gmra.mxu1 %v14149_v18  ;;  %v2757_v0 = vpop.f32.mrf.mxu0  ;;  %7634 = vmatmul.mubr.bf16.gmra.mxu0 %v2570_v31  ;;  %v97_v18 = vld [vmem:[%s13493_s0 + $0x278] sm:$0xff] }
 0x2eb   :  { %v10842_v53 = vadd.f32 %v2143_v36, %v14150_v14  ;;  %v10845_v63 = vadd.f32 %v2757_v0, %v10636_v11  ;;  %7501 = vmatprep.mubr.msk.bf16.mxu1 %vm8507_vm0, %v13811_v3  ;;  %7637 = vmatprep.mubr.msk.bf16.mxu0 %vm8507_vm0, %v13811_v3  ;;  %v10857_v28 = vpack.c.bf16 %v97_v18, %v96_v30  ;;  %v2575_v36 = vrot.slane %v14153_v42, 1  ;;  %v14154_v0 = vld [vmem:[#allocation38_spill] sm:$0xff]  ;;  %v14158_v42 = vld [vmem:[#allocation155_spill] sm:$0xff] }
 0x2ec   :  { %v7403_v35 = vpop.f32.mrf.mxu1  ;;  %v7539_v31 = vpop.f32.mrf.mxu0  ;;  %v2576_v14 = vrot.slane %v14154_v0, 2 }
 0x2ed   :  { %14151 = vst [vmem:[#allocation116_spill] sm:$0xff] %v10845_v63  ;;  %14152 = vst [vmem:[#allocation180_spill] sm:$0xff] %v10857_v28  ;;  %v14157_v31 = vld [vmem:[#allocation197_spill] sm:$0xff]  ;;  %v1969_v30 = vrot.slane %v10857_v28, 1 }
 0x2ee   :  { %v2146_v12 = vpop.f32.mrf.mxu1  ;;  %v2760_v11 = vpop.f32.mrf.mxu0  ;;  %v2577_v18 = vor.u32 %v2576_v14, %v2575_v36 }
 0x2ef   :  { %v10862_v59 = vadd.f32 %v2146_v12, %v14155_v43  ;;  %v10865_v10 = vadd.f32 %v2760_v11, %v10649_v39 }
 0x2f0   :  { %v7404_v24 = vpop.f32.mrf.mxu1  ;;  %v7540_v48 = vpop.f32.mrf.mxu0  ;;  %v2578_v11 = vsel %vm2459_vm3, %v2573_v50, %v2577_v18 }
 0x2f1   :  { %14156 = vst [vmem:[#allocation117_spill] sm:$0xff] %v10865_v10  ;;  %v14165_v10 = vld [vmem:[#allocation160_spill] sm:$0xff] }
 0x2f2   :  { %v2151_v35 = vpop.f32.mrf.mxu1  ;;  %7502 = vmatmul.mubr.bf16.gmra.mxu1 %v14157_v31  ;;  %v2765_v61 = vpop.f32.mrf.mxu0  ;;  %7638 = vmatmul.mubr.bf16.gmra.mxu0 %v2574_v20  ;;  %v14160_v20 = vld [vmem:[#allocation133_spill] sm:$0xff] }
 0x2f3   :  { %v10871_v0 = vadd.f32 %v2151_v35, %v14158_v42  ;;  %v10874_v43 = vadd.f32 %v2765_v61, %v10658_v17  ;;  %7505 = vmatprep.mubr.msk.bf16.mxu1 %vm8507_vm0, %v13811_v3  ;;  %7641 = vmatprep.mubr.msk.bf16.mxu0 %vm8507_vm0, %v13811_v3  ;;  %v1970_v12 = vsel %vm1364_vm2, %v14160_v20, %v1969_v30  ;;  %v14161_v42 = vld [vmem:[#allocation157_spill] sm:$0xff]  ;;  %v14164_v35 = vld [vmem:[#allocation44_spill] sm:$0xff] }
 0x2f4   :  { %v7407_v48 = vpop.f32.mrf.mxu1  ;;  %v7543_v39 = vpop.f32.mrf.mxu0  ;;  %v14163_v17 = vld [vmem:[#allocation49_spill] sm:$0xff]  ;;  %v2580_v31 = vrot.slane %v14164_v35, 2 }
 0x2f5   :  { %14159 = vst [vmem:[#allocation118_spill] sm:$0xff] %v10874_v43  ;;  %v2579_v14 = vrot.slane %v14163_v17, 1 }
 0x2f6   :  { %v2154_v24 = vpop.f32.mrf.mxu1  ;;  %v2768_v22 = vpop.f32.mrf.mxu0 }
 0x2f7   :  { %v10884_v36 = vadd.f32 %v2154_v24, %v14161_v42  ;;  %v10887_v61 = vadd.f32 %v2768_v22, %v10670_v1  ;;  %v2581_v1 = vor.u32 %v2580_v31, %v2579_v14 }
 0x2f8   :  { %v7408_v38 = vpop.f32.mrf.mxu1  ;;  %v7544_v48 = vpop.f32.mrf.mxu0 }
 0x2f9   :  { %14162 = vst [vmem:[#allocation183_spill] sm:$0xff] %v10887_v61 }
 0x2fa   :  { %v2159_v39 = vpop.f32.mrf.mxu1  ;;  %7506 = vmatmul.mubr.bf16.gmra.mxu1 %v1970_v12  ;;  %v2773_v43 = vpop.f32.mrf.mxu0  ;;  %7642 = vmatmul.mubr.bf16.gmra.mxu0 %v2578_v11  ;;  %v14167_v12 = vld [vmem:[#allocation55_spill] sm:$0xff] }
 0x2fb   :  { %v10892_v20 = vadd.f32 %v2159_v39, %v14165_v10  ;;  %v10895_v50 = vadd.f32 %v2773_v43, %v10680_v16  ;;  %7509 = vmatprep.mubr.msk.bf16.mxu1 %vm8507_vm0, %v13811_v3  ;;  %7645 = vmatprep.mubr.msk.bf16.mxu0 %vm8507_vm0, %v13811_v3  ;;  %v2583_v48 = vrot.slane %v14167_v12, 1  ;;  %v14168_v11 = vld [vmem:[#allocation51_spill] sm:$0xff]  ;;  %v14169_v10 = vld [vmem:[#allocation136_spill] sm:$0xff]  ;;  %v2582_v43 = vsel %vm2459_vm3, %v2577_v18, %v2581_v1  ;;  %v14172_v12 = vld [vmem:[#allocation10_spill] sm:$0xff] }
 0x2fc   :  { %v7411_v24 = vpop.f32.mrf.mxu1  ;;  %v7547_v38 = vpop.f32.mrf.mxu0  ;;  %v2584_v35 = vrot.slane %v14168_v11, 2  ;;  %v3147_v63 = vrot.slane %v14172_v12, 2  ;;  %v14173_v11 = vld [vmem:[#allocation162_spill] sm:$0xff]  ;;  %v14179_v12 = vld [vmem:[#allocation139_spill] sm:$0xff] }
 0x2fd   :  { %14166 = vst [vmem:[#allocation119_spill] sm:$0xff] %v10895_v50  ;;  %v14171_v24 = vld [vmem:[#allocation2_spill] sm:$0xff] }
 0x2fe   :  { %v2162_v22 = vpop.f32.mrf.mxu1  ;;  %v2776_v42 = vpop.f32.mrf.mxu0  ;;  %v2585_v31 = vor.u32 %v2584_v35, %v2583_v48  ;;  %v3146_v38 = vrot.slane %v14171_v24, 2  ;;  %v14177_v48 = vld [vmem:[#allocation61_spill] sm:$0xff] }
 0x2ff   :  { %v10904_v39 = vadd.f32 %v2162_v22, %v14169_v10  ;;  %v10907_v16 = vadd.f32 %v2776_v42, %v10696_v9  ;;  %v14178_v10 = vld [vmem:[#allocation56_spill] sm:$0xff] }
 0x300   :  { %v7412_v17 = vpop.f32.mrf.mxu1  ;;  %v7548_v50 = vpop.f32.mrf.mxu0  ;;  %v2586_v35 = vsel %vm2459_vm3, %v2581_v1, %v2585_v31 }
 0x301   :  { %14170 = vst [vmem:[#allocation120_spill] sm:$0xff] %v10907_v16  ;;  %v3148_v50 = vsel %vm3145_vm4, %v3146_v38, %v3147_v63 }
 0x302   :  { %v2167_v61 = vpop.f32.mrf.mxu1  ;;  %7510 = vmatmul.mubr.bf16.gmra.mxu1 %v1969_v30  ;;  %v2781_v14 = vpop.f32.mrf.mxu0  ;;  %7646 = vmatmul.mubr.bf16.gmra.mxu0 %v2582_v43  ;;  %v2588_v43 = vrot.slane %v14178_v10, 2 }
 0x303   :  { %v10913_v55 = vadd.f32 %v2167_v61, %v14173_v11  ;;  %v10916_v22 = vadd.f32 %v2781_v14, %v10706_v51  ;;  %7649 = vmatprep.mubr.msk.bf16.mxu0 %vm8507_vm0, %v13811_v3  ;;  %7701 = vmatprep.mubr.msk.bf16.mxu1 %vm8507_vm0, %v13811_v3  ;;  %v14175_v61 = vld [vmem:[#allocation165_spill] sm:$0xff]  ;;  %v2587_v11 = vrot.slane %v14177_v48, 1  ;;  %v14184_v48 = vld [vmem:[#allocation167_spill] sm:$0xff] }
 0x304   :  { %v7415_v9 = vpop.f32.mrf.mxu1  ;;  %v7551_v30 = vpop.f32.mrf.mxu0 }
 0x305   :  { %14174 = vst [vmem:[#allocation186_spill] sm:$0xff] %v10916_v22  ;;  %v14198_v22 = vld [vmem:[#allocation144_spill] sm:$0xff] }
 0x306   :  { %v2170_v18 = vpop.f32.mrf.mxu1  ;;  %v2784_v17 = vpop.f32.mrf.mxu0 }
 0x307   :  { %v10925_v42 = vadd.f32 %v2170_v18, %v14175_v61  ;;  %v10928_v51 = vadd.f32 %v2784_v17, %v10718_v5  ;;  %v2589_v5 = vor.u32 %v2588_v43, %v2587_v11  ;;  %v14181_v18 = vld [vmem:[#allocation15_spill] sm:$0xff] }
 0x308   :  { %v7416_v14 = vpop.f32.mrf.mxu1  ;;  %v7552_v24 = vpop.f32.mrf.mxu0  ;;  %v3149_v17 = vrot.slane %v14181_v18, 2 }
 0x309   :  { %14176 = vst [vmem:[#allocation121_spill] sm:$0xff] %v10928_v51 }
 0x30a   :  { %v2175_v9 = vpop.f32.mrf.mxu1  ;;  %v2789_v30 = vpop.f32.mrf.mxu0  ;;  %7650 = vmatmul.mubr.bf16.gmra.mxu0 %v2586_v35  ;;  %7702 = vmatmul.mubr.bf16.vlgmr.msra.gmra.mxu1 %v3148_v50  ;;  %v14182_v50 = vld [vmem:[#allocation67_spill] sm:$0xff]  ;;  %v10953_v11 = vsel %vm3145_vm4, %v3147_v63, %v3149_v17 }
 0x30b   :  { %v10933_v1 = vadd.f32 %v2175_v9, %v14179_v12  ;;  %v10936_v38 = vadd.f32 %v2789_v30, %v10731_v6  ;;  %7653 = vmatprep.mubr.msk.bf16.mxu0 %vm8507_vm0, %v13811_v3  ;;  %7705 = vmatprep.mubr.msk.bf16.mxu1 %vm8507_vm0, %v13811_v3  ;;  %v2591_v10 = vrot.slane %v14182_v50, 1  ;;  %v14183_v12 = vld [vmem:[#allocation62_spill] sm:$0xff] }
 0x30c   :  { %v7419_v61 = vpop.f32.mrf.mxu1  ;;  %v7555_v14 = vpop.f32.mrf.mxu0  ;;  %v2592_v9 = vrot.slane %v14183_v12, 2  ;;  %v14186_v12 = vld [vmem:[#allocation21_spill] sm:$0xff] }
 0x30d   :  { %14180 = vst [vmem:[#allocation122_spill] sm:$0xff] %v10936_v38  ;;  %v2590_v38 = vsel %vm2459_vm3, %v2585_v31, %v2589_v5  ;;  %v3151_v51 = vrot.slane %v14186_v12, 2 }
 0x30e   :  { %v2178_v24 = vpop.f32.mrf.mxu1  ;;  %v2792_v35 = vpop.f32.mrf.mxu0  ;;  %v2593_v50 = vor.u32 %v2592_v9, %v2591_v10 }
 0x30f   :  { %v10946_v6 = vadd.f32 %v2178_v24, %v14184_v48  ;;  %v10949_v30 = vadd.f32 %v2792_v35, %v10748_v21  ;;  %v14187_v48 = vld [vmem:[#allocation3_spill] sm:$0xff]  ;;  %v10969_v9 = vsel %vm3145_vm4, %v3149_v17, %v3151_v51 }
 0x310   :  { %v7420_v43 = vpop.f32.mrf.mxu1  ;;  %v7556_v61 = vpop.f32.mrf.mxu0  ;;  %v2594_v10 = vsel %vm2459_vm3, %v2589_v5, %v2593_v50  ;;  %v14193_v5 = vld [vmem:[#allocation169_spill] sm:$0xff] }
 0x311   :  { %14185 = vst [vmem:[#allocation189_spill] sm:$0xff] %v10949_v30  ;;  %v14189_v43 = vld [vmem:[#allocation5_spill] sm:$0xff] }
 0x312   :  { %v2183_v14 = vpop.f32.mrf.mxu1  ;;  %v2797_v18 = vpop.f32.mrf.mxu0  ;;  %7654 = vmatmul.mubr.bf16.gmra.mxu0 %v2590_v38  ;;  %7706 = vmatmul.mubr.bf16.gmra.mxu1 %v10953_v11 }
 0x313   :  { %v10958_v24 = vadd.f32 %v2183_v14, %v14187_v48  ;;  %v10961_v21 = vadd.f32 %v2797_v18, %v10761_v33  ;;  %7657 = vmatprep.mubr.msk.bf16.mxu0 %vm8507_vm0, %v13811_v3  ;;  %7709 = vmatprep.mubr.msk.bf16.mxu1 %vm8507_vm0, %v13811_v3  ;;  %v14191_v18 = vld [vmem:[#allocation72_spill] sm:$0xff] }
 0x314   :  { %v7423_v63 = vpop.f32.mrf.mxu1  ;;  %v7559_v31 = vpop.f32.mrf.mxu0  ;;  %v2595_v14 = vrot.slane %v14191_v18, 1  ;;  %v14192_v48 = vld [vmem:[#allocation68_spill] sm:$0xff]  ;;  %v14196_v18 = vld [vmem:[#allocation79_spill] sm:$0xff] }
 0x315   :  { %14188 = vst [vmem:[#allocation123_spill] sm:$0xff] %v10961_v21  ;;  %v2596_v12 = vrot.slane %v14192_v48, 2 }
 0x316   :  { %v2186_v38 = vpop.f32.mrf.mxu1  ;;  %v2800_v35 = vpop.f32.mrf.mxu0 }
 0x317   :  { %v10972_v61 = vadd.f32 %v2186_v38, %v14189_v43  ;;  %v10975_v33 = vadd.f32 %v2800_v35, %v10777_v37  ;;  %v2597_v37 = vor.u32 %v2596_v12, %v2595_v14 }
 0x318   :  { %v7424_v21 = vpop.f32.mrf.mxu1  ;;  %v7560_v63 = vpop.f32.mrf.mxu0 }
 0x319   :  { %14190 = vst [vmem:[#allocation125_spill] sm:$0xff] %v10975_v33  ;;  %v14195_v21 = vld [vmem:[#allocation27_spill] sm:$0xff]  ;;  %v2599_v33 = vrot.slane %v14196_v18, 1 }
 0x31a   :  { %v2191_v31 = vpop.f32.mrf.mxu1  ;;  %v2805_v30 = vpop.f32.mrf.mxu0  ;;  %7658 = vmatmul.mubr.bf16.gmra.mxu0 %v2594_v10  ;;  %7710 = vmatmul.mubr.bf16.gmra.mxu1 %v10969_v9  ;;  %v3153_v35 = vrot.slane %v14195_v21, 2 }
 0x31b   :  { %v10981_v17 = vadd.f32 %v2191_v31, %v14193_v5  ;;  %v10984_v38 = vadd.f32 %v2805_v30, %v10788_v4  ;;  %7661 = vmatprep.mubr.msk.bf16.mxu0 %vm8507_vm0, %v13811_v3  ;;  %7713 = vmatprep.mubr.msk.bf16.mxu1 %vm8507_vm0, %v13811_v3  ;;  %v14197_v31 = vld [vmem:[#allocation74_spill] sm:$0xff] }
 0x31c   :  { %v7427_v43 = vpop.f32.mrf.mxu1  ;;  %v7563_v63 = vpop.f32.mrf.mxu0  ;;  %v2600_v5 = vrot.slane %v14197_v31, 2  ;;  %v11001_v12 = vsel %vm3145_vm4, %v3151_v51, %v3153_v35  ;;  %v14200_v31 = vld [vmem:[#allocation33_spill] sm:$0xff] }
 0x31d   :  { %14194 = vst [vmem:[#allocation192_spill] sm:$0xff] %v10984_v38  ;;  %v2598_v38 = vsel %vm2459_vm3, %v2593_v50, %v2597_v37  ;;  %v3155_v16 = vrot.slane %v14200_v31, 2 }
 0x31e   :  { %v2194_v10 = vpop.f32.mrf.mxu1  ;;  %v2808_v48 = vpop.f32.mrf.mxu0  ;;  %v2601_v18 = vor.u32 %v2600_v5, %v2599_v33 }
 0x31f   :  { %v10994_v4 = vadd.f32 %v2194_v10, %v14198_v22  ;;  %v10997_v30 = vadd.f32 %v2808_v48, %v10795_v40  ;;  %v14201_v22 = vld [vmem:[#allocation170_spill] sm:$0xff]  ;;  %v11017_v5 = vsel %vm3145_vm4, %v3153_v35, %v3155_v16 }
 0x320   :  { %v7428_v14 = vpop.f32.mrf.mxu1  ;;  %v7564_v43 = vpop.f32.mrf.mxu0  ;;  %v2602_v33 = vsel %vm2459_vm3, %v2597_v37, %v2601_v18  ;;  %v14207_v37 = vld [vmem:[#allocation149_spill] sm:$0xff] }
 0x321   :  { %14199 = vst [vmem:[#allocation126_spill] sm:$0xff] %v10997_v30  ;;  %v14203_v14 = vld [vmem:[#allocation172_spill] sm:$0xff] }
 0x322   :  { %v2199_v63 = vpop.f32.mrf.mxu1  ;;  %v2813_v21 = vpop.f32.mrf.mxu0  ;;  %7662 = vmatmul.mubr.bf16.gmra.mxu0 %v2598_v38  ;;  %7714 = vmatmul.mubr.bf16.gmra.mxu1 %v11001_v12 }
 0x323   :  { %v11006_v10 = vadd.f32 %v2199_v63, %v14201_v22  ;;  %v11009_v40 = vadd.f32 %v2813_v21, %v10802_v15  ;;  %7665 = vmatprep.mubr.msk.bf16.mxu0 %vm8507_vm0, %v13811_v3  ;;  %7717 = vmatprep.mubr.msk.bf16.mxu1 %vm8507_vm0, %v13811_v3  ;;  %v14205_v21 = vld [vmem:[#allocation85_spill] sm:$0xff]  ;;  %v14206_v22 = vld [vmem:[#allocation80_spill] sm:$0xff] }
 0x324   :  { %v7431_v51 = vpop.f32.mrf.mxu1  ;;  %v7567_v50 = vpop.f32.mrf.mxu0  ;;  %v2603_v63 = vrot.slane %v14205_v21, 1  ;;  %v2604_v31 = vrot.slane %v14206_v22, 2  ;;  %v14210_v21 = vld [vmem:[#allocation90_spill] sm:$0xff] }
 0x325   :  { %14202 = vst [vmem:[#allocation128_spill] sm:$0xff] %v11009_v40 }
 0x326   :  { %v2202_v48 = vpop.f32.mrf.mxu1  ;;  %v2816_v38 = vpop.f32.mrf.mxu0 }
 0x327   :  { %v11020_v43 = vadd.f32 %v2202_v48, %v14203_v14  ;;  %v11023_v15 = vadd.f32 %v2816_v38, %v10814_v29  ;;  %v2605_v29 = vor.u32 %v2604_v31, %v2603_v63 }
 0x328   :  { %v7432_v40 = vpop.f32.mrf.mxu1  ;;  %v7568_v51 = vpop.f32.mrf.mxu0 }
 0x329   :  { %14204 = vst [vmem:[#allocation195_spill] sm:$0xff] %v11023_v15  ;;  %v14209_v40 = vld [vmem:[#allocation39_spill] sm:$0xff]  ;;  %v2607_v15 = vrot.slane %v14210_v21, 1 }
 0x32a   :  { %v2207_v50 = vpop.f32.mrf.mxu1  ;;  %v2821_v30 = vpop.f32.mrf.mxu0  ;;  %7666 = vmatmul.mubr.bf16.gmra.mxu0 %v2602_v33  ;;  %7718 = vmatmul.mubr.bf16.gmra.mxu1 %v11017_v5  ;;  %v3157_v38 = vrot.slane %v14209_v40, 2 }
 0x32b   :  { %v11029_v35 = vadd.f32 %v2207_v50, %v14207_v37  ;;  %v11032_v48 = vadd.f32 %v2821_v30, %v10822_v19  ;;  %7669 = vmatprep.mubr.msk.bf16.mxu0 %vm8507_vm0, %v13811_v3  ;;  %7721 = vmatprep.mubr.msk.bf16.mxu1 %vm8507_vm0, %v13811_v3  ;;  %v14211_v50 = vld [vmem:[#allocation86_spill] sm:$0xff] }
 0x32c   :  { %v7435_v14 = vpop.f32.mrf.mxu1  ;;  %v7571_v51 = vpop.f32.mrf.mxu0  ;;  %v2608_v37 = vrot.slane %v14211_v50, 2  ;;  %v11049_v31 = vsel %vm3145_vm4, %v3155_v16, %v3157_v38  ;;  %v14214_v50 = vld [vmem:[#allocation42_spill] sm:$0xff]  ;;  %v13752_v16 = vshrl.u32 %v10857_v28, 16 }
 0x32d   :  { %14208 = vst [vmem:[#allocation129_spill] sm:$0xff] %v11032_v48  ;;  %v2606_v48 = vsel %vm2459_vm3, %v2601_v18, %v2605_v29  ;;  %v3159_v2 = vrot.slane %v14214_v50, 2  ;;  %v13751_v18 = vshll.u32 %v10857_v28, 16 }
 0x32e   :  { %v2210_v33 = vpop.f32.mrf.mxu1  ;;  %v2824_v22 = vpop.f32.mrf.mxu0  ;;  %v2609_v21 = vor.u32 %v2608_v37, %v2607_v15 }
 0x32f   :  { %v11042_v19 = vadd.f32 %v2210_v33, %v14212_v57  ;;  %v11045_v30 = vadd.f32 %v2824_v22, %v10833_v58  ;;  %v14215_v57 = vld [vmem:[#allocation175_spill] sm:$0xff] }
 0x330   :  { %v7436_v63 = vpop.f32.mrf.mxu1  ;;  %v7572_v14 = vpop.f32.mrf.mxu0 }
 0x331   :  { %14213 = vst [vmem:[#allocation131_spill] sm:$0xff] %v11045_v30  ;;  %v2610_v63 = vsel %vm2459_vm3, %v2605_v29, %v2609_v21  ;;  %v11067_v14 = vsel %vm3145_vm4, %v3157_v38, %v3159_v2  ;;  %v14218_v29 = vld [vmem:[#allocation176_spill] sm:$0xff] }
 0x332   :  { %v2215_v51 = vpop.f32.mrf.mxu1  ;;  %v2829_v40 = vpop.f32.mrf.mxu0  ;;  %7670 = vmatmul.mubr.bf16.gmra.mxu0 %v2606_v48  ;;  %7722 = vmatmul.mubr.bf16.gmra.mxu1 %v11049_v31 }
 0x333   :  { %v11054_v33 = vadd.f32 %v2215_v51, %v14215_v57  ;;  %v11057_v58 = vadd.f32 %v2829_v40, %v10842_v53  ;;  %7673 = vmatprep.mubr.msk.bf16.mxu0 %vm8507_vm0, %v13811_v3  ;;  %7725 = vmatprep.mubr.msk.bf16.mxu1 %vm8507_vm0, %v13811_v3  ;;  %v14217_v53 = vld [vmem:[#allocation154_spill] sm:$0xff]  ;;  %v2614_v57 = vrot.slane %v13752_v16, 1 }
 0x334   :  { %v7439_v22 = vpop.f32.mrf.mxu1  ;;  %v7575_v15 = vpop.f32.mrf.mxu0  ;;  %v14221_v16 = vld [vmem:[#allocation178_spill] sm:$0xff] }
 0x335   :  { %14216 = vst [vmem:[#allocation196_spill] sm:$0xff] %v11057_v58  ;;  %v2617_v22 = vrot.slane %v13751_v18, 2 }
 0x336   :  { %v2218_v48 = vpop.f32.mrf.mxu1  ;;  %v2832_v37 = vpop.f32.mrf.mxu0 }
 0x337   :  { %v11070_v40 = vadd.f32 %v2218_v48, %v14217_v53  ;;  %v11073_v51 = vadd.f32 %v2832_v37, %v10862_v59  ;;  %v2618_v59 = vor.u32 %v2617_v22, %v2614_v57  ;;  %v14220_v37 = vld [vmem:[#allocation50_spill] sm:$0xff] }
 0x338   :  { %v7440_v15 = vpop.f32.mrf.mxu1  ;;  %v7576_v50 = vpop.f32.mrf.mxu0 }
 0x339   :  { %v3161_v50 = vrot.slane %v14220_v37, 2 }
 0x33a   :  { %v2223_v58 = vpop.f32.mrf.mxu1  ;;  %v2837_v30 = vpop.f32.mrf.mxu0  ;;  %7674 = vmatmul.mubr.bf16.gmra.mxu0 %v2610_v63  ;;  %7726 = vmatmul.mubr.bf16.gmra.mxu1 %v11067_v14 }
 0x33b   :  { %v11081_v38 = vadd.f32 %v2223_v58, %v14218_v29  ;;  %v11084_v48 = vadd.f32 %v2837_v30, %v10871_v0  ;;  %7677 = vmatprep.mubr.msk.bf16.mxu0 %vm8507_vm0, %v13811_v3  ;;  %7729 = vmatprep.mubr.msk.bf16.mxu1 %vm8507_vm0, %v13811_v3  ;;  %v2619_v0 = vsel %vm2459_vm3, %v2609_v21, %v2618_v59 }
 0x33c   :  { %v7443_v53 = vpop.f32.mrf.mxu1  ;;  %v7579_v15 = vpop.f32.mrf.mxu0  ;;  %v11099_v30 = vsel %vm3145_vm4, %v3159_v2, %v3161_v50  ;;  %v14224_v2 = vld [vmem:[#allocation58_spill] sm:$0xff] }
 0x33d   :  { %14219 = vst [vmem:[#allocation132_spill] sm:$0xff] %v11084_v48  ;;  %v14222_v53 = vld [vmem:[#allocation159_spill] sm:$0xff] }
 0x33e   :  { %v2226_v63 = vpop.f32.mrf.mxu1  ;;  %v2840_v18 = vpop.f32.mrf.mxu0 }
 0x33f   :  { %v11092_v28 = vadd.f32 %v2226_v63, %v14221_v16  ;;  %v11095_v58 = vadd.f32 %v2840_v18, %v10884_v36  ;;  %v3163_v36 = vrot.slane %v14224_v2, 2 }
 0x340   :  { %v7444_v29 = vpop.f32.mrf.mxu1  ;;  %v7580_v48 = vpop.f32.mrf.mxu0 }
 0x342   :  { %v2231_v57 = vpop.f32.mrf.mxu1  ;;  %v2845_v22 = vpop.f32.mrf.mxu0  ;;  %7678 = vmatmul.mubr.bf16.gmra.mxu0 %v2619_v0  ;;  %7730 = vmatmul.mubr.bf16.gmra.mxu1 %v11099_v30  ;;  %v14225_v0 = vld [vmem:[#allocation179_spill] sm:$0xff] }
 0x343   :  { %v11103_v15 = vadd.f32 %v2231_v57, %v14222_v53  ;;  %v11106_v16 = vadd.f32 %v2845_v22, %v10892_v20  ;;  %7681 = vmatprep.mubr.msk.bf16.mxu0 %vm8507_vm0, %v13811_v3  ;;  %7733 = vmatprep.mubr.msk.bf16.mxu1 %vm8507_vm0, %v13811_v3  ;;  %v11120_v20 = vsel %vm3145_vm4, %v3161_v50, %v3163_v36 }
 0x344   :  { %v7447_v21 = vpop.f32.mrf.mxu1  ;;  %v7583_v18 = vpop.f32.mrf.mxu0 }
 0x345   :  { %14223 = vst [vmem:[#allocation134_spill] sm:$0xff] %v11106_v16  ;;  %v14226_v21 = vld [vmem:[#allocation181_spill] sm:$0xff] }
 0x346   :  { %v2234_v48 = vpop.f32.mrf.mxu1  ;;  %v2848_v63 = vpop.f32.mrf.mxu0 }
 0x347   :  { %v11114_v29 = vadd.f32 %v2234_v48, %v14225_v0  ;;  %v11117_v57 = vadd.f32 %v2848_v63, %v10904_v39  ;;  %v14228_v39 = vld [vmem:[#allocation63_spill] sm:$0xff] }
 0x348   :  { %v7448_v22 = vpop.f32.mrf.mxu1  ;;  %v7584_v53 = vpop.f32.mrf.mxu0  ;;  %v3165_v50 = vrot.slane %v14228_v39, 2  ;;  %v14233_v39 = vld [vmem:[#allocation182_spill] sm:$0xff] }
 0x34a   :  { %v2239_v37 = vpop.f32.mrf.mxu1  ;;  %v2853_v16 = vpop.f32.mrf.mxu0  ;;  %7682 = vmatmul.mubr.bf16.gmra.mxu0 %v2618_v59  ;;  %7734 = vmatmul.mubr.bf16.gmra.mxu1 %v11120_v20 }
 0x34b   :  { %v11124_v18 = vadd.f32 %v2239_v37, %v14226_v21  ;;  %v11127_v2 = vadd.f32 %v2853_v16, %v10913_v55  ;;  %7737 = vmatprep.mubr.msk.bf16.mxu1 %vm8507_vm0, %v13811_v3  ;;  %7873 = vmatprep.mubr.msk.bf16.mxu0 %vm8507_vm0, %v13811_v3  ;;  %v11141_v55 = vsel %vm3145_vm4, %v3163_v36, %v3165_v50 }
 0x34c   :  { %v7451_v48 = vpop.f32.mrf.mxu1  ;;  %v7587_v63 = vpop.f32.mrf.mxu0 }
 0x34d   :  { %14227 = vst [vmem:[#allocation135_spill] sm:$0xff] %v11127_v2  ;;  %v14230_v48 = vld [vmem:[#allocation164_spill] sm:$0xff] }
 0x34e   :  { %v2242_v0 = vpop.f32.mrf.mxu1  ;;  %v2856_v59 = vpop.f32.mrf.mxu0 }
 0x34f   :  { %v11135_v22 = vadd.f32 %v2242_v0, %v10427_v52  ;;  %v11138_v37 = vadd.f32 %v2856_v59, %v10925_v42  ;;  %v14232_v42 = vld [vmem:[#allocation69_spill] sm:$0xff] }
 0x350   :  { %v7452_v16 = vpop.f32.mrf.mxu1  ;;  %v7588_v53 = vpop.f32.mrf.mxu0  ;;  %v3167_v36 = vrot.slane %v14232_v42, 2  ;;  %v14238_v42 = vld [vmem:[#allocation168_spill] sm:$0xff] }
 0x351   :  { %14229 = vst [vmem:[#allocation137_spill] sm:$0xff] %v11138_v37 }
 0x352   :  { %v2247_v21 = vpop.f32.mrf.mxu1  ;;  %v2861_v2 = vpop.f32.mrf.mxu0  ;;  %7738 = vmatmul.mubr.bf16.gmra.mxu1 %v11141_v55  ;;  %7874 = vmatmul.mubr.bf16.vlgmr.msra.gmra.mxu0 %v10953_v11 }
 0x353   :  { %v11146_v63 = vadd.f32 %v2247_v21, %v14230_v48  ;;  %v11149_v52 = vadd.f32 %v2861_v2, %v10933_v1  ;;  %7741 = vmatprep.mubr.msk.bf16.mxu1 %vm8507_vm0, %v13811_v3  ;;  %7877 = vmatprep.mubr.msk.bf16.mxu0 %vm8507_vm0, %v13811_v3  ;;  %v11163_v1 = vsel %vm3145_vm4, %v3165_v50, %v3167_v36 }
 0x354   :  { %v7455_v0 = vpop.f32.mrf.mxu1  ;;  %v7591_v59 = vpop.f32.mrf.mxu0 }
 0x355   :  { %14231 = vst [vmem:[#allocation138_spill] sm:$0xff] %v11149_v52  ;;  %v14235_v0 = vld [vmem:[#allocation184_spill] sm:$0xff] }
 0x356   :  { %v2250_v16 = vpop.f32.mrf.mxu1  ;;  %v2864_v53 = vpop.f32.mrf.mxu0 }
 0x357   :  { %v11157_v11 = vadd.f32 %v2250_v16, %v14233_v39  ;;  %v11160_v21 = vadd.f32 %v2864_v53, %v10946_v6  ;;  %v14237_v6 = vld [vmem:[#allocation75_spill] sm:$0xff] }
 0x358   :  { %v7456_v2 = vpop.f32.mrf.mxu1  ;;  %v7592_v48 = vpop.f32.mrf.mxu0  ;;  %v3169_v50 = vrot.slane %v14237_v6, 2  ;;  %v14243_v6 = vld [vmem:[#allocation187_spill] sm:$0xff] }
 0x359   :  { %14234 = vst [vmem:[#allocation141_spill] sm:$0xff] %v11160_v21 }
 0x35a   :  { %v2255_v52 = vpop.f32.mrf.mxu1  ;;  %v2869_v37 = vpop.f32.mrf.mxu0  ;;  %7742 = vmatmul.mubr.bf16.gmra.mxu1 %v11163_v1  ;;  %7878 = vmatmul.mubr.bf16.gmra.mxu0 %v10969_v9 }
 0x35b   :  { %v11168_v59 = vadd.f32 %v2255_v52, %v14235_v0  ;;  %v11171_v39 = vadd.f32 %v2869_v37, %v10958_v24  ;;  %7745 = vmatprep.mubr.msk.bf16.mxu1 %vm8507_vm0, %v13811_v3  ;;  %7881 = vmatprep.mubr.msk.bf16.mxu0 %vm8507_vm0, %v13811_v3  ;;  %v11185_v24 = vsel %vm3145_vm4, %v3167_v36, %v3169_v50 }
 0x35c   :  { %v7459_v16 = vpop.f32.mrf.mxu1  ;;  %v7595_v53 = vpop.f32.mrf.mxu0 }
 0x35d   :  { %14236 = vst [vmem:[#allocation143_spill] sm:$0xff] %v11171_v39  ;;  %v14240_v16 = vld [vmem:[#allocation185_spill] sm:$0xff] }
 0x35e   :  { %v2258_v2 = vpop.f32.mrf.mxu1  ;;  %v2872_v48 = vpop.f32.mrf.mxu0 }
 0x35f   :  { %v11179_v9 = vadd.f32 %v2258_v2, %v14238_v42  ;;  %v11182_v52 = vadd.f32 %v2872_v48, %v10972_v61  ;;  %v14242_v61 = vld [vmem:[#allocation81_spill] sm:$0xff] }
 0x360   :  { %v7460_v37 = vpop.f32.mrf.mxu1  ;;  %v7596_v0 = vpop.f32.mrf.mxu0  ;;  %v3171_v36 = vrot.slane %v14242_v61, 2  ;;  %v14248_v61 = vld [vmem:[#allocation188_spill] sm:$0xff] }
 0x361   :  { %14239 = vst [vmem:[#allocation146_spill] sm:$0xff] %v11182_v52 }
 0x362   :  { %v2263_v39 = vpop.f32.mrf.mxu1  ;;  %v2877_v21 = vpop.f32.mrf.mxu0  ;;  %7746 = vmatmul.mubr.bf16.gmra.mxu1 %v11185_v24  ;;  %7882 = vmatmul.mubr.bf16.gmra.mxu0 %v11001_v12 }
 0x363   :  { %v11190_v53 = vadd.f32 %v2263_v39, %v14240_v16  ;;  %v11193_v42 = vadd.f32 %v2877_v21, %v10981_v17  ;;  %7749 = vmatprep.mubr.msk.bf16.mxu1 %vm8507_vm0, %v13811_v3  ;;  %7885 = vmatprep.mubr.msk.bf16.mxu0 %vm8507_vm0, %v13811_v3  ;;  %v11207_v17 = vsel %vm3145_vm4, %v3169_v50, %v3171_v36 }
 0x364   :  { %v7463_v2 = vpop.f32.mrf.mxu1  ;;  %v7599_v48 = vpop.f32.mrf.mxu0 }
 0x365   :  { %14241 = vst [vmem:[#allocation148_spill] sm:$0xff] %v11193_v42  ;;  %v14245_v2 = vld [vmem:[#allocation171_spill] sm:$0xff] }
 0x366   :  { %v2266_v37 = vpop.f32.mrf.mxu1  ;;  %v2880_v0 = vpop.f32.mrf.mxu0 }
 0x367   :  { %v11201_v12 = vadd.f32 %v2266_v37, %v14243_v6  ;;  %v11204_v39 = vadd.f32 %v2880_v0, %v10994_v4  ;;  %v14247_v4 = vld [vmem:[#allocation87_spill] sm:$0xff] }
 0x368   :  { %v7464_v21 = vpop.f32.mrf.mxu1  ;;  %v7600_v16 = vpop.f32.mrf.mxu0  ;;  %v3173_v50 = vrot.slane %v14247_v4, 2 }
 0x369   :  { %14244 = vst [vmem:[#allocation151_spill] sm:$0xff] %v11204_v39 }
 0x36a   :  { %v2271_v42 = vpop.f32.mrf.mxu1  ;;  %v2885_v52 = vpop.f32.mrf.mxu0  ;;  %7750 = vmatmul.mubr.bf16.gmra.mxu1 %v11207_v17  ;;  %7886 = vmatmul.mubr.bf16.gmra.mxu0 %v11017_v5 }
 0x36b   :  { %v11212_v48 = vadd.f32 %v2271_v42, %v14245_v2  ;;  %v11215_v6 = vadd.f32 %v2885_v52, %v11006_v10  ;;  %7753 = vmatprep.mubr.msk.bf16.mxu1 %vm8507_vm0, %v13811_v3  ;;  %7889 = vmatprep.mubr.msk.bf16.mxu0 %vm8507_vm0, %v13811_v3  ;;  %v11229_v10 = vsel %vm3145_vm4, %v3171_v36, %v3173_v50 }
 0x36c   :  { %v7467_v37 = vpop.f32.mrf.mxu1  ;;  %v7603_v0 = vpop.f32.mrf.mxu0 }
 0x36d   :  { %14246 = vst [vmem:[#allocation153_spill] sm:$0xff] %v11215_v6  ;;  %v14249_v37 = vld [vmem:[#allocation190_spill] sm:$0xff] }
 0x36e   :  { %v2274_v21 = vpop.f32.mrf.mxu1  ;;  %v2888_v16 = vpop.f32.mrf.mxu0 }
 0x36f   :  { %v11223_v5 = vadd.f32 %v2274_v21, %v14248_v61  ;;  %v11226_v42 = vadd.f32 %v2888_v16, %v11020_v43  ;;  %v14251_v43 = vld [vmem:[#allocation91_spill] sm:$0xff] }
 0x370   :  { %v7468_v52 = vpop.f32.mrf.mxu1  ;;  %v7604_v2 = vpop.f32.mrf.mxu0  ;;  %v3175_v36 = vrot.slane %v14251_v43, 2 }
 0x371   :  { %v14252_v2 = vld [vmem:[#allocation174_spill] sm:$0xff] }
 0x372   :  { %v2279_v6 = vpop.f32.mrf.mxu1  ;;  %v2893_v39 = vpop.f32.mrf.mxu0  ;;  %7754 = vmatmul.mubr.bf16.gmra.mxu1 %v11229_v10  ;;  %7890 = vmatmul.mubr.bf16.gmra.mxu0 %v11049_v31  ;;  %v8487_v31 = vld [vmem:[%s13492_s1 + $0x1f8] sm:$0xff]  }
 0x373   :  { %v11234_v0 = vadd.f32 %v2279_v6, %v14249_v37  ;;  %v11237_v61 = vadd.f32 %v2893_v39, %v11029_v35  ;;  %7757 = vmatprep.mubr.msk.bf16.mxu1 %vm8507_vm0, %v13811_v3  ;;  %7893 = vmatprep.mubr.msk.bf16.mxu0 %vm8507_vm0, %v13811_v3  ;;  %v11254_v37 = vsel %vm3145_vm4, %v3173_v50, %v3175_v36 }
 0x374   :  { %v7471_v21 = vpop.f32.mrf.mxu1  ;;  %v7607_v16 = vpop.f32.mrf.mxu0  ;;  %8030 = vmatpush3.bf16.msra.mxu1 %v8487_v31 }
 0x375   :  { %14250 = vst [vmem:[#allocation156_spill] sm:$0xff] %v11237_v61  ;;  %v8488_v21 = vld [vmem:[%s13492_s1 + $0x238] sm:$0xff]   ;;  %8031 = vmatprep.subr.bf16.mxu1 %v13811_v3 }
 0x376   :  { %v2282_v52 = vpop.f32.mrf.mxu1  ;;  %v2896_v6 = vpop.f32.mrf.mxu0  ;;  %8202 = vmatpush3.bf16.msra.mxu0 %v8488_v21 }
 0x377   :  { %v11248_v35 = vadd.f32 %v2282_v52, %v14252_v2  ;;  %v11251_v39 = vadd.f32 %v2896_v6, %v11042_v19  ;;  %v14254_v19 = vld [vmem:[#allocation191_spill] sm:$0xff]  ;;  %8203 = vmatprep.subr.bf16.mxu0 %v13811_v3 }
 0x378   :  { %v7472_v16 = vpop.f32.mrf.mxu1  ;;  %v7608_v43 = vpop.f32.mrf.mxu0 }
 0x379   :  { %14253 = vst [vmem:[#allocation158_spill] sm:$0xff] %v11251_v39  ;;  %v14256_v43 = vld [vmem:[#allocation94_spill] sm:$0xff] }
 0x37a   :  { %v2287_v4 = vpop.f32.mrf.mxu1  ;;  %v2901_v31 = vpop.f32.mrf.mxu0  ;;  %7758 = vmatmul.mubr.bf16.gmra.mxu1 %v11254_v37  ;;  %7894 = vmatmul.mubr.bf16.gmra.mxu0 %v11067_v14  ;;  %v3177_v6 = vrot.slane %v14256_v43, 2 }
 0x37b   :  { %v11263_v52 = vadd.f32 %v2287_v4, %v14254_v19  ;;  %v11266_v50 = vadd.f32 %v2901_v31, %v11054_v33  ;;  %7761 = vmatprep.mubr.msk.bf16.mxu1 %vm8507_vm0, %v13811_v3  ;;  %7897 = vmatprep.mubr.msk.bf16.mxu0 %vm8507_vm0, %v13811_v3 }
 0x37c   :  { %v7475_v2 = vpop.f32.mrf.mxu1  ;;  %v7611_v21 = vpop.f32.mrf.mxu0  ;;  %v11281_v31 = vsel %vm3145_vm4, %v3175_v36, %v3177_v6 }
 0x37d   :  { %14255 = vst [vmem:[#allocation161_spill] sm:$0xff] %v11266_v50 }
 0x37e   :  { %v2290_v16 = vpop.f32.mrf.mxu1  ;;  %v2904_v14 = vpop.f32.mrf.mxu0 }
 0x37f   :  { %v11275_v4 = vadd.f32 %v2290_v16, %v10580_v26  ;;  %v11278_v33 = vadd.f32 %v2904_v14, %v11070_v40  ;;  %v14257_v40 = vld [vmem:[#allocation97_spill] sm:$0xff] }
 0x380   :  { %v7476_v19 = vpop.f32.mrf.mxu1  ;;  %v7612_v50 = vpop.f32.mrf.mxu0  ;;  %v3179_v36 = vrot.slane %v14257_v40, 2 }
 0x382   :  { %v2295_v39 = vpop.f32.mrf.mxu1  ;;  %v2909_v61 = vpop.f32.mrf.mxu0  ;;  %7762 = vmatmul.mubr.bf16.gmra.mxu1 %v11281_v31  ;;  %7898 = vmatmul.mubr.bf16.gmra.mxu0 %v11099_v30 }
 0x383   :  { %v11286_v2 = vadd.f32 %v2295_v39, %v10589_v44  ;;  %v11289_v26 = vadd.f32 %v2909_v61, %v11081_v38  ;;  %7765 = vmatprep.mubr.msk.bf16.mxu1 %vm8507_vm0, %v13811_v3  ;;  %7901 = vmatprep.mubr.msk.bf16.mxu0 %vm8507_vm0, %v13811_v3  ;;  %v11303_v38 = vsel %vm3145_vm4, %v3177_v6, %v3179_v36 }
 0x384   :  { %v7479_v50 = vpop.f32.mrf.mxu1  ;;  %v7615_v21 = vpop.f32.mrf.mxu0 }
 0x386   :  { %v2298_v16 = vpop.f32.mrf.mxu1  ;;  %v2912_v14 = vpop.f32.mrf.mxu0 }
 0x387   :  { %v11297_v30 = vadd.f32 %v2298_v16, %v10602_v45  ;;  %v11300_v44 = vadd.f32 %v2912_v14, %v11092_v28  ;;  %v14258_v28 = vld [vmem:[#allocation100_spill] sm:$0xff] }
 0x388   :  { %v7480_v61 = vpop.f32.mrf.mxu1  ;;  %v7616_v39 = vpop.f32.mrf.mxu0  ;;  %v3181_v6 = vrot.slane %v14258_v28, 2 }
 0x38a   :  { %v2303_v19 = vpop.f32.mrf.mxu1  ;;  %v2917_v43 = vpop.f32.mrf.mxu0  ;;  %7766 = vmatmul.mubr.bf16.gmra.mxu1 %v11303_v38  ;;  %7902 = vmatmul.mubr.bf16.gmra.mxu0 %v11120_v20 }
 0x38b   :  { %v11308_v50 = vadd.f32 %v2303_v19, %v10611_v47  ;;  %v11311_v45 = vadd.f32 %v2917_v43, %v11103_v15  ;;  %7769 = vmatprep.mubr.msk.bf16.mxu1 %vm8507_vm0, %v13811_v3  ;;  %7905 = vmatprep.mubr.msk.bf16.mxu0 %vm8507_vm0, %v13811_v3  ;;  %v11325_v15 = vsel %vm3145_vm4, %v3179_v36, %v3181_v6 }
 0x38c   :  { %v7483_v21 = vpop.f32.mrf.mxu1  ;;  %v7619_v16 = vpop.f32.mrf.mxu0 }
 0x38e   :  { %v2306_v14 = vpop.f32.mrf.mxu1  ;;  %v2920_v61 = vpop.f32.mrf.mxu0 }
 0x38f   :  { %v11319_v20 = vadd.f32 %v2306_v14, %v10623_v56  ;;  %v11322_v47 = vadd.f32 %v2920_v61, %v11114_v29  ;;  %v14259_v29 = vld [vmem:[#allocation103_spill] sm:$0xff] }
 0x390   :  { %v7484_v43 = vpop.f32.mrf.mxu1  ;;  %v7620_v39 = vpop.f32.mrf.mxu0  ;;  %v3183_v36 = vrot.slane %v14259_v29, 2 }
 0x392   :  { %v2311_v19 = vpop.f32.mrf.mxu1  ;;  %v2925_v40 = vpop.f32.mrf.mxu0  ;;  %7770 = vmatmul.mubr.bf16.gmra.mxu1 %v11325_v15  ;;  %7906 = vmatmul.mubr.bf16.gmra.mxu0 %v11141_v55 }
 0x393   :  { %v11330_v21 = vadd.f32 %v2311_v19, %v10633_v32  ;;  %v11333_v56 = vadd.f32 %v2925_v40, %v11124_v18  ;;  %7773 = vmatprep.mubr.msk.bf16.mxu1 %vm8507_vm0, %v13811_v3  ;;  %7909 = vmatprep.mubr.msk.bf16.mxu0 %vm8507_vm0, %v13811_v3  ;;  %v11347_v18 = vsel %vm3145_vm4, %v3181_v6, %v3183_v36 }
 0x394   :  { %v7487_v16 = vpop.f32.mrf.mxu1  ;;  %v7623_v14 = vpop.f32.mrf.mxu0 }
 0x396   :  { %v2314_v61 = vpop.f32.mrf.mxu1  ;;  %v2928_v43 = vpop.f32.mrf.mxu0 }
 0x397   :  { %v11341_v55 = vadd.f32 %v2314_v61, %v10646_v41  ;;  %v11344_v32 = vadd.f32 %v2928_v43, %v11135_v22  ;;  %v14260_v22 = vld [vmem:[#allocation106_spill] sm:$0xff] }
 0x398   :  { %v7488_v40 = vpop.f32.mrf.mxu1  ;;  %v7624_v39 = vpop.f32.mrf.mxu0  ;;  %v3185_v6 = vrot.slane %v14260_v22, 2 }
 0x399   :  { %v8490_v39 = vld [vmem:[%s13492_s1 + $0x230] sm:$0xff]  }
 0x39a   :  { %v2319_v19 = vpop.f32.mrf.mxu1  ;;  %v2933_v28 = vpop.f32.mrf.mxu0  ;;  %7774 = vmatmul.mubr.bf16.gmra.mxu1 %v11347_v18  ;;  %7910 = vmatmul.mubr.bf16.gmra.mxu0 %v11163_v1  ;;  %v8489_v1 = vld [vmem:[%s13492_s1 + $0x1f0] sm:$0xff]   ;;  %v11372_v40 = vsel %vm3145_vm4, %v3183_v36, %v3185_v6  ;;  %v14261_v36 = vld [vmem:[#allocation109_spill] sm:$0xff] }
 0x39b   :  { %v11352_v16 = vadd.f32 %v2319_v19, %v10655_v23  ;;  %v11355_v41 = vadd.f32 %v2933_v28, %v11146_v63  ;;  %7777 = vmatprep.mubr.msk.bf16.mxu1 %vm8507_vm0, %v13811_v3  ;;  %7913 = vmatprep.mubr.msk.bf16.mxu0 %vm8507_vm0, %v13811_v3 }
 0x39c   :  { %v7491_v14 = vpop.f32.mrf.mxu1  ;;  %v7627_v61 = vpop.f32.mrf.mxu0  ;;  %8032 = vmatpush3.bf16.msra.mxu1 %v8489_v1  ;;  %8204 = vmatpush3.bf16.msra.mxu0 %v8490_v39 }
 0x39d   :  { %8033 = vmatprep.subr.bf16.mxu1 %v13811_v3  ;;  %8205 = vmatprep.subr.bf16.mxu0 %v13811_v3 }
 0x39e   :  { %v2322_v43 = vpop.f32.mrf.mxu1  ;;  %v2936_v23 = vpop.f32.mrf.mxu0 }
 0x39f   :  { %v11366_v63 = vadd.f32 %v2322_v43, %v10667_v49  ;;  %v11369_v28 = vadd.f32 %v2936_v23, %v11157_v11  ;;  %v3187_v43 = vrot.slane %v14261_v36, 2 }
 0x3a0   :  { %v7492_v19 = vpop.f32.mrf.mxu1  ;;  %v7628_v14 = vpop.f32.mrf.mxu0 }
 0x3a1   :  { %v11399_v14 = vsel %vm3145_vm4, %v3185_v6, %v3187_v43  ;;  %v14262_v6 = vld [vmem:[#allocation112_spill] sm:$0xff] }
 0x3a2   :  { %v2327_v61 = vpop.f32.mrf.mxu1  ;;  %v2941_v1 = vpop.f32.mrf.mxu0  ;;  %7778 = vmatmul.mubr.bf16.gmra.mxu1 %v11372_v40  ;;  %7914 = vmatmul.mubr.bf16.gmra.mxu0 %v11185_v24 }
 0x3a3   :  { %v11381_v49 = vadd.f32 %v2327_v61, %v10677_v27  ;;  %v11384_v11 = vadd.f32 %v2941_v1, %v11168_v59  ;;  %7781 = vmatprep.mubr.msk.bf16.mxu1 %vm8507_vm0, %v13811_v3  ;;  %7917 = vmatprep.mubr.msk.bf16.mxu0 %vm8507_vm0, %v13811_v3 }
 0x3a4   :  { %v7495_v23 = vpop.f32.mrf.mxu1  ;;  %v7631_v39 = vpop.f32.mrf.mxu0 }
 0x3a5   :  { %v8491_v23 = vld [vmem:[%s13492_s1 + $0x1e8] sm:$0xff]  }
 0x3a6   :  { %v2330_v19 = vpop.f32.mrf.mxu1  ;;  %v2944_v24 = vpop.f32.mrf.mxu0  ;;  %8034 = vmatpush3.bf16.msra.mxu1 %v8491_v23  ;;  %v8493_v23 = vld [vmem:[%s13492_s1 + $0x1d8] sm:$0xff]  }
 0x3a7   :  { %v11393_v27 = vadd.f32 %v2330_v19, %v10693_v60  ;;  %v11396_v59 = vadd.f32 %v2944_v24, %v11179_v9  ;;  %v3189_v19 = vrot.slane %v14262_v6, 2  ;;  %8035 = vmatprep.subr.bf16.mxu1 %v13811_v3 }
 0x3a8   :  { %v7496_v61 = vpop.f32.mrf.mxu1  ;;  %v7632_v1 = vpop.f32.mrf.mxu0 }
 0x3aa   :  { %v2335_v39 = vpop.f32.mrf.mxu1  ;;  %v2949_v36 = vpop.f32.mrf.mxu0  ;;  %7782 = vmatmul.mubr.bf16.gmra.mxu1 %v11399_v14  ;;  %7918 = vmatmul.mubr.bf16.gmra.mxu0 %v11207_v17 }
 0x3ab   :  { %v11407_v60 = vadd.f32 %v2335_v39, %v10703_v13  ;;  %v11410_v9 = vadd.f32 %v2949_v36, %v11190_v53  ;;  %7785 = vmatprep.mubr.msk.bf16.mxu1 %vm8507_vm0, %v13811_v3  ;;  %7921 = vmatprep.mubr.msk.bf16.mxu0 %vm8507_vm0, %v13811_v3  ;;  %v8492_v13 = vld [vmem:[%s13492_s1 + $0x1e0] sm:$0xff]   ;;  %v11428_v39 = vsel %vm3145_vm4, %v3187_v43, %v3189_v19  ;;  %v14263_v43 = vld [vmem:[#allocation4_spill] sm:$0xff] }
 0x3ac   :  { %v7499_v24 = vpop.f32.mrf.mxu1  ;;  %v7635_v61 = vpop.f32.mrf.mxu0  ;;  %8036 = vmatpush3.bf16.msra.mxu1 %v8492_v13  ;;  %v3191_v13 = vrot.slane %v14263_v43, 2 }
 0x3ad   :  { %8037 = vmatprep.subr.bf16.mxu1 %v13811_v3 }
 0x3ae   :  { %v2338_v17 = vpop.f32.mrf.mxu1  ;;  %v2952_v53 = vpop.f32.mrf.mxu0 }
 0x3af   :  { %v11422_v36 = vadd.f32 %v2338_v17, %v10715_v62  ;;  %v11425_v1 = vadd.f32 %v2952_v53, %v11201_v12 }
 0x3b0   :  { %v7500_v24 = vpop.f32.mrf.mxu1  ;;  %v7636_v61 = vpop.f32.mrf.mxu0  ;;  %8038 = vmatpush3.bf16.msra.mxu1 %v8493_v23  ;;  %v8495_v23 = vld [vmem:[%s13492_s1 + $0x1c8] sm:$0xff]  }
 0x3b1   :  { %8039 = vmatprep.subr.bf16.mxu1 %v13811_v3  ;;  %v11458_v24 = vsel %vm3145_vm4, %v3189_v19, %v3191_v13  ;;  %v14264_v19 = vld [vmem:[#allocation6_spill] sm:$0xff] }
 0x3b2   :  { %v2343_v6 = vpop.f32.mrf.mxu1  ;;  %v2957_v22 = vpop.f32.mrf.mxu0  ;;  %7786 = vmatmul.mubr.bf16.gmra.mxu1 %v11428_v39  ;;  %7922 = vmatmul.mubr.bf16.gmra.mxu0 %v11229_v10 }
 0x3b3   :  { %v11437_v62 = vadd.f32 %v2343_v6, %v10728_v25  ;;  %v11440_v12 = vadd.f32 %v2957_v22, %v11212_v48  ;;  %7789 = vmatprep.mubr.msk.bf16.mxu1 %vm8507_vm0, %v13811_v3  ;;  %7925 = vmatprep.mubr.msk.bf16.mxu0 %vm8507_vm0, %v13811_v3  ;;  %v8494_v25 = vld [vmem:[%s13492_s1 + $0x1d0] sm:$0xff]  }
 0x3b4   :  { %v7503_v17 = vpop.f32.mrf.mxu1  ;;  %v7639_v53 = vpop.f32.mrf.mxu0  ;;  %8040 = vmatpush3.bf16.msra.mxu1 %v8494_v25  ;;  %v3193_v25 = vrot.slane %v14264_v19, 2 }
 0x3b5   :  { %8041 = vmatprep.subr.bf16.mxu1 %v13811_v3 }
 0x3b6   :  { %v2346_v10 = vpop.f32.mrf.mxu1  ;;  %v2960_v48 = vpop.f32.mrf.mxu0 }
 0x3b7   :  { %v11452_v22 = vadd.f32 %v2346_v10, %v10745_v54  ;;  %v11455_v6 = vadd.f32 %v2960_v48, %v11223_v5 }
 0x3b8   :  { %v7504_v61 = vpop.f32.mrf.mxu1  ;;  %v7640_v17 = vpop.f32.mrf.mxu0  ;;  %8042 = vmatpush3.bf16.msra.mxu1 %v8495_v23 }
 0x3b9   :  { %8043 = vmatprep.subr.bf16.mxu1 %v13811_v3  ;;  %v11488_v17 = vsel %vm3145_vm4, %v3191_v13, %v3193_v25 }
 0x3ba   :  { %v2351_v53 = vpop.f32.mrf.mxu1  ;;  %v2965_v43 = vpop.f32.mrf.mxu0  ;;  %7790 = vmatmul.mubr.bf16.gmra.mxu1 %v11458_v24  ;;  %7926 = vmatmul.mubr.bf16.gmra.mxu0 %v11254_v37 }
 0x3bb   :  { %v11467_v54 = vadd.f32 %v2351_v53, %v10758_v8  ;;  %v11470_v5 = vadd.f32 %v2965_v43, %v11234_v0  ;;  %7793 = vmatprep.mubr.msk.bf16.mxu1 %vm8507_vm0, %v13811_v3  ;;  %7929 = vmatprep.mubr.msk.bf16.mxu0 %vm8507_vm0, %v13811_v3  ;;  %v8496_v8 = vld [vmem:[%s13492_s1 + $0x1c0] sm:$0xff]  }
 0x3bc   :  { %v7507_v10 = vpop.f32.mrf.mxu1  ;;  %v7643_v48 = vpop.f32.mrf.mxu0  ;;  %8044 = vmatpush3.bf16.msra.mxu1 %v8496_v8 }
 0x3be   :  { %v2354_v37 = vpop.f32.mrf.mxu1  ;;  %v2968_v0 = vpop.f32.mrf.mxu0 }
 0x3bf   :  { %v11482_v43 = vadd.f32 %v2354_v37, %v10774_v46  ;;  %v11485_v61 = vadd.f32 %v2968_v0, %v11248_v35  ;;  %v14266_v35 = vld [vmem:[#allocation11_spill] sm:$0xff] }
 0x3c0   :  { %v7508_v53 = vpop.f32.mrf.mxu1  ;;  %v7644_v10 = vpop.f32.mrf.mxu0  ;;  %v3195_v13 = vrot.slane %v14266_v35, 2 }
 0x3c2   :  { %v2359_v23 = vpop.f32.mrf.mxu1  ;;  %v2973_v48 = vpop.f32.mrf.mxu0  ;;  %7794 = vmatmul.mubr.bf16.gmra.mxu1 %v11488_v17  ;;  %7930 = vmatmul.mubr.bf16.gmra.mxu0 %v11281_v31  ;;  %v8497_v31 = vld [vmem:[%s13492_s1 + $0x228] sm:$0xff]   ;;  %v11510_v53 = vsel %vm3145_vm4, %v3193_v25, %v3195_v13 }
 0x3c3   :  { %v11493_v19 = vadd.f32 %v2359_v23, %v10785_v34  ;;  %v11496_v46 = vadd.f32 %v2973_v48, %v11263_v52  ;;  %7797 = vmatprep.mubr.msk.bf16.mxu1 %vm8507_vm0, %v13811_v3  ;;  %7933 = vmatprep.mubr.msk.bf16.mxu0 %vm8507_vm0, %v13811_v3 }
 0x3c4   :  { %v7511_v8 = vpop.f32.mrf.mxu1  ;;  %v7647_v37 = vpop.f32.mrf.mxu0  ;;  %8206 = vmatpush3.bf16.msra.mxu0 %v8497_v31 }
 0x3c5   :  { %14265 = vst [vmem:[#allocation163_spill] sm:$0xff] %v11496_v46  ;;  %8207 = vmatprep.subr.bf16.mxu0 %v13811_v3 }
 0x3c6   :  { %v2362_v0 = vpop.f32.mrf.mxu1  ;;  %v2976_v34 = vpop.f32.mrf.mxu0 }
 0x3c7   :  { %v11507_v52 = vadd.f32 %v2976_v34, %v11275_v4  ;;  %v14269_v4 = vld [vmem:[#allocation16_spill] sm:$0xff] }
 0x3c8   :  { %v7512_v10 = vpop.f32.mrf.mxu1  ;;  %v7648_v23 = vpop.f32.mrf.mxu0  ;;  %v3197_v25 = vrot.slane %v14269_v4, 2 }
 0x3c9   :  { %14267 = vst [vmem:[#allocation166_spill] sm:$0xff] %v11507_v52 }
 0x3ca   :  { %v2981_v48 = vpop.f32.mrf.mxu0  ;;  %v3344_v8 = vpop.f32.mrf.mxu1  ;;  %7798 = vmatmul.mubr.bf16.gmra.mxu1 %v11510_v53  ;;  %7934 = vmatmul.mubr.bf16.gmra.mxu0 %v11303_v38 }
 0x3cb   :  { %v11516_v37 = vadd.f32 %v2981_v48, %v11286_v2  ;;  %v11519_v31 = vadd.f32 %v3344_v8, %v10805_v7  ;;  %7801 = vmatprep.mubr.msk.bf16.mxu1 %vm8507_vm0, %v13811_v3  ;;  %7937 = vmatprep.mubr.msk.bf16.mxu0 %vm8507_vm0, %v13811_v3  ;;  %v14271_v2 = vld [vmem:[#allocation193_spill] sm:$0xff]  ;;  %v11533_v7 = vsel %vm3145_vm4, %v3195_v13, %v3197_v25  ;;  %v14274_v13 = vld [vmem:[#allocation22_spill] sm:$0xff] }
 0x3cc   :  { %v7651_v0 = vpop.f32.mrf.mxu0  ;;  %v7703_v34 = vpop.f32.mrf.mxu1 }
 0x3cd   :  { %14268 = vst [vmem:[#allocation142_spill] sm:$0xff] %v11516_v37  ;;  %v14273_v34 = vld [vmem:[#allocation177_spill] sm:$0xff] }
 0x3ce   :  { %v2984_v10 = vpop.f32.mrf.mxu0  ;;  %v3347_v23 = vpop.f32.mrf.mxu1 }
 0x3cf   :  { %v11527_v38 = vadd.f32 %v2984_v10, %v11297_v30  ;;  %v11530_v48 = vadd.f32 %v3347_v23, %v14271_v2 }
 0x3d0   :  { %v7652_v8 = vpop.f32.mrf.mxu0  ;;  %v7704_v35 = vpop.f32.mrf.mxu1 }
 0x3d1   :  { %14270 = vst [vmem:[#allocation140_spill] sm:$0xff] %v11527_v38  ;;  %v3199_v35 = vrot.slane %v14274_v13, 2 }
 0x3d2   :  { %v2989_v29 = vpop.f32.mrf.mxu0  ;;  %v3352_v37 = vpop.f32.mrf.mxu1  ;;  %7802 = vmatmul.mubr.bf16.gmra.mxu1 %v11533_v7  ;;  %7938 = vmatmul.mubr.bf16.gmra.mxu0 %v11325_v15 }
 0x3d3   :  { %v11538_v0 = vadd.f32 %v2989_v29, %v11308_v50  ;;  %v11541_v30 = vadd.f32 %v3352_v37, %v14273_v34  ;;  %7805 = vmatprep.mubr.msk.bf16.mxu1 %vm8507_vm0, %v13811_v3  ;;  %7941 = vmatprep.mubr.msk.bf16.mxu0 %vm8507_vm0, %v13811_v3  ;;  %v14276_v50 = vld [vmem:[#allocation194_spill] sm:$0xff]  ;;  %v11555_v37 = vsel %vm3145_vm4, %v3197_v25, %v3199_v35  ;;  %v14279_v25 = vld [vmem:[#allocation28_spill] sm:$0xff] }
 0x3d4   :  { %v7655_v10 = vpop.f32.mrf.mxu0  ;;  %v7707_v23 = vpop.f32.mrf.mxu1 }
 0x3d5   :  { %14272 = vst [vmem:[#allocation124_spill] sm:$0xff] %v11538_v0  ;;  %v14278_v23 = vld [vmem:[#allocation116_spill] sm:$0xff] }
 0x3d6   :  { %v2992_v2 = vpop.f32.mrf.mxu0  ;;  %v3355_v8 = vpop.f32.mrf.mxu1 }
 0x3d7   :  { %v11549_v15 = vadd.f32 %v2992_v2, %v11319_v20  ;;  %v11552_v29 = vadd.f32 %v3355_v8, %v14276_v50 }
 0x3d8   :  { %v7656_v34 = vpop.f32.mrf.mxu0  ;;  %v7708_v4 = vpop.f32.mrf.mxu1 }
 0x3d9   :  { %14275 = vst [vmem:[#allocation147_spill] sm:$0xff] %v11549_v15  ;;  %v3201_v4 = vrot.slane %v14279_v25, 2 }
 0x3da   :  { %v2997_v0 = vpop.f32.mrf.mxu0  ;;  %v3360_v38 = vpop.f32.mrf.mxu1  ;;  %7806 = vmatmul.mubr.bf16.gmra.mxu1 %v11555_v37  ;;  %7942 = vmatmul.mubr.bf16.gmra.mxu0 %v11347_v18 }
 0x3db   :  { %v11560_v10 = vadd.f32 %v2997_v0, %v11330_v21  ;;  %v11563_v20 = vadd.f32 %v3360_v38, %v14278_v23  ;;  %7809 = vmatprep.mubr.msk.bf16.mxu1 %vm8507_vm0, %v13811_v3  ;;  %7945 = vmatprep.mubr.msk.bf16.mxu0 %vm8507_vm0, %v13811_v3  ;;  %v14281_v21 = vld [vmem:[#allocation117_spill] sm:$0xff]  ;;  %v11577_v38 = vsel %vm3145_vm4, %v3199_v35, %v3201_v4  ;;  %v14284_v35 = vld [vmem:[#allocation34_spill] sm:$0xff] }
 0x3dc   :  { %v7659_v2 = vpop.f32.mrf.mxu0  ;;  %v7711_v8 = vpop.f32.mrf.mxu1 }
 0x3dd   :  { %14277 = vst [vmem:[#allocation145_spill] sm:$0xff] %v11560_v10  ;;  %v14283_v8 = vld [vmem:[#allocation118_spill] sm:$0xff] }
 0x3de   :  { %v3000_v50 = vpop.f32.mrf.mxu0  ;;  %v3363_v34 = vpop.f32.mrf.mxu1 }
 0x3df   :  { %v11571_v18 = vadd.f32 %v3000_v50, %v11341_v55  ;;  %v11574_v0 = vadd.f32 %v3363_v34, %v14281_v21 }
 0x3e0   :  { %v7660_v23 = vpop.f32.mrf.mxu0  ;;  %v7712_v13 = vpop.f32.mrf.mxu1 }
 0x3e1   :  { %14280 = vst [vmem:[#allocation127_spill] sm:$0xff] %v11571_v18  ;;  %v3203_v13 = vrot.slane %v14284_v35, 2 }
 0x3e2   :  { %v3005_v10 = vpop.f32.mrf.mxu0  ;;  %v3368_v15 = vpop.f32.mrf.mxu1  ;;  %7810 = vmatmul.mubr.bf16.gmra.mxu1 %v11577_v38  ;;  %7946 = vmatmul.mubr.bf16.gmra.mxu0 %v11372_v40 }
 0x3e3   :  { %v11582_v2 = vadd.f32 %v3005_v10, %v11352_v16  ;;  %v11585_v55 = vadd.f32 %v3368_v15, %v14283_v8  ;;  %7813 = vmatprep.mubr.msk.bf16.mxu1 %vm8507_vm0, %v13811_v3  ;;  %7949 = vmatprep.mubr.msk.bf16.mxu0 %vm8507_vm0, %v13811_v3  ;;  %v14286_v16 = vld [vmem:[#allocation183_spill] sm:$0xff]  ;;  %v11599_v15 = vsel %vm3145_vm4, %v3201_v4, %v3203_v13  ;;  %v14289_v4 = vld [vmem:[#allocation40_spill] sm:$0xff] }
 0x3e4   :  { %v7663_v50 = vpop.f32.mrf.mxu0  ;;  %v7715_v34 = vpop.f32.mrf.mxu1 }
 0x3e5   :  { %14282 = vst [vmem:[#allocation152_spill] sm:$0xff] %v11582_v2  ;;  %v14288_v34 = vld [vmem:[#allocation119_spill] sm:$0xff] }
 0x3e6   :  { %v3008_v21 = vpop.f32.mrf.mxu0  ;;  %v3371_v23 = vpop.f32.mrf.mxu1 }
 0x3e7   :  { %v11593_v40 = vadd.f32 %v3008_v21, %v11366_v63  ;;  %v11596_v10 = vadd.f32 %v3371_v23, %v14286_v16 }
 0x3e8   :  { %v7664_v8 = vpop.f32.mrf.mxu0  ;;  %v7716_v25 = vpop.f32.mrf.mxu1 }
 0x3e9   :  { %14285 = vst [vmem:[#allocation150_spill] sm:$0xff] %v11593_v40  ;;  %v3205_v25 = vrot.slane %v14289_v4, 2  ;;  %v14311_v40 = vld [vmem:[#allocation128_spill] sm:$0xff] }
 0x3ea   :  { %v3013_v2 = vpop.f32.mrf.mxu0  ;;  %v3376_v18 = vpop.f32.mrf.mxu1  ;;  %7814 = vmatmul.mubr.bf16.gmra.mxu1 %v11599_v15  ;;  %7950 = vmatmul.mubr.bf16.gmra.mxu0 %v11399_v14  ;;  %v8498_v14 = vld [vmem:[%s13492_s1 + $0x220] sm:$0xff]  }
 0x3eb   :  { %v11604_v50 = vadd.f32 %v3013_v2, %v11381_v49  ;;  %v11607_v63 = vadd.f32 %v3376_v18, %v14288_v34  ;;  %7817 = vmatprep.mubr.msk.bf16.mxu1 %vm8507_vm0, %v13811_v3  ;;  %7953 = vmatprep.mubr.msk.bf16.mxu0 %vm8507_vm0, %v13811_v3  ;;  %v14291_v2 = vld [vmem:[#allocation120_spill] sm:$0xff]  ;;  %v11624_v34 = vsel %vm3145_vm4, %v3203_v13, %v3205_v25  ;;  %v14294_v13 = vld [vmem:[#allocation47_spill] sm:$0xff] }
 0x3ec   :  { %v7667_v21 = vpop.f32.mrf.mxu0  ;;  %v7719_v23 = vpop.f32.mrf.mxu1  ;;  %8208 = vmatpush3.bf16.msra.mxu0 %v8498_v14 }
 0x3ed   :  { %14287 = vst [vmem:[#allocation130_spill] sm:$0xff] %v11604_v50  ;;  %8209 = vmatprep.subr.bf16.mxu0 %v13811_v3  ;;  %v8499_v50 = vld [vmem:[%s13492_s1 + $0x218] sm:$0xff]  }
 0x3ee   :  { %v3016_v16 = vpop.f32.mrf.mxu0  ;;  %v3379_v49 = vpop.f32.mrf.mxu1 }
 0x3ef   :  { %v11618_v18 = vadd.f32 %v3016_v16, %v11393_v27  ;;  %v11621_v8 = vadd.f32 %v3379_v49, %v14291_v2  ;;  %v14293_v27 = vld [vmem:[#allocation186_spill] sm:$0xff]  ;;  %v3207_v49 = vrot.slane %v14294_v13, 2 }
 0x3f0   :  { %v7668_v21 = vpop.f32.mrf.mxu0  ;;  %v7720_v23 = vpop.f32.mrf.mxu1  ;;  %8210 = vmatpush3.bf16.msra.mxu0 %v8499_v50  ;;  %v8501_v50 = vld [vmem:[%s13492_s1 + $0x208] sm:$0xff]  }
 0x3f1   :  { %14290 = vst [vmem:[#allocation197_spill] sm:$0xff] %v11618_v18  ;;  %8211 = vmatprep.subr.bf16.mxu0 %v13811_v3 }
 0x3f2   :  { %v3021_v4 = vpop.f32.mrf.mxu0  ;;  %v3384_v35 = vpop.f32.mrf.mxu1  ;;  %7818 = vmatmul.mubr.bf16.gmra.mxu1 %v11624_v34  ;;  %7954 = vmatmul.mubr.bf16.gmra.mxu0 %v11428_v39 }
 0x3f3   :  { %v11630_v14 = vadd.f32 %v3021_v4, %v11407_v60  ;;  %v11633_v16 = vadd.f32 %v3384_v35, %v14293_v27  ;;  %7821 = vmatprep.mubr.msk.bf16.mxu1 %vm8507_vm0, %v13811_v3  ;;  %7957 = vmatprep.mubr.msk.bf16.mxu0 %vm8507_vm0, %v13811_v3  ;;  %v14296_v60 = vld [vmem:[#allocation121_spill] sm:$0xff]  ;;  %v11647_v35 = vsel %vm3145_vm4, %v3205_v25, %v3207_v49 }
 0x3f4   :  { %v7671_v2 = vpop.f32.mrf.mxu0  ;;  %v7723_v21 = vpop.f32.mrf.mxu1  ;;  %v14299_v25 = vld [vmem:[#allocation53_spill] sm:$0xff] }
 0x3f5   :  { %14292 = vst [vmem:[#allocation155_spill] sm:$0xff] %v11630_v14 }
 0x3f6   :  { %v3024_v23 = vpop.f32.mrf.mxu0  ;;  %v3387_v18 = vpop.f32.mrf.mxu1 }
 0x3f7   :  { %v11641_v39 = vadd.f32 %v3024_v23, %v11422_v36  ;;  %v11644_v4 = vadd.f32 %v3387_v18, %v14296_v60  ;;  %v14298_v18 = vld [vmem:[#allocation122_spill] sm:$0xff] }
 0x3f8   :  { %v7672_v27 = vpop.f32.mrf.mxu0  ;;  %v7724_v14 = vpop.f32.mrf.mxu1 }
 0x3f9   :  { %14295 = vst [vmem:[#allocation133_spill] sm:$0xff] %v11641_v39  ;;  %v3209_v14 = vrot.slane %v14299_v25, 2 }
 0x3fa   :  { %v3029_v13 = vpop.f32.mrf.mxu0  ;;  %v3392_v2 = vpop.f32.mrf.mxu1  ;;  %7822 = vmatmul.mubr.bf16.gmra.mxu1 %v11647_v35  ;;  %7958 = vmatmul.mubr.bf16.gmra.mxu0 %v11458_v24 }
 0x3fb   :  { %v11655_v36 = vadd.f32 %v3029_v13, %v11437_v62  ;;  %v11658_v21 = vadd.f32 %v3392_v2, %v14298_v18  ;;  %7825 = vmatprep.mubr.msk.bf16.mxu1 %vm8507_vm0, %v13811_v3  ;;  %7961 = vmatprep.mubr.msk.bf16.mxu0 %vm8507_vm0, %v13811_v3  ;;  %v8500_v62 = vld [vmem:[%s13492_s1 + $0x210] sm:$0xff]   ;;  %v14301_v2 = vld [vmem:[#allocation189_spill] sm:$0xff] }
 0x3fc   :  { %v7675_v23 = vpop.f32.mrf.mxu0  ;;  %v7727_v60 = vpop.f32.mrf.mxu1  ;;  %8212 = vmatpush3.bf16.msra.mxu0 %v8500_v62  ;;  %v14304_v62 = vld [vmem:[#allocation60_spill] sm:$0xff] }
 0x3fd   :  { %14297 = vst [vmem:[#allocation157_spill] sm:$0xff] %v11655_v36  ;;  %v11676_v36 = vsel %vm3145_vm4, %v3207_v49, %v3209_v14  ;;  %8213 = vmatprep.subr.bf16.mxu0 %v13811_v3  ;;  %v14303_v49 = vld [vmem:[#allocation123_spill] sm:$0xff] }
 0x3fe   :  { %v3032_v24 = vpop.f32.mrf.mxu0  ;;  %v3395_v13 = vpop.f32.mrf.mxu1 }
 0x3ff   :  { %v11670_v27 = vadd.f32 %v3032_v24, %v11452_v22  ;;  %v11673_v18 = vadd.f32 %v3395_v13, %v14301_v2  ;;  %v3211_v13 = vrot.slane %v14304_v62, 2 }
 0x400   :  { %v7676_v23 = vpop.f32.mrf.mxu0  ;;  %v7728_v60 = vpop.f32.mrf.mxu1  ;;  %8214 = vmatpush3.bf16.msra.mxu0 %v8501_v50 }
 0x401   :  { %14300 = vst [vmem:[#allocation160_spill] sm:$0xff] %v11670_v27  ;;  %8215 = vmatprep.subr.bf16.mxu0 %v13811_v3  ;;  %v14306_v60 = vld [vmem:[#allocation125_spill] sm:$0xff] }
 0x402   :  { %v3037_v25 = vpop.f32.mrf.mxu0  ;;  %v3400_v39 = vpop.f32.mrf.mxu1  ;;  %7826 = vmatmul.mubr.bf16.gmra.mxu1 %v11676_v36  ;;  %7962 = vmatmul.mubr.bf16.gmra.mxu0 %v11488_v17 }
 0x403   :  { %v11685_v22 = vadd.f32 %v3037_v25, %v11467_v54  ;;  %v11688_v24 = vadd.f32 %v3400_v39, %v14303_v49  ;;  %7829 = vmatprep.mubr.msk.bf16.mxu1 %vm8507_vm0, %v13811_v3  ;;  %7965 = vmatprep.mubr.msk.bf16.mxu0 %vm8507_vm0, %v13811_v3  ;;  %v8502_v54 = vld [vmem:[%s13492_s1 + $0x200] sm:$0xff]  }
 0x404   :  { %v7679_v2 = vpop.f32.mrf.mxu0  ;;  %v7731_v23 = vpop.f32.mrf.mxu1  ;;  %8216 = vmatpush3.bf16.msra.mxu0 %v8502_v54 }
 0x405   :  { %14302 = vst [vmem:[#allocation136_spill] sm:$0xff] %v11685_v22  ;;  %v11706_v22 = vsel %vm3145_vm4, %v3209_v14, %v3211_v13  ;;  %v14309_v14 = vld [vmem:[#allocation64_spill] sm:$0xff] }
 0x406   :  { %v3040_v17 = vpop.f32.mrf.mxu0  ;;  %v3403_v39 = vpop.f32.mrf.mxu1  ;;  %v3213_v54 = vrot.slane %v14309_v14, 2 }
 0x407   :  { %v11700_v25 = vadd.f32 %v3040_v17, %v11482_v43  ;;  %v11703_v49 = vadd.f32 %v3403_v39, %v14306_v60  ;;  %v14308_v43 = vld [vmem:[#allocation192_spill] sm:$0xff] }
 0x408   :  { %v7680_v2 = vpop.f32.mrf.mxu0  ;;  %v7732_v23 = vpop.f32.mrf.mxu1 }
 0x409   :  { %14305 = vst [vmem:[#allocation2_spill] sm:$0xff] %v11700_v25  ;;  %v14310_v25 = vld [vmem:[#allocation126_spill] sm:$0xff] }
 0x40a   :  { %v3045_v50 = vpop.f32.mrf.mxu0  ;;  %v3408_v62 = vpop.f32.mrf.mxu1  ;;  %7830 = vmatmul.mubr.bf16.gmra.mxu1 %v11706_v22  ;;  %7966 = vmatmul.mubr.bf16.gmra.mxu0 %v11510_v53 }
 0x40b   :  { %v11711_v27 = vadd.f32 %v3045_v50, %v11493_v19  ;;  %v11714_v17 = vadd.f32 %v3408_v62, %v14308_v43  ;;  %7833 = vmatprep.mubr.msk.bf16.mxu1 %vm8507_vm0, %v13811_v3  ;;  %7969 = vmatprep.mubr.msk.bf16.mxu0 %vm8507_vm0, %v13811_v3  ;;  %v11725_v19 = vsel %vm3145_vm4, %v3211_v13, %v3213_v54  ;;  %v14313_v13 = vld [vmem:[#allocation70_spill] sm:$0xff] }
 0x40c   :  { %v7683_v39 = vpop.f32.mrf.mxu0  ;;  %v7735_v60 = vpop.f32.mrf.mxu1 }
 0x40d   :  { %14307 = vst [vmem:[#allocation162_spill] sm:$0xff] %v11711_v27 }
 0x40e   :  { %v3048_v2 = vpop.f32.mrf.mxu0  ;;  %v3411_v23 = vpop.f32.mrf.mxu1 }
 0x40f   :  { %v11722_v53 = vadd.f32 %v3411_v23, %v14310_v25  ;;  %v3215_v25 = vrot.slane %v14313_v13, 2  ;;  %v14319_v13 = vld [vmem:[#allocation131_spill] sm:$0xff] }
 0x410   :  { %v7684_v62 = vpop.f32.mrf.mxu0  ;;  %v7736_v50 = vpop.f32.mrf.mxu1 }
 0x411   :  { %v14314_v50 = vld [vmem:[#allocation195_spill] sm:$0xff] }
 0x412   :  { %v3416_v43 = vpop.f32.mrf.mxu1  ;;  %7834 = vmatmul.mubr.bf16.gmra.mxu1 %v11725_v19  ;;  %v3836_v27 = vpop.f32.mrf.mxu0  ;;  %7970 = vmatmul.mubr.bf16.gmra.mxu0 %v11533_v7 }
 0x413   :  { %v11730_v14 = vadd.f32 %v3416_v43, %v14311_v40  ;;  %v11733_v39 = vadd.f32 %v3836_v27, %v11519_v31  ;;  %7837 = vmatprep.mubr.msk.bf16.mxu1 %vm8507_vm0, %v13811_v3  ;;  %7973 = vmatprep.mubr.msk.bf16.mxu0 %vm8507_vm0, %v13811_v3  ;;  %v11747_v31 = vsel %vm3145_vm4, %v3213_v54, %v3215_v25 }
 0x414   :  { %v7739_v60 = vpop.f32.mrf.mxu1  ;;  %v7875_v2 = vpop.f32.mrf.mxu0 }
 0x415   :  { %14312 = vst [vmem:[#allocation165_spill] sm:$0xff] %v11733_v39  ;;  %v14316_v60 = vld [vmem:[#allocation129_spill] sm:$0xff] }
 0x416   :  { %v3419_v23 = vpop.f32.mrf.mxu1  ;;  %v3839_v62 = vpop.f32.mrf.mxu0 }
 0x417   :  { %v11741_v7 = vadd.f32 %v3419_v23, %v14314_v50  ;;  %v11744_v40 = vadd.f32 %v3839_v62, %v11530_v48  ;;  %v14318_v48 = vld [vmem:[#allocation76_spill] sm:$0xff] }
 0x418   :  { %v7740_v27 = vpop.f32.mrf.mxu1  ;;  %v7876_v43 = vpop.f32.mrf.mxu0  ;;  %v3217_v54 = vrot.slane %v14318_v48, 2 }
 0x419   :  { %14315 = vst [vmem:[#allocation139_spill] sm:$0xff] %v11744_v40 }
 0x41a   :  { %v3424_v39 = vpop.f32.mrf.mxu1  ;;  %7838 = vmatmul.mubr.bf16.gmra.mxu1 %v11747_v31  ;;  %v3844_v52 = vpop.f32.mrf.mxu0  ;;  %7974 = vmatmul.mubr.bf16.gmra.mxu0 %v11555_v37 }
 0x41b   :  { %v11752_v2 = vadd.f32 %v3424_v39, %v14316_v60  ;;  %v11755_v23 = vadd.f32 %v3844_v52, %v11541_v30  ;;  %7841 = vmatprep.mubr.msk.bf16.mxu1 %vm8507_vm0, %v13811_v3  ;;  %7977 = vmatprep.mubr.msk.bf16.mxu0 %vm8507_vm0, %v13811_v3  ;;  %v11769_v52 = vsel %vm3145_vm4, %v3215_v25, %v3217_v54 }
 0x41c   :  { %v7743_v62 = vpop.f32.mrf.mxu1  ;;  %v7879_v50 = vpop.f32.mrf.mxu0 }
 0x41d   :  { %14317 = vst [vmem:[#allocation167_spill] sm:$0xff] %v11755_v23  ;;  %v14321_v62 = vld [vmem:[#allocation196_spill] sm:$0xff] }
 0x41e   :  { %v3427_v27 = vpop.f32.mrf.mxu1  ;;  %v3847_v43 = vpop.f32.mrf.mxu0 }
 0x41f   :  { %v11763_v37 = vadd.f32 %v3427_v27, %v14319_v13  ;;  %v11766_v39 = vadd.f32 %v3847_v43, %v11552_v29  ;;  %v14323_v29 = vld [vmem:[#allocation82_spill] sm:$0xff] }
 0x420   :  { %v7744_v30 = vpop.f32.mrf.mxu1  ;;  %v7880_v60 = vpop.f32.mrf.mxu0  ;;  %v3219_v25 = vrot.slane %v14323_v29, 2 }
 0x421   :  { %14320 = vst [vmem:[#allocation3_spill] sm:$0xff] %v11766_v39 }
 0x422   :  { %v3432_v23 = vpop.f32.mrf.mxu1  ;;  %7842 = vmatmul.mubr.bf16.gmra.mxu1 %v11769_v52  ;;  %v3852_v40 = vpop.f32.mrf.mxu0  ;;  %7978 = vmatmul.mubr.bf16.gmra.mxu0 %v11577_v38 }
 0x423   :  { %v11774_v50 = vadd.f32 %v3432_v23, %v14321_v62  ;;  %v11777_v13 = vadd.f32 %v3852_v40, %v11563_v20  ;;  %7845 = vmatprep.mubr.msk.bf16.mxu1 %vm8507_vm0, %v13811_v3  ;;  %7981 = vmatprep.mubr.msk.bf16.mxu0 %vm8507_vm0, %v13811_v3  ;;  %v11791_v20 = vsel %vm3145_vm4, %v3217_v54, %v3219_v25 }
 0x424   :  { %v7747_v27 = vpop.f32.mrf.mxu1  ;;  %v7883_v43 = vpop.f32.mrf.mxu0 }
 0x425   :  { %14322 = vst [vmem:[#allocation5_spill] sm:$0xff] %v11777_v13  ;;  %v14325_v27 = vld [vmem:[#allocation132_spill] sm:$0xff] }
 0x426   :  { %v3435_v30 = vpop.f32.mrf.mxu1  ;;  %v3855_v60 = vpop.f32.mrf.mxu0 }
 0x427   :  { %v11785_v38 = vadd.f32 %v3435_v30, %v11073_v51  ;;  %v11788_v23 = vadd.f32 %v3855_v60, %v11574_v0  ;;  %v14327_v0 = vld [vmem:[#allocation180_spill] sm:$0xff] }
 0x428   :  { %v7748_v40 = vpop.f32.mrf.mxu1  ;;  %v7884_v62 = vpop.f32.mrf.mxu0  ;;  %v11806_v54 = vrot.slane %v14327_v0, 2 }
 0x429   :  { %14324 = vst [vmem:[#allocation169_spill] sm:$0xff] %v11788_v23 }
 0x42a   :  { %v3440_v48 = vpop.f32.mrf.mxu1  ;;  %7846 = vmatmul.mubr.bf16.gmra.mxu1 %v11791_v20  ;;  %v3860_v13 = vpop.f32.mrf.mxu0  ;;  %7982 = vmatmul.mubr.bf16.gmra.mxu0 %v11599_v15 }
 0x42b   :  { %v11796_v43 = vadd.f32 %v3440_v48, %v14325_v27  ;;  %v11799_v51 = vadd.f32 %v3860_v13, %v11585_v55  ;;  %7849 = vmatprep.mubr.msk.bf16.mxu1 %vm8507_vm0, %v13811_v3  ;;  %7985 = vmatprep.mubr.msk.bf16.mxu0 %vm8507_vm0, %v13811_v3  ;;  %v11816_v55 = vsel %vm3145_vm4, %v3219_v25, %v11806_v54 }
 0x42c   :  { %v7751_v30 = vpop.f32.mrf.mxu1  ;;  %v7887_v60 = vpop.f32.mrf.mxu0 }
 0x42d   :  { %14326 = vst [vmem:[#allocation144_spill] sm:$0xff] %v11799_v51  ;;  %v14329_v30 = vld [vmem:[#allocation134_spill] sm:$0xff] }
 0x42e   :  { %v3443_v40 = vpop.f32.mrf.mxu1  ;;  %v3863_v62 = vpop.f32.mrf.mxu0 }
 0x42f   :  { %v11809_v15 = vadd.f32 %v3443_v40, %v11095_v58  ;;  %v11812_v48 = vadd.f32 %v3863_v62, %v11596_v10 }
 0x430   :  { %v7752_v13 = vpop.f32.mrf.mxu1  ;;  %v7888_v27 = vpop.f32.mrf.mxu0 }
 0x431   :  { %14328 = vst [vmem:[#allocation170_spill] sm:$0xff] %v11812_v48  ;;  %v14331_v13 = vld [vmem:[#allocation17_spill] sm:$0xff]  ;;  %v14332_v48 = vld [vmem:[#allocation12_spill] sm:$0xff] }
 0x432   :  { %v3448_v29 = vpop.f32.mrf.mxu1  ;;  %7850 = vmatmul.mubr.bf16.gmra.mxu1 %v11816_v55  ;;  %v3868_v0 = vpop.f32.mrf.mxu0  ;;  %7986 = vmatmul.mubr.bf16.gmra.mxu0 %v11624_v34  ;;  %v4241_v27 = vrot.slane %v14331_v13, 2  ;;  %v4242_v34 = vrot.slane %v14332_v48, 3  ;;  %v14335_v48 = vld [vmem:[#allocation135_spill] sm:$0xff] }
 0x433   :  { %v11821_v60 = vadd.f32 %v3448_v29, %v14329_v30  ;;  %v11824_v58 = vadd.f32 %v3868_v0, %v11607_v63  ;;  %7853 = vmatprep.mubr.msk.bf16.mxu1 %vm8507_vm0, %v13811_v3  ;;  %7989 = vmatprep.mubr.msk.bf16.mxu0 %vm8507_vm0, %v13811_v3  ;;  %v14333_v0 = vld [vmem:[#allocation23_spill] sm:$0xff] }
 0x434   :  { %v7755_v10 = vpop.f32.mrf.mxu1  ;;  %v7891_v25 = vpop.f32.mrf.mxu0  ;;  %v4244_v30 = vrot.slane %v14333_v0, 2  ;;  %v4243_v13 = vor.u32 %v4242_v34, %v4241_v27  ;;  %v14338_v27 = vld [vmem:[#allocation24_spill] sm:$0xff]  ;;  %v14339_v0 = vld [vmem:[#allocation137_spill] sm:$0xff] }
 0x435   :  { %14330 = vst [vmem:[#allocation172_spill] sm:$0xff] %v11824_v58  ;;  %v14334_v58 = vld [vmem:[#allocation18_spill] sm:$0xff]  ;;  %v4249_v34 = vrot.slane %v14338_v27, 3 }
 0x436   :  { %v3451_v40 = vpop.f32.mrf.mxu1  ;;  %v3871_v62 = vpop.f32.mrf.mxu0  ;;  %v4245_v51 = vrot.slane %v14334_v58, 3 }
 0x437   :  { %v11833_v29 = vadd.f32 %v3451_v40, %v11117_v57  ;;  %v11836_v63 = vadd.f32 %v3871_v62, %v11621_v8 }
 0x438   :  { %v7756_v23 = vpop.f32.mrf.mxu1  ;;  %v7892_v39 = vpop.f32.mrf.mxu0  ;;  %v4246_v8 = vor.u32 %v4245_v51, %v4244_v30 }
 0x43a   :  { %v3456_v10 = vpop.f32.mrf.mxu1  ;;  %7854 = vmatmul.mubr.bf16.gmra.mxu1 %v11806_v54  ;;  %v3876_v25 = vpop.f32.mrf.mxu0  ;;  %7990 = vmatmul.mubr.bf16.gmra.mxu0 %v11647_v35  ;;  %v14337_v35 = vld [vmem:[#allocation29_spill] sm:$0xff] }
 0x43b   :  { %v11843_v46 = vadd.f32 %v3456_v10, %v14335_v48  ;;  %v11846_v57 = vadd.f32 %v3876_v25, %v11633_v16  ;;  %7993 = vmatprep.mubr.msk.bf16.mxu0 %vm8507_vm0, %v13811_v3  ;;  %8045 = vmatprep.mubr.msk.bf16.mxu1 %vm8507_vm0, %v13811_v3  ;;  %v4248_v62 = vrot.slane %v14337_v35, 2  ;;  %v4247_v25 = vsel %vm4240_vm5, %v4243_v13, %v4246_v8 }
 0x43c   :  { %v7759_v39 = vpop.f32.mrf.mxu1  ;;  %v7895_v23 = vpop.f32.mrf.mxu0 }
 0x43d   :  { %14336 = vst [vmem:[#allocation149_spill] sm:$0xff] %v11846_v57  ;;  %v4250_v39 = vor.u32 %v4249_v34, %v4248_v62  ;;  %v14340_v23 = vld [vmem:[#allocation138_spill] sm:$0xff] }
 0x43e   :  { %v3459_v58 = vpop.f32.mrf.mxu1  ;;  %v3879_v40 = vpop.f32.mrf.mxu0 }
 0x43f   :  { %v11855_v10 = vadd.f32 %v3459_v58, %v14339_v0  ;;  %v11858_v16 = vadd.f32 %v3879_v40, %v11644_v4  ;;  %v14342_v40 = vld [vmem:[#allocation141_spill] sm:$0xff] }
 0x440   :  { %v7760_v48 = vpop.f32.mrf.mxu1  ;;  %v7896_v57 = vpop.f32.mrf.mxu0 }
 0x442   :  { %v3464_v51 = vpop.f32.mrf.mxu1  ;;  %v3884_v30 = vpop.f32.mrf.mxu0  ;;  %7994 = vmatmul.mubr.bf16.gmra.mxu0 %v11676_v36  ;;  %8046 = vmatmul.mubr.bf16.vlgmr.msra.gmra.mxu1 %v4247_v25  ;;  %v4251_v36 = vsel %vm4240_vm5, %v4246_v8, %v4250_v39  ;;  %v14345_v25 = vld [vmem:[#allocation30_spill] sm:$0xff] }
 0x443   :  { %v11863_v35 = vadd.f32 %v3464_v51, %v14340_v23  ;;  %v11866_v27 = vadd.f32 %v3884_v30, %v11658_v21  ;;  %7997 = vmatprep.mubr.msk.bf16.mxu0 %vm8507_vm0, %v13811_v3  ;;  %8049 = vmatprep.mubr.msk.bf16.mxu1 %vm8507_vm0, %v13811_v3  ;;  %v14344_v21 = vld [vmem:[#allocation35_spill] sm:$0xff]  ;;  %v4253_v48 = vrot.slane %v14345_v25, 3  ;;  %v14348_v25 = vld [vmem:[#allocation41_spill] sm:$0xff] }
 0x444   :  { %v7763_v4 = vpop.f32.mrf.mxu1  ;;  %v7899_v13 = vpop.f32.mrf.mxu0  ;;  %v4252_v0 = vrot.slane %v14344_v21, 2 }
 0x445   :  { %14341 = vst [vmem:[#allocation173_spill] sm:$0xff] %v11866_v27  ;;  %v14346_v4 = vld [vmem:[#allocation143_spill] sm:$0xff] }
 0x446   :  { %v3467_v57 = vpop.f32.mrf.mxu1  ;;  %v3887_v58 = vpop.f32.mrf.mxu0 }
 0x447   :  { %v11874_v62 = vadd.f32 %v3467_v57, %v14342_v40  ;;  %v11877_v34 = vadd.f32 %v3887_v58, %v11673_v18  ;;  %v4254_v18 = vor.u32 %v4253_v48, %v4252_v0 }
 0x448   :  { %v7764_v51 = vpop.f32.mrf.mxu1  ;;  %v7900_v30 = vpop.f32.mrf.mxu0 }
 0x449   :  { %14343 = vst [vmem:[#allocation175_spill] sm:$0xff] %v11877_v34  ;;  %v14350_v30 = vld [vmem:[#allocation146_spill] sm:$0xff] }
 0x44a   :  { %v3472_v23 = vpop.f32.mrf.mxu1  ;;  %v3892_v27 = vpop.f32.mrf.mxu0  ;;  %7998 = vmatmul.mubr.bf16.gmra.mxu0 %v11706_v22  ;;  %8050 = vmatmul.mubr.bf16.gmra.mxu1 %v4251_v36  ;;  %v4256_v22 = vrot.slane %v14348_v25, 2  ;;  %v14349_v36 = vld [vmem:[#allocation36_spill] sm:$0xff] }
 0x44b   :  { %v11883_v13 = vadd.f32 %v3472_v23, %v14346_v4  ;;  %v11886_v8 = vadd.f32 %v3892_v27, %v11688_v24  ;;  %8001 = vmatprep.mubr.msk.bf16.mxu0 %vm8507_vm0, %v13811_v3  ;;  %8053 = vmatprep.mubr.msk.bf16.mxu1 %vm8507_vm0, %v13811_v3  ;;  %v4257_v51 = vrot.slane %v14349_v36, 3  ;;  %v4255_v27 = vsel %vm4240_vm5, %v4250_v39, %v4254_v18 }
 0x44c   :  { %v7767_v57 = vpop.f32.mrf.mxu1  ;;  %v7903_v58 = vpop.f32.mrf.mxu0 }
 0x44d   :  { %14347 = vst [vmem:[#allocation154_spill] sm:$0xff] %v11886_v8  ;;  %v4258_v48 = vor.u32 %v4257_v51, %v4256_v22  ;;  %v14351_v57 = vld [vmem:[#allocation148_spill] sm:$0xff]  ;;  %v14354_v51 = vld [vmem:[#allocation43_spill] sm:$0xff] }
 0x44e   :  { %v3475_v40 = vpop.f32.mrf.mxu1  ;;  %v3895_v21 = vpop.f32.mrf.mxu0 }
 0x44f   :  { %v11895_v23 = vadd.f32 %v3475_v40, %v14350_v30  ;;  %v11898_v24 = vadd.f32 %v3895_v21, %v11703_v49  ;;  %v14352_v21 = vld [vmem:[#allocation151_spill] sm:$0xff]  ;;  %v4261_v30 = vrot.slane %v14354_v51, 3  ;;  %v14357_v51 = vld [vmem:[#allocation52_spill] sm:$0xff] }
 0x450   :  { %v7768_v4 = vpop.f32.mrf.mxu1  ;;  %v7904_v8 = vpop.f32.mrf.mxu0 }
 0x452   :  { %v3480_v34 = vpop.f32.mrf.mxu1  ;;  %v3900_v0 = vpop.f32.mrf.mxu0  ;;  %8002 = vmatmul.mubr.bf16.gmra.mxu0 %v11725_v19  ;;  %8054 = vmatmul.mubr.bf16.gmra.mxu1 %v4255_v27  ;;  %v4259_v19 = vsel %vm4240_vm5, %v4254_v18, %v4258_v48 }
 0x453   :  { %v11903_v58 = vadd.f32 %v3480_v34, %v14351_v57  ;;  %v11906_v25 = vadd.f32 %v3900_v0, %v11714_v17  ;;  %8005 = vmatprep.mubr.msk.bf16.mxu0 %vm8507_vm0, %v13811_v3  ;;  %8057 = vmatprep.mubr.msk.bf16.mxu1 %vm8507_vm0, %v13811_v3  ;;  %v14353_v17 = vld [vmem:[#allocation48_spill] sm:$0xff] }
 0x454   :  { %v7771_v49 = vpop.f32.mrf.mxu1  ;;  %v7907_v39 = vpop.f32.mrf.mxu0  ;;  %v4260_v36 = vrot.slane %v14353_v17, 2 }
 0x455   :  { %v14355_v49 = vld [vmem:[#allocation153_spill] sm:$0xff] }
 0x456   :  { %v3483_v8 = vpop.f32.mrf.mxu1  ;;  %v3903_v40 = vpop.f32.mrf.mxu0 }
 0x457   :  { %v11914_v22 = vadd.f32 %v3483_v8, %v14352_v21  ;;  %v11917_v34 = vadd.f32 %v3903_v40, %v11722_v53  ;;  %v4262_v53 = vor.u32 %v4261_v30, %v4260_v36 }
 0x458   :  { %v7772_v27 = vpop.f32.mrf.mxu1  ;;  %v7908_v4 = vpop.f32.mrf.mxu0 }
 0x45a   :  { %v3488_v0 = vpop.f32.mrf.mxu1  ;;  %v3908_v57 = vpop.f32.mrf.mxu0  ;;  %8006 = vmatmul.mubr.bf16.gmra.mxu0 %v11747_v31  ;;  %8058 = vmatmul.mubr.bf16.gmra.mxu1 %v4259_v19  ;;  %v4264_v31 = vrot.slane %v14357_v51, 2  ;;  %v14358_v19 = vld [vmem:[#allocation46_spill] sm:$0xff] }
 0x45b   :  { %v11923_v39 = vadd.f32 %v3488_v0, %v14355_v49  ;;  %v11926_v18 = vadd.f32 %v3908_v57, %v11730_v14  ;;  %8009 = vmatprep.mubr.msk.bf16.mxu0 %vm8507_vm0, %v13811_v3  ;;  %8061 = vmatprep.mubr.msk.bf16.mxu1 %vm8507_vm0, %v13811_v3  ;;  %v4265_v27 = vrot.slane %v14358_v19, 3  ;;  %v4263_v0 = vsel %vm4240_vm5, %v4258_v48, %v4262_v53 }
 0x45c   :  { %v7775_v8 = vpop.f32.mrf.mxu1  ;;  %v7911_v40 = vpop.f32.mrf.mxu0 }
 0x45d   :  { %14356 = vst [vmem:[#allocation176_spill] sm:$0xff] %v11926_v18  ;;  %v4266_v30 = vor.u32 %v4265_v27, %v4264_v31  ;;  %v14359_v8 = vld [vmem:[#allocation156_spill] sm:$0xff]  ;;  %v14362_v27 = vld [vmem:[#allocation54_spill] sm:$0xff] }
 0x45e   :  { %v3491_v21 = vpop.f32.mrf.mxu1  ;;  %v3911_v17 = vpop.f32.mrf.mxu0 }
 0x45f   :  { %v11935_v4 = vadd.f32 %v3491_v21, %v11226_v42  ;;  %v11938_v14 = vadd.f32 %v3911_v17, %v11741_v7  ;;  %v14360_v17 = vld [vmem:[#allocation158_spill] sm:$0xff] }
 0x460   :  { %v7776_v57 = vpop.f32.mrf.mxu1  ;;  %v7912_v49 = vpop.f32.mrf.mxu0 }
 0x462   :  { %v3496_v18 = vpop.f32.mrf.mxu1  ;;  %v3916_v36 = vpop.f32.mrf.mxu0  ;;  %8010 = vmatmul.mubr.bf16.gmra.mxu0 %v11769_v52  ;;  %8062 = vmatmul.mubr.bf16.gmra.mxu1 %v4263_v0  ;;  %v4267_v52 = vsel %vm4240_vm5, %v4262_v53, %v4266_v30  ;;  %v4269_v0 = vrot.slane %v14362_v27, 3  ;;  %v14365_v27 = vld [vmem:[#allocation65_spill] sm:$0xff] }
 0x463   :  { %v11943_v40 = vadd.f32 %v3496_v18, %v14359_v8  ;;  %v11946_v51 = vadd.f32 %v3916_v36, %v11752_v2  ;;  %8013 = vmatprep.mubr.msk.bf16.mxu0 %vm8507_vm0, %v13811_v3  ;;  %8065 = vmatprep.mubr.msk.bf16.mxu1 %vm8507_vm0, %v13811_v3  ;;  %v14361_v2 = vld [vmem:[#allocation57_spill] sm:$0xff] }
 0x464   :  { %v7779_v42 = vpop.f32.mrf.mxu1  ;;  %v7915_v7 = vpop.f32.mrf.mxu0  ;;  %v4268_v19 = vrot.slane %v14361_v2, 2 }
 0x465   :  { %v14363_v42 = vld [vmem:[#allocation161_spill] sm:$0xff] }
 0x466   :  { %v3499_v48 = vpop.f32.mrf.mxu1  ;;  %v3919_v21 = vpop.f32.mrf.mxu0 }
 0x467   :  { %v11954_v31 = vadd.f32 %v3499_v48, %v14360_v17  ;;  %v11957_v18 = vadd.f32 %v3919_v21, %v11763_v37  ;;  %v4270_v37 = vor.u32 %v4269_v0, %v4268_v19  ;;  %v98_v48 = vld [vmem:[%s13493_s0 + $0x280] sm:$0xff] }
 0x468   :  { %v7780_v57 = vpop.f32.mrf.mxu1  ;;  %v7916_v49 = vpop.f32.mrf.mxu0 }
 0x469   :  { %v4272_v57 = vrot.slane %v14365_v27, 2  ;;  %v14366_v49 = vld [vmem:[#allocation59_spill] sm:$0xff] }
 0x46a   :  { %v3504_v36 = vpop.f32.mrf.mxu1  ;;  %v3924_v8 = vpop.f32.mrf.mxu0  ;;  %8014 = vmatmul.mubr.bf16.gmra.mxu0 %v11791_v20  ;;  %8066 = vmatmul.mubr.bf16.gmra.mxu1 %v4267_v52  ;;  %v99_v20 = vld [vmem:[%s13493_s0 + $0x288] sm:$0xff] }
 0x46b   :  { %v11963_v7 = vadd.f32 %v3504_v36, %v14363_v42  ;;  %v11966_v53 = vadd.f32 %v3924_v8, %v11774_v50  ;;  %8017 = vmatprep.mubr.msk.bf16.mxu0 %vm8507_vm0, %v13811_v3  ;;  %8069 = vmatprep.mubr.msk.bf16.mxu1 %vm8507_vm0, %v13811_v3  ;;  %v11978_v2 = vpack.c.bf16 %v99_v20, %v98_v48  ;;  %v4273_v36 = vrot.slane %v14366_v49, 3 }
 0x46c   :  { %v7783_v21 = vpop.f32.mrf.mxu1  ;;  %v7919_v52 = vpop.f32.mrf.mxu0  ;;  %v4271_v8 = vsel %vm4240_vm5, %v4266_v30, %v4270_v37 }
 0x46d   :  { %14364 = vst [vmem:[#allocation178_spill] sm:$0xff] %v11966_v53  ;;  %v3750_v48 = vrot.slane %v11978_v2, 2  ;;  %v4274_v20 = vor.u32 %v4273_v36, %v4272_v57  ;;  %v14367_v57 = vld [vmem:[#allocation71_spill] sm:$0xff]  ;;  %v14368_v36 = vld [vmem:[#allocation66_spill] sm:$0xff] }
 0x46e   :  { %v3507_v17 = vpop.f32.mrf.mxu1  ;;  %v3927_v50 = vpop.f32.mrf.mxu0  ;;  %v4276_v49 = vrot.slane %v14367_v57, 2  ;;  %v14369_v57 = vld [vmem:[#allocation77_spill] sm:$0xff] }
 0x46f   :  { %v11983_v19 = vadd.f32 %v3507_v17, %v11278_v33  ;;  %v11986_v0 = vadd.f32 %v3927_v50, %v11785_v38  ;;  %v3751_v17 = vsel %vm3145_vm4, %v11806_v54, %v3750_v48  ;;  %v4275_v50 = vsel %vm4240_vm5, %v4270_v37, %v4274_v20 }
 0x470   :  { %v7784_v42 = vpop.f32.mrf.mxu1  ;;  %v7920_v53 = vpop.f32.mrf.mxu0 }
 0x472   :  { %v3512_v21 = vpop.f32.mrf.mxu1  ;;  %v3932_v52 = vpop.f32.mrf.mxu0  ;;  %8018 = vmatmul.mubr.bf16.gmra.mxu0 %v11816_v55  ;;  %8070 = vmatmul.mubr.bf16.gmra.mxu1 %v4271_v8  ;;  %v4277_v8 = vrot.slane %v14368_v36, 3 }
 0x473   :  { %v11992_v27 = vadd.f32 %v3512_v21, %v11289_v26  ;;  %v11995_v33 = vadd.f32 %v3932_v52, %v11796_v43  ;;  %8021 = vmatprep.mubr.msk.bf16.mxu0 %vm8507_vm0, %v13811_v3  ;;  %8073 = vmatprep.mubr.msk.bf16.mxu1 %vm8507_vm0, %v13811_v3 }
 0x474   :  { %v7787_v38 = vpop.f32.mrf.mxu1  ;;  %v7923_v30 = vpop.f32.mrf.mxu0 }
 0x476   :  { %v3515_v53 = vpop.f32.mrf.mxu1  ;;  %v3935_v55 = vpop.f32.mrf.mxu0 }
 0x477   :  { %v12005_v26 = vadd.f32 %v3515_v53, %v11300_v44  ;;  %v12008_v43 = vadd.f32 %v3935_v55, %v11809_v15  ;;  %v4278_v44 = vor.u32 %v4277_v8, %v4276_v49 }
 0x478   :  { %v7788_v42 = vpop.f32.mrf.mxu1  ;;  %v7924_v21 = vpop.f32.mrf.mxu0 }
 0x479   :  { %v4279_v42 = vsel %vm4240_vm5, %v4274_v20, %v4278_v44  ;;  %v14373_v20 = vld [vmem:[#allocation15_spill] sm:$0xff] }
 0x47a   :  { %v3520_v52 = vpop.f32.mrf.mxu1  ;;  %v3940_v38 = vpop.f32.mrf.mxu0  ;;  %8022 = vmatmul.mubr.bf16.gmra.mxu0 %v3751_v17  ;;  %8074 = vmatmul.mubr.bf16.gmra.mxu1 %v4275_v50  ;;  %v4280_v17 = vrot.slane %v14369_v57, 2  ;;  %v14370_v50 = vld [vmem:[#allocation73_spill] sm:$0xff] }
 0x47b   :  { %v12013_v54 = vadd.f32 %v3520_v52, %v11311_v45  ;;  %v12016_v37 = vadd.f32 %v3940_v38, %v11821_v60  ;;  %8025 = vmatprep.mubr.msk.bf16.mxu0 %vm8507_vm0, %v13811_v3  ;;  %8077 = vmatprep.mubr.msk.bf16.mxu1 %vm8507_vm0, %v13811_v3  ;;  %v4281_v36 = vrot.slane %v14370_v50, 3 }
 0x47c   :  { %v7791_v15 = vpop.f32.mrf.mxu1  ;;  %v7927_v30 = vpop.f32.mrf.mxu0 }
 0x47d   :  { %v4282_v8 = vor.u32 %v4281_v36, %v4280_v17  ;;  %v14375_v36 = vld [vmem:[#allocation78_spill] sm:$0xff] }
 0x47e   :  { %v3523_v53 = vpop.f32.mrf.mxu1  ;;  %v3943_v55 = vpop.f32.mrf.mxu0 }
 0x47f   :  { %v12025_v45 = vadd.f32 %v3523_v53, %v11322_v47  ;;  %v12028_v60 = vadd.f32 %v3943_v55, %v11833_v29  ;;  %v14372_v47 = vld [vmem:[#allocation10_spill] sm:$0xff]  ;;  %v4928_v53 = vrot.slane %v14373_v20, 3 }
 0x480   :  { %v7792_v21 = vpop.f32.mrf.mxu1  ;;  %v7928_v52 = vpop.f32.mrf.mxu0  ;;  %v4927_v29 = vrot.slane %v14372_v47, 3 }
 0x481   :  { %v4283_v52 = vsel %vm4240_vm5, %v4278_v44, %v4282_v8 }
 0x482   :  { %v3528_v38 = vpop.f32.mrf.mxu1  ;;  %v3948_v49 = vpop.f32.mrf.mxu0  ;;  %8026 = vmatmul.mubr.bf16.gmra.mxu0 %v3750_v48  ;;  %8078 = vmatmul.mubr.bf16.gmra.mxu1 %v4279_v42 }
 0x483   :  { %v12032_v15 = vadd.f32 %v3528_v38, %v11333_v56  ;;  %v12035_v30 = vadd.f32 %v3948_v49, %v11843_v46  ;;  %8081 = vmatprep.mubr.msk.bf16.mxu1 %vm8507_vm0, %v13811_v3  ;;  %8217 = vmatprep.mubr.msk.bf16.mxu0 %vm8507_vm0, %v13811_v3  ;;  %v14374_v56 = vld [vmem:[#allocation83_spill] sm:$0xff]  ;;  %v4285_v46 = vrot.slane %v14375_v36, 3  ;;  %v4929_v38 = vsel %vm4926_vm6, %v4927_v29, %v4928_v53 }
 0x484   :  { %v7795_v55 = vpop.f32.mrf.mxu1  ;;  %v7931_v48 = vpop.f32.mrf.mxu0  ;;  %v4284_v50 = vrot.slane %v14374_v56, 2  ;;  %v14376_v56 = vld [vmem:[#allocation21_spill] sm:$0xff] }
 0x485   :  { %14371 = vst [vmem:[#allocation159_spill] sm:$0xff] %v12035_v30  ;;  %v4930_v30 = vrot.slane %v14376_v56, 3 }
 0x486   :  { %v3531_v57 = vpop.f32.mrf.mxu1  ;;  %v3951_v17 = vpop.f32.mrf.mxu0  ;;  %v4286_v48 = vor.u32 %v4285_v46, %v4284_v50  ;;  %v14377_v46 = vld [vmem:[#allocation88_spill] sm:$0xff] }
 0x487   :  { %v12046_v42 = vadd.f32 %v3531_v57, %v11344_v32  ;;  %v12049_v21 = vadd.f32 %v3951_v17, %v11855_v10  ;;  %v4931_v50 = vsel %vm4926_vm6, %v4928_v53, %v4930_v30 }
 0x488   :  { %v7796_v49 = vpop.f32.mrf.mxu1  ;;  %v7932_v47 = vpop.f32.mrf.mxu0  ;;  %v4287_v17 = vsel %vm4240_vm5, %v4282_v8, %v4286_v48 }
 0x48a   :  { %v3536_v20 = vpop.f32.mrf.mxu1  ;;  %v3956_v55 = vpop.f32.mrf.mxu0  ;;  %8082 = vmatmul.mubr.bf16.gmra.mxu1 %v4283_v52  ;;  %8218 = vmatmul.mubr.bf16.vlgmr.msra.gmra.mxu0 %v4929_v38  ;;  %v4288_v52 = vrot.slane %v14377_v46, 2  ;;  %v14378_v38 = vld [vmem:[#allocation84_spill] sm:$0xff] }
 0x48b   :  { %v12055_v36 = vadd.f32 %v3536_v20, %v11355_v41  ;;  %v12058_v32 = vadd.f32 %v3956_v55, %v11863_v35  ;;  %8085 = vmatprep.mubr.msk.bf16.mxu1 %vm8507_vm0, %v13811_v3  ;;  %8221 = vmatprep.mubr.msk.bf16.mxu0 %vm8507_vm0, %v13811_v3  ;;  %v4289_v49 = vrot.slane %v14378_v38, 3 }
 0x48c   :  { %v7799_v10 = vpop.f32.mrf.mxu1  ;;  %v7935_v44 = vpop.f32.mrf.mxu0 }
 0x48e   :  { %v3539_v29 = vpop.f32.mrf.mxu1  ;;  %v3959_v57 = vpop.f32.mrf.mxu0 }
 0x48f   :  { %v12067_v41 = vadd.f32 %v3539_v29, %v11369_v28  ;;  %v12070_v35 = vadd.f32 %v3959_v57, %v11874_v62  ;;  %v4290_v28 = vor.u32 %v4289_v49, %v4288_v52  ;;  %v14379_v62 = vld [vmem:[#allocation27_spill] sm:$0xff] }
 0x490   :  { %v7800_v47 = vpop.f32.mrf.mxu1  ;;  %v7936_v20 = vpop.f32.mrf.mxu0  ;;  %v4932_v10 = vrot.slane %v14379_v62, 3 }
 0x491   :  { %v4291_v20 = vsel %vm4240_vm5, %v4286_v48, %v4290_v28 }
 0x492   :  { %v3544_v55 = vpop.f32.mrf.mxu1  ;;  %v3964_v56 = vpop.f32.mrf.mxu0  ;;  %8086 = vmatmul.mubr.bf16.gmra.mxu1 %v4287_v17  ;;  %8222 = vmatmul.mubr.bf16.gmra.mxu0 %v4931_v50  ;;  %v14380_v50 = vld [vmem:[#allocation92_spill] sm:$0xff]  ;;  %v4933_v52 = vsel %vm4926_vm6, %v4930_v30, %v4932_v10 }
 0x493   :  { %v12075_v8 = vadd.f32 %v3544_v55, %v11384_v11  ;;  %v12078_v53 = vadd.f32 %v3964_v56, %v11883_v13  ;;  %8089 = vmatprep.mubr.msk.bf16.mxu1 %vm8507_vm0, %v13811_v3  ;;  %8225 = vmatprep.mubr.msk.bf16.mxu0 %vm8507_vm0, %v13811_v3  ;;  %v4292_v46 = vrot.slane %v14380_v50, 2  ;;  %v14381_v11 = vld [vmem:[#allocation89_spill] sm:$0xff] }
 0x494   :  { %v7803_v44 = vpop.f32.mrf.mxu1  ;;  %v7939_v29 = vpop.f32.mrf.mxu0  ;;  %v4293_v38 = vrot.slane %v14381_v11, 3 }
 0x495   :  { %v14382_v29 = vld [vmem:[#allocation33_spill] sm:$0xff] }
 0x496   :  { %v3547_v57 = vpop.f32.mrf.mxu1  ;;  %v3967_v17 = vpop.f32.mrf.mxu0  ;;  %v4294_v44 = vor.u32 %v4293_v38, %v4292_v46  ;;  %v4934_v50 = vrot.slane %v14382_v29, 3  ;;  %v14383_v38 = vld [vmem:[#allocation95_spill] sm:$0xff] }
 0x497   :  { %v12088_v13 = vadd.f32 %v3547_v57, %v11396_v59  ;;  %v12091_v47 = vadd.f32 %v3967_v17, %v11895_v23 }
 0x498   :  { %v7804_v49 = vpop.f32.mrf.mxu1  ;;  %v7940_v55 = vpop.f32.mrf.mxu0  ;;  %v4295_v17 = vsel %vm4240_vm5, %v4290_v28, %v4294_v44  ;;  %v4935_v46 = vsel %vm4926_vm6, %v4932_v10, %v4934_v50 }
 0x49a   :  { %v3552_v56 = vpop.f32.mrf.mxu1  ;;  %v3972_v62 = vpop.f32.mrf.mxu0  ;;  %8090 = vmatmul.mubr.bf16.gmra.mxu1 %v4291_v20  ;;  %8226 = vmatmul.mubr.bf16.gmra.mxu0 %v4933_v52  ;;  %v4296_v20 = vrot.slane %v14383_v38, 2  ;;  %v14384_v52 = vld [vmem:[#allocation93_spill] sm:$0xff] }
 0x49b   :  { %v12097_v11 = vadd.f32 %v3552_v56, %v11410_v9  ;;  %v12100_v59 = vadd.f32 %v3972_v62, %v11903_v58  ;;  %8093 = vmatprep.mubr.msk.bf16.mxu1 %vm8507_vm0, %v13811_v3  ;;  %8229 = vmatprep.mubr.msk.bf16.mxu0 %vm8507_vm0, %v13811_v3  ;;  %v4297_v49 = vrot.slane %v14384_v52, 3 }
 0x49c   :  { %v7807_v23 = vpop.f32.mrf.mxu1  ;;  %v7943_v30 = vpop.f32.mrf.mxu0 }
 0x49e   :  { %v3555_v48 = vpop.f32.mrf.mxu1  ;;  %v3975_v57 = vpop.f32.mrf.mxu0 }
 0x49f   :  { %v12109_v9 = vadd.f32 %v3555_v48, %v11425_v1  ;;  %v12112_v58 = vadd.f32 %v3975_v57, %v11914_v22  ;;  %v4298_v1 = vor.u32 %v4297_v49, %v4296_v20  ;;  %v14385_v22 = vld [vmem:[#allocation39_spill] sm:$0xff] }
 0x4a0   :  { %v7808_v55 = vpop.f32.mrf.mxu1  ;;  %v7944_v56 = vpop.f32.mrf.mxu0  ;;  %v4936_v23 = vrot.slane %v14385_v22, 3 }
 0x4a1   :  { %v4299_v56 = vsel %vm4240_vm5, %v4294_v44, %v4298_v1 }
 0x4a2   :  { %v3560_v62 = vpop.f32.mrf.mxu1  ;;  %v3980_v29 = vpop.f32.mrf.mxu0  ;;  %8094 = vmatmul.mubr.bf16.gmra.mxu1 %v4295_v17  ;;  %8230 = vmatmul.mubr.bf16.gmra.mxu0 %v4935_v46  ;;  %v14386_v46 = vld [vmem:[#allocation98_spill] sm:$0xff]  ;;  %v4937_v20 = vsel %vm4926_vm6, %v4934_v50, %v4936_v23 }
 0x4a3   :  { %v12117_v28 = vadd.f32 %v3560_v62, %v11440_v12  ;;  %v12120_v10 = vadd.f32 %v3980_v29, %v11923_v39  ;;  %8097 = vmatprep.mubr.msk.bf16.mxu1 %vm8507_vm0, %v13811_v3  ;;  %8233 = vmatprep.mubr.msk.bf16.mxu0 %vm8507_vm0, %v13811_v3  ;;  %v4300_v38 = vrot.slane %v14386_v46, 2  ;;  %v14387_v12 = vld [vmem:[#allocation96_spill] sm:$0xff] }
 0x4a4   :  { %v7811_v30 = vpop.f32.mrf.mxu1  ;;  %v7947_v48 = vpop.f32.mrf.mxu0  ;;  %v4301_v52 = vrot.slane %v14387_v12, 3 }
 0x4a5   :  { %v14388_v48 = vld [vmem:[#allocation42_spill] sm:$0xff] }
 0x4a6   :  { %v3563_v57 = vpop.f32.mrf.mxu1  ;;  %v3983_v17 = vpop.f32.mrf.mxu0  ;;  %v4302_v30 = vor.u32 %v4301_v52, %v4300_v38  ;;  %v4938_v46 = vrot.slane %v14388_v48, 3  ;;  %v14391_v52 = vld [vmem:[#allocation101_spill] sm:$0xff] }
 0x4a7   :  { %v12130_v39 = vadd.f32 %v3563_v57, %v11455_v6  ;;  %v12133_v55 = vadd.f32 %v3983_v17, %v11935_v4 }
 0x4a8   :  { %v7812_v49 = vpop.f32.mrf.mxu1  ;;  %v7948_v62 = vpop.f32.mrf.mxu0  ;;  %v4303_v17 = vsel %vm4240_vm5, %v4298_v1, %v4302_v30  ;;  %v4939_v38 = vsel %vm4926_vm6, %v4936_v23, %v4938_v46 }
 0x4aa   :  { %v3568_v29 = vpop.f32.mrf.mxu1  ;;  %v3988_v22 = vpop.f32.mrf.mxu0  ;;  %8098 = vmatmul.mubr.bf16.gmra.mxu1 %v4299_v56  ;;  %8234 = vmatmul.mubr.bf16.gmra.mxu0 %v4937_v20  ;;  %v4304_v56 = vrot.slane %v14391_v52, 2  ;;  %v14392_v20 = vld [vmem:[#allocation99_spill] sm:$0xff] }
 0x4ab   :  { %v12139_v12 = vadd.f32 %v3568_v29, %v11470_v5  ;;  %v12142_v6 = vadd.f32 %v3988_v22, %v11943_v40  ;;  %8101 = vmatprep.mubr.msk.bf16.mxu1 %vm8507_vm0, %v13811_v3  ;;  %8237 = vmatprep.mubr.msk.bf16.mxu0 %vm8507_vm0, %v13811_v3  ;;  %v4305_v49 = vrot.slane %v14392_v20, 3 }
 0x4ac   :  { %v7815_v4 = vpop.f32.mrf.mxu1  ;;  %v7951_v44 = vpop.f32.mrf.mxu0 }
 0x4ad   :  { %14389 = vst [vmem:[#allocation179_spill] sm:$0xff] %v12142_v6  ;;  %v14393_v4 = vld [vmem:[#allocation163_spill] sm:$0xff] }
 0x4ae   :  { %v3571_v50 = vpop.f32.mrf.mxu1  ;;  %v3991_v57 = vpop.f32.mrf.mxu0 }
 0x4af   :  { %v12151_v5 = vadd.f32 %v3571_v50, %v11485_v61  ;;  %v12154_v40 = vadd.f32 %v3991_v57, %v11954_v31  ;;  %v4306_v61 = vor.u32 %v4305_v49, %v4304_v56  ;;  %v14395_v31 = vld [vmem:[#allocation50_spill] sm:$0xff] }
 0x4b0   :  { %v7816_v62 = vpop.f32.mrf.mxu1  ;;  %v7952_v29 = vpop.f32.mrf.mxu0  ;;  %v4940_v44 = vrot.slane %v14395_v31, 3 }
 0x4b1   :  { %14390 = vst [vmem:[#allocation181_spill] sm:$0xff] %v12154_v40  ;;  %v14397_v62 = vld [vmem:[#allocation102_spill] sm:$0xff] }
 0x4b2   :  { %v3576_v22 = vpop.f32.mrf.mxu1  ;;  %v3996_v48 = vpop.f32.mrf.mxu0  ;;  %8102 = vmatmul.mubr.bf16.gmra.mxu1 %v4303_v17  ;;  %8238 = vmatmul.mubr.bf16.gmra.mxu0 %v4939_v38  ;;  %v14396_v38 = vld [vmem:[#allocation104_spill] sm:$0xff]  ;;  %v4309_v29 = vrot.slane %v14397_v62, 3  ;;  %v4941_v56 = vsel %vm4926_vm6, %v4938_v46, %v4940_v44  ;;  %v14401_v62 = vld [vmem:[#allocation142_spill] sm:$0xff] }
 0x4b3   :  { %v12159_v1 = vadd.f32 %v3576_v22, %v14393_v4  ;;  %v12162_v23 = vadd.f32 %v3996_v48, %v11963_v7  ;;  %8105 = vmatprep.mubr.msk.bf16.mxu1 %vm8507_vm0, %v13811_v3  ;;  %8241 = vmatprep.mubr.msk.bf16.mxu0 %vm8507_vm0, %v13811_v3  ;;  %v4308_v20 = vrot.slane %v14396_v38, 2  ;;  %v14398_v22 = vld [vmem:[#allocation166_spill] sm:$0xff]  ;;  %v4307_v4 = vsel %vm4240_vm5, %v4302_v30, %v4306_v61 }
 0x4b4   :  { %v7819_v50 = vpop.f32.mrf.mxu1  ;;  %v7955_v57 = vpop.f32.mrf.mxu0  ;;  %v14400_v38 = vld [vmem:[#allocation58_spill] sm:$0xff] }
 0x4b5   :  { %14394 = vst [vmem:[#allocation164_spill] sm:$0xff] %v12162_v23  ;;  %v4310_v23 = vor.u32 %v4309_v29, %v4308_v20  ;;  %v4942_v40 = vrot.slane %v14400_v38, 3 }
 0x4b6   :  { %v3579_v52 = vpop.f32.mrf.mxu1  ;;  %v3999_v17 = vpop.f32.mrf.mxu0 }
 0x4b7   :  { %v12172_v7 = vadd.f32 %v3579_v52, %v14398_v22  ;;  %v12175_v48 = vadd.f32 %v3999_v17, %v11983_v19  ;;  %v4311_v20 = vsel %vm4240_vm5, %v4306_v61, %v4310_v23  ;;  %v4943_v29 = vsel %vm4926_vm6, %v4940_v44, %v4942_v40  ;;  %v14403_v22 = vld [vmem:[#allocation140_spill] sm:$0xff] }
 0x4b8   :  { %v7820_v49 = vpop.f32.mrf.mxu1  ;;  %v7956_v31 = vpop.f32.mrf.mxu0 }
 0x4b9   :  { %14399 = vst [vmem:[#allocation182_spill] sm:$0xff] %v12175_v48  ;;  %v14406_v31 = vld [vmem:[#allocation105_spill] sm:$0xff] }
 0x4ba   :  { %v3584_v50 = vpop.f32.mrf.mxu1  ;;  %v4004_v57 = vpop.f32.mrf.mxu0  ;;  %8106 = vmatmul.mubr.bf16.gmra.mxu1 %v4307_v4  ;;  %8242 = vmatmul.mubr.bf16.gmra.mxu0 %v4941_v56  ;;  %v14405_v56 = vld [vmem:[#allocation107_spill] sm:$0xff] }
 0x4bb   :  { %v12181_v6 = vadd.f32 %v3584_v50, %v14401_v62  ;;  %v12184_v52 = vadd.f32 %v4004_v57, %v11992_v27  ;;  %8109 = vmatprep.mubr.msk.bf16.mxu1 %vm8507_vm0, %v13811_v3  ;;  %8245 = vmatprep.mubr.msk.bf16.mxu0 %vm8507_vm0, %v13811_v3  ;;  %v4312_v49 = vrot.slane %v14405_v56, 2  ;;  %v4313_v50 = vrot.slane %v14406_v31, 3 }
 0x4bc   :  { %v7823_v19 = vpop.f32.mrf.mxu1  ;;  %v7959_v30 = vpop.f32.mrf.mxu0 }
 0x4bd   :  { %14402 = vst [vmem:[#allocation184_spill] sm:$0xff] %v12184_v52  ;;  %v14407_v30 = vld [vmem:[#allocation124_spill] sm:$0xff] }
 0x4be   :  { %v3587_v46 = vpop.f32.mrf.mxu1  ;;  %v4007_v17 = vpop.f32.mrf.mxu0 }
 0x4bf   :  { %v12193_v4 = vadd.f32 %v3587_v46, %v14403_v22  ;;  %v12196_v27 = vadd.f32 %v4007_v17, %v12005_v26  ;;  %v4314_v26 = vor.u32 %v4313_v50, %v4312_v49  ;;  %v14409_v46 = vld [vmem:[#allocation63_spill] sm:$0xff] }
 0x4c0   :  { %v7824_v57 = vpop.f32.mrf.mxu1  ;;  %v7960_v38 = vpop.f32.mrf.mxu0  ;;  %v4944_v17 = vrot.slane %v14409_v46, 3 }
 0x4c1   :  { %14404 = vst [vmem:[#allocation168_spill] sm:$0xff] %v12196_v27  ;;  %v14411_v38 = vld [vmem:[#allocation108_spill] sm:$0xff] }
 0x4c2   :  { %v3592_v62 = vpop.f32.mrf.mxu1  ;;  %v4012_v19 = vpop.f32.mrf.mxu0  ;;  %8110 = vmatmul.mubr.bf16.gmra.mxu1 %v4311_v20  ;;  %8246 = vmatmul.mubr.bf16.gmra.mxu0 %v4943_v29  ;;  %v14410_v29 = vld [vmem:[#allocation110_spill] sm:$0xff]  ;;  %v4945_v49 = vsel %vm4926_vm6, %v4942_v40, %v4944_v17 }
 0x4c3   :  { %v12201_v61 = vadd.f32 %v3592_v62, %v14407_v30  ;;  %v12204_v44 = vadd.f32 %v4012_v19, %v12013_v54  ;;  %8113 = vmatprep.mubr.msk.bf16.mxu1 %vm8507_vm0, %v13811_v3  ;;  %8249 = vmatprep.mubr.msk.bf16.mxu0 %vm8507_vm0, %v13811_v3  ;;  %v4316_v57 = vrot.slane %v14410_v29, 2  ;;  %v4317_v62 = vrot.slane %v14411_v38, 3  ;;  %v14412_v30 = vld [vmem:[#allocation147_spill] sm:$0xff]  ;;  %v14414_v29 = vld [vmem:[#allocation69_spill] sm:$0xff] }
 0x4c4   :  { %v7827_v22 = vpop.f32.mrf.mxu1  ;;  %v7963_v56 = vpop.f32.mrf.mxu0  ;;  %v4946_v52 = vrot.slane %v14414_v29, 3  ;;  %v14415_v38 = vld [vmem:[#allocation145_spill] sm:$0xff] }
 0x4c5   :  { %14408 = vst [vmem:[#allocation185_spill] sm:$0xff] %v12204_v44  ;;  %v4315_v44 = vsel %vm4240_vm5, %v4310_v23, %v4314_v26  ;;  %v4318_v27 = vor.u32 %v4317_v62, %v4316_v57  ;;  %v14417_v62 = vld [vmem:[#allocation127_spill] sm:$0xff] }
 0x4c6   :  { %v3595_v31 = vpop.f32.mrf.mxu1  ;;  %v4015_v20 = vpop.f32.mrf.mxu0  ;;  %v4947_v57 = vsel %vm4926_vm6, %v4944_v17, %v4946_v52 }
 0x4c7   :  { %v12214_v54 = vadd.f32 %v3595_v31, %v14412_v30  ;;  %v12217_v19 = vadd.f32 %v4015_v20, %v12025_v45  ;;  %v4319_v20 = vsel %vm4240_vm5, %v4314_v26, %v4318_v27 }
 0x4c8   :  { %v7828_v50 = vpop.f32.mrf.mxu1  ;;  %v7964_v46 = vpop.f32.mrf.mxu0 }
 0x4c9   :  { %14413 = vst [vmem:[#allocation187_spill] sm:$0xff] %v12217_v19  ;;  %v14420_v46 = vld [vmem:[#allocation111_spill] sm:$0xff] }
 0x4ca   :  { %v3600_v22 = vpop.f32.mrf.mxu1  ;;  %v4020_v56 = vpop.f32.mrf.mxu0  ;;  %8114 = vmatmul.mubr.bf16.gmra.mxu1 %v4315_v44  ;;  %8250 = vmatmul.mubr.bf16.gmra.mxu0 %v4945_v49  ;;  %v14419_v49 = vld [vmem:[#allocation113_spill] sm:$0xff] }
 0x4cb   :  { %v12223_v48 = vadd.f32 %v3600_v22, %v14415_v38  ;;  %v12226_v31 = vadd.f32 %v4020_v56, %v12032_v15  ;;  %8117 = vmatprep.mubr.msk.bf16.mxu1 %vm8507_vm0, %v13811_v3  ;;  %8253 = vmatprep.mubr.msk.bf16.mxu0 %vm8507_vm0, %v13811_v3  ;;  %v4320_v50 = vrot.slane %v14419_v49, 2  ;;  %v4321_v22 = vrot.slane %v14420_v46, 3 }
 0x4cc   :  { %v7831_v45 = vpop.f32.mrf.mxu1  ;;  %v7967_v40 = vpop.f32.mrf.mxu0 }
 0x4cd   :  { %14416 = vst [vmem:[#allocation171_spill] sm:$0xff] %v12226_v31  ;;  %v14421_v40 = vld [vmem:[#allocation152_spill] sm:$0xff] }
 0x4ce   :  { %v3603_v23 = vpop.f32.mrf.mxu1  ;;  %v4023_v44 = vpop.f32.mrf.mxu0 }
 0x4cf   :  { %v12235_v30 = vadd.f32 %v3603_v23, %v14417_v62  ;;  %v12238_v15 = vadd.f32 %v4023_v44, %v12046_v42  ;;  %v4322_v42 = vor.u32 %v4321_v22, %v4320_v50  ;;  %v14423_v23 = vld [vmem:[#allocation75_spill] sm:$0xff] }
 0x4d0   :  { %v7832_v56 = vpop.f32.mrf.mxu1  ;;  %v7968_v29 = vpop.f32.mrf.mxu0  ;;  %v4948_v44 = vrot.slane %v14423_v23, 3 }
 0x4d1   :  { %14418 = vst [vmem:[#allocation188_spill] sm:$0xff] %v12238_v15  ;;  %v14425_v29 = vld [vmem:[#allocation114_spill] sm:$0xff] }
 0x4d2   :  { %v3608_v38 = vpop.f32.mrf.mxu1  ;;  %v4028_v45 = vpop.f32.mrf.mxu0  ;;  %8118 = vmatmul.mubr.bf16.gmra.mxu1 %v4319_v20  ;;  %8254 = vmatmul.mubr.bf16.gmra.mxu0 %v4947_v57  ;;  %v14424_v57 = vld [vmem:[#allocation115_spill] sm:$0xff]  ;;  %v4949_v50 = vsel %vm4926_vm6, %v4946_v52, %v4948_v44 }
 0x4d3   :  { %v12243_v26 = vadd.f32 %v3608_v38, %v14421_v40  ;;  %v12246_v17 = vadd.f32 %v4028_v45, %v12055_v36  ;;  %8121 = vmatprep.mubr.msk.bf16.mxu1 %vm8507_vm0, %v13811_v3  ;;  %8257 = vmatprep.mubr.msk.bf16.mxu0 %vm8507_vm0, %v13811_v3  ;;  %v4324_v56 = vrot.slane %v14424_v57, 2  ;;  %v4325_v38 = vrot.slane %v14425_v29, 3  ;;  %v14426_v40 = vld [vmem:[#allocation150_spill] sm:$0xff]  ;;  %v14428_v57 = vld [vmem:[#allocation81_spill] sm:$0xff] }
 0x4d4   :  { %v7835_v62 = vpop.f32.mrf.mxu1  ;;  %v7971_v49 = vpop.f32.mrf.mxu0  ;;  %v4950_v31 = vrot.slane %v14428_v57, 3  ;;  %v14429_v29 = vld [vmem:[#allocation130_spill] sm:$0xff] }
 0x4d5   :  { %14422 = vst [vmem:[#allocation190_spill] sm:$0xff] %v12246_v17  ;;  %v4323_v17 = vsel %vm4240_vm5, %v4318_v27, %v4322_v42  ;;  %v4326_v15 = vor.u32 %v4325_v38, %v4324_v56  ;;  %v14431_v38 = vld [vmem:[#allocation197_spill] sm:$0xff] }
 0x4d6   :  { %v3611_v46 = vpop.f32.mrf.mxu1  ;;  %v4031_v20 = vpop.f32.mrf.mxu0  ;;  %v4951_v56 = vsel %vm4926_vm6, %v4948_v44, %v4950_v31 }
 0x4d7   :  { %v12256_v36 = vadd.f32 %v3611_v46, %v14426_v40  ;;  %v12259_v45 = vadd.f32 %v4031_v20, %v12067_v41  ;;  %v4327_v20 = vsel %vm4240_vm5, %v4322_v42, %v4326_v15 }
 0x4d8   :  { %v7836_v22 = vpop.f32.mrf.mxu1  ;;  %v7972_v23 = vpop.f32.mrf.mxu0 }
 0x4d9   :  { %14427 = vst [vmem:[#allocation174_spill] sm:$0xff] %v12259_v45  ;;  %v14434_v23 = vld [vmem:[#allocation7_spill] sm:$0xff] }
 0x4da   :  { %v3616_v62 = vpop.f32.mrf.mxu1  ;;  %v4036_v49 = vpop.f32.mrf.mxu0  ;;  %8122 = vmatmul.mubr.bf16.gmra.mxu1 %v4323_v17  ;;  %8258 = vmatmul.mubr.bf16.gmra.mxu0 %v4949_v50  ;;  %v14433_v50 = vld [vmem:[#allocation8_spill] sm:$0xff] }
 0x4db   :  { %v12265_v19 = vadd.f32 %v3616_v62, %v14429_v29  ;;  %v12268_v46 = vadd.f32 %v4036_v49, %v12075_v8  ;;  %8125 = vmatprep.mubr.msk.bf16.mxu1 %vm8507_vm0, %v13811_v3  ;;  %8261 = vmatprep.mubr.msk.bf16.mxu0 %vm8507_vm0, %v13811_v3  ;;  %v4328_v22 = vrot.slane %v14433_v50, 2  ;;  %v4329_v62 = vrot.slane %v14434_v23, 3 }
 0x4dc   :  { %v7839_v41 = vpop.f32.mrf.mxu1  ;;  %v7975_v52 = vpop.f32.mrf.mxu0 }
 0x4dd   :  { %14430 = vst [vmem:[#allocation191_spill] sm:$0xff] %v12268_v46  ;;  %v14435_v52 = vld [vmem:[#allocation155_spill] sm:$0xff] }
 0x4de   :  { %v3619_v27 = vpop.f32.mrf.mxu1  ;;  %v4039_v17 = vpop.f32.mrf.mxu0 }
 0x4df   :  { %v12277_v40 = vadd.f32 %v3619_v27, %v14431_v38  ;;  %v12280_v8 = vadd.f32 %v4039_v17, %v12088_v13  ;;  %v4330_v13 = vor.u32 %v4329_v62, %v4328_v22  ;;  %v14437_v27 = vld [vmem:[#allocation87_spill] sm:$0xff] }
 0x4e0   :  { %v7840_v49 = vpop.f32.mrf.mxu1  ;;  %v7976_v57 = vpop.f32.mrf.mxu0  ;;  %v4952_v17 = vrot.slane %v14437_v27, 3 }
 0x4e1   :  { %14432 = vst [vmem:[#allocation193_spill] sm:$0xff] %v12280_v8  ;;  %v14439_v57 = vld [vmem:[#allocation9_spill] sm:$0xff] }
 0x4e2   :  { %v3624_v29 = vpop.f32.mrf.mxu1  ;;  %v4044_v41 = vpop.f32.mrf.mxu0  ;;  %8126 = vmatmul.mubr.bf16.gmra.mxu1 %v4327_v20  ;;  %8262 = vmatmul.mubr.bf16.gmra.mxu0 %v4951_v56  ;;  %v14438_v56 = vld [vmem:[#allocation13_spill] sm:$0xff]  ;;  %v4953_v22 = vsel %vm4926_vm6, %v4950_v31, %v4952_v17 }
 0x4e3   :  { %v12285_v42 = vadd.f32 %v3624_v29, %v14435_v52  ;;  %v12288_v44 = vadd.f32 %v4044_v41, %v12097_v11  ;;  %8129 = vmatprep.mubr.msk.bf16.mxu1 %vm8507_vm0, %v13811_v3  ;;  %8265 = vmatprep.mubr.msk.bf16.mxu0 %vm8507_vm0, %v13811_v3  ;;  %v4332_v49 = vrot.slane %v14438_v56, 2  ;;  %v4333_v29 = vrot.slane %v14439_v57, 3  ;;  %v14440_v52 = vld [vmem:[#allocation133_spill] sm:$0xff]  ;;  %v14441_v56 = vld [vmem:[#allocation91_spill] sm:$0xff] }
 0x4e4   :  { %v7843_v38 = vpop.f32.mrf.mxu1  ;;  %v7979_v50 = vpop.f32.mrf.mxu0  ;;  %v4954_v46 = vrot.slane %v14441_v56, 3  ;;  %v14442_v57 = vld [vmem:[#allocation157_spill] sm:$0xff] }
 0x4e5   :  { %14436 = vst [vmem:[#allocation177_spill] sm:$0xff] %v12288_v44  ;;  %v4331_v44 = vsel %vm4240_vm5, %v4326_v15, %v4330_v13  ;;  %v4334_v8 = vor.u32 %v4333_v29, %v4332_v49  ;;  %v14444_v29 = vld [vmem:[#allocation160_spill] sm:$0xff] }
 0x4e6   :  { %v3627_v23 = vpop.f32.mrf.mxu1  ;;  %v4047_v20 = vpop.f32.mrf.mxu0  ;;  %v4955_v49 = vsel %vm4926_vm6, %v4952_v17, %v4954_v46 }
 0x4e7   :  { %v12298_v11 = vadd.f32 %v3627_v23, %v14440_v52  ;;  %v12301_v41 = vadd.f32 %v4047_v20, %v12109_v9  ;;  %v4335_v20 = vsel %vm4240_vm5, %v4330_v13, %v4334_v8 }
 0x4e8   :  { %v7844_v62 = vpop.f32.mrf.mxu1  ;;  %v7980_v27 = vpop.f32.mrf.mxu0 }
 0x4e9   :  { %v14447_v27 = vld [vmem:[#allocation14_spill] sm:$0xff] }
 0x4ea   :  { %v3632_v38 = vpop.f32.mrf.mxu1  ;;  %v4052_v50 = vpop.f32.mrf.mxu0  ;;  %8130 = vmatmul.mubr.bf16.gmra.mxu1 %v4331_v44  ;;  %8266 = vmatmul.mubr.bf16.gmra.mxu0 %v4953_v22  ;;  %v14446_v22 = vld [vmem:[#allocation19_spill] sm:$0xff] }
 0x4eb   :  { %v12307_v45 = vadd.f32 %v3632_v38, %v14442_v57  ;;  %v12310_v23 = vadd.f32 %v4052_v50, %v12117_v28  ;;  %8133 = vmatprep.mubr.msk.bf16.mxu1 %vm8507_vm0, %v13811_v3  ;;  %8269 = vmatprep.mubr.msk.bf16.mxu0 %vm8507_vm0, %v13811_v3  ;;  %v4336_v62 = vrot.slane %v14446_v22, 2  ;;  %v4337_v38 = vrot.slane %v14447_v27, 3 }
 0x4ec   :  { %v7847_v9 = vpop.f32.mrf.mxu1  ;;  %v7983_v31 = vpop.f32.mrf.mxu0 }
 0x4ed   :  { %14443 = vst [vmem:[#allocation194_spill] sm:$0xff] %v12310_v23  ;;  %v14448_v31 = vld [vmem:[#allocation136_spill] sm:$0xff] }
 0x4ee   :  { %v3635_v15 = vpop.f32.mrf.mxu1  ;;  %v4055_v44 = vpop.f32.mrf.mxu0 }
 0x4ef   :  { %v12319_v52 = vadd.f32 %v3635_v15, %v14444_v29  ;;  %v12322_v28 = vadd.f32 %v4055_v44, %v12130_v39  ;;  %v4338_v39 = vor.u32 %v4337_v38, %v4336_v62  ;;  %v14450_v15 = vld [vmem:[#allocation94_spill] sm:$0xff] }
 0x4f0   :  { %v7848_v50 = vpop.f32.mrf.mxu1  ;;  %v7984_v56 = vpop.f32.mrf.mxu0  ;;  %v4956_v44 = vrot.slane %v14450_v15, 3 }
 0x4f1   :  { %14445 = vst [vmem:[#allocation116_spill] sm:$0xff] %v12322_v28  ;;  %v14452_v56 = vld [vmem:[#allocation20_spill] sm:$0xff] }
 0x4f2   :  { %v3640_v57 = vpop.f32.mrf.mxu1  ;;  %v4060_v9 = vpop.f32.mrf.mxu0  ;;  %8134 = vmatmul.mubr.bf16.gmra.mxu1 %v4335_v20  ;;  %8270 = vmatmul.mubr.bf16.gmra.mxu0 %v4955_v49  ;;  %v14451_v49 = vld [vmem:[#allocation25_spill] sm:$0xff]  ;;  %v4957_v62 = vsel %vm4926_vm6, %v4954_v46, %v4956_v44 }
 0x4f3   :  { %v12327_v13 = vadd.f32 %v3640_v57, %v14448_v31  ;;  %v12330_v17 = vadd.f32 %v4060_v9, %v12139_v12  ;;  %8137 = vmatprep.mubr.msk.bf16.mxu1 %vm8507_vm0, %v13811_v3  ;;  %8273 = vmatprep.mubr.msk.bf16.mxu0 %vm8507_vm0, %v13811_v3  ;;  %v4340_v50 = vrot.slane %v14451_v49, 2  ;;  %v4341_v57 = vrot.slane %v14452_v56, 3  ;;  %v14453_v31 = vld [vmem:[#allocation2_spill] sm:$0xff] }
 0x4f4   :  { %v7851_v29 = vpop.f32.mrf.mxu1  ;;  %v7987_v22 = vpop.f32.mrf.mxu0  ;;  %v14455_v49 = vld [vmem:[#allocation162_spill] sm:$0xff] }
 0x4f5   :  { %14449 = vst [vmem:[#allocation117_spill] sm:$0xff] %v12330_v17  ;;  %v4339_v17 = vsel %vm4240_vm5, %v4334_v8, %v4338_v39  ;;  %v4342_v28 = vor.u32 %v4341_v57, %v4340_v50 }
 0x4f6   :  { %v3643_v27 = vpop.f32.mrf.mxu1  ;;  %v4063_v20 = vpop.f32.mrf.mxu0 }
 0x4f7   :  { %v12340_v12 = vadd.f32 %v3643_v27, %v14453_v31  ;;  %v12343_v9 = vadd.f32 %v4063_v20, %v12151_v5  ;;  %v14457_v5 = vld [vmem:[#allocation97_spill] sm:$0xff]  ;;  %v4343_v50 = vsel %vm4240_vm5, %v4338_v39, %v4342_v28  ;;  %v14459_v31 = vld [vmem:[#allocation31_spill] sm:$0xff] }
 0x4f8   :  { %v7852_v38 = vpop.f32.mrf.mxu1  ;;  %v7988_v15 = vpop.f32.mrf.mxu0  ;;  %v4958_v46 = vrot.slane %v14457_v5, 3 }
 0x4f9   :  { %14454 = vst [vmem:[#allocation118_spill] sm:$0xff] %v12343_v9  ;;  %v14460_v38 = vld [vmem:[#allocation26_spill] sm:$0xff] }
 0x4fa   :  { %v3648_v29 = vpop.f32.mrf.mxu1  ;;  %v4068_v22 = vpop.f32.mrf.mxu0  ;;  %8138 = vmatmul.mubr.bf16.gmra.mxu1 %v4339_v17  ;;  %8274 = vmatmul.mubr.bf16.gmra.mxu0 %v4957_v62  ;;  %v4344_v62 = vrot.slane %v14459_v31, 2  ;;  %v4345_v15 = vrot.slane %v14460_v38, 3 }
 0x4fb   :  { %v12348_v23 = vadd.f32 %v3648_v29, %v14455_v49  ;;  %v12351_v27 = vadd.f32 %v4068_v22, %v12159_v1  ;;  %8141 = vmatprep.mubr.msk.bf16.mxu1 %vm8507_vm0, %v13811_v3  ;;  %8277 = vmatprep.mubr.msk.bf16.mxu0 %vm8507_vm0, %v13811_v3  ;;  %v4959_v1 = vsel %vm4926_vm6, %v4956_v44, %v4958_v46  ;;  %v14463_v44 = vld [vmem:[#allocation100_spill] sm:$0xff] }
 0x4fc   :  { %v7855_v8 = vpop.f32.mrf.mxu1  ;;  %v7991_v20 = vpop.f32.mrf.mxu0 }
 0x4fd   :  { %14456 = vst [vmem:[#allocation183_spill] sm:$0xff] %v12351_v27  ;;  %v14462_v8 = vld [vmem:[#allocation165_spill] sm:$0xff]  ;;  %v4960_v20 = vrot.slane %v14463_v44, 3 }
 0x4fe   :  { %v3651_v56 = vpop.f32.mrf.mxu1  ;;  %v4071_v17 = vpop.f32.mrf.mxu0 }
 0x4ff   :  { %v12360_v57 = vadd.f32 %v4071_v17, %v12172_v7  ;;  %v4346_v7 = vor.u32 %v4345_v15, %v4344_v62  ;;  %v4961_v62 = vsel %vm4926_vm6, %v4958_v46, %v4960_v20 }
 0x500   :  { %v7856_v29 = vpop.f32.mrf.mxu1  ;;  %v7992_v22 = vpop.f32.mrf.mxu0 }
 0x501   :  { %14458 = vst [vmem:[#allocation119_spill] sm:$0xff] %v12360_v57  ;;  %v14467_v22 = vld [vmem:[#allocation139_spill] sm:$0xff] }
 0x502   :  { %v4076_v49 = vpop.f32.mrf.mxu0  ;;  %v4522_v27 = vpop.f32.mrf.mxu1  ;;  %8142 = vmatmul.mubr.bf16.gmra.mxu1 %v4343_v50  ;;  %8278 = vmatmul.mubr.bf16.gmra.mxu0 %v4959_v1  ;;  %v14464_v1 = vld [vmem:[#allocation37_spill] sm:$0xff] }
 0x503   :  { %v12366_v5 = vadd.f32 %v4076_v49, %v12181_v6  ;;  %v12369_v39 = vadd.f32 %v4522_v27, %v14462_v8  ;;  %8145 = vmatprep.mubr.msk.bf16.mxu1 %vm8507_vm0, %v13811_v3  ;;  %8281 = vmatprep.mubr.msk.bf16.mxu0 %vm8507_vm0, %v13811_v3  ;;  %v4348_v38 = vrot.slane %v14464_v1, 2  ;;  %v14465_v6 = vld [vmem:[#allocation32_spill] sm:$0xff]  ;;  %v4347_v8 = vsel %vm4240_vm5, %v4342_v28, %v4346_v7  ;;  %v14468_v1 = vld [vmem:[#allocation103_spill] sm:$0xff] }
 0x504   :  { %v7995_v56 = vpop.f32.mrf.mxu0  ;;  %v8047_v17 = vpop.f32.mrf.mxu1  ;;  %v4349_v29 = vrot.slane %v14465_v6, 3  ;;  %v4962_v57 = vrot.slane %v14468_v1, 3 }
 0x505   :  { %14461 = vst [vmem:[#allocation120_spill] sm:$0xff] %v12366_v5 }
 0x506   :  { %v4079_v31 = vpop.f32.mrf.mxu0  ;;  %v4525_v50 = vpop.f32.mrf.mxu1  ;;  %v4350_v5 = vor.u32 %v4349_v29, %v4348_v38  ;;  %v4963_v29 = vsel %vm4926_vm6, %v4960_v20, %v4962_v57  ;;  %v14476_v20 = vld [vmem:[#allocation5_spill] sm:$0xff] }
 0x507   :  { %v12379_v27 = vadd.f32 %v4079_v31, %v12193_v4  ;;  %v12382_v49 = vadd.f32 %v4525_v50, %v14467_v22  ;;  %v14470_v4 = vld [vmem:[#allocation167_spill] sm:$0xff] }
 0x508   :  { %v7996_v15 = vpop.f32.mrf.mxu0  ;;  %v8048_v44 = vpop.f32.mrf.mxu1  ;;  %v4351_v38 = vsel %vm4240_vm5, %v4346_v7, %v4350_v5 }
 0x509   :  { %14466 = vst [vmem:[#allocation186_spill] sm:$0xff] %v12379_v27  ;;  %v14473_v15 = vld [vmem:[#allocation45_spill] sm:$0xff] }
 0x50a   :  { %v4084_v56 = vpop.f32.mrf.mxu0  ;;  %v4530_v17 = vpop.f32.mrf.mxu1  ;;  %8146 = vmatmul.mubr.bf16.gmra.mxu1 %v4347_v8  ;;  %8282 = vmatmul.mubr.bf16.gmra.mxu0 %v4961_v62  ;;  %v14472_v8 = vld [vmem:[#allocation3_spill] sm:$0xff]  ;;  %v4352_v44 = vrot.slane %v14473_v15, 2 }
 0x50b   :  { %v12388_v6 = vadd.f32 %v4084_v56, %v12201_v61  ;;  %v12391_v31 = vadd.f32 %v4530_v17, %v14470_v4  ;;  %8149 = vmatprep.mubr.msk.bf16.mxu1 %vm8507_vm0, %v13811_v3  ;;  %8285 = vmatprep.mubr.msk.bf16.mxu0 %vm8507_vm0, %v13811_v3  ;;  %v14474_v56 = vld [vmem:[#allocation38_spill] sm:$0xff] }
 0x50c   :  { %v7999_v28 = vpop.f32.mrf.mxu0  ;;  %v8051_v46 = vpop.f32.mrf.mxu1  ;;  %v4353_v17 = vrot.slane %v14474_v56, 3 }
 0x50d   :  { %14469 = vst [vmem:[#allocation121_spill] sm:$0xff] %v12388_v6 }
 0x50e   :  { %v4087_v50 = vpop.f32.mrf.mxu0  ;;  %v4533_v22 = vpop.f32.mrf.mxu1 }
 0x50f   :  { %v12400_v61 = vadd.f32 %v4087_v50, %v12214_v54  ;;  %v12403_v62 = vadd.f32 %v4533_v22, %v14472_v8  ;;  %v4354_v54 = vor.u32 %v4353_v17, %v4352_v44  ;;  %v14477_v50 = vld [vmem:[#allocation106_spill] sm:$0xff] }
 0x510   :  { %v8000_v1 = vpop.f32.mrf.mxu0  ;;  %v8052_v4 = vpop.f32.mrf.mxu1  ;;  %v4964_v22 = vrot.slane %v14477_v50, 3 }
 0x511   :  { %14471 = vst [vmem:[#allocation122_spill] sm:$0xff] %v12400_v61 }
 0x512   :  { %v4092_v28 = vpop.f32.mrf.mxu0  ;;  %v4538_v46 = vpop.f32.mrf.mxu1  ;;  %8150 = vmatmul.mubr.bf16.gmra.mxu1 %v4351_v38  ;;  %8286 = vmatmul.mubr.bf16.gmra.mxu0 %v4963_v29  ;;  %v14478_v29 = vld [vmem:[#allocation49_spill] sm:$0xff]  ;;  %v4965_v44 = vsel %vm4926_vm6, %v4962_v57, %v4964_v22 }
 0x513   :  { %v12408_v7 = vadd.f32 %v4092_v28, %v12223_v48  ;;  %v12411_v6 = vadd.f32 %v4538_v46, %v14476_v20  ;;  %8153 = vmatprep.mubr.msk.bf16.mxu1 %vm8507_vm0, %v13811_v3  ;;  %8289 = vmatprep.mubr.msk.bf16.mxu0 %vm8507_vm0, %v13811_v3  ;;  %v4356_v1 = vrot.slane %v14478_v29, 2  ;;  %v14479_v48 = vld [vmem:[#allocation44_spill] sm:$0xff]  ;;  %v14481_v46 = vld [vmem:[#allocation169_spill] sm:$0xff] }
 0x514   :  { %v8003_v8 = vpop.f32.mrf.mxu0  ;;  %v8055_v15 = vpop.f32.mrf.mxu1  ;;  %v4357_v4 = vrot.slane %v14479_v48, 3  ;;  %v14482_v29 = vld [vmem:[#allocation109_spill] sm:$0xff] }
 0x515   :  { %14475 = vst [vmem:[#allocation189_spill] sm:$0xff] %v12408_v7  ;;  %v4355_v7 = vsel %vm4240_vm5, %v4350_v5, %v4354_v54  ;;  %v4966_v27 = vrot.slane %v14482_v29, 3 }
 0x516   :  { %v4095_v56 = vpop.f32.mrf.mxu0  ;;  %v4541_v38 = vpop.f32.mrf.mxu1  ;;  %v4358_v61 = vor.u32 %v4357_v4, %v4356_v1 }
 0x517   :  { %v12421_v28 = vadd.f32 %v4095_v56, %v12235_v30  ;;  %v12424_v20 = vadd.f32 %v4541_v38, %v14481_v46  ;;  %v14484_v30 = vld [vmem:[#allocation144_spill] sm:$0xff]  ;;  %v4967_v4 = vsel %vm4926_vm6, %v4964_v22, %v4966_v27  ;;  %v14486_v46 = vld [vmem:[#allocation170_spill] sm:$0xff] }
 0x518   :  { %v8004_v17 = vpop.f32.mrf.mxu0  ;;  %v8056_v50 = vpop.f32.mrf.mxu1  ;;  %v4359_v1 = vsel %vm4240_vm5, %v4354_v54, %v4358_v61  ;;  %v14490_v22 = vld [vmem:[#allocation172_spill] sm:$0xff] }
 0x519   :  { %14480 = vst [vmem:[#allocation123_spill] sm:$0xff] %v12421_v28  ;;  %v14487_v17 = vld [vmem:[#allocation55_spill] sm:$0xff] }
 0x51a   :  { %v4100_v8 = vpop.f32.mrf.mxu0  ;;  %v4546_v15 = vpop.f32.mrf.mxu1  ;;  %8154 = vmatmul.mubr.bf16.gmra.mxu1 %v4355_v7  ;;  %8290 = vmatmul.mubr.bf16.gmra.mxu0 %v4965_v44  ;;  %v4360_v50 = vrot.slane %v14487_v17, 2 }
 0x51b   :  { %v12430_v48 = vadd.f32 %v4100_v8, %v12243_v26  ;;  %v12433_v56 = vadd.f32 %v4546_v15, %v14484_v30  ;;  %8157 = vmatprep.mubr.msk.bf16.mxu1 %vm8507_vm0, %v13811_v3  ;;  %8293 = vmatprep.mubr.msk.bf16.mxu0 %vm8507_vm0, %v13811_v3  ;;  %v14488_v8 = vld [vmem:[#allocation51_spill] sm:$0xff] }
 0x51c   :  { %v8007_v57 = vpop.f32.mrf.mxu0  ;;  %v8059_v5 = vpop.f32.mrf.mxu1  ;;  %v4361_v15 = vrot.slane %v14488_v8, 3 }
 0x51d   :  { %14483 = vst [vmem:[#allocation125_spill] sm:$0xff] %v12430_v48 }
 0x51e   :  { %v4103_v38 = vpop.f32.mrf.mxu0  ;;  %v4549_v7 = vpop.f32.mrf.mxu1 }
 0x51f   :  { %v12442_v26 = vadd.f32 %v4103_v38, %v12256_v36  ;;  %v12445_v44 = vadd.f32 %v4549_v7, %v14486_v46  ;;  %v4362_v36 = vor.u32 %v4361_v15, %v4360_v50  ;;  %v14491_v38 = vld [vmem:[#allocation112_spill] sm:$0xff] }
 0x520   :  { %v8008_v29 = vpop.f32.mrf.mxu0  ;;  %v8060_v30 = vpop.f32.mrf.mxu1  ;;  %v4968_v7 = vrot.slane %v14491_v38, 3 }
 0x521   :  { %14485 = vst [vmem:[#allocation192_spill] sm:$0xff] %v12442_v26 }
 0x522   :  { %v4108_v57 = vpop.f32.mrf.mxu0  ;;  %v4554_v5 = vpop.f32.mrf.mxu1  ;;  %8158 = vmatmul.mubr.bf16.gmra.mxu1 %v4359_v1  ;;  %8294 = vmatmul.mubr.bf16.gmra.mxu0 %v4967_v4  ;;  %v14492_v4 = vld [vmem:[#allocation61_spill] sm:$0xff]  ;;  %v4969_v50 = vsel %vm4926_vm6, %v4966_v27, %v4968_v7 }
 0x523   :  { %v12450_v54 = vadd.f32 %v4108_v57, %v12265_v19  ;;  %v12453_v48 = vadd.f32 %v4554_v5, %v14490_v22  ;;  %8161 = vmatprep.mubr.msk.bf16.mxu1 %vm8507_vm0, %v13811_v3  ;;  %8297 = vmatprep.mubr.msk.bf16.mxu0 %vm8507_vm0, %v13811_v3  ;;  %v4364_v29 = vrot.slane %v14492_v4, 2  ;;  %v14493_v19 = vld [vmem:[#allocation56_spill] sm:$0xff]  ;;  %v4363_v22 = vsel %vm4240_vm5, %v4358_v61, %v4362_v36 }
 0x524   :  { %v8011_v46 = vpop.f32.mrf.mxu0  ;;  %v8063_v17 = vpop.f32.mrf.mxu1  ;;  %v4365_v30 = vrot.slane %v14493_v19, 3  ;;  %v14495_v4 = vld [vmem:[#allocation4_spill] sm:$0xff] }
 0x525   :  { %14489 = vst [vmem:[#allocation126_spill] sm:$0xff] %v12450_v54  ;;  %v4970_v26 = vrot.slane %v14495_v4, 3 }
 0x526   :  { %v4111_v8 = vpop.f32.mrf.mxu0  ;;  %v4557_v1 = vpop.f32.mrf.mxu1  ;;  %v4366_v54 = vor.u32 %v4365_v30, %v4364_v29 }
 0x527   :  { %v12463_v57 = vadd.f32 %v4111_v8, %v12277_v40  ;;  %v12466_v5 = vadd.f32 %v4557_v1, %v11836_v63  ;;  %v14497_v40 = vld [vmem:[#allocation149_spill] sm:$0xff]  ;;  %v4971_v30 = vsel %vm4926_vm6, %v4968_v7, %v4970_v26 }
 0x528   :  { %v8012_v15 = vpop.f32.mrf.mxu0  ;;  %v8064_v38 = vpop.f32.mrf.mxu1  ;;  %v4367_v29 = vsel %vm4240_vm5, %v4362_v36, %v4366_v54  ;;  %v14502_v7 = vld [vmem:[#allocation173_spill] sm:$0xff] }
 0x529   :  { %14494 = vst [vmem:[#allocation128_spill] sm:$0xff] %v12463_v57  ;;  %v14500_v38 = vld [vmem:[#allocation62_spill] sm:$0xff] }
 0x52a   :  { %v4116_v46 = vpop.f32.mrf.mxu0  ;;  %v4562_v17 = vpop.f32.mrf.mxu1  ;;  %8162 = vmatmul.mubr.bf16.gmra.mxu1 %v4363_v22  ;;  %8298 = vmatmul.mubr.bf16.gmra.mxu0 %v4969_v50  ;;  %v14499_v50 = vld [vmem:[#allocation67_spill] sm:$0xff] }
 0x52b   :  { %v12472_v19 = vadd.f32 %v4116_v46, %v12285_v42  ;;  %v12475_v8 = vadd.f32 %v4562_v17, %v14497_v40  ;;  %8165 = vmatprep.mubr.msk.bf16.mxu1 %vm8507_vm0, %v13811_v3  ;;  %8301 = vmatprep.mubr.msk.bf16.mxu0 %vm8507_vm0, %v13811_v3  ;;  %v4368_v15 = vrot.slane %v14499_v50, 2  ;;  %v4369_v46 = vrot.slane %v14500_v38, 3 }
 0x52c   :  { %v8015_v63 = vpop.f32.mrf.mxu0  ;;  %v8067_v27 = vpop.f32.mrf.mxu1 }
 0x52d   :  { %14496 = vst [vmem:[#allocation195_spill] sm:$0xff] %v12472_v19 }
 0x52e   :  { %v4119_v61 = vpop.f32.mrf.mxu0  ;;  %v4565_v1 = vpop.f32.mrf.mxu1 }
 0x52f   :  { %v12484_v42 = vadd.f32 %v4119_v61, %v12298_v11  ;;  %v12487_v22 = vadd.f32 %v4565_v1, %v11858_v16  ;;  %v4370_v16 = vor.u32 %v4369_v46, %v4368_v15  ;;  %v14503_v11 = vld [vmem:[#allocation6_spill] sm:$0xff] }
 0x530   :  { %v8016_v17 = vpop.f32.mrf.mxu0  ;;  %v8068_v4 = vpop.f32.mrf.mxu1  ;;  %v4972_v61 = vrot.slane %v14503_v11, 3 }
 0x531   :  { %14498 = vst [vmem:[#allocation129_spill] sm:$0xff] %v12484_v42 }
 0x532   :  { %v4124_v40 = vpop.f32.mrf.mxu0  ;;  %v4570_v63 = vpop.f32.mrf.mxu1  ;;  %8166 = vmatmul.mubr.bf16.gmra.mxu1 %v4367_v29  ;;  %8302 = vmatmul.mubr.bf16.gmra.mxu0 %v4971_v30  ;;  %v14504_v30 = vld [vmem:[#allocation72_spill] sm:$0xff]  ;;  %v4973_v15 = vsel %vm4926_vm6, %v4970_v26, %v4972_v61 }
 0x533   :  { %v12492_v36 = vadd.f32 %v4124_v40, %v12307_v45  ;;  %v12495_v27 = vadd.f32 %v4570_v63, %v14502_v7  ;;  %8169 = vmatprep.mubr.msk.bf16.mxu1 %vm8507_vm0, %v13811_v3  ;;  %8305 = vmatprep.mubr.msk.bf16.mxu0 %vm8507_vm0, %v13811_v3  ;;  %v4372_v17 = vrot.slane %v14504_v30, 2  ;;  %v14505_v45 = vld [vmem:[#allocation68_spill] sm:$0xff]  ;;  %v14507_v63 = vld [vmem:[#allocation175_spill] sm:$0xff] }
 0x534   :  { %v8019_v1 = vpop.f32.mrf.mxu0  ;;  %v8071_v50 = vpop.f32.mrf.mxu1  ;;  %v4373_v4 = vrot.slane %v14505_v45, 3  ;;  %v14508_v30 = vld [vmem:[#allocation11_spill] sm:$0xff] }
 0x535   :  { %14501 = vst [vmem:[#allocation131_spill] sm:$0xff] %v12492_v36  ;;  %v4371_v36 = vsel %vm4240_vm5, %v4366_v54, %v4370_v16  ;;  %v4974_v19 = vrot.slane %v14508_v30, 3 }
 0x536   :  { %v4127_v38 = vpop.f32.mrf.mxu0  ;;  %v4573_v29 = vpop.f32.mrf.mxu1  ;;  %v4374_v42 = vor.u32 %v4373_v4, %v4372_v17 }
 0x537   :  { %v12505_v40 = vadd.f32 %v4127_v38, %v12319_v52  ;;  %v12508_v7 = vadd.f32 %v4573_v29, %v14507_v63  ;;  %v14510_v52 = vld [vmem:[#allocation154_spill] sm:$0xff]  ;;  %v4975_v4 = vsel %vm4926_vm6, %v4972_v61, %v4974_v19 }
 0x538   :  { %v8020_v46 = vpop.f32.mrf.mxu0  ;;  %v8072_v11 = vpop.f32.mrf.mxu1  ;;  %v4375_v17 = vsel %vm4240_vm5, %v4370_v16, %v4374_v42 }
 0x539   :  { %14506 = vst [vmem:[#allocation196_spill] sm:$0xff] %v12505_v40  ;;  %v14513_v11 = vld [vmem:[#allocation74_spill] sm:$0xff] }
 0x53a   :  { %v4132_v1 = vpop.f32.mrf.mxu0  ;;  %v4578_v50 = vpop.f32.mrf.mxu1  ;;  %8170 = vmatmul.mubr.bf16.gmra.mxu1 %v4371_v36  ;;  %8306 = vmatmul.mubr.bf16.gmra.mxu0 %v4973_v15  ;;  %v14512_v15 = vld [vmem:[#allocation79_spill] sm:$0xff] }
 0x53b   :  { %v12514_v45 = vadd.f32 %v4132_v1, %v12327_v13  ;;  %v12517_v38 = vadd.f32 %v4578_v50, %v14510_v52  ;;  %8173 = vmatprep.mubr.msk.bf16.mxu1 %vm8507_vm0, %v13811_v3  ;;  %8309 = vmatprep.mubr.msk.bf16.mxu0 %vm8507_vm0, %v13811_v3  ;;  %v4376_v46 = vrot.slane %v14512_v15, 2  ;;  %v4377_v1 = vrot.slane %v14513_v11, 3 }
 0x53c   :  { %v8023_v26 = vpop.f32.mrf.mxu0  ;;  %v8075_v54 = vpop.f32.mrf.mxu1 }
 0x53d   :  { %14509 = vst [vmem:[#allocation132_spill] sm:$0xff] %v12514_v45 }
 0x53e   :  { %v4135_v29 = vpop.f32.mrf.mxu0  ;;  %v4581_v36 = vpop.f32.mrf.mxu1 }
 0x53f   :  { %v12526_v13 = vadd.f32 %v4135_v29, %v12340_v12  ;;  %v12529_v63 = vadd.f32 %v4581_v36, %v11898_v24  ;;  %v4378_v24 = vor.u32 %v4377_v1, %v4376_v46  ;;  %v14515_v12 = vld [vmem:[#allocation16_spill] sm:$0xff] }
 0x540   :  { %v8024_v50 = vpop.f32.mrf.mxu0  ;;  %v8076_v30 = vpop.f32.mrf.mxu1  ;;  %v4976_v54 = vrot.slane %v14515_v12, 3 }
 0x541   :  { %14511 = vst [vmem:[#allocation134_spill] sm:$0xff] %v12526_v13  ;;  %v4379_v30 = vsel %vm4240_vm5, %v4374_v42, %v4378_v24  ;;  %v14527_v13 = vld [vmem:[#allocation34_spill] sm:$0xff] }
 0x542   :  { %v4140_v52 = vpop.f32.mrf.mxu0  ;;  %v4586_v26 = vpop.f32.mrf.mxu1  ;;  %8174 = vmatmul.mubr.bf16.gmra.mxu1 %v4375_v17  ;;  %8310 = vmatmul.mubr.bf16.gmra.mxu0 %v4975_v4  ;;  %v14516_v4 = vld [vmem:[#allocation85_spill] sm:$0xff]  ;;  %v4982_v45 = vrot.slane %v14527_v13, 3 }
 0x543   :  { %v12534_v16 = vadd.f32 %v4140_v52, %v12348_v23  ;;  %v12537_v61 = vadd.f32 %v4586_v26, %v11906_v25  ;;  %8177 = vmatprep.mubr.msk.bf16.mxu1 %vm8507_vm0, %v13811_v3  ;;  %8313 = vmatprep.mubr.msk.bf16.mxu0 %vm8507_vm0, %v13811_v3  ;;  %v4380_v11 = vrot.slane %v14516_v4, 2  ;;  %v14517_v23 = vld [vmem:[#allocation80_spill] sm:$0xff]  ;;  %v4977_v52 = vsel %vm4926_vm6, %v4974_v19, %v4976_v54 }
 0x544   :  { %v8027_v29 = vpop.f32.mrf.mxu0  ;;  %v8079_v36 = vpop.f32.mrf.mxu1  ;;  %v4381_v50 = vrot.slane %v14517_v23, 3 }
 0x545   :  { %14514 = vst [vmem:[#allocation17_spill] sm:$0xff] %v12534_v16  ;;  %v14518_v29 = vld [vmem:[#allocation22_spill] sm:$0xff] }
 0x546   :  { %v4143_v15 = vpop.f32.mrf.mxu0  ;;  %v4589_v17 = vpop.f32.mrf.mxu1  ;;  %v4382_v12 = vor.u32 %v4381_v50, %v4380_v11  ;;  %v4978_v36 = vrot.slane %v14518_v29, 3 }
 0x547   :  { %v12547_v25 = vadd.f32 %v4589_v17, %v11917_v34  ;;  %v14519_v15 = vld [vmem:[#allocation176_spill] sm:$0xff] }
 0x548   :  { %v8028_v26 = vpop.f32.mrf.mxu0  ;;  %v8080_v16 = vpop.f32.mrf.mxu1  ;;  %v4383_v17 = vsel %vm4240_vm5, %v4378_v24, %v4382_v12  ;;  %v4979_v11 = vsel %vm4926_vm6, %v4976_v54, %v4978_v36 }
 0x549   :  { %v14522_v26 = vld [vmem:[#allocation86_spill] sm:$0xff] }
 0x54a   :  { %v4594_v46 = vpop.f32.mrf.mxu1  ;;  %8178 = vmatmul.mubr.bf16.gmra.mxu1 %v4379_v30  ;;  %v5125_v1 = vpop.f32.mrf.mxu0  ;;  %8314 = vmatmul.mubr.bf16.gmra.mxu0 %v4977_v52  ;;  %v14521_v30 = vld [vmem:[#allocation90_spill] sm:$0xff] }
 0x54b   :  { %v12553_v4 = vadd.f32 %v4594_v46, %v14519_v15  ;;  %v12556_v23 = vadd.f32 %v5125_v1, %v12369_v39  ;;  %8181 = vmatprep.mubr.msk.bf16.mxu1 %vm8507_vm0, %v13811_v3  ;;  %8317 = vmatprep.mubr.msk.bf16.mxu0 %vm8507_vm0, %v13811_v3  ;;  %v4384_v52 = vrot.slane %v14521_v30, 2  ;;  %v4385_v46 = vrot.slane %v14522_v26, 3 }
 0x54c   :  { %v8083_v34 = vpop.f32.mrf.mxu1  ;;  %v8219_v19 = vpop.f32.mrf.mxu0 }
 0x54d   :  { %14520 = vst [vmem:[#allocation12_spill] sm:$0xff] %v12556_v23 }
 0x54e   :  { %v4597_v42 = vpop.f32.mrf.mxu1  ;;  %v5128_v16 = vpop.f32.mrf.mxu0 }
 0x54f   :  { %v12565_v50 = vadd.f32 %v4597_v42, %v11938_v14  ;;  %v12568_v39 = vadd.f32 %v5128_v16, %v12382_v49  ;;  %v4386_v14 = vor.u32 %v4385_v46, %v4384_v52  ;;  %v14523_v49 = vld [vmem:[#allocation28_spill] sm:$0xff] }
 0x550   :  { %v8084_v1 = vpop.f32.mrf.mxu1  ;;  %v8220_v29 = vpop.f32.mrf.mxu0  ;;  %v4980_v19 = vrot.slane %v14523_v49, 3 }
 0x551   :  { %v4387_v52 = vsel %vm4240_vm5, %v4382_v12, %v4386_v14  ;;  %v4396_v12 = vshll.u32 %v11978_v2, 16 }
 0x552   :  { %v4602_v15 = vpop.f32.mrf.mxu1  ;;  %8182 = vmatmul.mubr.bf16.gmra.mxu1 %v4383_v17  ;;  %v5133_v34 = vpop.f32.mrf.mxu0  ;;  %8318 = vmatmul.mubr.bf16.gmra.mxu0 %v4979_v11  ;;  %v14524_v11 = vld [vmem:[#allocation180_spill] sm:$0xff]  ;;  %v4981_v46 = vsel %vm4926_vm6, %v4978_v36, %v4980_v19 }
 0x553   :  { %v12573_v24 = vadd.f32 %v4602_v15, %v11946_v51  ;;  %v12576_v54 = vadd.f32 %v5133_v34, %v12391_v31  ;;  %8185 = vmatprep.mubr.msk.bf16.mxu1 %vm8507_vm0, %v13811_v3  ;;  %8321 = vmatprep.mubr.msk.bf16.mxu0 %vm8507_vm0, %v13811_v3  ;;  %v14525_v26 = vshrl.u32 %v14524_v11, 16  ;;  %v14526_v1 = vshll.u32 %v14524_v11, 16 }
 0x554   :  { %v8087_v42 = vpop.f32.mrf.mxu1  ;;  %v8223_v16 = vpop.f32.mrf.mxu0 }
 0x555   :  { %v4388_v51 = vrot.slane %v14525_v26, 2  ;;  %v4389_v31 = vrot.slane %v14526_v1, 3  ;;  %v14528_v1 = vld [vmem:[#allocation178_spill] sm:$0xff] }
 0x556   :  { %v4605_v17 = vpop.f32.mrf.mxu1  ;;  %v5136_v30 = vpop.f32.mrf.mxu0 }
 0x557   :  { %v12588_v29 = vadd.f32 %v4605_v17, %v11957_v18  ;;  %v12591_v15 = vadd.f32 %v5136_v30, %v12403_v62  ;;  %v4390_v26 = vor.u32 %v4389_v31, %v4388_v51  ;;  %v4393_v62 = vshrl.u32 %v11978_v2, 16 }
 0x558   :  { %v8088_v34 = vpop.f32.mrf.mxu1  ;;  %v8224_v49 = vpop.f32.mrf.mxu0  ;;  %v4983_v31 = vsel %vm4926_vm6, %v4980_v19, %v4982_v45 }
 0x559   :  { %v4391_v51 = vsel %vm4240_vm5, %v4386_v14, %v4390_v26  ;;  %v4398_v34 = vrot.slane %v4396_v12, 3 }
 0x55a   :  { %v4610_v42 = vpop.f32.mrf.mxu1  ;;  %8186 = vmatmul.mubr.bf16.gmra.mxu1 %v4387_v52  ;;  %v5141_v16 = vpop.f32.mrf.mxu0  ;;  %8322 = vmatmul.mubr.bf16.gmra.mxu0 %v4981_v46  ;;  %v4395_v46 = vrot.slane %v4393_v62, 2 }
 0x55b   :  { %v12597_v40 = vadd.f32 %v4610_v42, %v14528_v1  ;;  %v12600_v18 = vadd.f32 %v5141_v16, %v12411_v6  ;;  %8189 = vmatprep.mubr.msk.bf16.mxu1 %vm8507_vm0, %v13811_v3  ;;  %8325 = vmatprep.mubr.msk.bf16.mxu0 %vm8507_vm0, %v13811_v3 }
 0x55c   :  { %v8091_v36 = vpop.f32.mrf.mxu1  ;;  %v8227_v17 = vpop.f32.mrf.mxu0 }
 0x55e   :  { %v4613_v30 = vpop.f32.mrf.mxu1  ;;  %v5144_v13 = vpop.f32.mrf.mxu0 }
 0x55f   :  { %v12611_v6 = vadd.f32 %v4613_v30, %v11986_v0  ;;  %v12614_v52 = vadd.f32 %v5144_v13, %v12424_v20  ;;  %v4399_v0 = vor.u32 %v4398_v34, %v4395_v46  ;;  %v14529_v20 = vld [vmem:[#allocation40_spill] sm:$0xff] }
 0x560   :  { %v8092_v49 = vpop.f32.mrf.mxu1  ;;  %v8228_v42 = vpop.f32.mrf.mxu0  ;;  %v4984_v19 = vrot.slane %v14529_v20, 3 }
 0x562   :  { %v4618_v16 = vpop.f32.mrf.mxu1  ;;  %8190 = vmatmul.mubr.bf16.gmra.mxu1 %v4391_v51  ;;  %v5149_v1 = vpop.f32.mrf.mxu0  ;;  %8326 = vmatmul.mubr.bf16.gmra.mxu0 %v4983_v31  ;;  %v4985_v51 = vsel %vm4926_vm6, %v4982_v45, %v4984_v19 }
 0x563   :  { %v12617_v36 = vadd.f32 %v4618_v16, %v11995_v33  ;;  %v12620_v14 = vadd.f32 %v5149_v1, %v12433_v56  ;;  %8193 = vmatprep.mubr.msk.bf16.mxu1 %vm8507_vm0, %v13811_v3  ;;  %8329 = vmatprep.mubr.msk.bf16.mxu0 %vm8507_vm0, %v13811_v3  ;;  %v4400_v56 = vsel %vm4240_vm5, %v4390_v26, %v4399_v0 }
 0x564   :  { %v8095_v62 = vpop.f32.mrf.mxu1  ;;  %v8231_v12 = vpop.f32.mrf.mxu0 }
 0x566   :  { %v4621_v17 = vpop.f32.mrf.mxu1  ;;  %v5152_v30 = vpop.f32.mrf.mxu0 }
 0x567   :  { %v12628_v13 = vadd.f32 %v4621_v17, %v12008_v43  ;;  %v12631_v33 = vadd.f32 %v5152_v30, %v12445_v44  ;;  %v14530_v43 = vld [vmem:[#allocation47_spill] sm:$0xff] }
 0x568   :  { %v8096_v31 = vpop.f32.mrf.mxu1  ;;  %v8232_v49 = vpop.f32.mrf.mxu0  ;;  %v4986_v44 = vrot.slane %v14530_v43, 3 }
 0x56a   :  { %v4626_v42 = vpop.f32.mrf.mxu1  ;;  %8194 = vmatmul.mubr.bf16.gmra.mxu1 %v4400_v56  ;;  %v5157_v46 = vpop.f32.mrf.mxu0  ;;  %8330 = vmatmul.mubr.bf16.gmra.mxu0 %v4985_v51  ;;  %v14531_v51 = vld [vmem:[#allocation159_spill] sm:$0xff] }
 0x56b   :  { %v12636_v34 = vadd.f32 %v4626_v42, %v12016_v37  ;;  %v12639_v16 = vadd.f32 %v5157_v46, %v12453_v48  ;;  %8197 = vmatprep.mubr.msk.bf16.mxu1 %vm8507_vm0, %v13811_v3  ;;  %8333 = vmatprep.mubr.msk.bf16.mxu0 %vm8507_vm0, %v13811_v3  ;;  %v4987_v48 = vsel %vm4926_vm6, %v4984_v19, %v4986_v44 }
 0x56c   :  { %v8099_v45 = vpop.f32.mrf.mxu1  ;;  %v8235_v26 = vpop.f32.mrf.mxu0 }
 0x56e   :  { %v4629_v1 = vpop.f32.mrf.mxu1  ;;  %v5160_v20 = vpop.f32.mrf.mxu0 }
 0x56f   :  { %v12647_v62 = vadd.f32 %v4629_v1, %v12028_v60  ;;  %v12650_v37 = vadd.f32 %v5160_v20, %v12466_v5  ;;  %v14532_v60 = vld [vmem:[#allocation53_spill] sm:$0xff] }
 0x570   :  { %v8100_v12 = vpop.f32.mrf.mxu1  ;;  %v8236_v17 = vpop.f32.mrf.mxu0  ;;  %v4988_v5 = vrot.slane %v14532_v60, 3 }
 0x572   :  { %v4634_v30 = vpop.f32.mrf.mxu1  ;;  %8198 = vmatmul.mubr.bf16.gmra.mxu1 %v4399_v0  ;;  %v5165_v56 = vpop.f32.mrf.mxu0  ;;  %8334 = vmatmul.mubr.bf16.gmra.mxu0 %v4987_v48  ;;  %v4989_v26 = vsel %vm4926_vm6, %v4986_v44, %v4988_v5 }
 0x573   :  { %v12654_v31 = vadd.f32 %v4634_v30, %v14531_v51  ;;  %v12657_v49 = vadd.f32 %v5165_v56, %v12475_v8  ;;  %8337 = vmatprep.mubr.msk.bf16.mxu0 %vm8507_vm0, %v13811_v3 }
 0x574   :  { %v8103_v42 = vpop.f32.mrf.mxu1  ;;  %v8239_v46 = vpop.f32.mrf.mxu0 }
 0x576   :  { %v4637_v19 = vpop.f32.mrf.mxu1  ;;  %v5168_v43 = vpop.f32.mrf.mxu0 }
 0x577   :  { %v12663_v45 = vadd.f32 %v4637_v19, %v12049_v21  ;;  %v12666_v0 = vadd.f32 %v5168_v43, %v12487_v22  ;;  %v14533_v21 = vld [vmem:[#allocation60_spill] sm:$0xff] }
 0x578   :  { %v8104_v1 = vpop.f32.mrf.mxu1  ;;  %v8240_v8 = vpop.f32.mrf.mxu0  ;;  %v4990_v30 = vrot.slane %v14533_v21, 3 }
 0x57a   :  { %v4642_v20 = vpop.f32.mrf.mxu1  ;;  %v5173_v48 = vpop.f32.mrf.mxu0  ;;  %8338 = vmatmul.mubr.bf16.gmra.mxu0 %v4989_v26 }
 0x57b   :  { %v12670_v12 = vadd.f32 %v4642_v20, %v12058_v32  ;;  %v12673_v17 = vadd.f32 %v5173_v48, %v12495_v27  ;;  %8341 = vmatprep.mubr.msk.bf16.mxu0 %vm8507_vm0, %v13811_v3  ;;  %v4991_v32 = vsel %vm4926_vm6, %v4988_v5, %v4990_v30 }
 0x57c   :  { %v8107_v22 = vpop.f32.mrf.mxu1  ;;  %v8243_v56 = vpop.f32.mrf.mxu0 }
 0x57e   :  { %v4645_v51 = vpop.f32.mrf.mxu1  ;;  %v5176_v44 = vpop.f32.mrf.mxu0 }
 0x57f   :  { %v12679_v60 = vadd.f32 %v4645_v51, %v12070_v35  ;;  %v12682_v42 = vadd.f32 %v5176_v44, %v12508_v7  ;;  %v14534_v35 = vld [vmem:[#allocation64_spill] sm:$0xff] }
 0x580   :  { %v8108_v46 = vpop.f32.mrf.mxu1  ;;  %v8244_v27 = vpop.f32.mrf.mxu0  ;;  %v4992_v8 = vrot.slane %v14534_v35, 3 }
 0x582   :  { %v4650_v19 = vpop.f32.mrf.mxu1  ;;  %v5181_v43 = vpop.f32.mrf.mxu0  ;;  %8342 = vmatmul.mubr.bf16.gmra.mxu0 %v4991_v32 }
 0x583   :  { %v12686_v26 = vadd.f32 %v4650_v19, %v12078_v53  ;;  %v12689_v1 = vadd.f32 %v5181_v43, %v12517_v38  ;;  %8345 = vmatprep.mubr.msk.bf16.mxu0 %vm8507_vm0, %v13811_v3  ;;  %v4993_v53 = vsel %vm4926_vm6, %v4990_v30, %v4992_v8 }
 0x584   :  { %v8111_v7 = vpop.f32.mrf.mxu1  ;;  %v8247_v20 = vpop.f32.mrf.mxu0 }
 0x586   :  { %v4653_v48 = vpop.f32.mrf.mxu1  ;;  %v5184_v5 = vpop.f32.mrf.mxu0 }
 0x587   :  { %v12695_v21 = vadd.f32 %v4653_v48, %v12091_v47  ;;  %v12698_v22 = vadd.f32 %v5184_v5, %v12529_v63  ;;  %v14536_v47 = vld [vmem:[#allocation70_spill] sm:$0xff] }
 0x588   :  { %v8112_v56 = vpop.f32.mrf.mxu1  ;;  %v8248_v38 = vpop.f32.mrf.mxu0  ;;  %v4994_v27 = vrot.slane %v14536_v47, 3 }
 0x58a   :  { %v4658_v51 = vpop.f32.mrf.mxu1  ;;  %v5189_v44 = vpop.f32.mrf.mxu0  ;;  %8346 = vmatmul.mubr.bf16.gmra.mxu0 %v4993_v53 }
 0x58b   :  { %v12702_v32 = vadd.f32 %v4658_v51, %v12100_v59  ;;  %v12705_v46 = vadd.f32 %v5189_v44, %v12537_v61  ;;  %8349 = vmatprep.mubr.msk.bf16.mxu0 %vm8507_vm0, %v13811_v3  ;;  %v4995_v59 = vsel %vm4926_vm6, %v4992_v8, %v4994_v27 }
 0x58c   :  { %v8115_v63 = vpop.f32.mrf.mxu1  ;;  %v8251_v19 = vpop.f32.mrf.mxu0 }
 0x58d   :  { %14535 = vst [vmem:[#allocation23_spill] sm:$0xff] %v12705_v46 }
 0x58e   :  { %v4661_v43 = vpop.f32.mrf.mxu1  ;;  %v5192_v30 = vpop.f32.mrf.mxu0 }
 0x58f   :  { %v12711_v35 = vadd.f32 %v4661_v43, %v12112_v58  ;;  %v12714_v7 = vadd.f32 %v5192_v30, %v12547_v25  ;;  %v14538_v58 = vld [vmem:[#allocation76_spill] sm:$0xff] }
 0x590   :  { %v8116_v20 = vpop.f32.mrf.mxu1  ;;  %v8252_v61 = vpop.f32.mrf.mxu0  ;;  %v4996_v38 = vrot.slane %v14538_v58, 3 }
 0x591   :  { %14537 = vst [vmem:[#allocation18_spill] sm:$0xff] %v12714_v7 }
 0x592   :  { %v4666_v48 = vpop.f32.mrf.mxu1  ;;  %v5197_v5 = vpop.f32.mrf.mxu0  ;;  %8350 = vmatmul.mubr.bf16.gmra.mxu0 %v4995_v59  ;;  %v14539_v59 = vld [vmem:[#allocation179_spill] sm:$0xff] }
 0x593   :  { %v12718_v53 = vadd.f32 %v4666_v48, %v12120_v10  ;;  %v12721_v56 = vadd.f32 %v5197_v5, %v12553_v4  ;;  %8353 = vmatprep.mubr.msk.bf16.mxu0 %vm8507_vm0, %v13811_v3  ;;  %v4997_v10 = vsel %vm4926_vm6, %v4994_v27, %v4996_v38 }
 0x594   :  { %v8119_v25 = vpop.f32.mrf.mxu1  ;;  %v8255_v51 = vpop.f32.mrf.mxu0 }
 0x595   :  { %v14542_v25 = vld [vmem:[#allocation181_spill] sm:$0xff] }
 0x596   :  { %v4669_v44 = vpop.f32.mrf.mxu1  ;;  %v5200_v8 = vpop.f32.mrf.mxu0 }
 0x597   :  { %v12727_v47 = vadd.f32 %v4669_v44, %v12133_v55  ;;  %v12730_v63 = vadd.f32 %v5200_v8, %v12565_v50  ;;  %v14541_v55 = vld [vmem:[#allocation82_spill] sm:$0xff] }
 0x598   :  { %v8120_v19 = vpop.f32.mrf.mxu1  ;;  %v8256_v4 = vpop.f32.mrf.mxu0  ;;  %v4998_v48 = vrot.slane %v14541_v55, 3 }
 0x599   :  { %v14544_v4 = vld [vmem:[#allocation164_spill] sm:$0xff] }
 0x59a   :  { %v4674_v43 = vpop.f32.mrf.mxu1  ;;  %v5205_v30 = vpop.f32.mrf.mxu0  ;;  %8354 = vmatmul.mubr.bf16.gmra.mxu0 %v4997_v10  ;;  %v4999_v44 = vsel %vm4926_vm6, %v4996_v38, %v4998_v48  ;;  %v14546_v38 = vld [vmem:[#allocation182_spill] sm:$0xff] }
 0x59b   :  { %v12734_v20 = vadd.f32 %v4674_v43, %v14539_v59  ;;  %v12737_v61 = vadd.f32 %v5205_v30, %v12573_v24  ;;  %8357 = vmatprep.mubr.msk.bf16.mxu0 %vm8507_vm0, %v13811_v3  ;;  %v5000_v30 = vrot.slane %v14524_v11, 3  ;;  %v5002_v11 = vrot.slane %v11978_v2, 3 }
 0x59c   :  { %v8123_v50 = vpop.f32.mrf.mxu1  ;;  %v8259_v5 = vpop.f32.mrf.mxu0 }
 0x59d   :  { %14540 = vst [vmem:[#allocation135_spill] sm:$0xff] %v12734_v20 }
 0x59e   :  { %v4677_v58 = vpop.f32.mrf.mxu1  ;;  %v12742_v27 = vpop.f32.mrf.mxu0 }
 0x59f   :  { %v12745_v51 = vadd.f32 %v4677_v58, %v14542_v25  ;;  %v5001_v25 = vsel %vm4926_vm6, %v4998_v48, %v5000_v30  ;;  %v14550_v48 = vld [vmem:[#allocation168_spill] sm:$0xff] }
 0x5a0   :  { %v8124_v8 = vpop.f32.mrf.mxu1  ;;  %v8260_v10 = vpop.f32.mrf.mxu0 }
 0x5a1   :  { %14543 = vst [vmem:[#allocation29_spill] sm:$0xff] %v12745_v51 }
 0x5a2   :  { %v4682_v19 = vpop.f32.mrf.mxu1  ;;  %v12748_v24 = vpop.f32.mrf.mxu0  ;;  %8358 = vmatmul.mubr.bf16.gmra.mxu0 %v4999_v44 }
 0x5a3   :  { %v12751_v43 = vadd.f32 %v4682_v19, %v14544_v4  ;;  %8361 = vmatprep.mubr.msk.bf16.mxu0 %vm8507_vm0, %v13811_v3  ;;  %v14548_v4 = vld [vmem:[#allocation184_spill] sm:$0xff] }
 0x5a4   :  { %v8127_v59 = vpop.f32.mrf.mxu1  ;;  %v8263_v55 = vpop.f32.mrf.mxu0 }
 0x5a5   :  { %14545 = vst [vmem:[#allocation24_spill] sm:$0xff] %v12751_v43 }
 0x5a6   :  { %v4685_v50 = vpop.f32.mrf.mxu1  ;;  %v12756_v5 = vpop.f32.mrf.mxu0 }
 0x5a7   :  { %v12759_v58 = vadd.f32 %v4685_v50, %v14546_v38 }
 0x5a8   :  { %v8128_v8 = vpop.f32.mrf.mxu1  ;;  %v8264_v44 = vpop.f32.mrf.mxu0 }
 0x5a9   :  { %14547 = vst [vmem:[#allocation137_spill] sm:$0xff] %v12759_v58  ;;  %v5003_v44 = vsel %vm4926_vm6, %v5000_v30, %v5002_v11  ;;  %v5757_v58 = vlaneseq }
 0x5aa   :  { %v4690_v10 = vpop.f32.mrf.mxu1  ;;  %v12762_v19 = vpop.f32.mrf.mxu0  ;;  %8362 = vmatmul.mubr.bf16.gmra.mxu0 %v5001_v25 }
 0x5ab   :  { %v12765_v57 = vadd.f32 %v4690_v10, %v14548_v4  ;;  %8365 = vmatprep.mubr.msk.bf16.mxu0 %vm8507_vm0, %v13811_v3  ;;  %v12780_v2 = vshrl.u32 %v5757_v58, 7 }
 0x5ac   :  { %v8131_v59 = vpop.f32.mrf.mxu1  ;;  %v8267_v55 = vpop.f32.mrf.mxu0 }
 0x5ad   :  { %14549 = vst [vmem:[#allocation138_spill] sm:$0xff] %v12765_v57  ;;  %v12778_v57 = vand.u32 127, %v5757_v58  ;;  %v14552_v59 = vld [vmem:[#allocation185_spill] sm:$0xff]  ;;  %v12789_v30 = vmul.u32 328, %v12780_v2  ;;  %v14554_v58 = vld [vmem:[#allocation187_spill] sm:$0xff]  ;;  %vm5876_vm15 = vcmp.lt.s32.totalorder %v12780_v2, 2 }
 0x5ae   :  { %v4693_v50 = vpop.f32.mrf.mxu1  ;;  %v12770_v38 = vpop.f32.mrf.mxu0 }
 0x5af   :  { %v12773_v8 = vadd.f32 %v4693_v50, %v14550_v48 }
 0x5b0   :  { %v8132_v28 = vpop.f32.mrf.mxu1  ;;  %v8268_v25 = vpop.f32.mrf.mxu0 }
 0x5b1   :  { %14551 = vst [vmem:[#allocation141_spill] sm:$0xff] %v12773_v8  ;;  %v5759_v28 = vadd.s32 128, %v12778_v57 }
 0x5b2   :  { %v4698_v10 = vpop.f32.mrf.mxu1  ;;  %v12776_v4 = vpop.f32.mrf.mxu0  ;;  %8366 = vmatmul.mubr.bf16.gmra.mxu0 %v5003_v44 }
 0x5b3   :  { %v12783_v55 = vadd.f32 %v4698_v10, %v14552_v59  ;;  %8369 = vmatprep.mubr.msk.bf16.mxu0 %vm8507_vm0, %v13811_v3  ;;  %v12794_v44 = vsub.s32 %v5759_v28, %v12789_v30  ;;  %v12801_v10 = vsub.s32 %v12778_v57, %v12789_v30  ;;  %v14556_v28 = vld [vmem:[#allocation171_spill] sm:$0xff] }
 0x5b4   :  { %v8135_v50 = vpop.f32.mrf.mxu1  ;;  %v8271_v48 = vpop.f32.mrf.mxu0 }
 0x5b5   :  { %14553 = vst [vmem:[#allocation35_spill] sm:$0xff] %v12783_v55  ;;  %v5798_v48 = vsub.s32 0, %v12794_v44  ;;  %v5787_v9 = vsub.s32 0, %v12801_v10  ;;  %vm5797_vm7 = vcmp.lt.s32.totalorder %v12794_v44, 0  ;;  %vm5772_vm11 = vcmp.ge.s32.totalorder %v12794_v44, 0 }
 0x5b6   :  { %v4701_v25 = vpop.f32.mrf.mxu1  ;;  %v12791_v8 = vpop.f32.mrf.mxu0  ;;  %vm5777_vm12 = vcmp.lt.s32.totalorder %v12794_v44, 288  ;;  %vm5786_vm3 = vcmp.lt.s32.totalorder %v12801_v10, 0 }
 0x5b7   :  { %v12797_v43 = vadd.f32 %v4701_v25, %v14554_v58  ;;  %v6309_v51 = vmin.u32 %v5798_v48, %v12794_v44  ;;  %v12812_v25 = vld [vmem:[%s13494_s2] ss:$0 sm:$0xff]  ;;  %v12820_v7 = vmin.u32 %v5787_v9, %v12801_v10  ;;  %vm12931_vm13 = vmand %vm5772_vm11, %vm5777_vm12 }
 0x5b8   :  { %v8136_v59 = vpop.f32.mrf.mxu1  ;;  %v8272_v50 = vpop.f32.mrf.mxu0  ;;  %v5534_v9 = vmul.f32 %v12812_v25, %v12698_v22  ;;  %v5532_v22 = vmul.f32 %v12812_v25, %v12682_v42  ;;  %v12872_v42 = vmul.f32 %v12812_v25, %v12631_v33  ;;  %v5531_v33 = vmul.f32 %v12812_v25, %v12673_v17 }
 0x5b9   :  { %14555 = vst [vmem:[#allocation30_spill] sm:$0xff] %v12797_v43  ;;  %v12814_v50 = vmul.u32.u64.low 3817748708, %v6309_v51  ;;  %v12815_v43 = vmul.u32.u64.high 3817748708, %v6309_v51, %v12814_v50 }
 0x5ba   :  { %v4706_v3 = vpop.f32.mrf.mxu1  ;;  %v5237_v55 = vpop.f32.mrf.mxu0  ;;  %8370 = vmatmul.mubr.bf16.gmra.mxu0 %v5002_v11  ;;  %v5524_v11 = vmul.f32 %v12812_v25, %v12614_v52  ;;  %v12836_v52 = vmul.f32 %v12812_v25, %v12576_v54  ;;  %v5528_v54 = vmul.f32 %v12812_v25, %v12650_v37 }
 0x5bb   :  { %v12807_v23 = vadd.f32 %v4706_v3, %v14556_v28  ;;  %v14558_v3 = vld [vmem:[#allocation188_spill] sm:$0xff] }
 0x5bc   :  { %v8139_v58 = vpop.f32.mrf.mxu1  ;;  %v8275_v59 = vpop.f32.mrf.mxu0  ;;  %14561 = vst [vmem:[#allocation146_spill] sm:$0xff] %v12836_v52  ;;  %v14564_v52 = vld [vmem:[#allocation190_spill] sm:$0xff] }
 0x5bd   :  { %14557 = vst [vmem:[#allocation143_spill] sm:$0xff] %v12807_v23  ;;  %v12828_v23 = vld [vmem:[%s13495_s3] ss:$0 sm:$0xff]  ;;  %v12832_v58 = vmul.f32 %v12812_v25, %v12568_v39 }
 0x5be   :  { %v4709_v20 = vpop.f32.mrf.mxu1  ;;  %v5240_v48 = vpop.f32.mrf.mxu0  ;;  %v12850_v39 = vadd.f32 %v12828_v23, %v5524_v11  ;;  %v5533_v11 = vmul.f32 %v12812_v25, %v12689_v1  ;;  %v12882_v1 = vadd.f32 %v12828_v23, %v5528_v54 }
 0x5bf   :  { %v12823_v28 = vadd.f32 %v4709_v20, %v14558_v3  ;;  %14560 = vst [vmem:[#allocation36_spill] sm:$0xff] %v12832_v58  ;;  %v5803_v20 = vshrl.u32 %v12815_v43, 4  ;;  %v12843_v3 = vmul.f32 %v12812_v25, %v12591_v15 }
 0x5c0   :  { %v8140_v59 = vpop.f32.mrf.mxu1  ;;  %v8276_v50 = vpop.f32.mrf.mxu0  ;;  %14563 = vst [vmem:[#allocation151_spill] sm:$0xff] %v12850_v39  ;;  %v12857_v58 = vmul.u32.u64.low 3817748708, %v12820_v7  ;;  %v12858_v15 = vmul.u32.u64.high 3817748708, %v12820_v7, %v12857_v58  ;;  %v12895_v54 = vadd.f32 %v12828_v23, %v5533_v11 }
 0x5c1   :  { %14559 = vst [vmem:[#allocation41_spill] sm:$0xff] %v12823_v28  ;;  %v12847_v28 = vmul.f32 %v12812_v25, %v12600_v18  ;;  %v5804_v43 = vmul.u32 18, %v5803_v20  ;;  %v12862_v18 = vmul.f32 %v12812_v25, %v12620_v14  ;;  %v12876_v20 = vmul.f32 %v12812_v25, %v12639_v16 }
 0x5c2   :  { %v4714_v59 = vpop.f32.mrf.mxu1  ;;  %v5245_v50 = vpop.f32.mrf.mxu0  ;;  %v12879_v58 = vadd.f32 %v12828_v23, %v5534_v9  ;;  %v12890_v16 = vadd.f32 %v12828_v23, %v5532_v22  ;;  %v5463_v9 = vadd.f32 %v5237_v55, %v12654_v31  ;;  %v5461_v31 = vadd.f32 %v12776_v4, %v12636_v34  ;;  %v14568_v4 = vld [vmem:[#allocation191_spill] sm:$0xff] }
 0x5c3   :  { %14562 = vst [vmem:[#allocation148_spill] sm:$0xff] %v12847_v28  ;;  %v12867_v46 = vadd.f32 %v4714_v59, %v14564_v52  ;;  %v5465_v37 = vadd.f32 %v5245_v50, %v12670_v12  ;;  %v5805_v28 = vsub.s32 %v6309_v51, %v5804_v43  ;;  %v5530_v12 = vmul.f32 %v12812_v25, %v12666_v0  ;;  %v14565_v43 = vld [vmem:[#allocation174_spill] sm:$0xff] }
 0x5c4   :  { %v8143_v14 = vpop.f32.mrf.mxu1  ;;  %v8279_v39 = vpop.f32.mrf.mxu0  ;;  %v5464_v52 = vadd.f32 %v5240_v48, %v12663_v45  ;;  %v5695_v45 = vmax.f32 %v12879_v58, 0.0  ;;  %v5462_v55 = vadd.f32 %v12791_v8, %v12647_v62  ;;  %v5792_v8 = vshrl.u32 %v12858_v15, 4 }
 0x5c5   :  { %v5549_v59 = vmul.f32 %v12812_v25, %v5465_v37  ;;  %v5806_v50 = vsub.s32 0, %v5805_v28 }
 0x5c6   :  { %v4717_v39 = vpop.f32.mrf.mxu1  ;;  %v5248_v51 = vpop.f32.mrf.mxu0  ;;  %v5548_v11 = vmul.f32 %v12812_v25, %v5464_v52 }
 0x5c7   :  { %v12898_v0 = vadd.f32 %v4717_v39, %v14565_v43  ;;  %v5466_v17 = vadd.f32 %v5248_v51, %v12679_v60  ;;  %v5807_v37 = vsel %vm5797_vm7, %v5806_v50, %v5805_v28  ;;  %v5547_v60 = vmul.f32 %v12812_v25, %v5463_v9 }
 0x5c8   :  { %v8144_v48 = vpop.f32.mrf.mxu1  ;;  %v8280_v22 = vpop.f32.mrf.mxu0  ;;  %vm5842_vm8 = vcmp.ne.s32.totalorder %v5807_v37, 0  ;;  %vm5847_vm9 = vcmp.lt.s32.totalorder %v5807_v37, 0  ;;  %v5633_v58 = vadd.f32 %v12828_v23, %v5549_v59  ;;  %v5857_v62 = vadd.s32 18, %v5807_v37 }
 0x5c9   :  { %v5550_v14 = vmul.f32 %v12812_v25, %v5466_v17  ;;  %vm12911_vm10 = vmand %vm5847_vm9, %vm5842_vm8  ;;  %v5460_v9 = vadd.f32 %v12770_v38, %v12628_v13  ;;  %v5546_v59 = vmul.f32 %v12812_v25, %v5462_v55  ;;  %v5459_v13 = vadd.f32 %v12762_v19, %v12617_v36 }
 0x5ca   :  { %v4722_v39 = vpop.f32.mrf.mxu1  ;;  %v5253_v51 = vpop.f32.mrf.mxu0  ;;  %v5862_v15 = vsel %vm12911_vm10, %v5857_v62, %v5807_v37  ;;  %v5545_v38 = vmul.f32 %v12812_v25, %v5461_v31  ;;  %v5793_v37 = vmul.u32 18, %v5792_v8  ;;  %v5631_v34 = vadd.f32 %v12828_v23, %v5547_v60 }
 0x5cb   :  { %v12917_v28 = vadd.f32 %v4722_v39, %v14568_v4  ;;  %v12920_v52 = vadd.f32 %v5253_v51, %v12686_v26  ;;  %v5634_v50 = vadd.f32 %v12828_v23, %v5550_v14  ;;  %v5632_v26 = vadd.f32 %v12828_v23, %v5548_v11  ;;  %v14571_v14 = vld [vmem:[#allocation193_spill] sm:$0xff] }
 0x5cc   :  { %v8147_v43 = vpop.f32.mrf.mxu1  ;;  %v8283_v17 = vpop.f32.mrf.mxu0  ;;  %vm5867_vm14 = vcmp.lt.s32.totalorder %v5862_v15, 16  ;;  %v5710_v51 = vmax.f32 %v5633_v58, 0.0  ;;  %v5529_v36 = vmul.f32 %v12812_v25, %v12657_v49  ;;  %v5614_v19 = vadd.f32 %v12828_v23, %v5530_v12  ;;  %v14572_v15 = vld [vmem:[#allocation177_spill] sm:$0xff] }
 0x5cd   :  { %v5711_v48 = vmax.f32 %v5634_v50, 0.0  ;;  %vm5872_vm1 = vmand %vm12931_vm13, %vm5867_vm14  ;;  %v5615_v31 = vadd.f32 %v12828_v23, %v5531_v33  ;;  %v5694_v62 = vmax.f32 %v12895_v54, 0.0  ;;  %v5458_v60 = vadd.f32 %v12756_v5, %v12611_v6 }
 0x5ce   :  { %v4725_v55 = vpop.f32.mrf.mxu1  ;;  %v5256_v44 = vpop.f32.mrf.mxu0  ;;  %vm5878_vm2 = vmand %vm5872_vm1, %vm5876_vm15  ;;  %v5544_v58 = vmul.f32 %v12812_v25, %v5460_v9  ;;  %v5709_v50 = vmax.f32 %v5632_v26, 0.0  ;;  %v5630_v49 = vadd.f32 %v12828_v23, %v5546_v59  ;;  %v5693_v12 = vmax.f32 %v12890_v16, 0.0 }
 0x5cf   :  { %v12942_v11 = vadd.f32 %v4725_v55, %v14571_v14  ;;  %v12945_v39 = vadd.f32 %v5256_v44, %v12695_v21  ;;  %6741 = vmatprep.subr.mxu1 %v5711_v48  ;;  %v13756_v21 = vmov 0.00390625   ;;  %v5457_v33 = vadd.f32 %v12748_v24, %v12597_v40 }
 0x5d0   :  { %v8148_v8 = vpop.f32.mrf.mxu1  ;;  %v8284_v4 = vpop.f32.mrf.mxu0  ;;  %6742 = vmatpush3.msra.mxu1 %v5695_v45  ;;  %6313 = vmatprep.mubr.msk.f32.mxu1 %vm5878_vm2, %v13756_v21  ;;  %v5543_v54 = vmul.f32 %v12812_v25, %v5459_v13  ;;  %v5794_v17 = vsub.s32 %v12820_v7, %v5793_v37  ;;  %v5708_v9 = vmax.f32 %v5631_v34, 0.0  ;;  %v5629_v16 = vadd.f32 %v12828_v23, %v5545_v38 }
 0x5d1   :  { %6743 = vmatprep.subr.mxu1 %v5710_v51  ;;  %v5613_v59 = vadd.f32 %v12828_v23, %v5529_v36  ;;  %v5691_v40 = vmax.f32 %v5614_v19, 0.0  ;;  %v5692_v24 = vmax.f32 %v5615_v31, 0.0  ;;  %v5761_v22 = vadd.s32 384, %v12778_v57 }
 0x5d2   :  { %v4730_v45 = vpop.f32.mrf.mxu1  ;;  %v5261_v43 = vpop.f32.mrf.mxu0  ;;  %6744 = vmatpush3.msra.mxu1 %v5694_v62  ;;  %v5456_v7 = vadd.f32 %v12742_v27, %v12588_v29  ;;  %v5542_v13 = vmul.f32 %v12812_v25, %v5458_v60  ;;  %v5628_v55 = vadd.f32 %v12828_v23, %v5544_v58  ;;  %v5541_v38 = vmul.f32 %v12812_v25, %v5457_v33 }
 0x5d3   :  { %v12966_v6 = vadd.f32 %v4730_v45, %v14572_v15  ;;  %v12969_v5 = vadd.f32 %v5261_v43, %v12702_v32  ;;  %6745 = vmatprep.subr.mxu1 %v5709_v50  ;;  %v5707_v32 = vmax.f32 %v5630_v49, 0.0  ;;  %v5627_v14 = vadd.f32 %v12828_v23, %v5543_v54  ;;  %v14573_v54 = vld [vmem:[#allocation194_spill] sm:$0xff] }
 0x5d4   :  { %v8151_v48 = vpop.f32.mrf.mxu1  ;;  %v8287_v26 = vpop.f32.mrf.mxu0  ;;  %6746 = vmatpush3.msra.mxu1 %v5693_v12  ;;  %v5795_v51 = vsub.s32 0, %v5794_v17  ;;  %v12981_v34 = vsub.s32 %v5761_v22, %v12789_v30  ;;  %v5706_v27 = vmax.f32 %v5629_v16, 0.0  ;;  %v12992_v19 = vadd.f32 %v12828_v23, %v12862_v18 }
 0x5d5   :  { %6747 = vmatprep.subr.mxu1 %v5708_v9  ;;  %v5611_v31 = vadd.f32 %v12828_v23, %v12876_v20  ;;  %v5690_v62 = vmax.f32 %v5613_v59, 0.0  ;;  %v5540_v60 = vmul.f32 %v12812_v25, %v5456_v7  ;;  %v5705_v58 = vmax.f32 %v5628_v55, 0.0 }
 0x5d6   :  { %v4733_v44 = vpop.f32.mrf.mxu1  ;;  %v5264_v37 = vpop.f32.mrf.mxu0  ;;  %6748 = vmatpush3.msra.mxu1 %v5692_v24  ;;  %v5626_v50 = vadd.f32 %v12828_v23, %v5542_v13  ;;  %v5689_v18 = vmax.f32 %v12882_v1, 0.0  ;;  %v5539_v20 = vmul.f32 %v12812_v25, %v12737_v61  ;;  %v13006_v33 = vsel %vm5786_vm3, %v5795_v51, %v5794_v17  ;;  %v14576_v51 = vld [vmem:[#allocation151_spill] sm:$0xff] }
 0x5d7   :  { %v12984_v36 = vadd.f32 %v4733_v44, %v12301_v41  ;;  %v12987_v29 = vadd.f32 %v5264_v37, %v12711_v35  ;;  %6749 = vmatprep.subr.mxu1 %v5707_v32  ;;  %v5820_v41 = vsub.s32 0, %v12981_v34  ;;  %v5610_v35 = vadd.f32 %v12828_v23, %v12872_v42  ;;  %v14574_v32 = vld [vmem:[#allocation116_spill] sm:$0xff] }
 0x5d8   :  { %v8152_v8 = vpop.f32.mrf.mxu1  ;;  %v8288_v4 = vpop.f32.mrf.mxu0  ;;  %6750 = vmatpush3.msra.mxu1 %v5691_v40  ;;  %v5704_v1 = vmax.f32 %v5627_v14, 0.0  ;;  %v5625_v15 = vadd.f32 %v12828_v23, %v5541_v38  ;;  %v5688_v61 = vmax.f32 %v5611_v31, 0.0  ;;  %v5538_v9 = vmul.f32 %v12812_v25, %v12730_v63  ;;  %v14575_v37 = vld [vmem:[#allocation148_spill] sm:$0xff] }
 0x5d9   :  { %6751 = vmatprep.subr.mxu1 %v5706_v27  ;;  %v6311_v42 = vmin.u32 %v5820_v41, %v12981_v34  ;;  %v5703_v24 = vmax.f32 %v5626_v50, 0.0  ;;  %v5624_v48 = vadd.f32 %v12828_v23, %v5540_v60  ;;  %vm5841_vm4 = vcmp.ne.s32.totalorder %v13006_v33, 0  ;;  %v14579_v4 = vld [vmem:[#allocation23_spill] sm:$0xff] }
 0x5da   :  { %v4738_v49 = vpop.f32.mrf.mxu1  ;;  %v5269_v12 = vpop.f32.mrf.mxu0  ;;  %6752 = vmatpush3.msra.mxu1 %v5690_v62  ;;  %vm5846_vm5 = vcmp.lt.s32.totalorder %v13006_v33, 0  ;;  %v5687_v26 = vmax.f32 %v5610_v35, 0.0  ;;  %v5537_v63 = vmul.f32 %v12812_v25, %v12721_v56  ;;  %v5623_v13 = vadd.f32 %v12828_v23, %v5539_v20  ;;  %v14580_v35 = vld [vmem:[#allocation18_spill] sm:$0xff] }
 0x5db   :  { %v13010_v45 = vadd.f32 %v4738_v49, %v14573_v54  ;;  %v13013_v43 = vadd.f32 %v5269_v12, %v12718_v53  ;;  %6753 = vmatprep.subr.mxu1 %v5705_v58  ;;  %v13018_v17 = vmul.u32.u64.low 3817748708, %v6311_v42  ;;  %v13019_v40 = vmul.u32.u64.high 3817748708, %v6311_v42, %v13018_v17  ;;  %vm13046_vm6 = vmand %vm5846_vm5, %vm5841_vm4  ;;  %v14581_v54 = vld [vmem:[#allocation117_spill] sm:$0xff] }
 0x5dc   :  { %v8155_v16 = vpop.f32.mrf.mxu1  ;;  %v8291_v59 = vpop.f32.mrf.mxu0  ;;  %6754 = vmatpush3.msra.mxu1 %v5689_v18  ;;  %v13026_v53 = vadd.f32 %v12828_v23, %v12843_v3  ;;  %v5702_v44 = vmax.f32 %v5625_v15, 0.0  ;;  %v5856_v3 = vadd.s32 18, %v13006_v33  ;;  %v5607_v14 = vadd.f32 %v12828_v23, %v14575_v37  ;;  %v14582_v15 = vld [vmem:[#allocation135_spill] sm:$0xff]  ;;  %v14584_v17 = vld [vmem:[#allocation146_spill] sm:$0xff] }
 0x5dd   :  { %6755 = vmatprep.subr.mxu1 %v5704_v1  ;;  %v5685_v56 = vmax.f32 %v14576_v51, 0.0  ;;  %v5686_v27 = vmax.f32 %v12992_v19, 0.0  ;;  %v5825_v8 = vshrl.u32 %v13019_v40, 4  ;;  %v5535_v41 = vmul.f32 %v12812_v25, %v14579_v4  ;;  %v14583_v16 = vld [vmem:[#allocation12_spill] sm:$0xff]  ;;  %v14590_v51 = vld [vmem:[#allocation118_spill] sm:$0xff] }
 0x5de   :  { %v4741_v22 = vpop.f32.mrf.mxu1  ;;  %v5272_v7 = vpop.f32.mrf.mxu0  ;;  %6756 = vmatpush3.msra.mxu1 %v5688_v61  ;;  %v5536_v60 = vmul.f32 %v12812_v25, %v14580_v35  ;;  %v5701_v19 = vmax.f32 %v5624_v48, 0.0  ;;  %v5622_v58 = vadd.f32 %v12828_v23, %v5538_v9  ;;  %v5700_v20 = vmax.f32 %v5623_v13, 0.0 }
 0x5df   :  { %v13032_v55 = vadd.f32 %v4741_v22, %v14574_v32  ;;  %v13035_v38 = vadd.f32 %v5272_v7, %v12727_v47  ;;  %6757 = vmatprep.subr.mxu1 %v5703_v24  ;;  %v5621_v49 = vadd.f32 %v12828_v23, %v5537_v63  ;;  %vm5771_vm7 = vcmp.ge.s32.totalorder %v12801_v10, 0  ;;  %v14585_v22 = vld [vmem:[#allocation36_spill] sm:$0xff] }
 0x5e0   :  { %v8156_v31 = vpop.f32.mrf.mxu1  ;;  %v8292_v62 = vpop.f32.mrf.mxu0  ;;  %6758 = vmatpush3.msra.mxu1 %v5687_v26  ;;  %v5826_v12 = vmul.u32 18, %v5825_v8  ;;  %vm5776_vm8 = vcmp.lt.s32.totalorder %v12801_v10, 288  ;;  %v5861_v9 = vsel %vm13046_vm6, %v5856_v3, %v13006_v33  ;;  %v5519_v59 = vmul.f32 %v12812_v25, %v14583_v16 }
 0x5e1   :  { %6759 = vmatprep.subr.mxu1 %v5702_v44  ;;  %v5605_v40 = vadd.f32 %v12828_v23, %v14584_v17  ;;  %v5684_v24 = vmax.f32 %v5607_v14, 0.0  ;;  %v5604_v7 = vadd.f32 %v12828_v23, %v14585_v22  ;;  %v5699_v13 = vmax.f32 %v5622_v58, 0.0  ;;  %vm13080_vm9 = vmand %vm5771_vm7, %vm5776_vm8 }
 0x5e2   :  { %v4746_v50 = vpop.f32.mrf.mxu1  ;;  %v5277_v18 = vpop.f32.mrf.mxu0  ;;  %6760 = vmatpush3.msra.mxu1 %v5686_v27  ;;  %v5827_v63 = vsub.s32 %v6311_v42, %v5826_v12  ;;  %v5620_v32 = vadd.f32 %v12828_v23, %v5536_v60  ;;  %v5683_v33 = vmax.f32 %v13026_v53, 0.0  ;;  %vm13084_vm10 = vcmp.lt.s32.totalorder %v5861_v9, 16 }
 0x5e3   :  { %v13059_v1 = vadd.f32 %v4746_v50, %v14581_v54  ;;  %v13062_v61 = vadd.f32 %v5277_v18, %v14582_v15  ;;  %6761 = vmatprep.subr.mxu1 %v5701_v19  ;;  %vm5819_vm11 = vcmp.lt.s32.totalorder %v12981_v34, 0  ;;  %v5698_v31 = vmax.f32 %v5621_v49, 0.0  ;;  %vm5871_vm12 = vmand %vm13080_vm9, %vm13084_vm10  ;;  %v14592_v18 = vld [vmem:[#allocation183_spill] sm:$0xff]  ;;  %v14593_v49 = vld [vmem:[#allocation24_spill] sm:$0xff] }
 0x5e4   :  { %v8159_v48 = vpop.f32.mrf.mxu1  ;;  %v8295_v26 = vpop.f32.mrf.mxu0  ;;  %6762 = vmatpush3.msra.mxu1 %v5685_v56  ;;  %v5828_v14 = vsub.s32 0, %v5827_v63  ;;  %v14591_v56 = vld [vmem:[#allocation29_spill] sm:$0xff]  ;;  %v5619_v10 = vadd.f32 %v12828_v23, %v5535_v41  ;;  %v5603_v62 = vadd.f32 %v12828_v23, %v5519_v59  ;;  %v5682_v47 = vmax.f32 %v5605_v40, 0.0  ;;  %vm5877_vm5 = vmand %vm5871_vm12, %vm5876_vm15 }
 0x5e5   :  { %6763 = vmatprep.subr.mxu1 %v5700_v20  ;;  %v5697_v60 = vmax.f32 %v5620_v32, 0.0  ;;  %v5681_v19 = vmax.f32 %v5604_v7, 0.0  ;;  %vm5774_vm1 = vcmp.ge.s32.totalorder %v12981_v34, 0  ;;  %vm5779_vm2 = vcmp.lt.s32.totalorder %v12981_v34, 288  ;;  %v14597_v26 = vld [vmem:[#allocation137_spill] sm:$0xff] }
 0x5e6   :  { %v4749_v44 = vpop.f32.mrf.mxu1  ;;  %v5280_v3 = vpop.f32.mrf.mxu0  ;;  %6764 = vmatpush3.msra.mxu1 %v5684_v24  ;;  %v5829_v35 = vsel %vm5819_vm11, %v5828_v14, %v5827_v63  ;;  %v5696_v54 = vmax.f32 %v5619_v10, 0.0  ;;  %vm13109_vm4 = vmand %vm5774_vm1, %vm5779_vm2  ;;  %v5680_v9 = vmax.f32 %v5603_v62, 0.0  ;;  %v14596_v24 = vld [vmem:[#allocation119_spill] sm:$0xff]  ;;  %v14601_v62 = vld [vmem:[#allocation141_spill] sm:$0xff] }
 0x5e7   :  { %v13090_v53 = vadd.f32 %v4749_v44, %v14590_v51  ;;  %v13093_v27 = vadd.f32 %v5280_v3, %v14591_v56  ;;  %6765 = vmatprep.subr.mxu1 %v5699_v13  ;;  %vm5844_vm13 = vcmp.ne.s32.totalorder %v5829_v35, 0  ;;  %vm5849_vm14 = vcmp.lt.s32.totalorder %v5829_v35, 0  ;;  %v14599_v3 = vld [vmem:[#allocation138_spill] sm:$0xff] }
 0x5e8   :  { %v8160_v8 = vpop.f32.mrf.mxu1  ;;  %v8296_v4 = vpop.f32.mrf.mxu0  ;;  %6766 = vmatpush3.msra.mxu1 %v5683_v33  ;;  %vm5854_vm3 = vmand %vm5849_vm14, %vm5844_vm13  ;;  %v5859_v41 = vadd.s32 18, %v5829_v35  ;;  %v14598_v33 = vld [vmem:[#allocation120_spill] sm:$0xff] }
 0x5e9   :  { %6767 = vmatprep.subr.mxu1 %v5698_v31  ;;  %v14600_v31 = vld [vmem:[#allocation186_spill] sm:$0xff] }
 0x5ea   :  { %v4754_v58 = vpop.f32.mrf.mxu1  ;;  %v5285_v50 = vpop.f32.mrf.mxu0  ;;  %6768 = vmatpush3.msra.mxu1 %v5682_v47  ;;  %v5864_v34 = vsel %vm5854_vm3, %v5859_v41, %v5829_v35 }
 0x5eb   :  { %v13104_v20 = vadd.f32 %v4754_v58, %v14592_v18  ;;  %v13107_v12 = vadd.f32 %v5285_v50, %v14593_v49  ;;  %6769 = vmatprep.subr.mxu1 %v5697_v60  ;;  %vm5869_vm6 = vcmp.lt.s32.totalorder %v5864_v34, 16  ;;  %v14603_v50 = vld [vmem:[#allocation35_spill] sm:$0xff] }
 0x5ec   :  { %v8163_v16 = vpop.f32.mrf.mxu1  ;;  %v8299_v59 = vpop.f32.mrf.mxu0  ;;  %6770 = vmatpush3.msra.mxu1 %v5681_v19  ;;  %vm5874_vm7 = vmand %vm13109_vm4, %vm5869_vm6  ;;  %v14602_v19 = vld [vmem:[#allocation121_spill] sm:$0xff] }
 0x5ed   :  { %6771 = vmatprep.subr.mxu1 %v5696_v54  ;;  %vm5880_vm8 = vmand %vm5874_vm7, %vm5876_vm15  ;;  %v14605_v59 = vld [vmem:[#allocation30_spill] sm:$0xff] }
 0x5ee   :  { %v4757_v17 = vpop.f32.mrf.mxu1  ;;  %v5288_v40 = vpop.f32.mrf.mxu0  ;;  %6772 = vmatpush3.msra.mxu1 %v5680_v9  ;;  %v14604_v9 = vld [vmem:[#allocation122_spill] sm:$0xff] }
 0x5ef   :  { %v13123_v48 = vadd.f32 %v4757_v17, %v14596_v24  ;;  %v13126_v63 = vadd.f32 %v5288_v40, %v14597_v26  ;;  %6314 = vmatmul.mubr.msk.f32.vlgmr.msra.gmra.mxu1 %vm5877_vm5, %v13756_v21 }
 0x5f0   :  { %v8164_v22 = vpop.f32.mrf.mxu1  ;;  %v8300_v7 = vpop.f32.mrf.mxu0  ;;  %6315 = vmatprep.mubr.msk.f32.mxu1 %vm5880_vm8, %v13756_v21 }
 0x5f1   :  { %v14606_v22 = vld [vmem:[#allocation189_spill] sm:$0xff] }
 0x5f2   :  { %v4762_v13 = vpop.f32.mrf.mxu1  ;;  %v5293_v32 = vpop.f32.mrf.mxu0 }
 0x5f3   :  { %v13133_v44 = vadd.f32 %v4762_v13, %v14598_v33  ;;  %v13136_v37 = vadd.f32 %v5293_v32, %v14599_v3  ;;  %v14607_v13 = vld [vmem:[#allocation143_spill] sm:$0xff] }
 0x5f4   :  { %v8167_v42 = vpop.f32.mrf.mxu1  ;;  %v8303_v14 = vpop.f32.mrf.mxu0 }
 0x5f6   :  { %v4765_v51 = vpop.f32.mrf.mxu1  ;;  %v5296_v56 = vpop.f32.mrf.mxu0 }
 0x5f7   :  { %v13139_v10 = vadd.f32 %v4765_v51, %v14600_v31  ;;  %v13142_v47 = vadd.f32 %v5296_v56, %v14601_v62  ;;  %v14608_v51 = vld [vmem:[#allocation123_spill] sm:$0xff]  ;;  %v14609_v31 = vld [vmem:[#allocation41_spill] sm:$0xff] }
 0x5f8   :  { %v8168_v8 = vpop.f32.mrf.mxu1  ;;  %v8304_v4 = vpop.f32.mrf.mxu0 }
 0x5fa   :  { %v4770_v35 = vpop.f32.mrf.mxu1  ;;  %v5301_v60 = vpop.f32.mrf.mxu0 }
 0x5fb   :  { %v13145_v58 = vadd.f32 %v4770_v35, %v14602_v19  ;;  %v13148_v41 = vadd.f32 %v5301_v60, %v14603_v50  ;;  %v14610_v19 = vld [vmem:[#allocation125_spill] sm:$0xff] }
 0x5fc   :  { %v8171_v18 = vpop.f32.mrf.mxu1  ;;  %v8307_v49 = vpop.f32.mrf.mxu0 }
 0x5fe   :  { %v4773_v54 = vpop.f32.mrf.mxu1  ;;  %v5304_v15 = vpop.f32.mrf.mxu0 }
 0x5ff   :  { %v13151_v16 = vadd.f32 %v4773_v54, %v14604_v9  ;;  %v13154_v34 = vadd.f32 %v5304_v15, %v14605_v59  ;;  %v14612_v59 = vld [vmem:[#allocation192_spill] sm:$0xff] }
 0x600   :  { %v8172_v17 = vpop.f32.mrf.mxu1  ;;  %v8308_v40 = vpop.f32.mrf.mxu0 }
 0x602   :  { %v4778_v24 = vpop.f32.mrf.mxu1  ;;  %v5309_v26 = vpop.f32.mrf.mxu0 }
 0x603   :  { %v13157_v7 = vadd.f32 %v4778_v24, %v14606_v22  ;;  %v13160_v32 = vadd.f32 %v5309_v26, %v14607_v13 }
 0x604   :  { %v8175_v33 = vpop.f32.mrf.mxu1  ;;  %v8311_v3 = vpop.f32.mrf.mxu0 }
 0x605   :  { %v14614_v33 = vld [vmem:[#allocation126_spill] sm:$0xff] }
 0x606   :  { %v4781_v42 = vpop.f32.mrf.mxu1  ;;  %v5312_v14 = vpop.f32.mrf.mxu0 }
 0x607   :  { %v13163_v56 = vadd.f32 %v4781_v42, %v14608_v51  ;;  %v13166_v62 = vadd.f32 %v5312_v14, %v14609_v31 }
 0x608   :  { %v8176_v8 = vpop.f32.mrf.mxu1  ;;  %v8312_v4 = vpop.f32.mrf.mxu0 }
 0x609   :  { %v14616_v8 = vld [vmem:[#allocation128_spill] sm:$0xff] }
 0x60a   :  { %v4786_v35 = vpop.f32.mrf.mxu1  ;;  %v5317_v60 = vpop.f32.mrf.mxu0 }
 0x60b   :  { %v13169_v50 = vadd.f32 %v4786_v35, %v14610_v19  ;;  %v13172_v18 = vadd.f32 %v5317_v60, %v12867_v46 }
 0x60c   :  { %v8179_v49 = vpop.f32.mrf.mxu1  ;;  %v8315_v54 = vpop.f32.mrf.mxu0 }
 0x60d   :  { %14611 = vst [vmem:[#allocation48_spill] sm:$0xff] %v13169_v50  ;;  %v14618_v54 = vld [vmem:[#allocation195_spill] sm:$0xff] }
 0x60e   :  { %v4789_v15 = vpop.f32.mrf.mxu1  ;;  %v5320_v9 = vpop.f32.mrf.mxu0 }
 0x60f   :  { %v13175_v17 = vadd.f32 %v4789_v15, %v14612_v59  ;;  %v13178_v40 = vadd.f32 %v5320_v9, %v12898_v0 }
 0x610   :  { %v8180_v24 = vpop.f32.mrf.mxu1  ;;  %v8316_v26 = vpop.f32.mrf.mxu0 }
 0x611   :  { %14613 = vst [vmem:[#allocation43_spill] sm:$0xff] %v13175_v17 }
 0x612   :  { %v4794_v22 = vpop.f32.mrf.mxu1  ;;  %v5325_v13 = vpop.f32.mrf.mxu0 }
 0x613   :  { %v13181_v3 = vadd.f32 %v4794_v22, %v14614_v33  ;;  %v13184_v46 = vadd.f32 %v5325_v13, %v12917_v28  ;;  %v14620_v22 = vld [vmem:[#allocation129_spill] sm:$0xff] }
 0x614   :  { %v8183_v42 = vpop.f32.mrf.mxu1  ;;  %v8319_v14 = vpop.f32.mrf.mxu0 }
 0x615   :  { %14615 = vst [vmem:[#allocation153_spill] sm:$0xff] %v13181_v3  ;;  %v5760_v3 = vadd.s32 256, %v12778_v57 }
 0x616   :  { %v4797_v51 = vpop.f32.mrf.mxu1  ;;  %v5328_v31 = vpop.f32.mrf.mxu0 }
 0x617   :  { %v13187_v4 = vadd.f32 %v4797_v51, %v14616_v8  ;;  %v13190_v0 = vadd.f32 %v5328_v31, %v12942_v11  ;;  %v14622_v51 = vld [vmem:[#allocation131_spill] sm:$0xff] }
 0x618   :  { %v8184_v35 = vpop.f32.mrf.mxu1  ;;  %v8320_v60 = vpop.f32.mrf.mxu0 }
 0x619   :  { %14617 = vst [vmem:[#allocation52_spill] sm:$0xff] %v13187_v4 }
 0x61a   :  { %v4802_v19 = vpop.f32.mrf.mxu1  ;;  %v5333_v49 = vpop.f32.mrf.mxu0 }
 0x61b   :  { %v13193_v15 = vadd.f32 %v4802_v19, %v14618_v54  ;;  %v13196_v28 = vadd.f32 %v5333_v49, %v12966_v6  ;;  %v14624_v19 = vld [vmem:[#allocation196_spill] sm:$0xff] }
 0x61c   :  { %v8187_v9 = vpop.f32.mrf.mxu1  ;;  %v8323_v59 = vpop.f32.mrf.mxu0 }
 0x61d   :  { %14619 = vst [vmem:[#allocation46_spill] sm:$0xff] %v13193_v15 }
 0x61e   :  { %v4805_v24 = vpop.f32.mrf.mxu1  ;;  %v13198_v26 = vpop.f32.mrf.mxu0 }
 0x61f   :  { %v13201_v13 = vadd.f32 %v4805_v24, %v14620_v22  ;;  %v14626_v22 = vld [vmem:[#allocation132_spill] sm:$0xff] }
 0x620   :  { %v8188_v11 = vpop.f32.mrf.mxu1  ;;  %v8324_v33 = vpop.f32.mrf.mxu0 }
 0x621   :  { %14621 = vst [vmem:[#allocation156_spill] sm:$0xff] %v13201_v13 }
 0x622   :  { %v4810_v42 = vpop.f32.mrf.mxu1  ;;  %v13203_v14 = vpop.f32.mrf.mxu0 }
 0x623   :  { %v13206_v31 = vadd.f32 %v4810_v42, %v14622_v51  ;;  %v14628_v51 = vld [vmem:[#allocation134_spill] sm:$0xff] }
 0x624   :  { %v8191_v8 = vpop.f32.mrf.mxu1  ;;  %v8327_v35 = vpop.f32.mrf.mxu0 }
 0x625   :  { %14623 = vst [vmem:[#allocation158_spill] sm:$0xff] %v13206_v31 }
 0x626   :  { %v4813_v6 = vpop.f32.mrf.mxu1  ;;  %v13208_v60 = vpop.f32.mrf.mxu0 }
 0x627   :  { %v13211_v49 = vadd.f32 %v4813_v6, %v14624_v19 }
 0x628   :  { %v8192_v54 = vpop.f32.mrf.mxu1  ;;  %v8328_v9 = vpop.f32.mrf.mxu0 }
 0x629   :  { %14625 = vst [vmem:[#allocation57_spill] sm:$0xff] %v13211_v49  ;;  %v14629_v54 = vld [vmem:[#allocation17_spill] sm:$0xff] }
 0x62a   :  { %v4818_v59 = vpop.f32.mrf.mxu1  ;;  %v5349_v24 = vpop.f32.mrf.mxu0 }
 0x62b   :  { %v13214_v11 = vadd.f32 %v4818_v59, %v14626_v22  ;;  %v13224_v59 = vsub.s32 %v5760_v3, %v12789_v30 }
 0x62c   :  { %v8195_v33 = vpop.f32.mrf.mxu1  ;;  %v8331_v21 = vpop.f32.mrf.mxu0 }
 0x62d   :  { %14627 = vst [vmem:[#allocation54_spill] sm:$0xff] %v13214_v11  ;;  %vm5808_vm9 = vcmp.lt.s32.totalorder %v13224_v59, 0  ;;  %vm5773_vm13 = vcmp.ge.s32.totalorder %v13224_v59, 0  ;;  %vm5778_vm14 = vcmp.lt.s32.totalorder %v13224_v59, 288 }
 0x62e   :  { %v4821_v50 = vpop.f32.mrf.mxu1  ;;  %v5352_v42 = vpop.f32.mrf.mxu0  ;;  %vm13383_vm1 = vmand %vm5773_vm13, %vm5778_vm14  ;;  %vm5887_vm14 = vcmask 850944  }
 0x62f   :  { %v13217_v8 = vadd.f32 %v4821_v50, %v14628_v51  ;;  %v5809_v50 = vsub.s32 0, %v13224_v59 }
 0x630   :  { %v8196_v35 = vpop.f32.mrf.mxu1  ;;  %v8332_v17 = vpop.f32.mrf.mxu0 }
 0x631   :  { %v6310_v13 = vmin.u32 %v5809_v50, %v13224_v59 }
 0x632   :  { %v4826_v6 = vpop.f32.mrf.mxu1  ;;  %v5357_v19 = vpop.f32.mrf.mxu0 }
 0x633   :  { %v13221_v9 = vadd.f32 %v4826_v6, %v14629_v54  ;;  %v13228_v11 = vmul.u32.u64.low 3817748708, %v6310_v13  ;;  %v13229_v6 = vmul.u32.u64.high 3817748708, %v6310_v13, %v13228_v11 }
 0x634   :  { %v8335_v4 = vpop.f32.mrf.mxu0  ;;  %v8199_v22 = vpop.f32.mrf.mxu1 }
 0x635   :  { %14630 = vst [vmem:[#allocation161_spill] sm:$0xff] %v13221_v9  ;;  %v5814_v9 = vshrl.u32 %v13229_v6, 4 }
 0x636   :  { %v5360_v21 = vpop.f32.mrf.mxu0  ;;  %v4829_v33 = vpop.f32.mrf.mxu1 }
 0x638   :  { %v8336_v15 = vpop.f32.mrf.mxu0  ;;  %v8200_v51 = vpop.f32.mrf.mxu1 }
 0x639   :  { %v5566_v15 = vmul.f32 %v12812_v25, %v13166_v62  ;;  %v5564_v62 = vmul.f32 %v12812_v25, %v13154_v34 }
 0x63a   :  { %v5365_v35 = vpop.f32.mrf.mxu0 }
 0x63b   :  { %v5495_v51 = vadd.f32 %v5365_v35, %v13133_v44  ;;  %v5650_v44 = vadd.f32 %v12828_v23, %v5566_v15  ;;  %v5493_v35 = vadd.f32 %v5357_v19, %v13104_v20 }
 0x63c   :  { %v8339_v17 = vpop.f32.mrf.mxu0 }
 0x63e   :  { %v5368_v31 = vpop.f32.mrf.mxu0 }
 0x63f   :  { %v5496_v22 = vadd.f32 %v5368_v31, %v13139_v10 }
 0x640   :  { %v8340_v49 = vpop.f32.mrf.mxu0 }
 0x641   :  { %v5565_v49 = vmul.f32 %v12812_v25, %v13160_v32  ;;  %v5580_v10 = vmul.f32 %v12812_v25, %v5496_v22  ;;  %v5492_v22 = vadd.f32 %v5352_v42, %v13090_v53 }
 0x642   :  { %v5373_v4 = vpop.f32.mrf.mxu0 }
 0x643   :  { %v5497_v3 = vadd.f32 %v5373_v4, %v13145_v58  ;;  %v5494_v58 = vadd.f32 %v5360_v21, %v13123_v48  ;;  %v5579_v4 = vmul.f32 %v12812_v25, %v5495_v51  ;;  %v5563_v21 = vmul.f32 %v12812_v25, %v13148_v41 }
 0x644   :  { %v8343_v54 = vpop.f32.mrf.mxu0  ;;  %v5664_v15 = vadd.f32 %v12828_v23, %v5580_v10  ;;  %v5727_v51 = vmax.f32 %v5650_v44, 0.0 }
 0x645   :  { %v5581_v17 = vmul.f32 %v12812_v25, %v5497_v3  ;;  %v5649_v3 = vadd.f32 %v12828_v23, %v5565_v49  ;;  %v5815_v54 = vmul.u32 18, %v5814_v9  ;;  %v5578_v20 = vmul.f32 %v12812_v25, %v5494_v58 }
 0x646   :  { %v5376_v33 = vpop.f32.mrf.mxu0  ;;  %v5663_v42 = vadd.f32 %v12828_v23, %v5579_v4  ;;  %v5561_v49 = vmul.f32 %v12812_v25, %v13136_v37  ;;  %v5559_v4 = vmul.f32 %v12812_v25, %v13107_v12 }
 0x647   :  { %v5498_v50 = vadd.f32 %v5376_v33, %v13151_v16  ;;  %v5665_v48 = vadd.f32 %v12828_v23, %v5581_v17  ;;  %v5648_v33 = vadd.f32 %v12828_v23, %v5564_v62  ;;  %v5491_v17 = vadd.f32 %v5349_v24, %v13059_v1 }
 0x648   :  { %v8344_v11 = vpop.f32.mrf.mxu0  ;;  %v5816_v10 = vsub.s32 %v6310_v13, %v5815_v54  ;;  %v5490_v1 = vadd.f32 %v13208_v60, %v13032_v55  ;;  %v5576_v24 = vmul.f32 %v12812_v25, %v5492_v22  ;;  %v5560_v62 = vmul.f32 %v12812_v25, %v13126_v63 }
 0x649   :  { %v5582_v31 = vmul.f32 %v12812_v25, %v5498_v50  ;;  %v5577_v50 = vmul.f32 %v12812_v25, %v5493_v35  ;;  %v5742_v53 = vmax.f32 %v5665_v48, 0.0  ;;  %v5726_v11 = vmax.f32 %v5649_v3, 0.0 }
 0x64a   :  { %v5381_v16 = vpop.f32.mrf.mxu0  ;;  %v5725_v44 = vmax.f32 %v5648_v33, 0.0  ;;  %v5489_v13 = vadd.f32 %v13203_v14, %v13010_v45  ;;  %v5575_v55 = vmul.f32 %v12812_v25, %v5491_v17  ;;  %v5740_v60 = vmax.f32 %v5663_v42, 0.0 }
 0x64b   :  { %v13250_v32 = vadd.f32 %v5381_v16, %v13157_v7  ;;  %v5666_v6 = vadd.f32 %v12828_v23, %v5582_v31  ;;  %v5562_v7 = vmul.f32 %v12812_v25, %v13142_v47  ;;  %v5647_v47 = vadd.f32 %v12828_v23, %v5563_v21 }
 0x64c   :  { %v8347_v34 = vpop.f32.mrf.mxu0  ;;  %v5662_v31 = vadd.f32 %v12828_v23, %v5578_v20  ;;  %v5661_v16 = vadd.f32 %v12828_v23, %v5577_v50  ;;  %v5645_v63 = vadd.f32 %v12828_v23, %v5561_v49  ;;  %v5817_v21 = vsub.s32 0, %v5816_v10 }
 0x64d   :  { %v5743_v19 = vmax.f32 %v5666_v6, 0.0  ;;  %v5646_v37 = vadd.f32 %v12828_v23, %v5562_v7  ;;  %v5724_v6 = vmax.f32 %v5647_v47, 0.0  ;;  %v5488_v3 = vadd.f32 %v13198_v26, %v12984_v36 }
 0x64e   :  { %v5384_v41 = vpop.f32.mrf.mxu0  ;;  %v5574_v45 = vmul.f32 %v12812_v25, %v5490_v1  ;;  %v5739_v14 = vmax.f32 %v5662_v31, 0.0  ;;  %v5660_v34 = vadd.f32 %v12828_v23, %v5576_v24  ;;  %v5558_v54 = vmul.f32 %v12812_v25, %v13093_v27 }
 0x64f   :  { %v13266_v9 = vadd.f32 %v5384_v41, %v13163_v56  ;;  %6776 = vmatprep.subr.mxu1 %v5743_v19  ;;  %v5741_v56 = vmax.f32 %v5664_v15, 0.0  ;;  %v5644_v12 = vadd.f32 %v12828_v23, %v5560_v62  ;;  %v5723_v22 = vmax.f32 %v5646_v37, 0.0 }
 0x650   :  { %v8348_v58 = vpop.f32.mrf.mxu0  ;;  %6777 = vmatpush3.msra.mxu1 %v5727_v51  ;;  %v5573_v19 = vmul.f32 %v12812_v25, %v5489_v13  ;;  %v5738_v36 = vmax.f32 %v5661_v16, 0.0  ;;  %v5659_v26 = vadd.f32 %v12828_v23, %v5575_v55  ;;  %v5557_v15 = vmul.f32 %v12812_v25, %v13062_v61  ;;  %v13335_v13 = vld [vmem:[%s13494_s2] ss:$0 sm:$0xff] }
 0x651   :  { %6778 = vmatprep.subr.mxu1 %v5742_v53  ;;  %v5643_v7 = vadd.f32 %v12828_v23, %v5559_v4  ;;  %v5722_v27 = vmax.f32 %v5645_v63, 0.0  ;;  %v5572_v51 = vmul.f32 %v12812_v25, %v5488_v3  ;;  %v5737_v17 = vmax.f32 %v5660_v34, 0.0  ;;  %v13348_v4 = vld [vmem:[%s13495_s3] ss:$0 sm:$0xff] }
 0x652   :  { %v13279_v35 = vpop.f32.mrf.mxu0  ;;  %6779 = vmatpush3.msra.mxu1 %v5726_v11  ;;  %v5658_v41 = vadd.f32 %v12828_v23, %v5574_v45  ;;  %v13305_v50 = vsel %vm5808_vm9, %v5817_v21, %v5816_v10  ;;  %v5556_v53 = vmul.f32 %v12812_v25, %v13035_v38  ;;  %v5642_v42 = vadd.f32 %v12828_v23, %v5558_v54 }
 0x653   :  { %6780 = vmatprep.subr.mxu1 %v5741_v56  ;;  %v5721_v49 = vmax.f32 %v5644_v12, 0.0  ;;  %v5762_v47 = vadd.s32 512, %v12778_v57  ;;  %v5554_v11 = vmul.f32 %v12812_v25, %v12987_v29  ;;  %v5571_v58 = vmul.f32 %v12812_v25, %v13196_v28 }
 0x654   :  { %v8351_v48 = vpop.f32.mrf.mxu0  ;;  %6781 = vmatpush3.msra.mxu1 %v5725_v44  ;;  %v5736_v10 = vmax.f32 %v5659_v26, 0.0  ;;  %v5657_v1 = vadd.f32 %v12828_v23, %v5573_v19  ;;  %v5555_v38 = vmul.f32 %v12812_v25, %v13013_v43  ;;  %v5641_v24 = vadd.f32 %v12828_v23, %v5557_v15 }
 0x655   :  { %6782 = vmatprep.subr.mxu1 %v5740_v60  ;;  %v5720_v56 = vmax.f32 %v5643_v7, 0.0  ;;  %vm5843_vm10 = vcmp.ne.s32.totalorder %v13305_v50, 0  ;;  %v5570_v57 = vmul.f32 %v12812_v25, %v13190_v0  ;;  %v5735_v29 = vmax.f32 %v5658_v41, 0.0 }
 0x656   :  { %v13295_v20 = vpop.f32.mrf.mxu0  ;;  %6783 = vmatpush3.msra.mxu1 %v5724_v6  ;;  %v5656_v28 = vadd.f32 %v12828_v23, %v5572_v51  ;;  %vm5848_vm11 = vcmp.lt.s32.totalorder %v13305_v50, 0  ;;  %v5640_v62 = vadd.f32 %v12828_v23, %v5556_v53  ;;  %v5719_v37 = vmax.f32 %v5642_v42, 0.0 }
 0x657   :  { %6784 = vmatprep.subr.mxu1 %v5739_v14  ;;  %v13330_v44 = vsub.s32 %v5762_v47, %v12789_v30  ;;  %v5569_v25 = vmul.f32 %v13335_v13, %v13184_v46  ;;  %v5734_v0 = vmax.f32 %v5657_v1, 0.0  ;;  %v5655_v55 = vadd.f32 %v12828_v23, %v5571_v58  ;;  %vm13355_vm12 = vmand %vm5848_vm11, %vm5843_vm10 }
 0x658   :  { %v8352_v33 = vpop.f32.mrf.mxu0  ;;  %6785 = vmatpush3.msra.mxu1 %v5723_v22  ;;  %v5858_v60 = vadd.s32 18, %v13305_v50  ;;  %v5552_v16 = vmul.f32 %v13335_v13, %v12945_v39  ;;  %v5553_v30 = vmul.f32 %v13335_v13, %v12969_v5  ;;  %v5639_v63 = vadd.f32 %v13348_v4, %v5555_v38 }
 0x659   :  { %6786 = vmatprep.subr.mxu1 %v5738_v36  ;;  %v5718_v46 = vmax.f32 %v5641_v24, 0.0  ;;  %v5638_v39 = vadd.f32 %v13348_v4, %v5554_v11  ;;  %v5568_v5 = vmul.f32 %v13335_v13, %v13178_v40  ;;  %v5733_v48 = vmax.f32 %v5656_v28, 0.0 }
 0x65a   :  { %v13310_v61 = vpop.f32.mrf.mxu0  ;;  %6787 = vmatpush3.msra.mxu1 %v5722_v27  ;;  %v5654_v21 = vadd.f32 %v13348_v4, %v5570_v57  ;;  %v5717_v3 = vmax.f32 %v5640_v62, 0.0  ;;  %v5831_v14 = vsub.s32 0, %v13330_v44  ;;  %v5567_v34 = vmul.f32 %v13335_v13, %v13172_v18 }
 0x65b   :  { %6788 = vmatprep.subr.mxu1 %v5737_v17  ;;  %v5732_v54 = vmax.f32 %v5655_v55, 0.0  ;;  %v5653_v40 = vadd.f32 %v13348_v4, %v5569_v25  ;;  %v5863_v12 = vsel %vm13355_vm12, %v5858_v60, %v13305_v50  ;;  %v5551_v22 = vmul.f32 %v13335_v13, %v12920_v52 }
 0x65c   :  { %v8355_v31 = vpop.f32.mrf.mxu0  ;;  %6789 = vmatpush3.msra.mxu1 %v5721_v49  ;;  %v5637_v19 = vadd.f32 %v13348_v4, %v5553_v30  ;;  %v5716_v36 = vmax.f32 %v5639_v63, 0.0  ;;  %v5731_v15 = vmax.f32 %v5654_v21, 0.0  ;;  %v5652_v18 = vadd.f32 %v13348_v4, %v5568_v5  ;;  %v14641_v5 = vld [vmem:[#allocation161_spill] sm:$0xff] }
 0x65d   :  { %6790 = vmatprep.subr.mxu1 %v5736_v10  ;;  %v5636_v7 = vadd.f32 %v13348_v4, %v5552_v16  ;;  %v5715_v27 = vmax.f32 %v5638_v39, 0.0  ;;  %vm13387_vm2 = vcmp.lt.s32.totalorder %v5863_v12, 16  ;;  %v6312_v17 = vmin.u32 %v5831_v14, %v13330_v44  ;;  %v14639_v16 = vld [vmem:[#allocation54_spill] sm:$0xff]  ;;  %v14643_v12 = vld [vmem:[#allocation156_spill] sm:$0xff] }
 0x65e   :  { %v13327_v43 = vpop.f32.mrf.mxu0  ;;  %6791 = vmatpush3.msra.mxu1 %v5720_v56  ;;  %v5730_v41 = vmax.f32 %v5653_v40, 0.0  ;;  %v5651_v50 = vadd.f32 %v13348_v4, %v5567_v34  ;;  %v5635_v53 = vadd.f32 %v13348_v4, %v5551_v22  ;;  %v5714_v42 = vmax.f32 %v5637_v19, 0.0  ;;  %vm5873_vm3 = vmand %vm13383_vm1, %vm13387_vm2 }
 0x65f   :  { %6792 = vmatprep.subr.mxu1 %v5735_v29  ;;  %v5729_v59 = vmax.f32 %v5652_v18, 0.0  ;;  %v5713_v47 = vmax.f32 %v5636_v7, 0.0  ;;  %v13398_v58 = vmul.u32.u64.low 3817748708, %v6312_v17  ;;  %v13399_v10 = vmul.u32.u64.high 3817748708, %v6312_v17, %v13398_v58  ;;  %vm5879_vm4 = vmand %vm5873_vm3, %vm5876_vm15  ;;  %v14644_v18 = vld [vmem:[#allocation46_spill] sm:$0xff] }
 0x660   :  { %v8356_v6 = vpop.f32.mrf.mxu0  ;;  %6793 = vmatpush3.msra.mxu1 %v5719_v37  ;;  %v5728_v1 = vmax.f32 %v5651_v50, 0.0  ;;  %v5712_v38 = vmax.f32 %v5635_v53, 0.0  ;;  %v14637_v31 = vmov 0.0   ;;  %v14638_v57 = vmov 0.00390625  }
 0x661   :  { %6794 = vmatprep.subr.mxu1 %v5734_v0  ;;  %v5836_v62 = vshrl.u32 %v13399_v10, 4  ;;  %v14640_v6 = vld [vmem:[#allocation57_spill] sm:$0xff]  ;;  %vm5775_vm8 = vcmp.ge.s32.totalorder %v13330_v44, 0  ;;  %vm5780_vm9 = vcmp.lt.s32.totalorder %v13330_v44, 288 }
 0x662   :  { %v13363_v45 = vpop.f32.mrf.mxu0  ;;  %6795 = vmatpush3.msra.mxu1 %v5718_v46  ;;  %vm13464_vm10 = vmand %vm5775_vm8, %vm5780_vm9 }
 0x663   :  { %6796 = vmatprep.subr.mxu1 %v5733_v48  ;;  %v5837_v0 = vmul.u32 18, %v5836_v62  ;;  %v5505_v7 = vadd.f32 %v13363_v45, %v14644_v18 }
 0x664   :  { %v8359_v26 = vpop.f32.mrf.mxu0  ;;  %6797 = vmatpush3.msra.mxu1 %v5717_v3  ;;  %v14642_v3 = vld [vmem:[#allocation158_spill] sm:$0xff] }
 0x665   :  { %6798 = vmatprep.subr.mxu1 %v5732_v54  ;;  %v5838_v46 = vsub.s32 %v6312_v17, %v5837_v0 }
 0x666   :  { %v5408_v33 = vpop.f32.mrf.mxu0  ;;  %6799 = vmatpush3.msra.mxu1 %v5716_v36 }
 0x667   :  { %6800 = vmatprep.subr.mxu1 %v5731_v15  ;;  %v5506_v22 = vadd.f32 %v5408_v33, %v14643_v12 }
 0x668   :  { %v8360_v49 = vpop.f32.mrf.mxu0  ;;  %6801 = vmatpush3.msra.mxu1 %v5715_v27 }
 0x669   :  { %6802 = vmatprep.subr.mxu1 %v5730_v41  ;;  %v14645_v41 = vld [vmem:[#allocation52_spill] sm:$0xff]  ;;  %v5590_v33 = vmul.f32 %v13335_v13, %v5506_v22  ;;  %v14646_v49 = vld [vmem:[#allocation153_spill] sm:$0xff] }
 0x66a   :  { %v5413_v11 = vpop.f32.mrf.mxu0  ;;  %6803 = vmatpush3.msra.mxu1 %v5714_v42  ;;  %v5504_v50 = vadd.f32 %v13327_v43, %v14645_v41  ;;  %v5503_v45 = vadd.f32 %v13310_v61, %v14646_v49  ;;  %v14647_v43 = vld [vmem:[#allocation43_spill] sm:$0xff] }
 0x66b   :  { %6804 = vmatprep.subr.mxu1 %v5729_v59  ;;  %v5507_v14 = vadd.f32 %v5413_v11, %v14642_v3  ;;  %v5589_v59 = vmul.f32 %v13335_v13, %v5505_v7  ;;  %v5502_v58 = vadd.f32 %v13295_v20, %v14647_v43 }
 0x66c   :  { %v8363_v24 = vpop.f32.mrf.mxu0  ;;  %6805 = vmatpush3.msra.mxu1 %v5713_v47  ;;  %v5588_v10 = vmul.f32 %v13335_v13, %v5504_v50 }
 0x66d   :  { %6806 = vmatprep.subr.mxu1 %v5728_v1  ;;  %v5591_v27 = vmul.f32 %v13335_v13, %v5507_v14  ;;  %v5674_v1 = vadd.f32 %v13348_v4, %v5590_v33  ;;  %v14648_v24 = vld [vmem:[#allocation48_spill] sm:$0xff]  ;;  %v5586_v62 = vmul.f32 %v13335_v13, %v5502_v58 }
 0x66e   :  { %v5416_v56 = vpop.f32.mrf.mxu0  ;;  %6807 = vmatpush3.msra.mxu1 %v5712_v38 }
 0x66f   :  { %8373 = vmatprep.subr.mxu1 %v14637_v31  ;;  %6316 = vmatmul.mubr.msk.f32.vlgmr.msra.gmra.mxu1 %vm5879_vm4, %v14638_v57  ;;  %v5508_v23 = vadd.f32 %v5416_v56, %v14640_v6  ;;  %v5675_v47 = vadd.f32 %v13348_v4, %v5591_v27  ;;  %v5501_v56 = vadd.f32 %v13279_v35, %v14648_v24 }
 0x670   :  { %v8364_v29 = vpop.f32.mrf.mxu0  ;;  %8399 = vmatprep.mubr.msk.f32.mxu1 %vm8507_vm0, %v14637_v31  ;;  %vm5830_vm0 = vcmp.lt.s32.totalorder %v13330_v44, 0  ;;  %v5587_v57 = vmul.f32 %v13335_v13, %v5503_v45  ;;  %v5583_v6 = vmul.f32 %v13335_v13, %v13250_v32 }
 0x671   :  { %v5592_v19 = vmul.f32 %v13335_v13, %v5508_v23  ;;  %v5673_v29 = vadd.f32 %v13348_v4, %v5589_v59  ;;  %v5585_v35 = vmul.f32 %v13335_v13, %v5501_v56 }
 0x672   :  { %v5421_v28 = vpop.f32.mrf.mxu0  ;;  %v5671_v0 = vadd.f32 %v13348_v4, %v5587_v57 }
 0x673   :  { %v5509_v30 = vadd.f32 %v5421_v28, %v14639_v16  ;;  %v5676_v53 = vadd.f32 %v13348_v4, %v5592_v19  ;;  %v5752_v28 = vmax.f32 %v5675_v47, 0.0  ;;  %v5584_v16 = vmul.f32 %v13335_v13, %v13266_v9 }
 0x674   :  { %v8367_v37 = vpop.f32.mrf.mxu0  ;;  %v5669_v23 = vadd.f32 %v13348_v4, %v5585_v35  ;;  %v5748_v9 = vmax.f32 %v5671_v0, 0.0 }
 0x675   :  { %v5593_v34 = vmul.f32 %v13335_v13, %v5509_v30  ;;  %v5753_v38 = vmax.f32 %v5676_v53, 0.0  ;;  %v5672_v37 = vadd.f32 %v13348_v4, %v5588_v10  ;;  %v5670_v30 = vadd.f32 %v13348_v4, %v5586_v62 }
 0x676   :  { %v5424_v25 = vpop.f32.mrf.mxu0  ;;  %v5746_v32 = vmax.f32 %v5669_v23, 0.0 }
 0x677   :  { %v5510_v55 = vadd.f32 %v5424_v25, %v13217_v8  ;;  %v5839_v8 = vsub.s32 0, %v5838_v46  ;;  %v5677_v52 = vadd.f32 %v13348_v4, %v5593_v34  ;;  %v5751_v25 = vmax.f32 %v5674_v1, 0.0 }
 0x678   :  { %v8368_v60 = vpop.f32.mrf.mxu0 }
 0x679   :  { %v5594_v39 = vmul.f32 %v13335_v13, %v5510_v55  ;;  %v5840_v17 = vsel %vm5830_vm0, %v5839_v8, %v5838_v46  ;;  %v5754_v11 = vmax.f32 %v5677_v52, 0.0  ;;  %v5750_v55 = vmax.f32 %v5673_v29, 0.0 }
 0x67a   :  { %v5429_v63 = vpop.f32.mrf.mxu0  ;;  %vm5845_vm5 = vcmp.ne.s32.totalorder %v5840_v17, 0  ;;  %vm5850_vm6 = vcmp.lt.s32.totalorder %v5840_v17, 0  ;;  %v5860_v61 = vadd.s32 18, %v5840_v17 }
 0x67b   :  { %v5511_v48 = vadd.f32 %v5429_v63, %v14641_v5  ;;  %v5678_v36 = vadd.f32 %v13348_v4, %v5594_v39  ;;  %vm13446_vm7 = vmand %vm5850_vm6, %vm5845_vm5  ;;  %v5749_v63 = vmax.f32 %v5672_v37, 0.0  ;;  %v5668_v39 = vadd.f32 %v13348_v4, %v5584_v16 }
 0x67c   :  { %v8371_v21 = vpop.f32.mrf.mxu0  ;;  %v5865_v60 = vsel %vm13446_vm7, %v5860_v61, %v5840_v17  ;;  %v5747_v5 = vmax.f32 %v5670_v30, 0.0 }
 0x67d   :  { %v5595_v54 = vmul.f32 %v13335_v13, %v5511_v48  ;;  %v5755_v42 = vmax.f32 %v5678_v36, 0.0  ;;  %vm13468_vm11 = vcmp.lt.s32.totalorder %v5865_v60, 16  ;;  %v5667_v48 = vadd.f32 %v13348_v4, %v5583_v6 }
 0x67e   :  { %v5432_v40 = vpop.f32.mrf.mxu0  ;;  %vm5875_vm12 = vmand %vm13464_vm10, %vm13468_vm11  ;;  %v5745_v13 = vmax.f32 %v5668_v39, 0.0 }
 0x67f   :  { %v5679_v26 = vadd.f32 %v13348_v4, %v5595_v54  ;;  %vm5881_vm13 = vmand %vm5875_vm12, %vm5876_vm15  ;;  %v5744_v21 = vmax.f32 %v5667_v48, 0.0 }
 0x680   :  { %v8372_v15 = vpop.f32.mrf.mxu0  ;;  %v5886_v3 = vsel %vm5881_vm13, 0.00390625, %v14637_v31 }
 0x681   :  { %v5756_v51 = vmax.f32 %v5679_v26, 0.0 }
 0x683   :  { %8374 = vmatpush3.msra.mxu1 %v5756_v51 }
 0x684   :  { %8375 = vmatprep.subr.mxu1 %v14637_v31 }
 0x685   :  { %8376 = vmatpush3.msra.mxu1 %v5755_v42 }
 0x686   :  { %8377 = vmatprep.subr.mxu1 %v14637_v31 }
 0x687   :  { %8378 = vmatpush3.msra.mxu1 %v5754_v11 }
 0x688   :  { %8379 = vmatprep.subr.mxu1 %v14637_v31 }
 0x689   :  { %8380 = vmatpush3.msra.mxu1 %v5753_v38 }
 0x68a   :  { %8381 = vmatprep.subr.mxu1 %v14637_v31 }
 0x68b   :  { %8382 = vmatpush3.msra.mxu1 %v5752_v28 }
 0x68c   :  { %8383 = vmatprep.subr.mxu1 %v14637_v31 }
 0x68d   :  { %8384 = vmatpush3.msra.mxu1 %v5751_v25 }
 0x68e   :  { %8385 = vmatprep.subr.mxu1 %v14637_v31 }
 0x68f   :  { %8386 = vmatpush3.msra.mxu1 %v5750_v55 }
 0x690   :  { %8387 = vmatprep.subr.mxu1 %v14637_v31 }
 0x691   :  { %8388 = vmatpush3.msra.mxu1 %v5749_v63 }
 0x692   :  { %8389 = vmatprep.subr.mxu1 %v14637_v31 }
 0x693   :  { %8390 = vmatpush3.msra.mxu1 %v5748_v9 }
 0x694   :  { %8391 = vmatprep.subr.mxu1 %v14637_v31 }
 0x695   :  { %8392 = vmatpush3.msra.mxu1 %v5747_v5 }
 0x696   :  { %8393 = vmatprep.subr.mxu1 %v14637_v31 }
 0x697   :  { %8394 = vmatpush3.msra.mxu1 %v5746_v32 }
 0x698   :  { %8395 = vmatprep.subr.mxu1 %v14637_v31 }
 0x699   :  { %8396 = vmatpush3.msra.mxu1 %v5745_v13 }
 0x69a   :  { %8397 = vmatprep.subr.mxu1 %v14637_v31 }
 0x69b   :  { %8398 = vmatpush3.msra.mxu1 %v5744_v21 }
 0x69c   :  { %8400 = vmatmul.mubr.msk.f32.vlgmr.msra.gmra.mxu1 %vm5887_vm14, %v5886_v3 }
 0x6af   :  { %v6773_v4 = vpop.f32.mrf.mxu1 }
 0x6b1   :  { %v6774_v14 = vpop.f32.mrf.mxu1 }
 0x6b2   :  { %v6775_v2 = vadd.f32 %v6774_v14, %v6773_v4 }
 0x72f   :  { %v6808_v34 = vpop.f32.mrf.mxu1 }
 0x731   :  { %v6809_v54 = vpop.f32.mrf.mxu1 }
 0x732   :  { %v6810_v8 = vadd.f32 %v6809_v54, %v6808_v34 }
 0x734   :  { %v6028_v40 = vadd.f32 %v6810_v8, %v6775_v2 }
 0x75c   :  { %v6097_v12 = vpop.f32.mrf.mxu1 }
 0x75d   :  { %v6098_v22 = vadd.f32 %v6097_v12, %v6028_v40 }
 0x75e   :  { %v8401_v19 = vpop.f32.mrf.mxu1 }
 0x75f   :  { %6101 = vst [vmem:[%s13496_s4] sm:$0xff] %v6098_v22 }

</bundles_post_ra>
